<compile_context>
chip_gen: v7x
topology: tpu7x:2x2x1
jax: 0.10.0
libtpu: 0.0.40
codegen_flags: <defaults>
</compile_context>

<pallas_src>
import jax
import jax.numpy as jnp
from jax.experimental import pallas as pl
from jax.experimental.pallas import tpu as pltpu


# ----------------------------------------------------------------------------
# Kernel 1: fused (BN-folded) conv-as-matmul + bias + ReLU + 2x2 maxpool
#           lane-dense: output is (Cout, tq) per block -> (N, Cout, Q) overall.
# ----------------------------------------------------------------------------
def _conv_bn_relu_pool_kernel(p_ref, w_ref, b_ref, o_ref):
    # p_ref: (1, 4, K9, tq) bf16   4 = positions inside the 2x2 pool window
    # w_ref: (Cout, K9)     bf16   BN scale already folded in
    # b_ref: (Cout, 1)      f32
    # o_ref: (1, Cout, tq)  bf16
    w = w_ref[...]
    b = b_ref[...]

    def conv_pos(pos):
        y = jnp.dot(w, p_ref[0, pos], preferred_element_type=jnp.float32)
        return jnp.maximum(y + b, 0.0)            # conv bias + ReLU, lane dim = tq

    # 2x2 max-pool = elementwise max over the 4 pool-position slabs
    y01 = jnp.maximum(conv_pos(0), conv_pos(1))
    y23 = jnp.maximum(conv_pos(2), conv_pos(3))
    o_ref[0] = jnp.maximum(y01, y23).astype(o_ref.dtype)


def conv_bn_relu_pool(patches, w_t, bias, *, tq):
    # patches: (N, 4, K9, Q) bf16, w_t: (Cout, K9) bf16, bias: (Cout, 1) f32
    N, _, K9, Q = patches.shape
    Cout = w_t.shape[0]
    assert Q % tq == 0
    return pl.pallas_call(
        _conv_bn_relu_pool_kernel,
        out_shape=jax.ShapeDtypeStruct((N, Cout, Q), jnp.bfloat16),
        grid_spec=pltpu.PrefetchScalarGridSpec(
            num_scalar_prefetch=0,
            grid=(N, Q // tq),
            in_specs=[
                pl.BlockSpec((1, 4, K9, tq), lambda n, q: (n, 0, 0, q)),
                pl.BlockSpec((Cout, K9), lambda n, q: (0, 0)),
                pl.BlockSpec((Cout, 1), lambda n, q: (0, 0)),
            ],
            out_specs=pl.BlockSpec((1, Cout, tq), lambda n, q: (n, 0, q)),
        ),
        compiler_params=pltpu.CompilerParams(
            dimension_semantics=("parallel", "parallel")),
    )(patches, w_t, bias)


# ----------------------------------------------------------------------------
# Kernel 2: fused fc1 (int8 weight stream) -> ReLU -> fc2
#   grid = (H-tiles, K-tiles[reduction, last]); f32 VMEM accumulator; per-column
#   dequant scale applied in the epilogue; partial logits summed in XLA.
# ----------------------------------------------------------------------------
def _mlp_head_kernel(x_ref, w1_ref, s_ref, b1_ref, w2_ref, o_ref, acc_ref):
    k = pl.program_id(1)

    @pl.when(k == 0)
    def _():
        acc_ref[...] = jnp.zeros_like(acc_ref)

    # int8 weight tile cast to bf16 right before the MXU dot (HBM stream stays int8).
    acc_ref[...] += jnp.dot(x_ref[...], w1_ref[...].astype(jnp.bfloat16),
                            preferred_element_type=jnp.float32)

    @pl.when(k == pl.num_programs(1) - 1)
    def _():
        # dequant (per-column scale) + fc1 bias (pos contribution folded in) + ReLU
        h = jnp.maximum(acc_ref[...] * s_ref[...] + b1_ref[...], 0.0)
        o_ref[0] = jnp.dot(h, w2_ref[...],
                           preferred_element_type=jnp.float32).astype(o_ref.dtype)


def _head_config():
    """Chip-aware head tiling: split the hidden dim across v7x's 2 TensorCores."""
    kind = jax.devices()[0].device_kind.lower()
    if "7" in kind:  # v7x: 2 TCs per chip, 64 MiB VMEM per TC
        return dict(th=512,
                    dim_sems=(pltpu.CORE_PARALLEL, pltpu.ARBITRARY),
                    vmem_limit=32 << 20)
    # v5e / v6e (and other single-TC parts): no H split, 128 MiB VMEM
    return dict(th=1024, dim_sems=("arbitrary", "arbitrary"), vmem_limit=48 << 20)


def mlp_head(flat_bf16, pos, params, *, tk=4096):
    # flat_bf16: (N, 32768) bf16, pos: (N, 4) f32
    N = flat_bf16.shape[0]
    cfg = _head_config()
    th = cfg["th"]

    w1q = params["fc1_w_q"]          # (32768, 1024) int8, zero-padded cols
    scale = params["fc1_scale"]      # (1, 1024) f32 per-column dequant scale
    w2 = params["fc2_w"]             # (1024, C) f32, zero-padded rows
    Kf, Hp = w1q.shape
    C = w2.shape[1]
    assert Kf % tk == 0 and Hp % th == 0
    KB, HT = Kf // tk, Hp // th

    # fold the 4 positional features + fc1 bias into a per-row bias (tiny XLA matmul)
    b1_eff = pos @ params["fc1_w_pos"] + params["fc1_b"]            # (N, 1000)
    b1_eff = jnp.pad(b1_eff, ((0, 0), (0, Hp - b1_eff.shape[1])))   # (N, 1024)

    partial = pl.pallas_call(
        _mlp_head_kernel,
        out_shape=jax.ShapeDtypeStruct((HT, N, C), jnp.float32),
        grid_spec=pltpu.PrefetchScalarGridSpec(
            num_scalar_prefetch=0,
            grid=(HT, KB),                       # reduction (K) axis last
            in_specs=[
                pl.BlockSpec((N, tk), lambda h, k: (0, k)),
                # dominant 32 MiB int8 weight stream; default double buffering
                pl.BlockSpec((tk, th), lambda h, k: (k, h)),
                pl.BlockSpec((1, th), lambda h, k: (0, h)),
                pl.BlockSpec((N, th), lambda h, k: (0, h)),
                pl.BlockSpec((th, C), lambda h, k: (h, 0)),
            ],
            out_specs=pl.BlockSpec((1, N, C), lambda h, k: (h, 0, 0)),
            scratch_shapes=[pltpu.VMEM((N, th), jnp.float32)],
        ),
        compiler_params=pltpu.CompilerParams(
            dimension_semantics=cfg["dim_sems"],
            vmem_limit_bytes=cfg["vmem_limit"]),
    )(flat_bf16, w1q, scale, b1_eff, w2)

    # combine the per-H-tile partial logits (trivial when HT == 1) and add fc2 bias
    return jnp.sum(partial, axis=0) + params["fc2_b"]


# ----------------------------------------------------------------------------
# JAX glue: im2col patch extraction (data movement only), bf16 output,
#           feature-major / pool-position-major layout for the lane-dense kernel.
# ----------------------------------------------------------------------------
def extract_pool_patches_nchw(x, out_dtype=jnp.bfloat16):
    """x: (N, C, H, W); 3x3 conv pad=1 followed by 2x2/2 maxpool.
    Returns patches (N, 4, 9*C, (H//2)*(W//2)); feature order is (ky, kx, ci)."""
    N, C, H, W = x.shape
    Ho, Wo = H // 2, W // 2
    xp = jnp.pad(x, ((0, 0), (0, 0), (1, 1), (1, 1)))
    taps = [xp[:, :, ky:ky + H, kx:kx + W] for ky in range(3) for kx in range(3)]
    t = jnp.stack(taps, axis=1)                    # (N, 9, C, H, W)
    t = t.reshape(N, 9 * C, Ho, 2, Wo, 2)          # split spatial into 2x2 pool cells
    t = t.transpose(0, 3, 5, 1, 2, 4)              # (N, 2, 2, 9C, Ho, Wo)
    return t.reshape(N, 4, 9 * C, Ho * Wo).astype(out_dtype)


# ----------------------------------------------------------------------------
# Model128 forward
# ----------------------------------------------------------------------------
def model128_forward(image_nchw, params):
    N = image_nchw.shape[0]
    assert image_nchw.shape[1:] == (4, 128, 128), image_nchw.shape
    scores = image_nchw[:, :3, :, :]                 # (N, 3, 128, 128)
    pos = image_nchw[:, 3, 0, :4]                    # (N, 4)

    # block 1: BN1(folded) -> conv1 -> dropout(identity) -> ReLU -> maxpool2x2
    p1 = extract_pool_patches_nchw(scores)                                # (N, 4, 27, 4096)
    y1 = conv_bn_relu_pool(p1, params["w1c"], params["b1c"], tq=1024)     # (N, 16, 4096) bf16

    # block 2: BN2(folded) -> conv2 -> dropout(identity) -> ReLU -> maxpool2x2
    x2 = y1.reshape(N, 16, 64, 64)                                        # free (channel-major)
    p2 = extract_pool_patches_nchw(x2)                                    # (N, 4, 144, 1024)
    y2 = conv_bn_relu_pool(p2, params["w2c"], params["b2c"], tq=512)      # (N, 32, 1024) bf16

    # PyTorch (C,H,W) flatten is a free reshape (output already channel-major bf16)
    flat = y2.reshape(N, 32 * 32 * 32)                                    # (N, 32768) bf16
    return mlp_head(flat, pos, params)


# ----------------------------------------------------------------------------
# Deterministic parameter init (kaiming-normal weights, as in the module) plus the
# one-time weight prep the kernels expect (BN fold, transpose, int8 quant, padding).
# ----------------------------------------------------------------------------
def init_params(key, num_classes=10):
    ks = jax.random.split(key, 8)
    eps = 1e-5
    bn_scale = 1.0 / jnp.sqrt(jnp.float32(1.0 + eps))   # eval BN: mean=0, var=1, g=1, b=0

    def kaiming(k, shape, fan_in):
        return jax.random.normal(k, shape, jnp.float32) * jnp.sqrt(2.0 / fan_in)

    def uniform_bias(k, n, fan_in):
        bound = 1.0 / jnp.sqrt(jnp.float32(fan_in))
        return jax.random.uniform(k, (n,), jnp.float32, -bound, bound)

    # conv weights generated as (ky, kx, Cin, Cout); the kernel wants (Cout, 9*Cin)
    # with feature order (ky, kx, ci).  NOTE: real PyTorch conv weights (Cout,Cin,kH,kW)
    # must be permuted to (kH,kW,Cin,Cout) before this reshape/transpose.
    w1 = kaiming(ks[0], (3, 3, 3, 16), 3 * 9)
    b1 = uniform_bias(ks[1], 16, 3 * 9)
    w2 = kaiming(ks[2], (3, 3, 16, 32), 16 * 9)
    b2 = uniform_bias(ks[3], 32, 16 * 9)

    in_feats = 32 * 32 * 32 + 4              # 32772
    Hn, Hp = 1000, 1024
    fc1_w = kaiming(ks[4], (in_feats, Hn), in_feats)
    fc1_b = uniform_bias(ks[5], Hn, in_feats)
    fc2_w = kaiming(ks[6], (Hn, num_classes), Hn)
    fc2_b = uniform_bias(ks[7], num_classes, Hn)

    # one-time prep:
    #  * fold eval-mode BN (applied before each conv) into the conv weights,
    #  * split fc1_w into the big image part (int8 + per-column scale, H padded to
    #    1024) and the tiny positional part (f32, folded into the bias per call),
    #  * zero-pad fc2_w rows to the padded hidden size.
    w1_t = (w1 * bn_scale).reshape(27, 16).T         # (16, 27)
    w2_t = (w2 * bn_scale).reshape(144, 32).T        # (32, 144)

    k_main = 32 * 32 * 32
    w_main = jnp.pad(fc1_w[:k_main], ((0, 0), (0, Hp - Hn)))    # (32768, 1024)
    absmax = jnp.max(jnp.abs(w_main), axis=0)                   # (1024,)
    scale = jnp.where(absmax > 0, absmax / 127.0, 1.0)
    w_q = jnp.clip(jnp.round(w_main / scale), -127, 127).astype(jnp.int8)

    return {
        "w1c": w1_t.astype(jnp.bfloat16),           # (16, 27)
        "b1c": b1.reshape(16, 1),
        "w2c": w2_t.astype(jnp.bfloat16),           # (32, 144)
        "b2c": b2.reshape(32, 1),
        "fc1_w_q": w_q,                             # (32768, 1024) int8 weight stream
        "fc1_scale": scale.reshape(1, Hp),          # (1, 1024) f32
        "fc1_w_pos": fc1_w[k_main:],                # (4, 1000) f32
        "fc1_b": fc1_b,                             # (1000,)
        "fc2_w": jnp.pad(fc2_w, ((0, Hp - Hn), (0, 0))),   # (1024, C)
        "fc2_b": fc2_b,                             # (C,)
    }


if __name__ == "__main__":
    num_classes = 10
    key = jax.random.PRNGKey(0)
    kp, kx = jax.random.split(key)

    params = init_params(kp, num_classes)
    # batch=2, 4 input channels, 128x128 spatial (spatial size fixed by fc1's in_features)
    image = jax.random.normal(kx, (2, 4, 128, 128), dtype=jnp.float32)

    out = jax.jit(model128_forward)(image, params)
    out = jax.block_until_ready(out)
    assert out.shape == (2, num_classes), out.shape
    assert bool(jnp.all(jnp.isfinite(out)))
    print("KERNEL_OK")
</pallas_src>

<mosaic_0001>
module attributes {stable_mosaic.version = 11 : i64} {
  func.func @_conv_bn_relu_pool_kernel(%arg0: i32, %arg1: i32, %arg2: memref<1x4x27x1024xbf16, #tpu.memory_space<vmem>>, %arg3: memref<16x27xbf16, #tpu.memory_space<vmem>>, %arg4: memref<16x1xf32, #tpu.memory_space<vmem>>, %arg5: memref<1x16x1024xbf16, #tpu.memory_space<vmem>>) attributes {dimension_semantics = [#tpu.dimension_semantics<parallel>, #tpu.dimension_semantics<parallel>], iteration_bounds = array<i64: 2, 4>, scalar_prefetch = 0 : i64, scratch_operands = 0 : i64, tpu.core_type = #tpu.core_type<tc>, window_params = [{transform_indices = @transform_0, window_bounds = array<i64: 1, 4, 27, 1024>}, {pipeline_mode = #tpu.pipeline_mode<synchronous>, transform_indices = @transform_1, window_bounds = array<i64: 16, 27>}, {pipeline_mode = #tpu.pipeline_mode<synchronous>, transform_indices = @transform_2, window_bounds = array<i64: 16, 1>}, {transform_indices = @transform_3, window_bounds = array<i64: 1, 16, 1024>}]} {
    %c0 = arith.constant 0 : index
    %c0_0 = arith.constant 0 : index
    %0 = vector.load %arg3[%c0, %c0_0] : memref<16x27xbf16, #tpu.memory_space<vmem>>, vector<16x27xbf16>
    %c0_1 = arith.constant 0 : index
    %c0_2 = arith.constant 0 : index
    %1 = vector.load %arg4[%c0_1, %c0_2] : memref<16x1xf32, #tpu.memory_space<vmem>>, vector<16x1xf32>
    %c0_3 = arith.constant 0 : index
    %c0_4 = arith.constant 0 : index
    %c0_5 = arith.constant 0 : index
    %c0_6 = arith.constant 0 : index
    %2 = vector.load %arg2[%c0_3, %c0_4, %c0_5, %c0_6] : memref<1x4x27x1024xbf16, #tpu.memory_space<vmem>>, vector<1x1x27x1024xbf16>
    %3 = vector.shape_cast %2 : vector<1x1x27x1024xbf16> to vector<27x1024xbf16>
    %cst = arith.constant dense<0.000000e+00> : vector<16x1024xf32>
    %4 = tpu.matmul %0, %3, %cst {dimension_numbers = #tpu.dot_dimension_numbers<[1], [0], [0], [1], [0, 0, 1, 1], [], []>} : vector<16x27xbf16>, vector<27x1024xbf16>, vector<16x1024xf32> -> vector<16x1024xf32>
    %5 = vector.broadcast %1 : vector<16x1xf32> to vector<16x1024xf32>
    %6 = arith.addf %4, %5 : vector<16x1024xf32>
    %cst_7 = arith.constant 0.000000e+00 : f32
    %7 = vector.broadcast %cst_7 : f32 to vector<16x1024xf32>
    %8 = arith.maximumf %6, %7 : vector<16x1024xf32>
    %c0_8 = arith.constant 0 : index
    %c1 = arith.constant 1 : index
    %c0_9 = arith.constant 0 : index
    %c0_10 = arith.constant 0 : index
    %9 = vector.load %arg2[%c0_8, %c1, %c0_9, %c0_10] : memref<1x4x27x1024xbf16, #tpu.memory_space<vmem>>, vector<1x1x27x1024xbf16>
    %10 = vector.shape_cast %9 : vector<1x1x27x1024xbf16> to vector<27x1024xbf16>
    %cst_11 = arith.constant dense<0.000000e+00> : vector<16x1024xf32>
    %11 = tpu.matmul %0, %10, %cst_11 {dimension_numbers = #tpu.dot_dimension_numbers<[1], [0], [0], [1], [0, 0, 1, 1], [], []>} : vector<16x27xbf16>, vector<27x1024xbf16>, vector<16x1024xf32> -> vector<16x1024xf32>
    %12 = vector.broadcast %1 : vector<16x1xf32> to vector<16x1024xf32>
    %13 = arith.addf %11, %12 : vector<16x1024xf32>
    %cst_12 = arith.constant 0.000000e+00 : f32
    %14 = vector.broadcast %cst_12 : f32 to vector<16x1024xf32>
    %15 = arith.maximumf %13, %14 : vector<16x1024xf32>
    %16 = arith.maximumf %8, %15 : vector<16x1024xf32>
    %c0_13 = arith.constant 0 : index
    %c2 = arith.constant 2 : index
    %c0_14 = arith.constant 0 : index
    %c0_15 = arith.constant 0 : index
    %17 = vector.load %arg2[%c0_13, %c2, %c0_14, %c0_15] : memref<1x4x27x1024xbf16, #tpu.memory_space<vmem>>, vector<1x1x27x1024xbf16>
    %18 = vector.shape_cast %17 : vector<1x1x27x1024xbf16> to vector<27x1024xbf16>
    %cst_16 = arith.constant dense<0.000000e+00> : vector<16x1024xf32>
    %19 = tpu.matmul %0, %18, %cst_16 {dimension_numbers = #tpu.dot_dimension_numbers<[1], [0], [0], [1], [0, 0, 1, 1], [], []>} : vector<16x27xbf16>, vector<27x1024xbf16>, vector<16x1024xf32> -> vector<16x1024xf32>
    %20 = vector.broadcast %1 : vector<16x1xf32> to vector<16x1024xf32>
    %21 = arith.addf %19, %20 : vector<16x1024xf32>
    %cst_17 = arith.constant 0.000000e+00 : f32
    %22 = vector.broadcast %cst_17 : f32 to vector<16x1024xf32>
    %23 = arith.maximumf %21, %22 : vector<16x1024xf32>
    %c0_18 = arith.constant 0 : index
    %c3 = arith.constant 3 : index
    %c0_19 = arith.constant 0 : index
    %c0_20 = arith.constant 0 : index
    %24 = vector.load %arg2[%c0_18, %c3, %c0_19, %c0_20] : memref<1x4x27x1024xbf16, #tpu.memory_space<vmem>>, vector<1x1x27x1024xbf16>
    %25 = vector.shape_cast %24 : vector<1x1x27x1024xbf16> to vector<27x1024xbf16>
    %cst_21 = arith.constant dense<0.000000e+00> : vector<16x1024xf32>
    %26 = tpu.matmul %0, %25, %cst_21 {dimension_numbers = #tpu.dot_dimension_numbers<[1], [0], [0], [1], [0, 0, 1, 1], [], []>} : vector<16x27xbf16>, vector<27x1024xbf16>, vector<16x1024xf32> -> vector<16x1024xf32>
    %27 = vector.broadcast %1 : vector<16x1xf32> to vector<16x1024xf32>
    %28 = arith.addf %26, %27 : vector<16x1024xf32>
    %cst_22 = arith.constant 0.000000e+00 : f32
    %29 = vector.broadcast %cst_22 : f32 to vector<16x1024xf32>
    %30 = arith.maximumf %28, %29 : vector<16x1024xf32>
    %31 = arith.maximumf %23, %30 : vector<16x1024xf32>
    %32 = arith.maximumf %16, %31 : vector<16x1024xf32>
    %33 = arith.truncf %32 : vector<16x1024xf32> to vector<16x1024xbf16>
    %c0_23 = arith.constant 0 : index
    %c0_24 = arith.constant 0 : index
    %c0_25 = arith.constant 0 : index
    %34 = vector.load %arg5[%c0_23, %c0_24, %c0_25] : memref<1x16x1024xbf16, #tpu.memory_space<vmem>>, vector<1x16x1024xbf16>
    %35 = vector.shape_cast %34 : vector<1x16x1024xbf16> to vector<16x1024xbf16>
    %36 = vector.shape_cast %33 : vector<16x1024xbf16> to vector<1x16x1024xbf16>
    tpu.vector_store %arg5[%c0_23, %c0_24, %c0_25], %36 {strides = array<i32>} : memref<1x16x1024xbf16, #tpu.memory_space<vmem>>, vector<1x16x1024xbf16>,
    return
  }
  func.func @transform_0(%arg0: i32, %arg1: i32) -> (i32, i32, i32, i32) {
    %c0_i32 = arith.constant 0 : i32
    %c0_i32_0 = arith.constant 0 : i32
    %c0_i32_1 = arith.constant 0 : i32
    return %arg0, %c0_i32, %c0_i32_0, %arg1 : i32, i32, i32, i32
  }
  func.func @transform_1(%arg0: i32, %arg1: i32) -> (i32, i32) {
    %c0_i32 = arith.constant 0 : i32
    %c0_i32_0 = arith.constant 0 : i32
    %c0_i32_1 = arith.constant 0 : i32
    return %c0_i32, %c0_i32_0 : i32, i32
  }
  func.func @transform_2(%arg0: i32, %arg1: i32) -> (i32, i32) {
    %c0_i32 = arith.constant 0 : i32
    %c0_i32_0 = arith.constant 0 : i32
    %c0_i32_1 = arith.constant 0 : i32
    return %c0_i32, %c0_i32_0 : i32, i32
  }
  func.func @transform_3(%arg0: i32, %arg1: i32) -> (i32, i32, i32) {
    %c0_i32 = arith.constant 0 : i32
    %c0_i32_0 = arith.constant 0 : i32
    return %arg0, %c0_i32, %arg1 : i32, i32, i32
  }
}

module attributes {stable_mosaic.version = 11 : i64} {
  func.func @_conv_bn_relu_pool_kernel(%arg0: i32, %arg1: i32, %arg2: memref<1x4x144x512xbf16, #tpu.memory_space<vmem>>, %arg3: memref<32x144xbf16, #tpu.memory_space<vmem>>, %arg4: memref<32x1xf32, #tpu.memory_space<vmem>>, %arg5: memref<1x32x512xbf16, #tpu.memory_space<vmem>>) attributes {dimension_semantics = [#tpu.dimension_semantics<parallel>, #tpu.dimension_semantics<parallel>], iteration_bounds = array<i64: 2, 2>, scalar_prefetch = 0 : i64, scratch_operands = 0 : i64, tpu.core_type = #tpu.core_type<tc>, window_params = [{transform_indices = @transform_0, window_bounds = array<i64: 1, 4, 144, 512>}, {pipeline_mode = #tpu.pipeline_mode<synchronous>, transform_indices = @transform_1, window_bounds = array<i64: 32, 144>}, {pipeline_mode = #tpu.pipeline_mode<synchronous>, transform_indices = @transform_2, window_bounds = array<i64: 32, 1>}, {transform_indices = @transform_3, window_bounds = array<i64: 1, 32, 512>}]} {
    %c0 = arith.constant 0 : index
    %c0_0 = arith.constant 0 : index
    %0 = vector.load %arg3[%c0, %c0_0] : memref<32x144xbf16, #tpu.memory_space<vmem>>, vector<32x144xbf16>
    %c0_1 = arith.constant 0 : index
    %c0_2 = arith.constant 0 : index
    %1 = vector.load %arg4[%c0_1, %c0_2] : memref<32x1xf32, #tpu.memory_space<vmem>>, vector<32x1xf32>
    %c0_3 = arith.constant 0 : index
    %c0_4 = arith.constant 0 : index
    %c0_5 = arith.constant 0 : index
    %c0_6 = arith.constant 0 : index
    %2 = vector.load %arg2[%c0_3, %c0_4, %c0_5, %c0_6] : memref<1x4x144x512xbf16, #tpu.memory_space<vmem>>, vector<1x1x144x512xbf16>
    %3 = vector.shape_cast %2 : vector<1x1x144x512xbf16> to vector<144x512xbf16>
    %cst = arith.constant dense<0.000000e+00> : vector<32x512xf32>
    %4 = tpu.matmul %0, %3, %cst {dimension_numbers = #tpu.dot_dimension_numbers<[1], [0], [0], [1], [0, 0, 1, 1], [], []>} : vector<32x144xbf16>, vector<144x512xbf16>, vector<32x512xf32> -> vector<32x512xf32>
    %5 = vector.broadcast %1 : vector<32x1xf32> to vector<32x512xf32>
    %6 = arith.addf %4, %5 : vector<32x512xf32>
    %cst_7 = arith.constant 0.000000e+00 : f32
    %7 = vector.broadcast %cst_7 : f32 to vector<32x512xf32>
    %8 = arith.maximumf %6, %7 : vector<32x512xf32>
    %c0_8 = arith.constant 0 : index
    %c1 = arith.constant 1 : index
    %c0_9 = arith.constant 0 : index
    %c0_10 = arith.constant 0 : index
    %9 = vector.load %arg2[%c0_8, %c1, %c0_9, %c0_10] : memref<1x4x144x512xbf16, #tpu.memory_space<vmem>>, vector<1x1x144x512xbf16>
    %10 = vector.shape_cast %9 : vector<1x1x144x512xbf16> to vector<144x512xbf16>
    %cst_11 = arith.constant dense<0.000000e+00> : vector<32x512xf32>
    %11 = tpu.matmul %0, %10, %cst_11 {dimension_numbers = #tpu.dot_dimension_numbers<[1], [0], [0], [1], [0, 0, 1, 1], [], []>} : vector<32x144xbf16>, vector<144x512xbf16>, vector<32x512xf32> -> vector<32x512xf32>
    %12 = vector.broadcast %1 : vector<32x1xf32> to vector<32x512xf32>
    %13 = arith.addf %11, %12 : vector<32x512xf32>
    %cst_12 = arith.constant 0.000000e+00 : f32
    %14 = vector.broadcast %cst_12 : f32 to vector<32x512xf32>
    %15 = arith.maximumf %13, %14 : vector<32x512xf32>
    %16 = arith.maximumf %8, %15 : vector<32x512xf32>
    %c0_13 = arith.constant 0 : index
    %c2 = arith.constant 2 : index
    %c0_14 = arith.constant 0 : index
    %c0_15 = arith.constant 0 : index
    %17 = vector.load %arg2[%c0_13, %c2, %c0_14, %c0_15] : memref<1x4x144x512xbf16, #tpu.memory_space<vmem>>, vector<1x1x144x512xbf16>
    %18 = vector.shape_cast %17 : vector<1x1x144x512xbf16> to vector<144x512xbf16>
    %cst_16 = arith.constant dense<0.000000e+00> : vector<32x512xf32>
    %19 = tpu.matmul %0, %18, %cst_16 {dimension_numbers = #tpu.dot_dimension_numbers<[1], [0], [0], [1], [0, 0, 1, 1], [], []>} : vector<32x144xbf16>, vector<144x512xbf16>, vector<32x512xf32> -> vector<32x512xf32>
    %20 = vector.broadcast %1 : vector<32x1xf32> to vector<32x512xf32>
    %21 = arith.addf %19, %20 : vector<32x512xf32>
    %cst_17 = arith.constant 0.000000e+00 : f32
    %22 = vector.broadcast %cst_17 : f32 to vector<32x512xf32>
    %23 = arith.maximumf %21, %22 : vector<32x512xf32>
    %c0_18 = arith.constant 0 : index
    %c3 = arith.constant 3 : index
    %c0_19 = arith.constant 0 : index
    %c0_20 = arith.constant 0 : index
    %24 = vector.load %arg2[%c0_18, %c3, %c0_19, %c0_20] : memref<1x4x144x512xbf16, #tpu.memory_space<vmem>>, vector<1x1x144x512xbf16>
    %25 = vector.shape_cast %24 : vector<1x1x144x512xbf16> to vector<144x512xbf16>
    %cst_21 = arith.constant dense<0.000000e+00> : vector<32x512xf32>
    %26 = tpu.matmul %0, %25, %cst_21 {dimension_numbers = #tpu.dot_dimension_numbers<[1], [0], [0], [1], [0, 0, 1, 1], [], []>} : vector<32x144xbf16>, vector<144x512xbf16>, vector<32x512xf32> -> vector<32x512xf32>
    %27 = vector.broadcast %1 : vector<32x1xf32> to vector<32x512xf32>
    %28 = arith.addf %26, %27 : vector<32x512xf32>
    %cst_22 = arith.constant 0.000000e+00 : f32
    %29 = vector.broadcast %cst_22 : f32 to vector<32x512xf32>
    %30 = arith.maximumf %28, %29 : vector<32x512xf32>
    %31 = arith.maximumf %23, %30 : vector<32x512xf32>
    %32 = arith.maximumf %16, %31 : vector<32x512xf32>
    %33 = arith.truncf %32 : vector<32x512xf32> to vector<32x512xbf16>
    %c0_23 = arith.constant 0 : index
    %c0_24 = arith.constant 0 : index
    %c0_25 = arith.constant 0 : index
    %34 = vector.load %arg5[%c0_23, %c0_24, %c0_25] : memref<1x32x512xbf16, #tpu.memory_space<vmem>>, vector<1x32x512xbf16>
    %35 = vector.shape_cast %34 : vector<1x32x512xbf16> to vector<32x512xbf16>
    %36 = vector.shape_cast %33 : vector<32x512xbf16> to vector<1x32x512xbf16>
    tpu.vector_store %arg5[%c0_23, %c0_24, %c0_25], %36 {strides = array<i32>} : memref<1x32x512xbf16, #tpu.memory_space<vmem>>, vector<1x32x512xbf16>,
    return
  }
  func.func @transform_0(%arg0: i32, %arg1: i32) -> (i32, i32, i32, i32) {
    %c0_i32 = arith.constant 0 : i32
    %c0_i32_0 = arith.constant 0 : i32
    %c0_i32_1 = arith.constant 0 : i32
    return %arg0, %c0_i32, %c0_i32_0, %arg1 : i32, i32, i32, i32
  }
  func.func @transform_1(%arg0: i32, %arg1: i32) -> (i32, i32) {
    %c0_i32 = arith.constant 0 : i32
    %c0_i32_0 = arith.constant 0 : i32
    %c0_i32_1 = arith.constant 0 : i32
    return %c0_i32, %c0_i32_0 : i32, i32
  }
  func.func @transform_2(%arg0: i32, %arg1: i32) -> (i32, i32) {
    %c0_i32 = arith.constant 0 : i32
    %c0_i32_0 = arith.constant 0 : i32
    %c0_i32_1 = arith.constant 0 : i32
    return %c0_i32, %c0_i32_0 : i32, i32
  }
  func.func @transform_3(%arg0: i32, %arg1: i32) -> (i32, i32, i32) {
    %c0_i32 = arith.constant 0 : i32
    %c0_i32_0 = arith.constant 0 : i32
    return %arg0, %c0_i32, %arg1 : i32, i32, i32
  }
}

module attributes {stable_mosaic.version = 11 : i64} {
  func.func @_mlp_head_kernel(%arg0: i32, %arg1: i32, %arg2: memref<2x4096xbf16, #tpu.memory_space<vmem>>, %arg3: memref<4096x1024xi8, #tpu.memory_space<vmem>>, %arg4: memref<1x1024xf32, #tpu.memory_space<vmem>>, %arg5: memref<2x1024xf32, #tpu.memory_space<vmem>>, %arg6: memref<1024x10xf32, #tpu.memory_space<vmem>>, %arg7: memref<1x2x10xf32, #tpu.memory_space<vmem>>, %arg8: memref<2x1024xf32, #tpu.memory_space<vmem>>) attributes {dimension_semantics = [#tpu.dimension_semantics<arbitrary>, #tpu.dimension_semantics<arbitrary>], iteration_bounds = array<i64: 1, 8>, scalar_prefetch = 0 : i64, scratch_operands = 1 : i64, tpu.core_type = #tpu.core_type<tc>, window_params = [{transform_indices = @transform_0, window_bounds = array<i64: 2, 4096>}, {transform_indices = @transform_1, window_bounds = array<i64: 4096, 1024>}, {transform_indices = @transform_2, window_bounds = array<i64: 1, 1024>}, {transform_indices = @transform_3, window_bounds = array<i64: 2, 1024>}, {transform_indices = @transform_4, window_bounds = array<i64: 1024, 10>}, {transform_indices = @transform_5, window_bounds = array<i64: 1, 2, 10>}]} {
    %c0_i32 = arith.constant 0 : i32
    %0 = arith.cmpi eq, %arg1, %c0_i32 : i32
    %1 = arith.extui %0 : i1 to i32
    %c0_i32_0 = arith.constant 0 : i32
    %2 = arith.cmpi ne, %1, %c0_i32_0 : i32
    scf.if %2 {
      %cst_9 = arith.constant 0.000000e+00 : f32
      %13 = vector.broadcast %cst_9 : f32 to vector<2x1024xf32>
      %c0_10 = arith.constant 0 : index
      %c0_11 = arith.constant 0 : index
      %14 = vector.load %arg8[%c0_10, %c0_11] : memref<2x1024xf32, #tpu.memory_space<vmem>>, vector<2x1024xf32>
      tpu.vector_store %arg8[%c0_10, %c0_11], %13 {strides = array<i32>} : memref<2x1024xf32, #tpu.memory_space<vmem>>, vector<2x1024xf32>,
    } else {
    }
    %c0 = arith.constant 0 : index
    %c0_1 = arith.constant 0 : index
    %3 = vector.load %arg8[%c0, %c0_1] : memref<2x1024xf32, #tpu.memory_space<vmem>>, vector<2x1024xf32>
    %c0_2 = arith.constant 0 : index
    %c0_3 = arith.constant 0 : index
    %4 = vector.load %arg2[%c0_2, %c0_3] : memref<2x4096xbf16, #tpu.memory_space<vmem>>, vector<2x4096xbf16>
    %c0_4 = arith.constant 0 : index
    %c0_5 = arith.constant 0 : index
    %5 = vector.load %arg3[%c0_4, %c0_5] : memref<4096x1024xi8, #tpu.memory_space<vmem>>, vector<4096x1024xi8>
    %6 = arith.sitofp %5 : vector<4096x1024xi8> to vector<4096x1024xbf16>
    %cst = arith.constant dense<0.000000e+00> : vector<2x1024xf32>
    %7 = tpu.matmul %4, %6, %cst {dimension_numbers = #tpu.dot_dimension_numbers<[1], [0], [0], [1], [0, 0, 1, 1], [], []>} : vector<2x4096xbf16>, vector<4096x1024xbf16>, vector<2x1024xf32> -> vector<2x1024xf32>
    %8 = arith.addf %3, %7 : vector<2x1024xf32>
    %c0_6 = arith.constant 0 : index
    %c0_7 = arith.constant 0 : index
    %9 = vector.load %arg8[%c0_6, %c0_7] : memref<2x1024xf32, #tpu.memory_space<vmem>>, vector<2x1024xf32>
    tpu.vector_store %arg8[%c0_6, %c0_7], %8 {strides = array<i32>} : memref<2x1024xf32, #tpu.memory_space<vmem>>, vector<2x1024xf32>,
    %c7_i32 = arith.constant 7 : i32
    %10 = arith.cmpi eq, %arg1, %c7_i32 : i32
    %11 = arith.extui %10 : i1 to i32
    %c0_i32_8 = arith.constant 0 : i32
    %12 = arith.cmpi ne, %11, %c0_i32_8 : i32
    scf.if %12 {
      %c0_9 = arith.constant 0 : index
      %c0_10 = arith.constant 0 : index
      %13 = vector.load %arg8[%c0_9, %c0_10] : memref<2x1024xf32, #tpu.memory_space<vmem>>, vector<2x1024xf32>
      %c0_11 = arith.constant 0 : index
      %c0_12 = arith.constant 0 : index
      %14 = vector.load %arg4[%c0_11, %c0_12] : memref<1x1024xf32, #tpu.memory_space<vmem>>, vector<1x1024xf32>
      %15 = vector.broadcast %14 : vector<1x1024xf32> to vector<2x1024xf32>
      %16 = arith.mulf %13, %15 : vector<2x1024xf32>
      %c0_13 = arith.constant 0 : index
      %c0_14 = arith.constant 0 : index
      %17 = vector.load %arg5[%c0_13, %c0_14] : memref<2x1024xf32, #tpu.memory_space<vmem>>, vector<2x1024xf32>
      %18 = arith.addf %16, %17 : vector<2x1024xf32>
      %cst_15 = arith.constant 0.000000e+00 : f32
      %19 = vector.broadcast %cst_15 : f32 to vector<2x1024xf32>
      %20 = arith.maximumf %18, %19 : vector<2x1024xf32>
      %c0_16 = arith.constant 0 : index
      %c0_17 = arith.constant 0 : index
      %21 = vector.load %arg6[%c0_16, %c0_17] : memref<1024x10xf32, #tpu.memory_space<vmem>>, vector<1024x10xf32>
      %cst_18 = arith.constant dense<0.000000e+00> : vector<2x10xf32>
      %22 = tpu.matmul %20, %21, %cst_18 {dimension_numbers = #tpu.dot_dimension_numbers<[1], [0], [0], [1], [0, 0, 1, 1], [], []>} : vector<2x1024xf32>, vector<1024x10xf32>, vector<2x10xf32> -> vector<2x10xf32>
      %c0_19 = arith.constant 0 : index
      %c0_20 = arith.constant 0 : index
      %c0_21 = arith.constant 0 : index
      %23 = vector.load %arg7[%c0_19, %c0_20, %c0_21] : memref<1x2x10xf32, #tpu.memory_space<vmem>>, vector<1x2x10xf32>
      %24 = vector.shape_cast %23 : vector<1x2x10xf32> to vector<2x10xf32>
      %25 = vector.shape_cast %22 : vector<2x10xf32> to vector<1x2x10xf32>
      tpu.vector_store %arg7[%c0_19, %c0_20, %c0_21], %25 {strides = array<i32>} : memref<1x2x10xf32, #tpu.memory_space<vmem>>, vector<1x2x10xf32>,
    } else {
    }
    return
  }
  func.func @transform_0(%arg0: i32, %arg1: i32) -> (i32, i32) {
    %c0_i32 = arith.constant 0 : i32
    %c0_i32_0 = arith.constant 0 : i32
    return %c0_i32, %arg1 : i32, i32
  }
  func.func @transform_1(%arg0: i32, %arg1: i32) -> (i32, i32) {
    %c0_i32 = arith.constant 0 : i32
    return %arg1, %arg0 : i32, i32
  }
  func.func @transform_2(%arg0: i32, %arg1: i32) -> (i32, i32) {
    %c0_i32 = arith.constant 0 : i32
    %c0_i32_0 = arith.constant 0 : i32
    return %c0_i32, %arg0 : i32, i32
  }
  func.func @transform_3(%arg0: i32, %arg1: i32) -> (i32, i32) {
    %c0_i32 = arith.constant 0 : i32
    %c0_i32_0 = arith.constant 0 : i32
    return %c0_i32, %arg0 : i32, i32
  }
  func.func @transform_4(%arg0: i32, %arg1: i32) -> (i32, i32) {
    %c0_i32 = arith.constant 0 : i32
    %c0_i32_0 = arith.constant 0 : i32
    return %arg0, %c0_i32 : i32, i32
  }
  func.func @transform_5(%arg0: i32, %arg1: i32) -> (i32, i32, i32) {
    %c0_i32 = arith.constant 0 : i32
    %c0_i32_0 = arith.constant 0 : i32
    %c0_i32_1 = arith.constant 0 : i32
    return %arg0, %c0_i32, %c0_i32_0 : i32, i32, i32
  }
}

</mosaic_0001>

<bundles_post_ra>
// kernel: model128_forward.3
= control target key start
LH: loop header
LB: loop body
LE: loop exit
PB: predicated region body
PF: predicated region fallthrough
CT: control target
= control target key end

     0   :  { %s2083_s12 = smov 0   ;;  %s2085_s13 = smov 0   ;;  %s2677_s0 = inlined_call_operand.vmem [shape: bf16[2,4,27,4096], index: 0, kind: input, shape index: {}]   ;;  %s2678_s1 = inlined_call_operand.vmem [shape: bf16[16,27], index: 1, kind: input, shape index: {}]   ;;  %s2679_s2 = inlined_call_operand.vmem [shape: f32[16,1], index: 2, kind: input, shape index: {}]   ;;  %s2680_s3 = inlined_call_operand.vmem [shape: bf16[2,16,4096], index: 3, kind: output, shape index: {}]  }
   0x1   :  { %s2087_s14 = smov 0   ;;  %s2089_s15 = smov 0  }
   0x2   :  { %s2091_s16 = smov 0   ;;  %s2093_s17 = smov 0  }
   0x3   :  { %s2095_s18 = smov 0  }
   0x4 LB: > { %s22_s19 = sadd.s32 1, %s2051_s16  ;;  %s25_s20 = sadd.s32 1, %s2055_s17  ;;  %s2059_s18 = sphi %s2095_s18, %s13_s18   ;;  %s2055_s17 = sphi %s2093_s17, %s2687_s17   ;;  %s2051_s16 = sphi %s2091_s16, %s2686_s16   ;;  %s2047_s15 = sphi %s2089_s15, %s2685_s15   ;;  %s2043_s14 = sphi %s2087_s14, %s2684_s14   ;;  %s2039_s13 = sphi %s2085_s13, %s2683_s13   ;;  %s2035_s12 = sphi %s2083_s12, %s2682_s12  }
   0x5   : > { %p23_p0 = scmp.ge.s32.totalorder %s22_s19, 4  ;;  %s1783_s21 = sadd.s32 4294967295, %s2059_s18  }
   0x6   : > { %p41_p1 = scmp.ne.s32.totalorder %s2039_s13, %s2035_s12  ;;  %p42_p2 = scmp.eq.s32.totalorder %s2059_s18, 0 }
   0x7   : > { %s2689_s19 = smov (%p23_p0, %s22_s19), 0  ;;  %s2691_s20 = smov (!%p23_p0, %s25_s20), %s2055_s17 }
   0x8   : > { %p27_p3 = scmp.ge.s32.totalorder %s2691_s20, 2  ;;  %p115_p4 = scmp.eq.s32.totalorder %s1783_s21, 7 }
   0x9   : > { %s30_s22 = ssub.s32 %s2051_s16, %s2689_s19  ;;  %p43_p5 = por %p42_p2, %p41_p1 }
   0xa   : > { %s2693_s20 = smov (%p27_p3, %s2691_s20), 0  ;;  %p2131_p6 = por %p115_p4, %p41_p1 }
   0xb   : > { %s29_s24 = ssub.s32 %s2055_s17, %s2693_s20  ;;  %s34_s26 = sadd.s32 1, %s2039_s13 }
   0xc   : > { %s31_s25 = sor.u32 %s30_s22, %s29_s24  ;;  %p1786_p8 = scmp.ge.s32.totalorder %s2059_s18, 8 }
   0xd   : > { %p32_p7 = scmp.eq.s32.totalorder %s31_s25, 0 }
   0xe   : > { %143 = sbr.rel (%p1786_p8) target bundleno = 60 (0x3c), region = 24 }
   0xf   : > { %s2139_s27 = scalar_select %p32_p7, %s2039_s13, %s34_s26  }
  0x15   : > { %146 = sbr.rel (!%p43_p5) target bundleno = 60 (0x3c), region = 28  ;;  %s148_s28 = sand.u32 (%p43_p5), 1, %s2039_s13  }
  0x16   : > { %s1788_s29 = sshll.u32 (%p43_p5), %s2051_s16, 3  ;;  %s1787_s30 = sshll.u32 (%p43_p5), %s148_s28, 9 }
  0x17   : > { %s1789_s4 = sshll.u32 (%p43_p5), %s2055_s17, 9  ;;  %s2153_s10 = scalar_lea.vmem (%p43_p5), [#allocation2], %s1787_s30 }
  0x18   : > { %s153_s5 = sadd.s32 (%p43_p5), %s1789_s4, %s1788_s29 }
  0x19   : > { %s1790_s6 = sshll.u32 (%p43_p5), %s153_s5, 2 }
  0x1a   : > { %s2148_s9 = scalar_lea.vmem (%p43_p5), %s2677_s0, %s1790_s6 }
  0x1b   : > { %v168_v0 = vld [vmem:[%s2148_s9] sm:$0xff] (%p43_p5)  ;;  %v170_v1 = vld [vmem:[%s2148_s9 + $0x8] sm:$0xff] (%p43_p5)  ;;  %v172_v2 = vld [vmem:[%s2148_s9 + $0x10] sm:$0xff] (%p43_p5) }
  0x1c   : > { %169 = vst [vmem:[%s2153_s10] sm:$0xff] %v168_v0  ;;  %171 = vst [vmem:[%s2153_s10 + $0x8] sm:$0xff] %v170_v1  ;;  %v174_v3 = vld [vmem:[%s2148_s9 + $0x18] sm:$0xff]  ;;  %v176_v4 = vld [vmem:[%s2148_s9 + $0x80] sm:$0xff] }
  0x1d   : > { %173 = vst [vmem:[%s2153_s10 + $0x10] sm:$0xff] %v172_v2  ;;  %v178_v5 = vld [vmem:[%s2148_s9 + $0x88] sm:$0xff]  ;;  %175 = vst [vmem:[%s2153_s10 + $0x18] sm:$0xff] %v174_v3  ;;  %v180_v6 = vld [vmem:[%s2148_s9 + $0x90] sm:$0xff] }
  0x1e   : > { %177 = vst [vmem:[%s2153_s10 + $0x20] sm:$0xff] %v176_v4  ;;  %179 = vst [vmem:[%s2153_s10 + $0x28] sm:$0xff] %v178_v5  ;;  %v182_v7 = vld [vmem:[%s2148_s9 + $0x98] sm:$0xff]  ;;  %v184_v8 = vld [vmem:[%s2148_s9 + $0x100] sm:$0xff] }
  0x1f   : > { %181 = vst [vmem:[%s2153_s10 + $0x30] sm:$0xff] %v180_v6  ;;  %183 = vst [vmem:[%s2153_s10 + $0x38] sm:$0xff] %v182_v7  ;;  %v186_v9 = vld [vmem:[%s2148_s9 + $0x108] sm:$0xff]  ;;  %v188_v10 = vld [vmem:[%s2148_s9 + $0x110] sm:$0xff] }
  0x20   : > { %185 = vst [vmem:[%s2153_s10 + $0x40] sm:$0xff] %v184_v8  ;;  %v190_v11 = vld [vmem:[%s2148_s9 + $0x118] sm:$0xff]  ;;  %187 = vst [vmem:[%s2153_s10 + $0x48] sm:$0xff] %v186_v9  ;;  %v192_v12 = vld [vmem:[%s2148_s9 + $0x180] sm:$0xff] }
  0x21   : > { %189 = vst [vmem:[%s2153_s10 + $0x50] sm:$0xff] %v188_v10  ;;  %191 = vst [vmem:[%s2153_s10 + $0x58] sm:$0xff] %v190_v11  ;;  %v194_v13 = vld [vmem:[%s2148_s9 + $0x188] sm:$0xff]  ;;  %v196_v14 = vld [vmem:[%s2148_s9 + $0x190] sm:$0xff] }
  0x22   : > { %193 = vst [vmem:[%s2153_s10 + $0x60] sm:$0xff] %v192_v12  ;;  %195 = vst [vmem:[%s2153_s10 + $0x68] sm:$0xff] %v194_v13  ;;  %v198_v15 = vld [vmem:[%s2148_s9 + $0x198] sm:$0xff]  ;;  %v200_v16 = vld [vmem:[%s2148_s9 + $0x200] sm:$0xff] }
  0x23   : > { %197 = vst [vmem:[%s2153_s10 + $0x70] sm:$0xff] %v196_v14  ;;  %v202_v17 = vld [vmem:[%s2148_s9 + $0x208] sm:$0xff]  ;;  %199 = vst [vmem:[%s2153_s10 + $0x78] sm:$0xff] %v198_v15  ;;  %v204_v18 = vld [vmem:[%s2148_s9 + $0x210] sm:$0xff] }
  0x24   : > { %201 = vst [vmem:[%s2153_s10 + $0x80] sm:$0xff] %v200_v16  ;;  %203 = vst [vmem:[%s2153_s10 + $0x88] sm:$0xff] %v202_v17  ;;  %v206_v19 = vld [vmem:[%s2148_s9 + $0x218] sm:$0xff]  ;;  %v208_v20 = vld [vmem:[%s2148_s9 + $0x280] sm:$0xff] }
  0x25   : > { %205 = vst [vmem:[%s2153_s10 + $0x90] sm:$0xff] %v204_v18  ;;  %207 = vst [vmem:[%s2153_s10 + $0x98] sm:$0xff] %v206_v19  ;;  %v210_v21 = vld [vmem:[%s2148_s9 + $0x288] sm:$0xff]  ;;  %v212_v22 = vld [vmem:[%s2148_s9 + $0x290] sm:$0xff] }
  0x26   : > { %209 = vst [vmem:[%s2153_s10 + $0xa0] sm:$0xff] %v208_v20  ;;  %v214_v23 = vld [vmem:[%s2148_s9 + $0x298] sm:$0xff]  ;;  %211 = vst [vmem:[%s2153_s10 + $0xa8] sm:$0xff] %v210_v21  ;;  %v216_v24 = vld [vmem:[%s2148_s9 + $0x300] sm:$0xff] }
  0x27   : > { %213 = vst [vmem:[%s2153_s10 + $0xb0] sm:$0xff] %v212_v22  ;;  %215 = vst [vmem:[%s2153_s10 + $0xb8] sm:$0xff] %v214_v23  ;;  %v218_v25 = vld [vmem:[%s2148_s9 + $0x308] sm:$0xff]  ;;  %v220_v26 = vld [vmem:[%s2148_s9 + $0x310] sm:$0xff] }
  0x28   : > { %217 = vst [vmem:[%s2153_s10 + $0xc0] sm:$0xff] %v216_v24  ;;  %219 = vst [vmem:[%s2153_s10 + $0xc8] sm:$0xff] %v218_v25  ;;  %v222_v27 = vld [vmem:[%s2148_s9 + $0x318] sm:$0xff]  ;;  %v224_v28 = vld [vmem:[%s2148_s9 + $0x380] sm:$0xff] }
  0x29   : > { %221 = vst [vmem:[%s2153_s10 + $0xd0] sm:$0xff] %v220_v26  ;;  %v226_v29 = vld [vmem:[%s2148_s9 + $0x388] sm:$0xff]  ;;  %223 = vst [vmem:[%s2153_s10 + $0xd8] sm:$0xff] %v222_v27  ;;  %v228_v30 = vld [vmem:[%s2148_s9 + $0x390] sm:$0xff] }
  0x2a   : > { %225 = vst [vmem:[%s2153_s10 + $0xe0] sm:$0xff] %v224_v28  ;;  %227 = vst [vmem:[%s2153_s10 + $0xe8] sm:$0xff] %v226_v29  ;;  %v230_v31 = vld [vmem:[%s2148_s9 + $0x398] sm:$0xff]  ;;  %v232_v32 = vld [vmem:[%s2148_s9 + $0x400] sm:$0xff] }
  0x2b   : > { %229 = vst [vmem:[%s2153_s10 + $0xf0] sm:$0xff] %v228_v30  ;;  %231 = vst [vmem:[%s2153_s10 + $0xf8] sm:$0xff] %v230_v31  ;;  %v234_v33 = vld [vmem:[%s2148_s9 + $0x408] sm:$0xff]  ;;  %v236_v34 = vld [vmem:[%s2148_s9 + $0x410] sm:$0xff] }
  0x2c   : > { %233 = vst [vmem:[%s2153_s10 + $0x100] sm:$0xff] %v232_v32  ;;  %v238_v35 = vld [vmem:[%s2148_s9 + $0x418] sm:$0xff]  ;;  %235 = vst [vmem:[%s2153_s10 + $0x108] sm:$0xff] %v234_v33  ;;  %v240_v36 = vld [vmem:[%s2148_s9 + $0x480] sm:$0xff] }
  0x2d   : > { %237 = vst [vmem:[%s2153_s10 + $0x110] sm:$0xff] %v236_v34  ;;  %239 = vst [vmem:[%s2153_s10 + $0x118] sm:$0xff] %v238_v35  ;;  %v242_v37 = vld [vmem:[%s2148_s9 + $0x488] sm:$0xff]  ;;  %v244_v38 = vld [vmem:[%s2148_s9 + $0x490] sm:$0xff] }
  0x2e   : > { %241 = vst [vmem:[%s2153_s10 + $0x120] sm:$0xff] %v240_v36  ;;  %243 = vst [vmem:[%s2153_s10 + $0x128] sm:$0xff] %v242_v37  ;;  %v246_v39 = vld [vmem:[%s2148_s9 + $0x498] sm:$0xff]  ;;  %v248_v40 = vld [vmem:[%s2148_s9 + $0x500] sm:$0xff] }
  0x2f   : > { %245 = vst [vmem:[%s2153_s10 + $0x130] sm:$0xff] %v244_v38  ;;  %v250_v41 = vld [vmem:[%s2148_s9 + $0x508] sm:$0xff]  ;;  %247 = vst [vmem:[%s2153_s10 + $0x138] sm:$0xff] %v246_v39  ;;  %v252_v42 = vld [vmem:[%s2148_s9 + $0x510] sm:$0xff] }
  0x30   : > { %249 = vst [vmem:[%s2153_s10 + $0x140] sm:$0xff] %v248_v40  ;;  %251 = vst [vmem:[%s2153_s10 + $0x148] sm:$0xff] %v250_v41  ;;  %v254_v43 = vld [vmem:[%s2148_s9 + $0x518] sm:$0xff]  ;;  %v256_v44 = vld [vmem:[%s2148_s9 + $0x580] sm:$0xff] }
  0x31   : > { %253 = vst [vmem:[%s2153_s10 + $0x150] sm:$0xff] %v252_v42  ;;  %255 = vst [vmem:[%s2153_s10 + $0x158] sm:$0xff] %v254_v43  ;;  %v258_v45 = vld [vmem:[%s2148_s9 + $0x588] sm:$0xff]  ;;  %v260_v46 = vld [vmem:[%s2148_s9 + $0x590] sm:$0xff] }
  0x32   : > { %257 = vst [vmem:[%s2153_s10 + $0x160] sm:$0xff] %v256_v44  ;;  %v262_v47 = vld [vmem:[%s2148_s9 + $0x598] sm:$0xff]  ;;  %259 = vst [vmem:[%s2153_s10 + $0x168] sm:$0xff] %v258_v45  ;;  %v264_v48 = vld [vmem:[%s2148_s9 + $0x600] sm:$0xff] }
  0x33   : > { %261 = vst [vmem:[%s2153_s10 + $0x170] sm:$0xff] %v260_v46  ;;  %263 = vst [vmem:[%s2153_s10 + $0x178] sm:$0xff] %v262_v47  ;;  %v266_v49 = vld [vmem:[%s2148_s9 + $0x608] sm:$0xff]  ;;  %v268_v50 = vld [vmem:[%s2148_s9 + $0x610] sm:$0xff] }
  0x34   : > { %265 = vst [vmem:[%s2153_s10 + $0x180] sm:$0xff] %v264_v48  ;;  %267 = vst [vmem:[%s2153_s10 + $0x188] sm:$0xff] %v266_v49  ;;  %v270_v51 = vld [vmem:[%s2148_s9 + $0x618] sm:$0xff]  ;;  %v272_v52 = vld [vmem:[%s2148_s9 + $0x680] sm:$0xff] }
  0x35   : > { %269 = vst [vmem:[%s2153_s10 + $0x190] sm:$0xff] %v268_v50  ;;  %v274_v53 = vld [vmem:[%s2148_s9 + $0x688] sm:$0xff]  ;;  %271 = vst [vmem:[%s2153_s10 + $0x198] sm:$0xff] %v270_v51  ;;  %v276_v54 = vld [vmem:[%s2148_s9 + $0x690] sm:$0xff] }
  0x36   : > { %273 = vst [vmem:[%s2153_s10 + $0x1a0] sm:$0xff] %v272_v52  ;;  %275 = vst [vmem:[%s2153_s10 + $0x1a8] sm:$0xff] %v274_v53  ;;  %v278_v55 = vld [vmem:[%s2148_s9 + $0x698] sm:$0xff]  ;;  %v280_v56 = vld [vmem:[%s2148_s9 + $0x700] sm:$0xff] }
  0x37   : > { %277 = vst [vmem:[%s2153_s10 + $0x1b0] sm:$0xff] %v276_v54  ;;  %279 = vst [vmem:[%s2153_s10 + $0x1b8] sm:$0xff] %v278_v55  ;;  %v282_v57 = vld [vmem:[%s2148_s9 + $0x708] sm:$0xff]  ;;  %v284_v58 = vld [vmem:[%s2148_s9 + $0x710] sm:$0xff] }
  0x38   : > { %281 = vst [vmem:[%s2153_s10 + $0x1c0] sm:$0xff] %v280_v56  ;;  %v286_v59 = vld [vmem:[%s2148_s9 + $0x718] sm:$0xff]  ;;  %283 = vst [vmem:[%s2153_s10 + $0x1c8] sm:$0xff] %v282_v57  ;;  %v288_v60 = vld [vmem:[%s2148_s9 + $0x780] sm:$0xff] }
  0x39   : > { %285 = vst [vmem:[%s2153_s10 + $0x1d0] sm:$0xff] %v284_v58  ;;  %287 = vst [vmem:[%s2153_s10 + $0x1d8] sm:$0xff] %v286_v59  ;;  %v290_v61 = vld [vmem:[%s2148_s9 + $0x788] sm:$0xff]  ;;  %v292_v62 = vld [vmem:[%s2148_s9 + $0x790] sm:$0xff] }
  0x3a   : > { %289 = vst [vmem:[%s2153_s10 + $0x1e0] sm:$0xff] %v288_v60  ;;  %291 = vst [vmem:[%s2153_s10 + $0x1e8] sm:$0xff] %v290_v61  ;;  %v294_v63 = vld [vmem:[%s2148_s9 + $0x798] sm:$0xff] }
  0x3b   : > { %293 = vst [vmem:[%s2153_s10 + $0x1f0] sm:$0xff] %v292_v62  ;;  %295 = vst [vmem:[%s2153_s10 + $0x1f8] sm:$0xff] %v294_v63 }
  0x3c PF: > { %p1791_p9 = scmp.ge.s32.totalorder %s2059_s18, 1  ;;  %p300_p10 = scmp.lt.s32.totalorder %s2059_s18, 9 }
  0x3e   : > { %p301_p11 = pnand %p1791_p9, %p300_p10 }
  0x3f   : > { %s307_s11 = sand.u32 (!%p301_p11), 1, %s2035_s12   ;;  %vm443_vm0 = vcmask (!%p301_p11), 1044480   ;;  %vm444_vm1 = vcmask (!%p301_p11), 1045504   ;;  %v2061_v0 = vmov (!%p301_p11), 65535   ;;  %v2062_v2 = vmov (!%p301_p11), 0   ;;  %v334_v3 = vld [vmem:[%s2679_s2] sm:$0xff] (!%p301_p11) }
  0x40   : > { %304 = sbr.rel (%p301_p11) target bundleno = 371 (0x173), region = 51  ;;  %s1792_s21 = sshll.u32 (!%p301_p11), %s307_s11, 9  ;;  %v445_v1 = vsel (!%p301_p11), %vm443_vm0, 4294967295, %v2061_v0  ;;  %503 = vmatprep.mubr.bf16.mxu0 (!%p301_p11), %v2062_v2  ;;  %546 = vmatprep.mubr.bf16.mxu1 (!%p301_p11), %v2062_v2  ;;  %v2319_v36 = vld [vmem:[%s2678_s1] sm:$0xff] (!%p301_p11)   ;;  %vm439_vm2 = vcmask (!%p301_p11), 220160  }
  0x41   : > { %2003 = vset.pattern.permute.xlu0 (!%p301_p11), %v2062_v2  ;;  %s2291_s25 = scalar_lea.vmem (!%p301_p11), [#allocation2], %s1792_s21  ;;  %v2300_v12 = vsel (!%p301_p11), %vm444_vm1, %v445_v1, 0  ;;  %s2589_s4 = sshll.u32 (!%p301_p11), %s307_s11, 6 }
  0x42   : > { %v336_v4 = vld [vmem:[%s2291_s25] sm:$0xff] (!%p301_p11)  ;;  %v337_v6 = vld [vmem:[%s2291_s25 + $0x8] sm:$0xff] (!%p301_p11)  ;;  %354 = vperm.xlu0 (!%p301_p11), %2003, %v334_v3   ;;  %v338_v19 = vld [vmem:[%s2291_s25 + $0x10] sm:$0xff] (!%p301_p11)  ;;  %s2603_s12 = scalar_lea.vmem (!%p301_p11), [#allocation3], %s2589_s4 }
  0x43   : > { %v340_v5 = vld [vmem:[%s2291_s25 + $0x20] sm:$0xff] (!%p301_p11)  ;;  %v341_v8 = vld [vmem:[%s2291_s25 + $0x28] sm:$0xff] (!%p301_p11)  ;;  %v342_v22 = vld [vmem:[%s2291_s25 + $0x30] sm:$0xff] (!%p301_p11) }
  0x44   : > { %v1796_v7 = vcombine.high (!%p301_p11), %v336_v4, %v340_v5  ;;  %v1795_v9 = vcombine.low (!%p301_p11), %v336_v4, %v340_v5  ;;  %v344_v10 = vld [vmem:[%s2291_s25 + $0x40] sm:$0xff] (!%p301_p11)  ;;  %v1798_v13 = vcombine.high (!%p301_p11), %v337_v6, %v341_v8  ;;  %v1797_v14 = vcombine.low (!%p301_p11), %v337_v6, %v341_v8  ;;  %v345_v16 = vld [vmem:[%s2291_s25 + $0x48] sm:$0xff] (!%p301_p11)  ;;  %v339_v23 = vld [vmem:[%s2291_s25 + $0x18] sm:$0xff] (!%p301_p11) }
  0x45   : > { %v348_v11 = vld [vmem:[%s2291_s25 + $0x60] sm:$0x33] (!%p301_p11)  ;;  %v349_v17 = vld [vmem:[%s2291_s25 + $0x68] sm:$0x33] (!%p301_p11)  ;;  %v343_v24 = vld [vmem:[%s2291_s25 + $0x38] sm:$0xff] (!%p301_p11)  ;;  %v1800_v32 = vcombine.high (!%p301_p11), %v338_v19, %v342_v22  ;;  %v1799_v38 = vcombine.low (!%p301_p11), %v338_v19, %v342_v22 }
  0x46   : > { %v1804_v15 = vcombine.high (!%p301_p11), %v344_v10, %v348_v11  ;;  %v1803_v18 = vcombine.low (!%p301_p11), %v344_v10, %v348_v11  ;;  %471 = vmatprep.subr.bf16.mxu0 (!%p301_p11), %v1796_v7  ;;  %v1806_v20 = vcombine.high (!%p301_p11), %v345_v16, %v349_v17  ;;  %v1805_v21 = vcombine.low (!%p301_p11), %v345_v16, %v349_v17  ;;  %v346_v27 = vld [vmem:[%s2291_s25 + $0x50] sm:$0xff] (!%p301_p11)  ;;  %v347_v29 = vld [vmem:[%s2291_s25 + $0x58] sm:$0xff] (!%p301_p11)  ;;  %v1815_v43 = vld [vmem:[%s2291_s25 + $0x80] sm:$0xff] (!%p301_p11) }
  0x47   : > { %514 = vmatprep.subr.bf16.mxu1 %v1798_v13  ;;  %472 = vmatpush1.bf16.msra.mxu0 %v1795_v9  ;;  %v350_v28 = vld [vmem:[%s2291_s25 + $0x70] sm:$0x33]  ;;  %v351_v33 = vld [vmem:[%s2291_s25 + $0x78] sm:$0x33]  ;;  %v1802_v34 = vcombine.high %v339_v23, %v343_v24  ;;  %v1801_v40 = vcombine.low %v339_v23, %v343_v24  ;;  %v1819_v44 = vld [vmem:[%s2291_s25 + $0xa0] sm:$0xff]  ;;  %s1932_s5 = sshll.u32 (%p2131_p6), %s2043_s14, 3 }
  0x48   : > { %v451_v25 = vand.u32 %v1804_v15, %v2300_v12  ;;  %v448_v26 = vand.u32 %v1803_v18, %v2300_v12  ;;  %515 = vmatpush1.bf16.msra.mxu1 %v1797_v14  ;;  %v457_v30 = vand.u32 %v1806_v20, %v2300_v12  ;;  %v454_v31 = vand.u32 %v1805_v21, %v2300_v12  ;;  %v1816_v46 = vld [vmem:[%s2291_s25 + $0x88] sm:$0xff]  ;;  %v1823_v47 = vld [vmem:[%s2291_s25 + $0xc0] sm:$0xff]  ;;  %v1817_v63 = vld [vmem:[%s2291_s25 + $0x90] sm:$0xff]  ;;  %s1933_s6 = sshll.u32 (%p2131_p6), %s2047_s15, 6 }
  0x49   : > { %v1808_v35 = vcombine.high %v346_v27, %v350_v28  ;;  %v1810_v37 = vcombine.high %v347_v29, %v351_v33  ;;  %v1807_v39 = vcombine.low %v346_v27, %v350_v28  ;;  %v1809_v42 = vcombine.low %v347_v29, %v351_v33  ;;  %v1827_v48 = vld [vmem:[%s2291_s25 + $0xe0] sm:$0x33]  ;;  %v1820_v49 = vld [vmem:[%s2291_s25 + $0xa8] sm:$0xff]  ;;  %v1821_v0 = vld [vmem:[%s2291_s25 + $0xb0] sm:$0xff]  ;;  %s1675_s7 = sadd.s32 (%p2131_p6), %s1933_s6, %s1932_s5 }
  0x4a   : > { %473 = vmatprep.subr.bf16.mxu0 %v451_v25  ;;  %516 = vmatprep.subr.bf16.mxu1 %v457_v30  ;;  %v1824_v50 = vld [vmem:[%s2291_s25 + $0xc8] sm:$0xff]  ;;  %v1832_v54 = vcombine.high %v1815_v43, %v1819_v44  ;;  %v1840_v55 = vcombine.high %v1823_v47, %v1827_v48  ;;  %v1834_v56 = vcombine.high %v1816_v46, %v1820_v49  ;;  %v1818_v3 = vld [vmem:[%s2291_s25 + $0x98] sm:$0xff]  ;;  %v1825_v4 = vld [vmem:[%s2291_s25 + $0xd0] sm:$0xff]  ;;  %s1934_s23 = sshll.u32 (%p2131_p6), %s1675_s7, 2 }
  0x4b   : > { %474 = vmatpush1.bf16.msra.mxu0 %v448_v26  ;;  %v463_v41 = vand.u32 %v1808_v35, %v2300_v12  ;;  %v469_v45 = vand.u32 %v1810_v37, %v2300_v12  ;;  %v1828_v51 = vld [vmem:[%s2291_s25 + $0xe8] sm:$0x33]  ;;  %v460_v52 = vand.u32 %v1807_v39, %v2300_v12  ;;  %v466_v53 = vand.u32 %v1809_v42, %v2300_v12  ;;  %v1829_v5 = vld [vmem:[%s2291_s25 + $0xf0] sm:$0x33]  ;;  %v1822_v6 = vld [vmem:[%s2291_s25 + $0xb8] sm:$0xff]  ;;  %s1677_s10 = scalar_lea.vmem (%p2131_p6), %s2680_s3, %s1934_s23 }
  0x4c   : > { %517 = vmatpush1.bf16.msra.mxu1 %v454_v31  ;;  %557 = vmatprep.subr.bf16.mxu0 %v1800_v32  ;;  %v1842_v57 = vcombine.high %v1824_v50, %v1828_v51  ;;  %v1831_v58 = vcombine.low %v1815_v43, %v1819_v44  ;;  %v1839_v59 = vcombine.low %v1823_v47, %v1827_v48  ;;  %v1826_v7 = vld [vmem:[%s2291_s25 + $0xd8] sm:$0xff]  ;;  %v335_v18 = vld [vmem:[%s2679_s2 + $0x8] sm:$0xff]  ;;  %v1851_v22 = vld [vmem:[%s2291_s25 + $0x100] sm:$0xff] }
  0x4d   : > { %600 = vmatprep.subr.bf16.mxu1 %v1802_v34  ;;  %v1833_v60 = vcombine.low %v1816_v46, %v1820_v49  ;;  %v752_v61 = vand.u32 %v1840_v55, %v2300_v12  ;;  %v1841_v62 = vcombine.low %v1824_v50, %v1828_v51  ;;  %v1830_v8 = vld [vmem:[%s2291_s25 + $0xf8] sm:$0x33]  ;;  %v1836_v11 = vcombine.high %v1817_v63, %v1821_v0  ;;  %v1855_v23 = vld [vmem:[%s2291_s25 + $0x120] sm:$0xff]  ;;  %v1852_v25 = vld [vmem:[%s2291_s25 + $0x108] sm:$0xff] }
  0x4e   : > { %1811 = vmatmul.mubr.msk.bf16.vlgmr.msra.gmra.mrb[0].mxu0 %vm439_vm2, %v2319_v36  ;;  %v758_v1 = vand.u32 %v1842_v57, %v2300_v12  ;;  %v749_v9 = vand.u32 %v1839_v59, %v2300_v12  ;;  %v1844_v13 = vcombine.high %v1825_v4, %v1829_v5  ;;  %v1838_v14 = vcombine.high %v1818_v3, %v1822_v6  ;;  %v1859_v26 = vld [vmem:[%s2291_s25 + $0x140] sm:$0xff]  ;;  %v1856_v28 = vld [vmem:[%s2291_s25 + $0x128] sm:$0xff]  ;;  %v1853_v43 = vld [vmem:[%s2291_s25 + $0x110] sm:$0xff] }
  0x4f   : > { %1812 = vmatmul.mubr.msk.bf16.vlgmr.msra.gmra.mrb[0].mxu1 %vm439_vm2, %v2319_v36  ;;  %558 = vmatpush1.bf16.msra.mxu0 %v1799_v38  ;;  %v755_v10 = vand.u32 %v1841_v62, %v2300_v12  ;;  %v1846_v15 = vcombine.high %v1826_v7, %v1830_v8  ;;  %v1835_v16 = vcombine.low %v1817_v63, %v1821_v0  ;;  %v1863_v27 = vld [vmem:[%s2291_s25 + $0x160] sm:$0x33]  ;;  %v1860_v29 = vld [vmem:[%s2291_s25 + $0x148] sm:$0xff]  ;;  %v1857_v44 = vld [vmem:[%s2291_s25 + $0x130] sm:$0xff] }
  0x50   : > { %601 = vmatpush1.bf16.msra.mxu1 %v1801_v40  ;;  %559 = vmatprep.subr.bf16.mxu0 %v463_v41  ;;  %v1843_v17 = vcombine.low %v1825_v4, %v1829_v5  ;;  %v1837_v19 = vcombine.low %v1818_v3, %v1822_v6  ;;  %v764_v20 = vand.u32 %v1844_v13, %v2300_v12  ;;  %v1864_v30 = vld [vmem:[%s2291_s25 + $0x168] sm:$0x33]  ;;  %v1854_v46 = vld [vmem:[%s2291_s25 + $0x118] sm:$0xff]  ;;  %v1861_v47 = vld [vmem:[%s2291_s25 + $0x150] sm:$0xff] }
  0x51   : > { %602 = vmatprep.subr.bf16.mxu1 %v469_v45  ;;  %589 = vmatprep.mubr.bf16.mxu0 %v2062_v2  ;;  %v1845_v21 = vcombine.low %v1826_v7, %v1830_v8  ;;  %v770_v24 = vand.u32 %v1846_v15, %v2300_v12  ;;  %v1868_v33 = vcombine.high %v1851_v22, %v1855_v23  ;;  %v1865_v48 = vld [vmem:[%s2291_s25 + $0x170] sm:$0x33]  ;;  %v1858_v49 = vld [vmem:[%s2291_s25 + $0x138] sm:$0xff]  ;;  %v1887_v63 = vld [vmem:[%s2291_s25 + $0x180] sm:$0xff] }
  0x52   : > { %632 = vmatprep.mubr.bf16.mxu1 %v2062_v2  ;;  %359 = vperm.xlu0 %2003, %v335_v18   ;;  %v761_v31 = vand.u32 %v1843_v17, %v2300_v12  ;;  %v1876_v34 = vcombine.high %v1859_v26, %v1863_v27  ;;  %v1870_v35 = vcombine.high %v1852_v25, %v1856_v28  ;;  %v1862_v50 = vld [vmem:[%s2291_s25 + $0x158] sm:$0xff]  ;;  %v1891_v0 = vld [vmem:[%s2291_s25 + $0x1a0] sm:$0xff]  ;;  %v1888_v3 = vld [vmem:[%s2291_s25 + $0x188] sm:$0xff] }
  0x53   : > { %560 = vmatpush1.bf16.msra.mxu0 %v460_v52  ;;  %v767_v32 = vand.u32 %v1845_v21, %v2300_v12  ;;  %v1878_v37 = vcombine.high %v1860_v29, %v1864_v30  ;;  %v1867_v38 = vcombine.low %v1851_v22, %v1855_v23  ;;  %v1875_v39 = vcombine.low %v1859_v26, %v1863_v27  ;;  %v1866_v51 = vld [vmem:[%s2291_s25 + $0x178] sm:$0x33]  ;;  %v1895_v4 = vld [vmem:[%s2291_s25 + $0x1c0] sm:$0xff]  ;;  %v1892_v6 = vld [vmem:[%s2291_s25 + $0x1a8] sm:$0xff] }
  0x54   : > { %603 = vmatpush1.bf16.msra.mxu1 %v466_v53  ;;  %772 = vmatprep.subr.bf16.mxu0 %v1832_v54  ;;  %v1869_v40 = vcombine.low %v1852_v25, %v1856_v28  ;;  %v1069_v41 = vand.u32 %v1876_v34, %v2300_v12  ;;  %v1877_v42 = vcombine.low %v1860_v29, %v1864_v30  ;;  %v1899_v5 = vld [vmem:[%s2291_s25 + $0x1e0] sm:$0x33]  ;;  %v1896_v7 = vld [vmem:[%s2291_s25 + $0x1c8] sm:$0xff]  ;;  %v1889_v21 = vld [vmem:[%s2291_s25 + $0x190] sm:$0xff] }
  0x55   : > { %815 = vmatprep.subr.bf16.mxu1 %v1834_v56  ;;  %v1075_v45 = vand.u32 %v1878_v37, %v2300_v12  ;;  %v1066_v52 = vand.u32 %v1875_v39, %v2300_v12  ;;  %v1872_v54 = vcombine.high %v1853_v43, %v1857_v44  ;;  %v1880_v55 = vcombine.high %v1861_v47, %v1865_v48  ;;  %v1900_v8 = vld [vmem:[%s2291_s25 + $0x1e8] sm:$0x33]  ;;  %v1893_v22 = vld [vmem:[%s2291_s25 + $0x1b0] sm:$0xff]  ;;  %v1894_v27 = vld [vmem:[%s2291_s25 + $0x1b8] sm:$0xff] }
  0x56   : > { %1813 = vmatmul.mubr.msk.bf16.vlgmr.msra.gmra.mrb[4].mxu0 %vm439_vm2, %v2319_v36  ;;  %v1072_v53 = vand.u32 %v1877_v42, %v2300_v12  ;;  %v1874_v56 = vcombine.high %v1854_v46, %v1858_v49  ;;  %v1882_v57 = vcombine.high %v1862_v50, %v1866_v51  ;;  %v1879_v59 = vcombine.low %v1861_v47, %v1865_v48  ;;  %v1897_v25 = vld [vmem:[%s2291_s25 + $0x1d0] sm:$0xff]  ;;  %v1898_v28 = vld [vmem:[%s2291_s25 + $0x1d8] sm:$0xff] }
  0x57   : > { %1814 = vmatmul.mubr.msk.bf16.vlgmr.msra.gmra.mrb[4].mxu1 %vm439_vm2, %v2319_v36  ;;  %773 = vmatpush1.bf16.msra.mxu0 %v1831_v58  ;;  %v1871_v58 = vcombine.low %v1853_v43, %v1857_v44  ;;  %v1881_v62 = vcombine.low %v1862_v50, %v1866_v51  ;;  %v1912_v13 = vcombine.high %v1895_v4, %v1899_v5  ;;  %v1901_v26 = vld [vmem:[%s2291_s25 + $0x1f0] sm:$0x33]  ;;  %v1902_v29 = vld [vmem:[%s2291_s25 + $0x1f8] sm:$0x33] }
  0x58   : > { %816 = vmatpush1.bf16.msra.mxu1 %v1833_v60  ;;  %774 = vmatprep.subr.bf16.mxu0 %v752_v61  ;;  %v1873_v60 = vcombine.low %v1854_v46, %v1858_v49  ;;  %v1081_v61 = vand.u32 %v1880_v55, %v2300_v12  ;;  %v1914_v15 = vcombine.high %v1896_v7, %v1900_v8 }
  0x59   : > { %817 = vmatprep.subr.bf16.mxu1 %v758_v1  ;;  %804 = vmatprep.mubr.bf16.mxu0 %v2062_v2  ;;  %v1087_v1 = vand.u32 %v1882_v57, %v2300_v12  ;;  %v1911_v17 = vcombine.low %v1895_v4, %v1899_v5  ;;  %v1905_v18 = vcombine.low %v1888_v3, %v1892_v6 }
  0x5a   : > { %847 = vmatprep.mubr.bf16.mxu1 %v2062_v2  ;;  %v1376_v23 = vand.u32 %v1914_v15, %v2300_v12  ;;  %v1907_v37 = vcombine.low %v1889_v21, %v1893_v22 }
  0x5b   : > { %775 = vmatpush1.bf16.msra.mxu0 %v749_v9  ;;  %v1078_v9 = vand.u32 %v1879_v59, %v2300_v12  ;;  %v1367_v30 = vand.u32 %v1911_v17, %v2300_v12 }
  0x5c   : > { %818 = vmatpush1.bf16.msra.mxu1 %v755_v10  ;;  %858 = vmatprep.subr.bf16.mxu0 %v1836_v11  ;;  %v1084_v10 = vand.u32 %v1881_v62, %v2300_v12  ;;  %v1904_v11 = vcombine.high %v1887_v63, %v1891_v0 }
  0x5d   : > { %901 = vmatprep.subr.bf16.mxu1 %v1838_v14  ;;  %v1906_v14 = vcombine.high %v1888_v3, %v1892_v6 }
  0x5e   : > { %1847 = vmatmul.mubr.msk.bf16.vlgmr.msra.gmra.mrb[8].mxu0 %vm439_vm2, %v2319_v36 }
  0x5f   : > { %1848 = vmatmul.mubr.msk.bf16.vlgmr.msra.gmra.mrb[8].mxu1 %vm439_vm2, %v2319_v36  ;;  %859 = vmatpush1.bf16.msra.mxu0 %v1835_v16  ;;  %v1903_v16 = vcombine.low %v1887_v63, %v1891_v0 }
  0x60   : > { %902 = vmatpush1.bf16.msra.mxu1 %v1837_v19  ;;  %860 = vmatprep.subr.bf16.mxu0 %v764_v20  ;;  %v1370_v19 = vand.u32 %v1912_v13, %v2300_v12  ;;  %v1913_v20 = vcombine.low %v1896_v7, %v1900_v8 }
  0x61   : > { %903 = vmatprep.subr.bf16.mxu1 %v770_v24  ;;  %890 = vmatprep.mubr.bf16.mxu0 %v2062_v2  ;;  %v1890_v24 = vld [vmem:[%s2291_s25 + $0x198] sm:$0xff] }
  0x62   : > { %933 = vmatprep.mubr.bf16.mxu1 %v2062_v2  ;;  %v1910_v34 = vcombine.high %v1890_v24, %v1894_v27  ;;  %v1909_v39 = vcombine.low %v1890_v24, %v1894_v27 }
  0x63   : > { %861 = vmatpush1.bf16.msra.mxu0 %v761_v31  ;;  %v1373_v31 = vand.u32 %v1913_v20, %v2300_v12 }
  0x64   : > { %904 = vmatpush1.bf16.msra.mxu1 %v767_v32  ;;  %1089 = vmatprep.subr.bf16.mxu0 %v1868_v33  ;;  %v1908_v32 = vcombine.high %v1889_v21, %v1893_v22  ;;  %v1916_v33 = vcombine.high %v1897_v25, %v1901_v26 }
  0x65   : > { %1132 = vmatprep.subr.bf16.mxu1 %v1870_v35  ;;  %v1918_v35 = vcombine.high %v1898_v28, %v1902_v29 }
  0x66   : > { %1849 = vmatmul.mubr.msk.bf16.vlgmr.msra.gmra.mrb[12].mxu0 %vm439_vm2, %v2319_v36 }
  0x67   : > { %1850 = vmatmul.mubr.msk.bf16.vlgmr.msra.gmra.mrb[12].mxu1 %vm439_vm2, %v2319_v36  ;;  %1090 = vmatpush1.bf16.msra.mxu0 %v1867_v38  ;;  %v1915_v38 = vcombine.low %v1897_v25, %v1901_v26  ;;  %v1388_v42 = vand.u32 %v1918_v35, %v2300_v12 }
  0x68   : > { %1133 = vmatpush1.bf16.msra.mxu1 %v1869_v40  ;;  %1091 = vmatprep.subr.bf16.mxu0 %v1069_v41  ;;  %v1382_v40 = vand.u32 %v1916_v33, %v2300_v12  ;;  %v1917_v41 = vcombine.low %v1898_v28, %v1902_v29 }
  0x69   : > { %1134 = vmatprep.subr.bf16.mxu1 %v1075_v45  ;;  %1121 = vmatprep.mubr.bf16.mxu0 %v2062_v2  ;;  %v1379_v43 = vand.u32 %v1915_v38, %v2300_v12 }
  0x6a   : > { %1164 = vmatprep.mubr.bf16.mxu1 %v2062_v2  ;;  %v1385_v44 = vand.u32 %v1917_v41, %v2300_v12 }
  0x6b   : > { %1092 = vmatpush1.bf16.msra.mxu0 %v1066_v52 }
  0x6c   : > { %1135 = vmatpush1.bf16.msra.mxu1 %v1072_v53  ;;  %1175 = vmatprep.subr.bf16.mxu0 %v1872_v54 }
  0x6d   : > { %1218 = vmatprep.subr.bf16.mxu1 %v1874_v56 }
  0x6e   : > { %1883 = vmatmul.mubr.msk.bf16.vlgmr.msra.gmra.mrb[16].mxu0 %vm439_vm2, %v2319_v36 }
  0x6f   : > { %1884 = vmatmul.mubr.msk.bf16.vlgmr.msra.gmra.mrb[16].mxu1 %vm439_vm2, %v2319_v36  ;;  %1176 = vmatpush1.bf16.msra.mxu0 %v1871_v58 }
  0x70   : > { %1219 = vmatpush1.bf16.msra.mxu1 %v1873_v60  ;;  %1177 = vmatprep.subr.bf16.mxu0 %v1081_v61 }
  0x71   : > { %1220 = vmatprep.subr.bf16.mxu1 %v1087_v1  ;;  %1207 = vmatprep.mubr.bf16.mxu0 %v2062_v2 }
  0x72   : > { %1250 = vmatprep.mubr.bf16.mxu1 %v2062_v2 }
  0x73   : > { %1178 = vmatpush1.bf16.msra.mxu0 %v1078_v9 }
  0x74   : > { %1221 = vmatpush1.bf16.msra.mxu1 %v1084_v10  ;;  %1390 = vmatprep.subr.bf16.mxu0 %v1904_v11 }
  0x75   : > { %1433 = vmatprep.subr.bf16.mxu1 %v1906_v14 }
  0x76   : > { %1885 = vmatmul.mubr.msk.bf16.vlgmr.msra.gmra.mrb[20].mxu0 %vm439_vm2, %v2319_v36 }
  0x77   : > { %1886 = vmatmul.mubr.msk.bf16.vlgmr.msra.gmra.mrb[20].mxu1 %vm439_vm2, %v2319_v36  ;;  %1391 = vmatpush1.bf16.msra.mxu0 %v1903_v16 }
  0x78   : > { %1434 = vmatpush1.bf16.msra.mxu1 %v1905_v18  ;;  %1392 = vmatprep.subr.bf16.mxu0 %v1370_v19 }
  0x79   : > { %1435 = vmatprep.subr.bf16.mxu1 %v1376_v23  ;;  %1422 = vmatprep.mubr.bf16.mxu0 %v2062_v2 }
  0x7a   : > { %1465 = vmatprep.mubr.bf16.mxu1 %v2062_v2 }
  0x7b   : > { %1393 = vmatpush1.bf16.msra.mxu0 %v1367_v30 }
  0x7c   : > { %1436 = vmatpush1.bf16.msra.mxu1 %v1373_v31  ;;  %1476 = vmatprep.subr.bf16.mxu0 %v1908_v32 }
  0x7d   : > { %1519 = vmatprep.subr.bf16.mxu1 %v1910_v34 }
  0x7e   : > { %1919 = vmatmul.mubr.msk.bf16.vlgmr.msra.gmra.mrb[24].mxu0 %vm439_vm2, %v2319_v36 }
  0x7f   : > { %1920 = vmatmul.mubr.msk.bf16.vlgmr.msra.gmra.mrb[24].mxu1 %vm439_vm2, %v2319_v36  ;;  %1477 = vmatpush1.bf16.msra.mxu0 %v1907_v37 }
  0x80   : > { %1520 = vmatpush1.bf16.msra.mxu1 %v1909_v39  ;;  %1478 = vmatprep.subr.bf16.mxu0 %v1382_v40 }
  0x81   : > { %1521 = vmatprep.subr.bf16.mxu1 %v1388_v42  ;;  %1508 = vmatprep.mubr.bf16.mxu0 %v2062_v2 }
  0x82   : > { %1551 = vmatprep.mubr.bf16.mxu1 %v2062_v2 }
  0x83   : > { %1479 = vmatpush1.bf16.msra.mxu0 %v1379_v43 }
  0x84   : > { %1522 = vmatpush1.bf16.msra.mxu1 %v1385_v44 }
  0x86   : > { %1921 = vmatmul.mubr.msk.bf16.vlgmr.msra.gmra.mrb[28].mxu0 %vm439_vm2, %v2319_v36 }
  0x87   : > { %1922 = vmatmul.mubr.msk.bf16.vlgmr.msra.gmra.mrb[28].mxu1 %vm439_vm2, %v2319_v36 }
  0xc1   : > { %v2446_v45 = vpop.permute.xlu0 %354 }
  0xd1   : > { %v2448_v53 = vpop.permute.xlu0 %359 }
 0x121   : > { %v505_v46 = vpop.f32.mrb[0].mxu0 }
 0x122   : > { %v548_v47 = vpop.f32.mrb[0].mxu1  ;;  %v507_v48 = vpop.f32.mrb[1].mxu0  ;;  %v506_v58 = vadd.f32 %v505_v46, %v2446_v45 }
 0x123   : > { %v550_v49 = vpop.f32.mrb[1].mxu1  ;;  %v509_v12 = vpop.f32.mrb[2].mxu0  ;;  %v549_v36 = vadd.f32 %v548_v47, %v2446_v45  ;;  %v508_v59 = vadd.f32 %v507_v48, %v2446_v45 }
 0x124   : > { %v552_v50 = vpop.f32.mrb[2].mxu1  ;;  %v511_v51 = vpop.f32.mrb[3].mxu0  ;;  %v551_v60 = vadd.f32 %v550_v49, %v2446_v45  ;;  %v510_v63 = vadd.f32 %v509_v12, %v2448_v53  ;;  %v643_v6 = vmax.f32 %v506_v58, 0.0 }
 0x125   : > { %v554_v52 = vpop.f32.mrb[3].mxu1  ;;  %v553_v0 = vadd.f32 %v552_v50, %v2448_v53  ;;  %v512_v1 = vadd.f32 %v511_v51, %v2448_v53  ;;  %v645_v7 = vmax.f32 %v549_v36, 0.0  ;;  %v644_v8 = vmax.f32 %v508_v59, 0.0 }
 0x126   : > { %v555_v3 = vadd.f32 %v554_v52, %v2448_v53  ;;  %v646_v9 = vmax.f32 %v551_v60, 0.0  ;;  %v651_v10 = vmax.f32 %v510_v63, 0.0 }
 0x127   : > { %v653_v11 = vmax.f32 %v553_v0, 0.0  ;;  %v652_v13 = vmax.f32 %v512_v1, 0.0 }
 0x128   : > { %v654_v14 = vmax.f32 %v555_v3, 0.0 }
 0x129   : > { %v591_v2 = vpop.f32.mrb[4].mxu0 }
 0x12a   : > { %v634_v54 = vpop.f32.mrb[4].mxu1  ;;  %v593_v55 = vpop.f32.mrb[5].mxu0  ;;  %v2459_v5 = vadd.f32 %v591_v2, %v2446_v45 }
 0x12b   : > { %v636_v56 = vpop.f32.mrb[5].mxu1  ;;  %v595_v57 = vpop.f32.mrb[6].mxu0  ;;  %v2463_v17 = vadd.f32 %v634_v54, %v2446_v45  ;;  %v2466_v18 = vadd.f32 %v593_v55, %v2446_v45 }
 0x12c   : > { %v638_v61 = vpop.f32.mrb[6].mxu1  ;;  %v597_v62 = vpop.f32.mrb[7].mxu0  ;;  %v647_v16 = vmax.f32 %v2459_v5, 0.0  ;;  %v2470_v22 = vadd.f32 %v636_v56, %v2446_v45  ;;  %v2473_v23 = vadd.f32 %v595_v57, %v2448_v53 }
 0x12d   : > { %v640_v4 = vpop.f32.mrb[7].mxu1  ;;  %v2478_v28 = vadd.f32 %v638_v61, %v2448_v53  ;;  %v598_v49 = vadd.f32 %v597_v62, %v2448_v53  ;;  %v649_v52 = vmax.f32 %v2463_v17, 0.0  ;;  %v648_v2 = vmax.f32 %v2466_v18, 0.0 }
 0x12e   : > { %v650_v57 = vmax.f32 %v2470_v22, 0.0  ;;  %v655_v58 = vmax.f32 %v2473_v23, 0.0  ;;  %v641_v63 = vadd.f32 %v640_v4, %v2448_v53 }
 0x12f   : > { %v657_v62 = vmax.f32 %v2478_v28, 0.0 }
 0x131   : > { %v806_v15 = vpop.f32.mrb[8].mxu0 }
 0x132   : > { %v807_v19 = vadd.f32 %v806_v15, %v2446_v45  ;;  %v849_v20 = vpop.f32.mrb[8].mxu1  ;;  %v808_v21 = vpop.f32.mrb[9].mxu0 }
 0x133   : > { %v850_v24 = vadd.f32 %v849_v20, %v2446_v45  ;;  %v809_v25 = vadd.f32 %v808_v21, %v2446_v45  ;;  %v851_v26 = vpop.f32.mrb[9].mxu1  ;;  %v810_v27 = vpop.f32.mrb[10].mxu0 }
 0x134   : > { %v944_v29 = vmax.f32 %v807_v19, 0.0  ;;  %v852_v30 = vadd.f32 %v851_v26, %v2446_v45  ;;  %v811_v31 = vadd.f32 %v810_v27, %v2448_v53  ;;  %v853_v32 = vpop.f32.mrb[10].mxu1  ;;  %v812_v33 = vpop.f32.mrb[11].mxu0  ;;  %v658_v27 = vmax.f32 %v641_v63, 0.0 }
 0x135   : > { %v946_v34 = vmax.f32 %v850_v24, 0.0  ;;  %v945_v35 = vmax.f32 %v809_v25, 0.0  ;;  %v854_v37 = vadd.f32 %v853_v32, %v2448_v53  ;;  %v813_v38 = vadd.f32 %v812_v33, %v2448_v53  ;;  %v855_v39 = vpop.f32.mrb[11].mxu1 }
 0x136   : > { %v2484_v40 = vmax.f32 %v643_v6, %v944_v29  ;;  %v947_v41 = vmax.f32 %v852_v30, 0.0  ;;  %v952_v42 = vmax.f32 %v811_v31, 0.0  ;;  %v856_v43 = vadd.f32 %v855_v39, %v2448_v53 }
 0x137   : > { %v2487_v44 = vmax.f32 %v645_v7, %v946_v34  ;;  %v2489_v46 = vmax.f32 %v644_v8, %v945_v35  ;;  %v954_v47 = vmax.f32 %v854_v37, 0.0  ;;  %v953_v48 = vmax.f32 %v813_v38, 0.0 }
 0x138   : > { %v2492_v12 = vmax.f32 %v646_v9, %v947_v41  ;;  %v2494_v50 = vmax.f32 %v651_v10, %v952_v42  ;;  %v955_v51 = vmax.f32 %v856_v43, 0.0  ;;  %v656_v7 = vmax.f32 %v598_v49, 0.0 }
 0x139   : > { %v2498_v54 = vmax.f32 %v653_v11, %v954_v47  ;;  %v2500_v55 = vmax.f32 %v652_v13, %v953_v48  ;;  %v892_v56 = vpop.f32.mrb[12].mxu0 }
 0x13a   : > { %v2504_v36 = vmax.f32 %v654_v14, %v955_v51  ;;  %v893_v59 = vadd.f32 %v892_v56, %v2446_v45  ;;  %v935_v60 = vpop.f32.mrb[12].mxu1  ;;  %v894_v61 = vpop.f32.mrb[13].mxu0 }
 0x13b   : > { %v936_v0 = vadd.f32 %v935_v60, %v2446_v45  ;;  %v895_v1 = vadd.f32 %v894_v61, %v2446_v45  ;;  %v937_v3 = vpop.f32.mrb[13].mxu1  ;;  %v896_v6 = vpop.f32.mrb[14].mxu0 }
 0x13c   : > { %v948_v8 = vmax.f32 %v893_v59, 0.0  ;;  %v938_v9 = vadd.f32 %v937_v3, %v2446_v45  ;;  %v897_v10 = vadd.f32 %v896_v6, %v2448_v53  ;;  %v939_v11 = vpop.f32.mrb[14].mxu1  ;;  %v898_v13 = vpop.f32.mrb[15].mxu0 }
 0x13d   : > { %v950_v14 = vmax.f32 %v936_v0, 0.0  ;;  %v949_v15 = vmax.f32 %v895_v1, 0.0  ;;  %v940_v17 = vadd.f32 %v939_v11, %v2448_v53  ;;  %v899_v4 = vadd.f32 %v898_v13, %v2448_v53  ;;  %v941_v18 = vpop.f32.mrb[15].mxu1 }
 0x13e   : > { %v2517_v19 = vmax.f32 %v647_v16, %v948_v8  ;;  %v951_v20 = vmax.f32 %v938_v9, 0.0  ;;  %v956_v21 = vmax.f32 %v897_v10, 0.0  ;;  %v942_v22 = vadd.f32 %v941_v18, %v2448_v53 }
 0x13f   : > { %v2520_v23 = vmax.f32 %v649_v52, %v950_v14  ;;  %v2522_v24 = vmax.f32 %v648_v2, %v949_v15  ;;  %v958_v25 = vmax.f32 %v940_v17, 0.0  ;;  %v957_v26 = vmax.f32 %v899_v4, 0.0 }
 0x140   : > { %v2524_v28 = vmax.f32 %v650_v57, %v951_v20  ;;  %v2526_v29 = vmax.f32 %v655_v58, %v956_v21  ;;  %v959_v30 = vmax.f32 %v942_v22, 0.0 }
 0x141   : > { %v2528_v31 = vmax.f32 %v657_v62, %v958_v25  ;;  %v2530_v5 = vmax.f32 %v656_v7, %v957_v26  ;;  %v1123_v16 = vpop.f32.mrb[16].mxu0 }
 0x142   : > { %v2532_v32 = vmax.f32 %v658_v27, %v959_v30  ;;  %v1166_v33 = vpop.f32.mrb[16].mxu1  ;;  %v1125_v34 = vpop.f32.mrb[17].mxu0  ;;  %v1124_v48 = vadd.f32 %v1123_v16, %v2446_v45 }
 0x143   : > { %v1168_v35 = vpop.f32.mrb[17].mxu1  ;;  %v1127_v37 = vpop.f32.mrb[18].mxu0  ;;  %v1167_v49 = vadd.f32 %v1166_v33, %v2446_v45  ;;  %v1126_v51 = vadd.f32 %v1125_v34, %v2446_v45 }
 0x144   : > { %v1170_v38 = vpop.f32.mrb[18].mxu1  ;;  %v1129_v39 = vpop.f32.mrb[19].mxu0  ;;  %v1169_v56 = vadd.f32 %v1168_v35, %v2446_v45  ;;  %v1128_v57 = vadd.f32 %v1127_v37, %v2448_v53  ;;  %v1261_v8 = vmax.f32 %v1124_v48, 0.0 }
 0x145   : > { %v1172_v41 = vpop.f32.mrb[19].mxu1  ;;  %v2540_v58 = vadd.f32 %v1170_v38, %v2448_v53  ;;  %v1130_v61 = vadd.f32 %v1129_v39, %v2448_v53  ;;  %v1263_v9 = vmax.f32 %v1167_v49, 0.0  ;;  %v1262_v10 = vmax.f32 %v1126_v51, 0.0 }
 0x146   : > { %v2544_v62 = vadd.f32 %v1172_v41, %v2448_v53  ;;  %v1264_v13 = vmax.f32 %v1169_v56, 0.0  ;;  %v1269_v14 = vmax.f32 %v1128_v57, 0.0 }
 0x147   : > { %v1271_v15 = vmax.f32 %v2540_v58, 0.0  ;;  %v1270_v4 = vmax.f32 %v1130_v61, 0.0 }
 0x148   : > { %v1272_v18 = vmax.f32 %v2544_v62, 0.0 }
 0x149   : > { %v1209_v42 = vpop.f32.mrb[20].mxu0 }
 0x14a   : > { %v1252_v43 = vpop.f32.mrb[20].mxu1  ;;  %v1211_v47 = vpop.f32.mrb[21].mxu0  ;;  %v2547_v63 = vadd.f32 %v1209_v42, %v2446_v45 }
 0x14b   : > { %v1254_v52 = vpop.f32.mrb[21].mxu1  ;;  %v1213_v2 = vpop.f32.mrb[22].mxu0  ;;  %v2550_v0 = vadd.f32 %v1252_v43, %v2446_v45  ;;  %v2553_v3 = vadd.f32 %v1211_v47, %v2446_v45 }
 0x14c   : > { %v1256_v59 = vpop.f32.mrb[22].mxu1  ;;  %v1215_v60 = vpop.f32.mrb[23].mxu0  ;;  %v2556_v6 = vadd.f32 %v1254_v52, %v2446_v45  ;;  %v2559_v7 = vadd.f32 %v1213_v2, %v2448_v53  ;;  %v1265_v20 = vmax.f32 %v2547_v63, 0.0 }
 0x14d   : > { %v1258_v1 = vpop.f32.mrb[23].mxu1  ;;  %v2562_v11 = vadd.f32 %v1256_v59, %v2448_v53  ;;  %v2566_v17 = vadd.f32 %v1215_v60, %v2448_v53  ;;  %v1267_v21 = vmax.f32 %v2550_v0, 0.0  ;;  %v1266_v25 = vmax.f32 %v2553_v3, 0.0 }
 0x14e   : > { %v1268_v26 = vmax.f32 %v2556_v6, 0.0  ;;  %v1273_v27 = vmax.f32 %v2559_v7, 0.0  ;;  %v2577_v35 = vadd.f32 %v1258_v1, %v2448_v53 }
 0x14f   : > { %v1275_v34 = vmax.f32 %v2562_v11, 0.0  ;;  %v1274_v42 = vmax.f32 %v2566_v17, 0.0 }
 0x151   : > { %v1424_v22 = vpop.f32.mrb[24].mxu0 }
 0x152   : > { %v1425_v30 = vadd.f32 %v1424_v22, %v2446_v45  ;;  %v1467_v16 = vpop.f32.mrb[24].mxu1  ;;  %v1426_v33 = vpop.f32.mrb[25].mxu0 }
 0x153   : > { %v1468_v37 = vadd.f32 %v1467_v16, %v2446_v45  ;;  %v1427_v38 = vadd.f32 %v1426_v33, %v2446_v45  ;;  %v1469_v39 = vpop.f32.mrb[25].mxu1  ;;  %v1428_v41 = vpop.f32.mrb[26].mxu0 }
 0x154   : > { %v1562_v43 = vmax.f32 %v1425_v30, 0.0  ;;  %v1470_v47 = vadd.f32 %v1469_v39, %v2446_v45  ;;  %v1429_v48 = vadd.f32 %v1428_v41, %v2448_v53  ;;  %v1471_v49 = vpop.f32.mrb[26].mxu1  ;;  %v1430_v51 = vpop.f32.mrb[27].mxu0 }
 0x155   : > { %v1564_v52 = vmax.f32 %v1468_v37, 0.0  ;;  %v1563_v2 = vmax.f32 %v1427_v38, 0.0  ;;  %v1472_v56 = vadd.f32 %v1471_v49, %v2448_v53  ;;  %v1431_v57 = vadd.f32 %v1430_v51, %v2448_v53  ;;  %v1473_v58 = vpop.f32.mrb[27].mxu1 }
 0x156   : > { %v1578_v59 = vmax.f32 %v1261_v8, %v1562_v43  ;;  %v1565_v60 = vmax.f32 %v1470_v47, 0.0  ;;  %v1570_v61 = vmax.f32 %v1429_v48, 0.0  ;;  %v1474_v62 = vadd.f32 %v1473_v58, %v2448_v53 }
 0x157   : > { %v1580_v1 = vmax.f32 %v1263_v9, %v1564_v52  ;;  %v1579_v22 = vmax.f32 %v1262_v10, %v1563_v2  ;;  %v1572_v30 = vmax.f32 %v1472_v56, 0.0  ;;  %v1571_v16 = vmax.f32 %v1431_v57, 0.0 }
 0x158   : > { %v1594_v33 = vmax.f32 %v2484_v40, %v1578_v59  ;;  %v1581_v37 = vmax.f32 %v1264_v13, %v1565_v60  ;;  %v1586_v38 = vmax.f32 %v1269_v14, %v1570_v61  ;;  %v1573_v39 = vmax.f32 %v1474_v62, 0.0 }
 0x159   : > { %v1596_v41 = vmax.f32 %v2487_v44, %v1580_v1  ;;  %v1595_v8 = vmax.f32 %v2489_v46, %v1579_v22  ;;  %v1588_v43 = vmax.f32 %v1271_v15, %v1572_v30  ;;  %v1587_v47 = vmax.f32 %v1270_v4, %v1571_v16  ;;  %v1510_v48 = vpop.f32.mrb[28].mxu0 }
 0x15a   : > { %v1597_v9 = vmax.f32 %v2492_v12, %v1581_v37  ;;  %v1602_v49 = vmax.f32 %v2494_v50, %v1586_v38  ;;  %v1589_v51 = vmax.f32 %v1272_v18, %v1573_v39  ;;  %v1511_v10 = vadd.f32 %v1510_v48, %v2446_v45  ;;  %v1553_v52 = vpop.f32.mrb[28].mxu1  ;;  %v1512_v40 = vpop.f32.mrb[29].mxu0 }
 0x15b   : > { %v1937_v13 = vpack.c.bf16 %v1595_v8, %v1594_v33  ;;  %v1604_v14 = vmax.f32 %v2498_v54, %v1588_v43  ;;  %v1603_v44 = vmax.f32 %v2500_v55, %v1587_v47  ;;  %v1554_v46 = vadd.f32 %v1553_v52, %v2446_v45  ;;  %v1555_v15 = vpop.f32.mrb[29].mxu1  ;;  %v1514_v4 = vpop.f32.mrb[30].mxu0 }
 0x15c   : > { %v1938_v2 = vpack.c.bf16 %v1597_v9, %v1596_v41  ;;  %v1605_v12 = vmax.f32 %v2504_v36, %v1589_v51  ;;  %v1566_v56 = vmax.f32 %v1511_v10, 0.0  ;;  %v1513_v50 = vadd.f32 %v1512_v40, %v2446_v45  ;;  %v1557_v18 = vpop.f32.mrb[30].mxu1  ;;  %v1516_v57 = vpop.f32.mrb[31].mxu0 }
 0x15d   : > { %1658 = vst [vmem:[%s2603_s12] sm:$0xff] %v1937_v13  ;;  %v1941_v54 = vpack.c.bf16 %v1603_v44, %v1602_v49  ;;  %v1568_v55 = vmax.f32 %v1554_v46, 0.0  ;;  %v1556_v58 = vadd.f32 %v1555_v15, %v2446_v45  ;;  %v1515_v59 = vadd.f32 %v1514_v4, %v2448_v53  ;;  %v1559_v60 = vpop.f32.mrb[31].mxu1 }
 0x15e   : > { %1659 = vst [vmem:[%s2603_s12 + $0x8] sm:$0xff] %v1938_v2  ;;  %v1942_v36 = vpack.c.bf16 %v1605_v12, %v1604_v14  ;;  %v1582_v61 = vmax.f32 %v1265_v20, %v1566_v56  ;;  %v1567_v62 = vmax.f32 %v1513_v50, 0.0  ;;  %v1558_v1 = vadd.f32 %v1557_v18, %v2448_v53 }
 0x15f   : > { %1662 = vst [vmem:[%s2603_s12 + $0x20] sm:$0xff] %v1941_v54  ;;  %v1584_v22 = vmax.f32 %v1267_v21, %v1568_v55  ;;  %v1569_v30 = vmax.f32 %v1556_v58, 0.0  ;;  %v1574_v16 = vmax.f32 %v1515_v59, 0.0  ;;  %v1517_v33 = vadd.f32 %v1516_v57, %v2448_v53 }
 0x160   : > { %1663 = vst [vmem:[%s2603_s12 + $0x28] sm:$0xff] %v1942_v36  ;;  %v1598_v45 = vmax.f32 %v2517_v19, %v1582_v61  ;;  %v1583_v37 = vmax.f32 %v1266_v25, %v1567_v62  ;;  %v1576_v38 = vmax.f32 %v1558_v1, 0.0  ;;  %v1560_v63 = vadd.f32 %v1559_v60, %v2448_v53 }
 0x161   : > { %v1600_v20 = vmax.f32 %v2520_v23, %v1584_v22  ;;  %v1585_v0 = vmax.f32 %v1268_v26, %v1569_v30  ;;  %v1590_v21 = vmax.f32 %v1273_v27, %v1574_v16  ;;  %v1575_v39 = vmax.f32 %v1517_v33, 0.0 }
 0x162   : > { %v1276_v41 = vmax.f32 %v2577_v35, 0.0  ;;  %v1599_v19 = vmax.f32 %v2522_v24, %v1583_v37  ;;  %v1592_v3 = vmax.f32 %v1275_v34, %v1576_v38  ;;  %v1577_v53 = vmax.f32 %v1560_v63, 0.0 }
 0x163   : > { %v1601_v23 = vmax.f32 %v2524_v28, %v1585_v0  ;;  %v1606_v6 = vmax.f32 %v2526_v29, %v1590_v21  ;;  %v1591_v7 = vmax.f32 %v1274_v42, %v1575_v39 }
 0x164   : > { %v1939_v25 = vpack.c.bf16 %v1599_v19, %v1598_v45  ;;  %v1608_v26 = vmax.f32 %v2528_v31, %v1592_v3  ;;  %v1593_v27 = vmax.f32 %v1276_v41, %v1577_v53  ;;  %1672 = sbr.rel (!%p2131_p6) target bundleno = 371 (0x173), region = 59  ;;  %v1690_v28 = vld [vmem:[%s2603_s12] sm:$0xff] (%p2131_p6) }
 0x165   : > { %v1940_v35 = vpack.c.bf16 %v1601_v23, %v1600_v20  ;;  %v1607_v24 = vmax.f32 %v2530_v5, %v1591_v7  ;;  %v1692_v29 = vld [vmem:[%s2603_s12 + $0x8] sm:$0xff] (%p2131_p6)  ;;  %1691 = vst [vmem:[%s1677_s10] sm:$0xff] (%p2131_p6), %v1690_v28 }
 0x166   : > { %1660 = vst [vmem:[%s2603_s12 + $0x10] sm:$0xff] %v1939_v25  ;;  %v1609_v11 = vmax.f32 %v2532_v32, %v1593_v27  ;;  %v1698_v32 = vld [vmem:[%s2603_s12 + $0x20] sm:$0xff] (%p2131_p6)  ;;  %1693 = vst [vmem:[%s1677_s10 + $0x8] sm:$0xff] (%p2131_p6), %v1692_v29 }
 0x167   : > { %1661 = vst [vmem:[%s2603_s12 + $0x18] sm:$0xff] %v1940_v35  ;;  %v1943_v34 = vpack.c.bf16 %v1607_v24, %v1606_v6  ;;  %v1700_v17 = vld [vmem:[%s2603_s12 + $0x28] sm:$0xff] (%p2131_p6)  ;;  %1699 = vst [vmem:[%s1677_s10 + $0x80] sm:$0xff] (%p2131_p6), %v1698_v32 }
 0x168   : > { %v1944_v8 = vpack.c.bf16 %v1609_v11, %v1608_v26  ;;  %1701 = vst [vmem:[%s1677_s10 + $0x88] sm:$0xff] (%p2131_p6), %v1700_v17 }
 0x169   : > { %1664 = vst [vmem:[%s2603_s12 + $0x30] sm:$0xff] %v1943_v34 }
 0x16a   : > { %1665 = vst [vmem:[%s2603_s12 + $0x38] sm:$0xff] %v1944_v8 }
 0x16d   : > { %v1694_v31 = vld [vmem:[%s2603_s12 + $0x10] sm:$0xff] }
 0x16e   : > { %v1696_v5 = vld [vmem:[%s2603_s12 + $0x18] sm:$0xff]  ;;  %1695 = vst [vmem:[%s1677_s10 + $0x10] sm:$0xff] %v1694_v31 }
 0x16f   : > { %1697 = vst [vmem:[%s1677_s10 + $0x18] sm:$0xff] %v1696_v5 }
 0x170   : > { %v1702_v42 = vld [vmem:[%s2603_s12 + $0x30] sm:$0xff] }
 0x171   : > { %v1704_v43 = vld [vmem:[%s2603_s12 + $0x38] sm:$0xff]  ;;  %1703 = vst [vmem:[%s1677_s10 + $0x90] sm:$0xff] %v1702_v42 }
 0x172   : > { %1705 = vst [vmem:[%s1677_s10 + $0x98] sm:$0xff] %v1704_v43 }
 0x173 PF: > { %s13_s18 = sadd.s32 1, %s2059_s18   ;;  %s2682_s12 = smov %s2039_s13 }
 0x174   : > { %p10_p12 = scmp.ge.s32.totalorder %s13_s18, 10   ;;  %s2683_s13 = smov %s2139_s27 }
 0x175   : > { %s2684_s14 = smov %s2051_s16  ;;  %s2685_s15 = smov %s2055_s17 }
 0x176   : > { %s2686_s16 = smov %s2689_s19  ;;  %s2687_s17 = smov %s2693_s20 }
 0x177   :  { %12 = sbr.rel (!%p10_p12) target bundleno = 4 (0x4), region = 116 }

// kernel: model128_forward.4
= control target key start
LH: loop header
LB: loop body
LE: loop exit
PB: predicated region body
PF: predicated region fallthrough
CT: control target
= control target key end

     0   :  { %s2784_s12 = smov 0   ;;  %s2786_s13 = smov 0   ;;  %s3607_s0 = inlined_call_operand.vmem [shape: bf16[2,4,144,1024], index: 0, kind: input, shape index: {}]   ;;  %s3608_s1 = inlined_call_operand.vmem [shape: bf16[32,144], index: 1, kind: input, shape index: {}]   ;;  %s3609_s2 = inlined_call_operand.vmem [shape: f32[32,1], index: 2, kind: input, shape index: {}]   ;;  %s3610_s3 = inlined_call_operand.vmem [shape: bf16[2,32,1024], index: 3, kind: output, shape index: {}]  }
   0x1   :  { %s2788_s14 = smov 0   ;;  %s2790_s15 = smov 0  }
   0x2   :  { %s2792_s16 = smov 0   ;;  %s2794_s17 = smov 0  }
   0x3   :  { %s2796_s18 = smov 0  }
   0x4 LB: > { %s22_s19 = sadd.s32 1, %s2753_s16  ;;  %s25_s20 = sadd.s32 1, %s2757_s17  ;;  %s2761_s18 = sphi %s2796_s18, %s13_s18   ;;  %s2757_s17 = sphi %s2794_s17, %s3618_s17   ;;  %s2753_s16 = sphi %s2792_s16, %s3617_s16   ;;  %s2749_s15 = sphi %s2790_s15, %s3616_s15   ;;  %s2745_s14 = sphi %s2788_s14, %s3615_s14   ;;  %s2741_s13 = sphi %s2786_s13, %s3614_s13   ;;  %s2737_s12 = sphi %s2784_s12, %s3613_s12  }
   0x5   : > { %p23_p0 = scmp.ge.s32.totalorder %s22_s19, 2  ;;  %s2121_s21 = sadd.s32 4294967295, %s2761_s18  }
   0x6   : > { %p41_p1 = scmp.ne.s32.totalorder %s2741_s13, %s2737_s12  ;;  %p42_p2 = scmp.eq.s32.totalorder %s2761_s18, 0 }
   0x7   : > { %s3620_s19 = smov (%p23_p0, %s22_s19), 0  ;;  %s3622_s20 = smov (!%p23_p0, %s25_s20), %s2757_s17 }
   0x8   : > { %p27_p3 = scmp.ge.s32.totalorder %s3622_s20, 2  ;;  %p115_p4 = scmp.eq.s32.totalorder %s2121_s21, 3 }
   0x9   : > { %s30_s22 = ssub.s32 %s2753_s16, %s3620_s19  ;;  %p43_p5 = por %p42_p2, %p41_p1 }
   0xa   : > { %s3624_s20 = smov (%p27_p3, %s3622_s20), 0  ;;  %p2832_p6 = por %p115_p4, %p41_p1 }
   0xb   : > { %s29_s24 = ssub.s32 %s2757_s17, %s3624_s20  ;;  %s34_s26 = sadd.s32 1, %s2741_s13 }
   0xc   : > { %s31_s25 = sor.u32 %s30_s22, %s29_s24  ;;  %p2124_p8 = scmp.ge.s32.totalorder %s2761_s18, 4 }
   0xd   : > { %p32_p7 = scmp.eq.s32.totalorder %s31_s25, 0 }
   0xe   : > { %143 = sbr.rel (%p2124_p8) target bundleno = 101 (0x65), region = 24 }
   0xf   : > { %s2840_s27 = scalar_select %p32_p7, %s2741_s13, %s34_s26  }
  0x15   : > { %146 = sbr.rel (!%p43_p5) target bundleno = 101 (0x65), region = 28  ;;  %s148_s28 = sand.u32 (%p43_p5), 1, %s2741_s13  }
  0x16   : > { %s2423_s29 = smul.u32 (%p43_p5), 1152, %s148_s28  ;;  %s2125_s30 = sshll.u32 (%p43_p5), %s2753_s16, 2 }
  0x17   : > { %s2424_s4 = smul.u32 (%p43_p5), 576, %s2757_s17 }
  0x18   : > { %s2854_s10 = scalar_lea.vmem (%p43_p5), [#allocation2], %s2423_s29 }
  0x19   : > { %s153_s5 = sadd.s32 (%p43_p5), %s2424_s4, %s2125_s30 }
  0x1a   : > { %s2126_s6 = sshll.u32 (%p43_p5), %s153_s5, 2 }
  0x1b   : > { %s2849_s9 = scalar_lea.vmem (%p43_p5), %s3607_s0, %s2126_s6 }
  0x1c   : > { %v168_v0 = vld [vmem:[%s2849_s9] sm:$0xff]  ;;  %v170_v1 = vld [vmem:[%s2849_s9 + $0x8] sm:$0xff] }
  0x1d   : > { %v172_v2 = vld [vmem:[%s2849_s9 + $0x20] sm:$0xff]  ;;  %169 = vst [vmem:[%s2854_s10] sm:$0xff] %v168_v0  ;;  %171 = vst [vmem:[%s2854_s10 + $0x8] sm:$0xff] %v170_v1  ;;  %v174_v3 = vld [vmem:[%s2849_s9 + $0x28] sm:$0xff] }
  0x1e   : > { %173 = vst [vmem:[%s2854_s10 + $0x10] sm:$0xff] %v172_v2  ;;  %v176_v4 = vld [vmem:[%s2849_s9 + $0x40] sm:$0xff]  ;;  %v178_v5 = vld [vmem:[%s2849_s9 + $0x48] sm:$0xff]  ;;  %175 = vst [vmem:[%s2854_s10 + $0x18] sm:$0xff] %v174_v3 }
  0x1f   : > { %177 = vst [vmem:[%s2854_s10 + $0x20] sm:$0xff] %v176_v4  ;;  %179 = vst [vmem:[%s2854_s10 + $0x28] sm:$0xff] %v178_v5  ;;  %v180_v6 = vld [vmem:[%s2849_s9 + $0x60] sm:$0xff]  ;;  %v182_v7 = vld [vmem:[%s2849_s9 + $0x68] sm:$0xff] }
  0x20   : > { %v184_v8 = vld [vmem:[%s2849_s9 + $0x80] sm:$0xff]  ;;  %181 = vst [vmem:[%s2854_s10 + $0x30] sm:$0xff] %v180_v6  ;;  %183 = vst [vmem:[%s2854_s10 + $0x38] sm:$0xff] %v182_v7  ;;  %v186_v9 = vld [vmem:[%s2849_s9 + $0x88] sm:$0xff] }
  0x21   : > { %185 = vst [vmem:[%s2854_s10 + $0x40] sm:$0xff] %v184_v8  ;;  %v188_v10 = vld [vmem:[%s2849_s9 + $0xa0] sm:$0xff]  ;;  %v190_v11 = vld [vmem:[%s2849_s9 + $0xa8] sm:$0xff]  ;;  %187 = vst [vmem:[%s2854_s10 + $0x48] sm:$0xff] %v186_v9 }
  0x22   : > { %189 = vst [vmem:[%s2854_s10 + $0x50] sm:$0xff] %v188_v10  ;;  %191 = vst [vmem:[%s2854_s10 + $0x58] sm:$0xff] %v190_v11  ;;  %v192_v12 = vld [vmem:[%s2849_s9 + $0xc0] sm:$0xff]  ;;  %v194_v13 = vld [vmem:[%s2849_s9 + $0xc8] sm:$0xff] }
  0x23   : > { %v196_v14 = vld [vmem:[%s2849_s9 + $0xe0] sm:$0xff]  ;;  %193 = vst [vmem:[%s2854_s10 + $0x60] sm:$0xff] %v192_v12  ;;  %195 = vst [vmem:[%s2854_s10 + $0x68] sm:$0xff] %v194_v13  ;;  %v198_v15 = vld [vmem:[%s2849_s9 + $0xe8] sm:$0xff] }
  0x24   : > { %197 = vst [vmem:[%s2854_s10 + $0x70] sm:$0xff] %v196_v14  ;;  %v200_v16 = vld [vmem:[%s2849_s9 + $0x100] sm:$0xff]  ;;  %v202_v17 = vld [vmem:[%s2849_s9 + $0x108] sm:$0xff]  ;;  %199 = vst [vmem:[%s2854_s10 + $0x78] sm:$0xff] %v198_v15 }
  0x25   : > { %201 = vst [vmem:[%s2854_s10 + $0x80] sm:$0xff] %v200_v16  ;;  %203 = vst [vmem:[%s2854_s10 + $0x88] sm:$0xff] %v202_v17  ;;  %v204_v18 = vld [vmem:[%s2849_s9 + $0x120] sm:$0xff]  ;;  %v206_v19 = vld [vmem:[%s2849_s9 + $0x128] sm:$0xff] }
  0x26   : > { %v208_v20 = vld [vmem:[%s2849_s9 + $0x140] sm:$0xff]  ;;  %205 = vst [vmem:[%s2854_s10 + $0x90] sm:$0xff] %v204_v18  ;;  %207 = vst [vmem:[%s2854_s10 + $0x98] sm:$0xff] %v206_v19  ;;  %v210_v21 = vld [vmem:[%s2849_s9 + $0x148] sm:$0xff] }
  0x27   : > { %209 = vst [vmem:[%s2854_s10 + $0xa0] sm:$0xff] %v208_v20  ;;  %v212_v22 = vld [vmem:[%s2849_s9 + $0x160] sm:$0xff]  ;;  %v214_v23 = vld [vmem:[%s2849_s9 + $0x168] sm:$0xff]  ;;  %211 = vst [vmem:[%s2854_s10 + $0xa8] sm:$0xff] %v210_v21 }
  0x28   : > { %213 = vst [vmem:[%s2854_s10 + $0xb0] sm:$0xff] %v212_v22  ;;  %215 = vst [vmem:[%s2854_s10 + $0xb8] sm:$0xff] %v214_v23  ;;  %v216_v24 = vld [vmem:[%s2849_s9 + $0x180] sm:$0xff]  ;;  %v218_v25 = vld [vmem:[%s2849_s9 + $0x188] sm:$0xff] }
  0x29   : > { %v220_v26 = vld [vmem:[%s2849_s9 + $0x1a0] sm:$0xff]  ;;  %217 = vst [vmem:[%s2854_s10 + $0xc0] sm:$0xff] %v216_v24  ;;  %219 = vst [vmem:[%s2854_s10 + $0xc8] sm:$0xff] %v218_v25  ;;  %v222_v27 = vld [vmem:[%s2849_s9 + $0x1a8] sm:$0xff] }
  0x2a   : > { %221 = vst [vmem:[%s2854_s10 + $0xd0] sm:$0xff] %v220_v26  ;;  %v224_v28 = vld [vmem:[%s2849_s9 + $0x1c0] sm:$0xff]  ;;  %v226_v29 = vld [vmem:[%s2849_s9 + $0x1c8] sm:$0xff]  ;;  %223 = vst [vmem:[%s2854_s10 + $0xd8] sm:$0xff] %v222_v27 }
  0x2b   : > { %225 = vst [vmem:[%s2854_s10 + $0xe0] sm:$0xff] %v224_v28  ;;  %227 = vst [vmem:[%s2854_s10 + $0xe8] sm:$0xff] %v226_v29  ;;  %v228_v30 = vld [vmem:[%s2849_s9 + $0x1e0] sm:$0xff]  ;;  %v230_v31 = vld [vmem:[%s2849_s9 + $0x1e8] sm:$0xff] }
  0x2c   : > { %v232_v32 = vld [vmem:[%s2849_s9 + $0x200] sm:$0xff]  ;;  %229 = vst [vmem:[%s2854_s10 + $0xf0] sm:$0xff] %v228_v30  ;;  %231 = vst [vmem:[%s2854_s10 + $0xf8] sm:$0xff] %v230_v31  ;;  %v234_v33 = vld [vmem:[%s2849_s9 + $0x208] sm:$0xff] }
  0x2d   : > { %233 = vst [vmem:[%s2854_s10 + $0x100] sm:$0xff] %v232_v32  ;;  %v236_v34 = vld [vmem:[%s2849_s9 + $0x220] sm:$0xff]  ;;  %v238_v35 = vld [vmem:[%s2849_s9 + $0x228] sm:$0xff]  ;;  %235 = vst [vmem:[%s2854_s10 + $0x108] sm:$0xff] %v234_v33 }
  0x2e   : > { %237 = vst [vmem:[%s2854_s10 + $0x110] sm:$0xff] %v236_v34  ;;  %239 = vst [vmem:[%s2854_s10 + $0x118] sm:$0xff] %v238_v35  ;;  %v240_v36 = vld [vmem:[%s2849_s9 + $0x240] sm:$0xff]  ;;  %v242_v37 = vld [vmem:[%s2849_s9 + $0x248] sm:$0xff] }
  0x2f   : > { %v244_v38 = vld [vmem:[%s2849_s9 + $0x260] sm:$0xff]  ;;  %241 = vst [vmem:[%s2854_s10 + $0x120] sm:$0xff] %v240_v36  ;;  %243 = vst [vmem:[%s2854_s10 + $0x128] sm:$0xff] %v242_v37  ;;  %v246_v39 = vld [vmem:[%s2849_s9 + $0x268] sm:$0xff] }
  0x30   : > { %245 = vst [vmem:[%s2854_s10 + $0x130] sm:$0xff] %v244_v38  ;;  %v248_v40 = vld [vmem:[%s2849_s9 + $0x280] sm:$0xff]  ;;  %v250_v41 = vld [vmem:[%s2849_s9 + $0x288] sm:$0xff]  ;;  %247 = vst [vmem:[%s2854_s10 + $0x138] sm:$0xff] %v246_v39 }
  0x31   : > { %249 = vst [vmem:[%s2854_s10 + $0x140] sm:$0xff] %v248_v40  ;;  %251 = vst [vmem:[%s2854_s10 + $0x148] sm:$0xff] %v250_v41  ;;  %v252_v42 = vld [vmem:[%s2849_s9 + $0x2a0] sm:$0xff]  ;;  %v254_v43 = vld [vmem:[%s2849_s9 + $0x2a8] sm:$0xff] }
  0x32   : > { %v256_v44 = vld [vmem:[%s2849_s9 + $0x2c0] sm:$0xff]  ;;  %253 = vst [vmem:[%s2854_s10 + $0x150] sm:$0xff] %v252_v42  ;;  %255 = vst [vmem:[%s2854_s10 + $0x158] sm:$0xff] %v254_v43  ;;  %v258_v45 = vld [vmem:[%s2849_s9 + $0x2c8] sm:$0xff] }
  0x33   : > { %257 = vst [vmem:[%s2854_s10 + $0x160] sm:$0xff] %v256_v44  ;;  %v260_v46 = vld [vmem:[%s2849_s9 + $0x2e0] sm:$0xff]  ;;  %v262_v47 = vld [vmem:[%s2849_s9 + $0x2e8] sm:$0xff]  ;;  %259 = vst [vmem:[%s2854_s10 + $0x168] sm:$0xff] %v258_v45 }
  0x34   : > { %261 = vst [vmem:[%s2854_s10 + $0x170] sm:$0xff] %v260_v46  ;;  %263 = vst [vmem:[%s2854_s10 + $0x178] sm:$0xff] %v262_v47  ;;  %v264_v48 = vld [vmem:[%s2849_s9 + $0x300] sm:$0xff]  ;;  %v266_v49 = vld [vmem:[%s2849_s9 + $0x308] sm:$0xff] }
  0x35   : > { %v268_v50 = vld [vmem:[%s2849_s9 + $0x320] sm:$0xff]  ;;  %265 = vst [vmem:[%s2854_s10 + $0x180] sm:$0xff] %v264_v48  ;;  %267 = vst [vmem:[%s2854_s10 + $0x188] sm:$0xff] %v266_v49  ;;  %v270_v51 = vld [vmem:[%s2849_s9 + $0x328] sm:$0xff] }
  0x36   : > { %269 = vst [vmem:[%s2854_s10 + $0x190] sm:$0xff] %v268_v50  ;;  %v272_v52 = vld [vmem:[%s2849_s9 + $0x340] sm:$0xff]  ;;  %v274_v53 = vld [vmem:[%s2849_s9 + $0x348] sm:$0xff]  ;;  %271 = vst [vmem:[%s2854_s10 + $0x198] sm:$0xff] %v270_v51 }
  0x37   : > { %273 = vst [vmem:[%s2854_s10 + $0x1a0] sm:$0xff] %v272_v52  ;;  %275 = vst [vmem:[%s2854_s10 + $0x1a8] sm:$0xff] %v274_v53  ;;  %v276_v54 = vld [vmem:[%s2849_s9 + $0x360] sm:$0xff]  ;;  %v278_v55 = vld [vmem:[%s2849_s9 + $0x368] sm:$0xff] }
  0x38   : > { %v280_v56 = vld [vmem:[%s2849_s9 + $0x380] sm:$0xff]  ;;  %277 = vst [vmem:[%s2854_s10 + $0x1b0] sm:$0xff] %v276_v54  ;;  %279 = vst [vmem:[%s2854_s10 + $0x1b8] sm:$0xff] %v278_v55  ;;  %v282_v57 = vld [vmem:[%s2849_s9 + $0x388] sm:$0xff] }
  0x39   : > { %281 = vst [vmem:[%s2854_s10 + $0x1c0] sm:$0xff] %v280_v56  ;;  %v284_v58 = vld [vmem:[%s2849_s9 + $0x3a0] sm:$0xff]  ;;  %v286_v59 = vld [vmem:[%s2849_s9 + $0x3a8] sm:$0xff]  ;;  %283 = vst [vmem:[%s2854_s10 + $0x1c8] sm:$0xff] %v282_v57 }
  0x3a   : > { %285 = vst [vmem:[%s2854_s10 + $0x1d0] sm:$0xff] %v284_v58  ;;  %287 = vst [vmem:[%s2854_s10 + $0x1d8] sm:$0xff] %v286_v59  ;;  %v288_v60 = vld [vmem:[%s2849_s9 + $0x3c0] sm:$0xff]  ;;  %v290_v61 = vld [vmem:[%s2849_s9 + $0x3c8] sm:$0xff] }
  0x3b   : > { %v292_v62 = vld [vmem:[%s2849_s9 + $0x3e0] sm:$0xff]  ;;  %289 = vst [vmem:[%s2854_s10 + $0x1e0] sm:$0xff] %v288_v60  ;;  %291 = vst [vmem:[%s2854_s10 + $0x1e8] sm:$0xff] %v290_v61  ;;  %v294_v63 = vld [vmem:[%s2849_s9 + $0x3e8] sm:$0xff] }
  0x3c   : > { %293 = vst [vmem:[%s2854_s10 + $0x1f0] sm:$0xff] %v292_v62  ;;  %v296_v0 = vld [vmem:[%s2849_s9 + $0x400] sm:$0xff]  ;;  %v298_v1 = vld [vmem:[%s2849_s9 + $0x408] sm:$0xff]  ;;  %295 = vst [vmem:[%s2854_s10 + $0x1f8] sm:$0xff] %v294_v63 }
  0x3d   : > { %297 = vst [vmem:[%s2854_s10 + $0x200] sm:$0xff] %v296_v0  ;;  %299 = vst [vmem:[%s2854_s10 + $0x208] sm:$0xff] %v298_v1  ;;  %v300_v2 = vld [vmem:[%s2849_s9 + $0x420] sm:$0xff]  ;;  %v302_v3 = vld [vmem:[%s2849_s9 + $0x428] sm:$0xff] }
  0x3e   : > { %v304_v4 = vld [vmem:[%s2849_s9 + $0x440] sm:$0xff]  ;;  %301 = vst [vmem:[%s2854_s10 + $0x210] sm:$0xff] %v300_v2  ;;  %303 = vst [vmem:[%s2854_s10 + $0x218] sm:$0xff] %v302_v3  ;;  %v306_v5 = vld [vmem:[%s2849_s9 + $0x448] sm:$0xff] }
  0x3f   : > { %305 = vst [vmem:[%s2854_s10 + $0x220] sm:$0xff] %v304_v4  ;;  %v308_v6 = vld [vmem:[%s2849_s9 + $0x460] sm:$0xff]  ;;  %v310_v7 = vld [vmem:[%s2849_s9 + $0x468] sm:$0xff]  ;;  %307 = vst [vmem:[%s2854_s10 + $0x228] sm:$0xff] %v306_v5 }
  0x40   : > { %309 = vst [vmem:[%s2854_s10 + $0x230] sm:$0xff] %v308_v6  ;;  %311 = vst [vmem:[%s2854_s10 + $0x238] sm:$0xff] %v310_v7  ;;  %v312_v8 = vld [vmem:[%s2849_s9 + $0x480] sm:$0xff]  ;;  %v314_v9 = vld [vmem:[%s2849_s9 + $0x488] sm:$0xff] }
  0x41   : > { %v316_v10 = vld [vmem:[%s2849_s9 + $0x4a0] sm:$0xff]  ;;  %313 = vst [vmem:[%s2854_s10 + $0x240] sm:$0xff] %v312_v8  ;;  %315 = vst [vmem:[%s2854_s10 + $0x248] sm:$0xff] %v314_v9  ;;  %v318_v11 = vld [vmem:[%s2849_s9 + $0x4a8] sm:$0xff] }
  0x42   : > { %317 = vst [vmem:[%s2854_s10 + $0x250] sm:$0xff] %v316_v10  ;;  %v320_v12 = vld [vmem:[%s2849_s9 + $0x4c0] sm:$0xff]  ;;  %v322_v13 = vld [vmem:[%s2849_s9 + $0x4c8] sm:$0xff]  ;;  %319 = vst [vmem:[%s2854_s10 + $0x258] sm:$0xff] %v318_v11 }
  0x43   : > { %321 = vst [vmem:[%s2854_s10 + $0x260] sm:$0xff] %v320_v12  ;;  %323 = vst [vmem:[%s2854_s10 + $0x268] sm:$0xff] %v322_v13  ;;  %v324_v14 = vld [vmem:[%s2849_s9 + $0x4e0] sm:$0xff]  ;;  %v326_v15 = vld [vmem:[%s2849_s9 + $0x4e8] sm:$0xff] }
  0x44   : > { %v328_v16 = vld [vmem:[%s2849_s9 + $0x500] sm:$0xff]  ;;  %325 = vst [vmem:[%s2854_s10 + $0x270] sm:$0xff] %v324_v14  ;;  %327 = vst [vmem:[%s2854_s10 + $0x278] sm:$0xff] %v326_v15  ;;  %v330_v17 = vld [vmem:[%s2849_s9 + $0x508] sm:$0xff] }
  0x45   : > { %329 = vst [vmem:[%s2854_s10 + $0x280] sm:$0xff] %v328_v16  ;;  %v332_v18 = vld [vmem:[%s2849_s9 + $0x520] sm:$0xff]  ;;  %v334_v19 = vld [vmem:[%s2849_s9 + $0x528] sm:$0xff]  ;;  %331 = vst [vmem:[%s2854_s10 + $0x288] sm:$0xff] %v330_v17 }
  0x46   : > { %333 = vst [vmem:[%s2854_s10 + $0x290] sm:$0xff] %v332_v18  ;;  %335 = vst [vmem:[%s2854_s10 + $0x298] sm:$0xff] %v334_v19  ;;  %v336_v20 = vld [vmem:[%s2849_s9 + $0x540] sm:$0xff]  ;;  %v338_v21 = vld [vmem:[%s2849_s9 + $0x548] sm:$0xff] }
  0x47   : > { %v340_v22 = vld [vmem:[%s2849_s9 + $0x560] sm:$0xff]  ;;  %337 = vst [vmem:[%s2854_s10 + $0x2a0] sm:$0xff] %v336_v20  ;;  %339 = vst [vmem:[%s2854_s10 + $0x2a8] sm:$0xff] %v338_v21  ;;  %v342_v23 = vld [vmem:[%s2849_s9 + $0x568] sm:$0xff] }
  0x48   : > { %341 = vst [vmem:[%s2854_s10 + $0x2b0] sm:$0xff] %v340_v22  ;;  %v344_v24 = vld [vmem:[%s2849_s9 + $0x580] sm:$0xff]  ;;  %v346_v25 = vld [vmem:[%s2849_s9 + $0x588] sm:$0xff]  ;;  %343 = vst [vmem:[%s2854_s10 + $0x2b8] sm:$0xff] %v342_v23 }
  0x49   : > { %345 = vst [vmem:[%s2854_s10 + $0x2c0] sm:$0xff] %v344_v24  ;;  %347 = vst [vmem:[%s2854_s10 + $0x2c8] sm:$0xff] %v346_v25  ;;  %v348_v26 = vld [vmem:[%s2849_s9 + $0x5a0] sm:$0xff]  ;;  %v350_v27 = vld [vmem:[%s2849_s9 + $0x5a8] sm:$0xff] }
  0x4a   : > { %v352_v28 = vld [vmem:[%s2849_s9 + $0x5c0] sm:$0xff]  ;;  %349 = vst [vmem:[%s2854_s10 + $0x2d0] sm:$0xff] %v348_v26  ;;  %351 = vst [vmem:[%s2854_s10 + $0x2d8] sm:$0xff] %v350_v27  ;;  %v354_v29 = vld [vmem:[%s2849_s9 + $0x5c8] sm:$0xff] }
  0x4b   : > { %353 = vst [vmem:[%s2854_s10 + $0x2e0] sm:$0xff] %v352_v28  ;;  %v356_v30 = vld [vmem:[%s2849_s9 + $0x5e0] sm:$0xff]  ;;  %v358_v31 = vld [vmem:[%s2849_s9 + $0x5e8] sm:$0xff]  ;;  %355 = vst [vmem:[%s2854_s10 + $0x2e8] sm:$0xff] %v354_v29 }
  0x4c   : > { %357 = vst [vmem:[%s2854_s10 + $0x2f0] sm:$0xff] %v356_v30  ;;  %359 = vst [vmem:[%s2854_s10 + $0x2f8] sm:$0xff] %v358_v31  ;;  %v360_v32 = vld [vmem:[%s2849_s9 + $0x600] sm:$0xff]  ;;  %v362_v33 = vld [vmem:[%s2849_s9 + $0x608] sm:$0xff] }
  0x4d   : > { %v364_v34 = vld [vmem:[%s2849_s9 + $0x620] sm:$0xff]  ;;  %361 = vst [vmem:[%s2854_s10 + $0x300] sm:$0xff] %v360_v32  ;;  %363 = vst [vmem:[%s2854_s10 + $0x308] sm:$0xff] %v362_v33  ;;  %v366_v35 = vld [vmem:[%s2849_s9 + $0x628] sm:$0xff] }
  0x4e   : > { %365 = vst [vmem:[%s2854_s10 + $0x310] sm:$0xff] %v364_v34  ;;  %v368_v36 = vld [vmem:[%s2849_s9 + $0x640] sm:$0xff]  ;;  %v370_v37 = vld [vmem:[%s2849_s9 + $0x648] sm:$0xff]  ;;  %367 = vst [vmem:[%s2854_s10 + $0x318] sm:$0xff] %v366_v35 }
  0x4f   : > { %369 = vst [vmem:[%s2854_s10 + $0x320] sm:$0xff] %v368_v36  ;;  %371 = vst [vmem:[%s2854_s10 + $0x328] sm:$0xff] %v370_v37  ;;  %v372_v38 = vld [vmem:[%s2849_s9 + $0x660] sm:$0xff]  ;;  %v374_v39 = vld [vmem:[%s2849_s9 + $0x668] sm:$0xff] }
  0x50   : > { %v376_v40 = vld [vmem:[%s2849_s9 + $0x680] sm:$0xff]  ;;  %373 = vst [vmem:[%s2854_s10 + $0x330] sm:$0xff] %v372_v38  ;;  %375 = vst [vmem:[%s2854_s10 + $0x338] sm:$0xff] %v374_v39  ;;  %v378_v41 = vld [vmem:[%s2849_s9 + $0x688] sm:$0xff] }
  0x51   : > { %377 = vst [vmem:[%s2854_s10 + $0x340] sm:$0xff] %v376_v40  ;;  %v380_v42 = vld [vmem:[%s2849_s9 + $0x6a0] sm:$0xff]  ;;  %v382_v43 = vld [vmem:[%s2849_s9 + $0x6a8] sm:$0xff]  ;;  %379 = vst [vmem:[%s2854_s10 + $0x348] sm:$0xff] %v378_v41 }
  0x52   : > { %381 = vst [vmem:[%s2854_s10 + $0x350] sm:$0xff] %v380_v42  ;;  %383 = vst [vmem:[%s2854_s10 + $0x358] sm:$0xff] %v382_v43  ;;  %v384_v44 = vld [vmem:[%s2849_s9 + $0x6c0] sm:$0xff]  ;;  %v386_v45 = vld [vmem:[%s2849_s9 + $0x6c8] sm:$0xff] }
  0x53   : > { %v388_v46 = vld [vmem:[%s2849_s9 + $0x6e0] sm:$0xff]  ;;  %385 = vst [vmem:[%s2854_s10 + $0x360] sm:$0xff] %v384_v44  ;;  %387 = vst [vmem:[%s2854_s10 + $0x368] sm:$0xff] %v386_v45  ;;  %v390_v47 = vld [vmem:[%s2849_s9 + $0x6e8] sm:$0xff] }
  0x54   : > { %389 = vst [vmem:[%s2854_s10 + $0x370] sm:$0xff] %v388_v46  ;;  %v392_v48 = vld [vmem:[%s2849_s9 + $0x700] sm:$0xff]  ;;  %v394_v49 = vld [vmem:[%s2849_s9 + $0x708] sm:$0xff]  ;;  %391 = vst [vmem:[%s2854_s10 + $0x378] sm:$0xff] %v390_v47 }
  0x55   : > { %393 = vst [vmem:[%s2854_s10 + $0x380] sm:$0xff] %v392_v48  ;;  %395 = vst [vmem:[%s2854_s10 + $0x388] sm:$0xff] %v394_v49  ;;  %v396_v50 = vld [vmem:[%s2849_s9 + $0x720] sm:$0xff]  ;;  %v398_v51 = vld [vmem:[%s2849_s9 + $0x728] sm:$0xff] }
  0x56   : > { %v400_v52 = vld [vmem:[%s2849_s9 + $0x740] sm:$0xff]  ;;  %397 = vst [vmem:[%s2854_s10 + $0x390] sm:$0xff] %v396_v50  ;;  %399 = vst [vmem:[%s2854_s10 + $0x398] sm:$0xff] %v398_v51  ;;  %v402_v53 = vld [vmem:[%s2849_s9 + $0x748] sm:$0xff] }
  0x57   : > { %401 = vst [vmem:[%s2854_s10 + $0x3a0] sm:$0xff] %v400_v52  ;;  %v404_v54 = vld [vmem:[%s2849_s9 + $0x760] sm:$0xff]  ;;  %v406_v55 = vld [vmem:[%s2849_s9 + $0x768] sm:$0xff]  ;;  %403 = vst [vmem:[%s2854_s10 + $0x3a8] sm:$0xff] %v402_v53 }
  0x58   : > { %405 = vst [vmem:[%s2854_s10 + $0x3b0] sm:$0xff] %v404_v54  ;;  %407 = vst [vmem:[%s2854_s10 + $0x3b8] sm:$0xff] %v406_v55  ;;  %v408_v56 = vld [vmem:[%s2849_s9 + $0x780] sm:$0xff]  ;;  %v410_v57 = vld [vmem:[%s2849_s9 + $0x788] sm:$0xff] }
  0x59   : > { %v412_v58 = vld [vmem:[%s2849_s9 + $0x7a0] sm:$0xff]  ;;  %409 = vst [vmem:[%s2854_s10 + $0x3c0] sm:$0xff] %v408_v56  ;;  %411 = vst [vmem:[%s2854_s10 + $0x3c8] sm:$0xff] %v410_v57  ;;  %v414_v59 = vld [vmem:[%s2849_s9 + $0x7a8] sm:$0xff] }
  0x5a   : > { %413 = vst [vmem:[%s2854_s10 + $0x3d0] sm:$0xff] %v412_v58  ;;  %v416_v60 = vld [vmem:[%s2849_s9 + $0x7c0] sm:$0xff]  ;;  %v418_v61 = vld [vmem:[%s2849_s9 + $0x7c8] sm:$0xff]  ;;  %415 = vst [vmem:[%s2854_s10 + $0x3d8] sm:$0xff] %v414_v59 }
  0x5b   : > { %417 = vst [vmem:[%s2854_s10 + $0x3e0] sm:$0xff] %v416_v60  ;;  %419 = vst [vmem:[%s2854_s10 + $0x3e8] sm:$0xff] %v418_v61  ;;  %v420_v62 = vld [vmem:[%s2849_s9 + $0x7e0] sm:$0xff]  ;;  %v422_v63 = vld [vmem:[%s2849_s9 + $0x7e8] sm:$0xff] }
  0x5c   : > { %v424_v0 = vld [vmem:[%s2849_s9 + $0x800] sm:$0xff]  ;;  %421 = vst [vmem:[%s2854_s10 + $0x3f0] sm:$0xff] %v420_v62  ;;  %423 = vst [vmem:[%s2854_s10 + $0x3f8] sm:$0xff] %v422_v63  ;;  %v426_v1 = vld [vmem:[%s2849_s9 + $0x808] sm:$0xff] }
  0x5d   : > { %425 = vst [vmem:[%s2854_s10 + $0x400] sm:$0xff] %v424_v0  ;;  %v428_v2 = vld [vmem:[%s2849_s9 + $0x820] sm:$0xff]  ;;  %v430_v3 = vld [vmem:[%s2849_s9 + $0x828] sm:$0xff]  ;;  %427 = vst [vmem:[%s2854_s10 + $0x408] sm:$0xff] %v426_v1 }
  0x5e   : > { %429 = vst [vmem:[%s2854_s10 + $0x410] sm:$0xff] %v428_v2  ;;  %431 = vst [vmem:[%s2854_s10 + $0x418] sm:$0xff] %v430_v3  ;;  %v432_v4 = vld [vmem:[%s2849_s9 + $0x840] sm:$0xff]  ;;  %v434_v5 = vld [vmem:[%s2849_s9 + $0x848] sm:$0xff] }
  0x5f   : > { %v436_v6 = vld [vmem:[%s2849_s9 + $0x860] sm:$0xff]  ;;  %433 = vst [vmem:[%s2854_s10 + $0x420] sm:$0xff] %v432_v4  ;;  %435 = vst [vmem:[%s2854_s10 + $0x428] sm:$0xff] %v434_v5  ;;  %v438_v7 = vld [vmem:[%s2849_s9 + $0x868] sm:$0xff] }
  0x60   : > { %437 = vst [vmem:[%s2854_s10 + $0x430] sm:$0xff] %v436_v6  ;;  %v440_v8 = vld [vmem:[%s2849_s9 + $0x880] sm:$0xff]  ;;  %v442_v9 = vld [vmem:[%s2849_s9 + $0x888] sm:$0xff]  ;;  %439 = vst [vmem:[%s2854_s10 + $0x438] sm:$0xff] %v438_v7 }
  0x61   : > { %441 = vst [vmem:[%s2854_s10 + $0x440] sm:$0xff] %v440_v8  ;;  %443 = vst [vmem:[%s2854_s10 + $0x448] sm:$0xff] %v442_v9  ;;  %v444_v10 = vld [vmem:[%s2849_s9 + $0x8a0] sm:$0xff]  ;;  %v446_v11 = vld [vmem:[%s2849_s9 + $0x8a8] sm:$0xff] }
  0x62   : > { %v448_v12 = vld [vmem:[%s2849_s9 + $0x8c0] sm:$0xff]  ;;  %445 = vst [vmem:[%s2854_s10 + $0x450] sm:$0xff] %v444_v10  ;;  %447 = vst [vmem:[%s2854_s10 + $0x458] sm:$0xff] %v446_v11  ;;  %v450_v13 = vld [vmem:[%s2849_s9 + $0x8c8] sm:$0xff] }
  0x63   : > { %449 = vst [vmem:[%s2854_s10 + $0x460] sm:$0xff] %v448_v12  ;;  %v452_v14 = vld [vmem:[%s2849_s9 + $0x8e0] sm:$0xff]  ;;  %v454_v15 = vld [vmem:[%s2849_s9 + $0x8e8] sm:$0xff]  ;;  %451 = vst [vmem:[%s2854_s10 + $0x468] sm:$0xff] %v450_v13 }
  0x64   : > { %453 = vst [vmem:[%s2854_s10 + $0x470] sm:$0xff] %v452_v14  ;;  %455 = vst [vmem:[%s2854_s10 + $0x478] sm:$0xff] %v454_v15 }
  0x65 PF: > { %p2127_p9 = scmp.ge.s32.totalorder %s2761_s18, 1  ;;  %p460_p10 = scmp.lt.s32.totalorder %s2761_s18, 5 }
  0x67   : > { %p461_p11 = pnand %p2127_p9, %p460_p10 }
  0x68   : > { %s467_s11 = sand.u32 (!%p461_p11), 1, %s2737_s12   ;;  %v3147_v16 = vld [vmem:[%s3608_s1 + $0x4] ss:$8 sps:$4 sm:$0xff] (!%p461_p11)   ;;  %vm754_vm0 = vcmask (!%p461_p11), 130048   ;;  %v2763_v18 = vmov (!%p461_p11), 0  }
  0x69   : > { %464 = sbr.rel (%p461_p11) target bundleno = 499 (0x1f3), region = 51  ;;  %2169 = vmatprep.mubr.msk.bf16.mxu0 (!%p461_p11), %vm754_vm0, %v3147_v16  ;;  %2171 = vmatprep.mubr.msk.bf16.mxu1 (!%p461_p11), %vm754_vm0, %v3147_v16  ;;  %v496_v17 = vld [vmem:[%s3609_s2] sm:$0xff] (!%p461_p11)  ;;  %v497_v20 = vld [vmem:[%s3609_s2 + $0x8] sm:$0xff] (!%p461_p11)  ;;  %v3213_v63 = vld [vmem:[%s3608_s1 + $0x14] ss:$8 sps:$4 sm:$0xff] (!%p461_p11)   ;;  %s3518_s25 = sshll.u32 (!%p461_p11), %s467_s11, 6 }
  0x6a   : > { %s2425_s24 = smul.u32 (!%p461_p11), 1152, %s467_s11  ;;  %2483 = vset.pattern.permute.xlu0 (!%p461_p11), %v2763_v18  ;;  %2484 = vset.pattern.permute.xlu1 (!%p461_p11), %v2763_v18  ;;  %v3204_v58 = vld [vmem:[%s3608_s1] ss:$8 sps:$4 sm:$0xff] (!%p461_p11)   ;;  %v3228_v4 = vld [vmem:[%s3608_s1 + $0x10] ss:$8 sps:$4 sm:$0xff] (!%p461_p11)   ;;  %s3533_s12 = scalar_lea.vmem (!%p461_p11), [#allocation3], %s3518_s25 }
  0x6b   : > { %538 = vperm.xlu0 (!%p461_p11), %2483, %v496_v17  }
  0x6c   : > { %s3158_s28 = scalar_lea.vmem (!%p461_p11), [#allocation2], %s2425_s24 }
  0x6d   : > { %v2485_v19 = vld [vmem:[%s3158_s28 + $0x4] ss:$16 sps:$4 sm:$0xff] (!%p461_p11)   ;;  %v2487_v21 = vld [vmem:[%s3158_s28 + $0xc] ss:$16 sps:$4 sm:$0xff] (!%p461_p11)   ;;  %v2489_v22 = vld [vmem:[%s3158_s28] ss:$16 sps:$4 sm:$0xff] (!%p461_p11)  }
  0x6e   : > { %761 = vmatprep.subr.bf16.mxu0 (!%p461_p11), %v2485_v19  ;;  %v2490_v23 = vld [vmem:[%s3158_s28 + $0x8] ss:$16 sps:$4 sm:$0xff] (!%p461_p11)   ;;  %814 = vmatprep.subr.bf16.mxu1 (!%p461_p11), %v2487_v21  ;;  %v2491_v24 = vld [vmem:[%s3158_s28 + $0x24] ss:$16 sps:$4 sm:$0xff] (!%p461_p11)   ;;  %v2493_v25 = vld [vmem:[%s3158_s28 + $0x2c] ss:$16 sps:$4 sm:$0xff] (!%p461_p11)  }
  0x6f   : > { %762 = vmatpush1.bf16.msra.mxu0 (!%p461_p11), %v2489_v22  ;;  %815 = vmatpush1.bf16.msra.mxu1 (!%p461_p11), %v2490_v23  ;;  %v2495_v26 = vld [vmem:[%s3158_s28 + $0x20] ss:$16 sps:$4 sm:$0xff] (!%p461_p11)   ;;  %v2496_v27 = vld [vmem:[%s3158_s28 + $0x28] ss:$16 sps:$4 sm:$0xff] (!%p461_p11)   ;;  %v2497_v28 = vld [vmem:[%s3158_s28 + $0x44] ss:$16 sps:$4 sm:$0xff] (!%p461_p11)  }
  0x70   : > { %763 = vmatprep.subr.bf16.mxu0 %v2491_v24  ;;  %543 = vperm.xlu0 %2483, %v497_v20   ;;  %v2499_v29 = vld [vmem:[%s3158_s28 + $0x4c] ss:$16 sps:$4 sm:$0xff]   ;;  %v2501_v30 = vld [vmem:[%s3158_s28 + $0x40] ss:$16 sps:$4 sm:$0xff]   ;;  %v2502_v31 = vld [vmem:[%s3158_s28 + $0x48] ss:$16 sps:$4 sm:$0xff]  }
  0x71   : > { %816 = vmatprep.subr.bf16.mxu1 %v2493_v25  ;;  %v2503_v32 = vld [vmem:[%s3158_s28 + $0x64] ss:$16 sps:$4 sm:$0xff]   ;;  %v2505_v33 = vld [vmem:[%s3158_s28 + $0x6c] ss:$16 sps:$4 sm:$0xff]   ;;  %v2507_v34 = vld [vmem:[%s3158_s28 + $0x60] ss:$16 sps:$4 sm:$0xff]  }
  0x72   : > { %v2508_v35 = vld [vmem:[%s3158_s28 + $0x68] ss:$16 sps:$4 sm:$0xff]   ;;  %v2509_v36 = vld [vmem:[%s3158_s28 + $0x84] ss:$16 sps:$4 sm:$0xff]   ;;  %v2511_v37 = vld [vmem:[%s3158_s28 + $0x8c] ss:$16 sps:$4 sm:$0xff]  }
  0x73   : > { %764 = vmatpush1.bf16.msra.mxu0 %v2495_v26  ;;  %817 = vmatpush1.bf16.msra.mxu1 %v2496_v27  ;;  %v2513_v38 = vld [vmem:[%s3158_s28 + $0x80] ss:$16 sps:$4 sm:$0xff]   ;;  %v2514_v39 = vld [vmem:[%s3158_s28 + $0x88] ss:$16 sps:$4 sm:$0xff]   ;;  %v2515_v40 = vld [vmem:[%s3158_s28 + $0xa4] ss:$16 sps:$4 sm:$0xff]  }
  0x74   : > { %765 = vmatprep.subr.bf16.mxu0 %v2497_v28  ;;  %818 = vmatprep.subr.bf16.mxu1 %v2499_v29  ;;  %v2517_v41 = vld [vmem:[%s3158_s28 + $0xac] ss:$16 sps:$4 sm:$0xff]   ;;  %v2519_v42 = vld [vmem:[%s3158_s28 + $0xa0] ss:$16 sps:$4 sm:$0xff]   ;;  %v2520_v43 = vld [vmem:[%s3158_s28 + $0xa8] ss:$16 sps:$4 sm:$0xff]  }
  0x75   : > { %v2521_v44 = vld [vmem:[%s3158_s28 + $0xc4] ss:$16 sps:$4 sm:$0xff]   ;;  %v2523_v45 = vld [vmem:[%s3158_s28 + $0xcc] ss:$16 sps:$4 sm:$0xff]   ;;  %v2525_v46 = vld [vmem:[%s3158_s28 + $0xc0] ss:$16 sps:$4 sm:$0xff]  }
  0x76   : > { %v2526_v47 = vld [vmem:[%s3158_s28 + $0xc8] ss:$16 sps:$4 sm:$0xff]   ;;  %v2527_v48 = vld [vmem:[%s3158_s28 + $0xe4] ss:$16 sps:$4 sm:$0xff]   ;;  %v2529_v49 = vld [vmem:[%s3158_s28 + $0xec] ss:$16 sps:$4 sm:$0xff]  }
  0x77   : > { %766 = vmatpush1.bf16.msra.mxu0 %v2501_v30  ;;  %819 = vmatpush1.bf16.msra.mxu1 %v2502_v31  ;;  %v2531_v50 = vld [vmem:[%s3158_s28 + $0xe0] ss:$16 sps:$4 sm:$0xff]   ;;  %v2532_v51 = vld [vmem:[%s3158_s28 + $0xe8] ss:$16 sps:$4 sm:$0xff]   ;;  %v2533_v52 = vld [vmem:[%s3158_s28 + $0x104] ss:$16 sps:$4 sm:$0xff]  }
  0x78   : > { %767 = vmatprep.subr.bf16.mxu0 %v2503_v32  ;;  %820 = vmatprep.subr.bf16.mxu1 %v2505_v33  ;;  %v2535_v53 = vld [vmem:[%s3158_s28 + $0x10c] ss:$16 sps:$4 sm:$0xff]   ;;  %v2537_v54 = vld [vmem:[%s3158_s28 + $0x100] ss:$16 sps:$4 sm:$0xff]   ;;  %v2538_v55 = vld [vmem:[%s3158_s28 + $0x108] ss:$16 sps:$4 sm:$0xff]  }
  0x79   : > { %v2544_v56 = vld [vmem:[%s3158_s28 + $0x124] ss:$16 sps:$4 sm:$0xff]   ;;  %v2547_v57 = vld [vmem:[%s3158_s28 + $0x12c] ss:$16 sps:$4 sm:$0xff]   ;;  %v2542_v59 = vld [vmem:[%s3158_s28 + $0x120] ss:$16 sps:$4 sm:$0xff]  }
  0x7a   : > { %v2545_v60 = vld [vmem:[%s3158_s28 + $0x128] ss:$16 sps:$4 sm:$0xff]   ;;  %v2550_v61 = vld [vmem:[%s3158_s28 + $0x144] ss:$16 sps:$4 sm:$0xff]   ;;  %v2553_v62 = vld [vmem:[%s3158_s28 + $0x14c] ss:$16 sps:$4 sm:$0xff]  }
  0x7b   : > { %768 = vmatpush1.bf16.msra.mxu0 %v2507_v34  ;;  %821 = vmatpush1.bf16.msra.mxu1 %v2508_v35  ;;  %v2548_v0 = vld [vmem:[%s3158_s28 + $0x140] ss:$16 sps:$4 sm:$0xff]   ;;  %v2551_v1 = vld [vmem:[%s3158_s28 + $0x148] ss:$16 sps:$4 sm:$0xff]   ;;  %v2556_v2 = vld [vmem:[%s3158_s28 + $0x164] ss:$16 sps:$4 sm:$0xff]  }
  0x7c   : > { %769 = vmatprep.subr.bf16.mxu0 %v2509_v36  ;;  %822 = vmatprep.subr.bf16.mxu1 %v2511_v37  ;;  %v2559_v3 = vld [vmem:[%s3158_s28 + $0x16c] ss:$16 sps:$4 sm:$0xff]   ;;  %v2554_v5 = vld [vmem:[%s3158_s28 + $0x160] ss:$16 sps:$4 sm:$0xff]   ;;  %v2557_v6 = vld [vmem:[%s3158_s28 + $0x168] ss:$16 sps:$4 sm:$0xff]  }
  0x7d   : > { %v2562_v7 = vld [vmem:[%s3158_s28 + $0x184] ss:$16 sps:$4 sm:$0xff]   ;;  %v2565_v8 = vld [vmem:[%s3158_s28 + $0x18c] ss:$16 sps:$4 sm:$0xff]   ;;  %v2560_v9 = vld [vmem:[%s3158_s28 + $0x180] ss:$16 sps:$4 sm:$0xff]  }
  0x7e   : > { %v2563_v10 = vld [vmem:[%s3158_s28 + $0x188] ss:$16 sps:$4 sm:$0xff]   ;;  %v2568_v11 = vld [vmem:[%s3158_s28 + $0x1a4] ss:$16 sps:$4 sm:$0xff]   ;;  %v2571_v12 = vld [vmem:[%s3158_s28 + $0x1ac] ss:$16 sps:$4 sm:$0xff]  }
  0x7f   : > { %770 = vmatpush1.bf16.msra.mxu0 %v2513_v38  ;;  %823 = vmatpush1.bf16.msra.mxu1 %v2514_v39  ;;  %v2566_v13 = vld [vmem:[%s3158_s28 + $0x1a0] ss:$16 sps:$4 sm:$0xff]   ;;  %v2569_v14 = vld [vmem:[%s3158_s28 + $0x1a8] ss:$16 sps:$4 sm:$0xff]   ;;  %v2574_v15 = vld [vmem:[%s3158_s28 + $0x1c4] ss:$16 sps:$4 sm:$0xff]  }
  0x80   : > { %771 = vmatprep.subr.bf16.mxu0 %v2515_v40  ;;  %824 = vmatprep.subr.bf16.mxu1 %v2517_v41  ;;  %v2577_v17 = vld [vmem:[%s3158_s28 + $0x1cc] ss:$16 sps:$4 sm:$0xff]   ;;  %v2572_v18 = vld [vmem:[%s3158_s28 + $0x1c0] ss:$16 sps:$4 sm:$0xff]   ;;  %v2575_v19 = vld [vmem:[%s3158_s28 + $0x1c8] ss:$16 sps:$4 sm:$0xff]  }
  0x81   : > { %v2580_v20 = vld [vmem:[%s3158_s28 + $0x1e4] ss:$16 sps:$4 sm:$0xff]   ;;  %v2583_v21 = vld [vmem:[%s3158_s28 + $0x1ec] ss:$16 sps:$4 sm:$0xff]   ;;  %v2578_v22 = vld [vmem:[%s3158_s28 + $0x1e0] ss:$16 sps:$4 sm:$0xff]  }
  0x82   : > { %v2581_v23 = vld [vmem:[%s3158_s28 + $0x1e8] ss:$16 sps:$4 sm:$0xff]   ;;  %v2589_v24 = vld [vmem:[%s3158_s28 + $0x204] ss:$16 sps:$4 sm:$0xff]   ;;  %v2592_v25 = vld [vmem:[%s3158_s28 + $0x20c] ss:$16 sps:$4 sm:$0xff]  }
  0x83   : > { %772 = vmatpush1.bf16.msra.mxu0 %v2519_v42  ;;  %825 = vmatpush1.bf16.msra.mxu1 %v2520_v43  ;;  %v2587_v26 = vld [vmem:[%s3158_s28 + $0x200] ss:$16 sps:$4 sm:$0xff]   ;;  %v2590_v27 = vld [vmem:[%s3158_s28 + $0x208] ss:$16 sps:$4 sm:$0xff]   ;;  %v2595_v28 = vld [vmem:[%s3158_s28 + $0x224] ss:$16 sps:$4 sm:$0xff]  }
  0x84   : > { %773 = vmatprep.subr.bf16.mxu0 %v2521_v44  ;;  %826 = vmatprep.subr.bf16.mxu1 %v2523_v45  ;;  %v2598_v29 = vld [vmem:[%s3158_s28 + $0x22c] ss:$16 sps:$4 sm:$0xff]   ;;  %v2593_v30 = vld [vmem:[%s3158_s28 + $0x220] ss:$16 sps:$4 sm:$0xff]   ;;  %v2596_v31 = vld [vmem:[%s3158_s28 + $0x228] ss:$16 sps:$4 sm:$0xff]  }
  0x85   : > { %v2601_v32 = vld [vmem:[%s3158_s28 + $0x244] ss:$16 sps:$4 sm:$0xff]   ;;  %v2604_v33 = vld [vmem:[%s3158_s28 + $0x24c] ss:$16 sps:$4 sm:$0xff]   ;;  %v2599_v34 = vld [vmem:[%s3158_s28 + $0x240] ss:$16 sps:$4 sm:$0xff]  }
  0x86   : > { %v2602_v35 = vld [vmem:[%s3158_s28 + $0x248] ss:$16 sps:$4 sm:$0xff]   ;;  %v2607_v36 = vld [vmem:[%s3158_s28 + $0x264] ss:$16 sps:$4 sm:$0xff]   ;;  %v2610_v37 = vld [vmem:[%s3158_s28 + $0x26c] ss:$16 sps:$4 sm:$0xff]  }
  0x87   : > { %774 = vmatpush1.bf16.msra.mxu0 %v2525_v46  ;;  %827 = vmatpush1.bf16.msra.mxu1 %v2526_v47  ;;  %v2605_v38 = vld [vmem:[%s3158_s28 + $0x260] ss:$16 sps:$4 sm:$0xff]   ;;  %v2608_v39 = vld [vmem:[%s3158_s28 + $0x268] ss:$16 sps:$4 sm:$0xff]   ;;  %v2613_v40 = vld [vmem:[%s3158_s28 + $0x284] ss:$16 sps:$4 sm:$0xff]  }
  0x88   : > { %775 = vmatprep.subr.bf16.mxu0 %v2527_v48  ;;  %828 = vmatprep.subr.bf16.mxu1 %v2529_v49  ;;  %v2616_v41 = vld [vmem:[%s3158_s28 + $0x28c] ss:$16 sps:$4 sm:$0xff]   ;;  %v2611_v42 = vld [vmem:[%s3158_s28 + $0x280] ss:$16 sps:$4 sm:$0xff]   ;;  %v2614_v43 = vld [vmem:[%s3158_s28 + $0x288] ss:$16 sps:$4 sm:$0xff]  }
  0x89   : > { %v2619_v44 = vld [vmem:[%s3158_s28 + $0x2a4] ss:$16 sps:$4 sm:$0xff]   ;;  %v2622_v45 = vld [vmem:[%s3158_s28 + $0x2ac] ss:$16 sps:$4 sm:$0xff]   ;;  %v2617_v46 = vld [vmem:[%s3158_s28 + $0x2a0] ss:$16 sps:$4 sm:$0xff]  }
  0x8a   : > { %v2620_v47 = vld [vmem:[%s3158_s28 + $0x2a8] ss:$16 sps:$4 sm:$0xff]   ;;  %v2625_v48 = vld [vmem:[%s3158_s28 + $0x2c4] ss:$16 sps:$4 sm:$0xff]   ;;  %v2628_v49 = vld [vmem:[%s3158_s28 + $0x2cc] ss:$16 sps:$4 sm:$0xff]  }
  0x8b   : > { %776 = vmatpush1.bf16.msra.mxu0 %v2531_v50  ;;  %829 = vmatpush1.bf16.msra.mxu1 %v2532_v51  ;;  %v2623_v50 = vld [vmem:[%s3158_s28 + $0x2c0] ss:$16 sps:$4 sm:$0xff]   ;;  %v2626_v51 = vld [vmem:[%s3158_s28 + $0x2c8] ss:$16 sps:$4 sm:$0xff]   ;;  %s2410_s11 = sshll.u32 (%p2832_p6), %s2745_s14, 2  ;;  %s2411_s26 = sshll.u32 (%p2832_p6), %s2749_s15, 5 }
  0x8c   : > { %777 = vmatprep.subr.bf16.mxu0 %v2533_v52  ;;  %830 = vmatprep.subr.bf16.mxu1 %v2535_v53  ;;  %v2631_v52 = vld [vmem:[%s3158_s28 + $0x2e4] ss:$16 sps:$4 sm:$0xff]   ;;  %v2634_v53 = vld [vmem:[%s3158_s28 + $0x2ec] ss:$16 sps:$4 sm:$0xff]  }
  0x8f   : > { %778 = vmatpush1.bf16.msra.mxu0 %v2537_v54  ;;  %831 = vmatpush1.bf16.msra.mxu1 %v2538_v55  ;;  %v2629_v54 = vld [vmem:[%s3158_s28 + $0x2e0] ss:$16 sps:$4 sm:$0xff]   ;;  %v2632_v55 = vld [vmem:[%s3158_s28 + $0x2e8] ss:$16 sps:$4 sm:$0xff]  }
  0x90   : > { %1100 = vmatprep.subr.bf16.mxu0 %v2544_v56  ;;  %1153 = vmatprep.subr.bf16.mxu1 %v2547_v57  ;;  %v2637_v56 = vld [vmem:[%s3158_s28 + $0x304] ss:$16 sps:$4 sm:$0xff]   ;;  %v2640_v57 = vld [vmem:[%s3158_s28 + $0x30c] ss:$16 sps:$4 sm:$0xff]  }
  0x92   : > { %794 = vmatmul.mubr.bf16.vlgmr.msra.gmra.mrb[0].mxu0 %v3204_v58  ;;  %847 = vmatmul.mubr.bf16.vlgmr.msra.gmra.mrb[0].mxu1 %v3204_v58 }
  0x93   : > { %1101 = vmatpush1.bf16.msra.mxu0 %v2542_v59  ;;  %1154 = vmatpush1.bf16.msra.mxu1 %v2545_v60  ;;  %v2635_v59 = vld [vmem:[%s3158_s28 + $0x300] ss:$16 sps:$4 sm:$0xff]   ;;  %v2638_v60 = vld [vmem:[%s3158_s28 + $0x308] ss:$16 sps:$4 sm:$0xff]  }
  0x94   : > { %1102 = vmatprep.subr.bf16.mxu0 %v2550_v61  ;;  %1155 = vmatprep.subr.bf16.mxu1 %v2553_v62  ;;  %v498_v61 = vld [vmem:[%s3609_s2 + $0x10] sm:$0xff] }
  0x95   : > { %2170 = vmatprep.mubr.msk.bf16.mxu0 %vm754_vm0, %v3213_v63  ;;  %2172 = vmatprep.mubr.msk.bf16.mxu1 %vm754_vm0, %v3213_v63  ;;  %v2643_v62 = vld [vmem:[%s3158_s28 + $0x324] ss:$16 sps:$4 sm:$0xff]  }
  0x96   : > { %548 = vperm.xlu1 %2484, %v498_v61  }
  0x97   : > { %1103 = vmatpush1.bf16.msra.mxu0 %v2548_v0  ;;  %1156 = vmatpush1.bf16.msra.mxu1 %v2551_v1  ;;  %v2646_v0 = vld [vmem:[%s3158_s28 + $0x32c] ss:$16 sps:$4 sm:$0xff]  }
  0x98   : > { %1104 = vmatprep.subr.bf16.mxu0 %v2556_v2  ;;  %1157 = vmatprep.subr.bf16.mxu1 %v2559_v3  ;;  %v499_v1 = vld [vmem:[%s3609_s2 + $0x18] sm:$0xff]  ;;  %v2641_v2 = vld [vmem:[%s3158_s28 + $0x320] ss:$16 sps:$4 sm:$0xff]  }
  0x99   : > { %v2644_v3 = vld [vmem:[%s3158_s28 + $0x328] ss:$16 sps:$4 sm:$0xff]  }
  0x9a   : > { %804 = vmatmul.mubr.bf16.gmra.mrb[4].mxu0 %v3228_v4  ;;  %857 = vmatmul.mubr.bf16.gmra.mrb[4].mxu1 %v3228_v4 }
  0x9b   : > { %1105 = vmatpush1.bf16.msra.mxu0 %v2554_v5  ;;  %1158 = vmatpush1.bf16.msra.mxu1 %v2557_v6  ;;  %v2649_v5 = vld [vmem:[%s3158_s28 + $0x344] ss:$16 sps:$4 sm:$0xff]   ;;  %v2652_v6 = vld [vmem:[%s3158_s28 + $0x34c] ss:$16 sps:$4 sm:$0xff]  }
  0x9c   : > { %1106 = vmatprep.subr.bf16.mxu0 %v2562_v7  ;;  %1159 = vmatprep.subr.bf16.mxu1 %v2565_v8  ;;  %v2647_v7 = vld [vmem:[%s3158_s28 + $0x340] ss:$16 sps:$4 sm:$0xff]   ;;  %v2650_v8 = vld [vmem:[%s3158_s28 + $0x348] ss:$16 sps:$4 sm:$0xff]  }
  0x9d   : > { %2245 = vmatprep.mubr.msk.bf16.mxu0 %vm754_vm0, %v3147_v16  ;;  %2247 = vmatprep.mubr.msk.bf16.mxu1 %vm754_vm0, %v3147_v16 }
  0x9e   : > { %553 = vperm.xlu1 %2484, %v499_v1  }
  0x9f   : > { %1107 = vmatpush1.bf16.msra.mxu0 %v2560_v9  ;;  %1160 = vmatpush1.bf16.msra.mxu1 %v2563_v10  ;;  %v2655_v9 = vld [vmem:[%s3158_s28 + $0x364] ss:$16 sps:$4 sm:$0xff]   ;;  %v2658_v10 = vld [vmem:[%s3158_s28 + $0x36c] ss:$16 sps:$4 sm:$0xff]  }
  0xa0   : > { %1108 = vmatprep.subr.bf16.mxu0 %v2568_v11  ;;  %1161 = vmatprep.subr.bf16.mxu1 %v2571_v12  ;;  %v2653_v11 = vld [vmem:[%s3158_s28 + $0x360] ss:$16 sps:$4 sm:$0xff]   ;;  %v2656_v12 = vld [vmem:[%s3158_s28 + $0x368] ss:$16 sps:$4 sm:$0xff]  }
  0xa3   : > { %1109 = vmatpush1.bf16.msra.mxu0 %v2566_v13  ;;  %1162 = vmatpush1.bf16.msra.mxu1 %v2569_v14  ;;  %v2661_v13 = vld [vmem:[%s3158_s28 + $0x384] ss:$16 sps:$4 sm:$0xff]   ;;  %v2664_v14 = vld [vmem:[%s3158_s28 + $0x38c] ss:$16 sps:$4 sm:$0xff]  }
  0xa4   : > { %1110 = vmatprep.subr.bf16.mxu0 %v2574_v15  ;;  %1163 = vmatprep.subr.bf16.mxu1 %v2577_v17  ;;  %v2659_v15 = vld [vmem:[%s3158_s28 + $0x380] ss:$16 sps:$4 sm:$0xff]   ;;  %v2662_v17 = vld [vmem:[%s3158_s28 + $0x388] ss:$16 sps:$4 sm:$0xff]  }
  0xa7   : > { %1111 = vmatpush1.bf16.msra.mxu0 %v2572_v18  ;;  %1164 = vmatpush1.bf16.msra.mxu1 %v2575_v19  ;;  %v2667_v18 = vld [vmem:[%s3158_s28 + $0x3a4] ss:$16 sps:$4 sm:$0xff]   ;;  %v2670_v19 = vld [vmem:[%s3158_s28 + $0x3ac] ss:$16 sps:$4 sm:$0xff]  }
  0xa8   : > { %1112 = vmatprep.subr.bf16.mxu0 %v2580_v20  ;;  %1165 = vmatprep.subr.bf16.mxu1 %v2583_v21  ;;  %v2665_v20 = vld [vmem:[%s3158_s28 + $0x3a0] ss:$16 sps:$4 sm:$0xff]   ;;  %v2668_v21 = vld [vmem:[%s3158_s28 + $0x3a8] ss:$16 sps:$4 sm:$0xff]  }
  0xab   : > { %1113 = vmatpush1.bf16.msra.mxu0 %v2578_v22  ;;  %1166 = vmatpush1.bf16.msra.mxu1 %v2581_v23  ;;  %v2673_v22 = vld [vmem:[%s3158_s28 + $0x3c4] ss:$16 sps:$4 sm:$0xff]   ;;  %v2676_v23 = vld [vmem:[%s3158_s28 + $0x3cc] ss:$16 sps:$4 sm:$0xff]  }
  0xac   : > { %1114 = vmatprep.subr.bf16.mxu0 %v2589_v24  ;;  %1167 = vmatprep.subr.bf16.mxu1 %v2592_v25  ;;  %v2671_v24 = vld [vmem:[%s3158_s28 + $0x3c0] ss:$16 sps:$4 sm:$0xff]   ;;  %v2674_v25 = vld [vmem:[%s3158_s28 + $0x3c8] ss:$16 sps:$4 sm:$0xff]  }
  0xaf   : > { %1115 = vmatpush1.bf16.msra.mxu0 %v2587_v26  ;;  %1168 = vmatpush1.bf16.msra.mxu1 %v2590_v27  ;;  %v2679_v26 = vld [vmem:[%s3158_s28 + $0x3e4] ss:$16 sps:$4 sm:$0xff]   ;;  %v2682_v27 = vld [vmem:[%s3158_s28 + $0x3ec] ss:$16 sps:$4 sm:$0xff]  }
  0xb0   : > { %1116 = vmatprep.subr.bf16.mxu0 %v2595_v28  ;;  %1169 = vmatprep.subr.bf16.mxu1 %v2598_v29  ;;  %v2677_v28 = vld [vmem:[%s3158_s28 + $0x3e0] ss:$16 sps:$4 sm:$0xff]   ;;  %v2680_v29 = vld [vmem:[%s3158_s28 + $0x3e8] ss:$16 sps:$4 sm:$0xff]  }
  0xb3   : > { %1117 = vmatpush1.bf16.msra.mxu0 %v2593_v30  ;;  %1170 = vmatpush1.bf16.msra.mxu1 %v2596_v31  ;;  %v2685_v30 = vld [vmem:[%s3158_s28 + $0x404] ss:$16 sps:$4 sm:$0xff]   ;;  %v2688_v31 = vld [vmem:[%s3158_s28 + $0x40c] ss:$16 sps:$4 sm:$0xff]  }
  0xb4   : > { %1455 = vmatprep.subr.bf16.mxu0 %v2601_v32  ;;  %1508 = vmatprep.subr.bf16.mxu1 %v2604_v33  ;;  %v2683_v32 = vld [vmem:[%s3158_s28 + $0x400] ss:$16 sps:$4 sm:$0xff]   ;;  %v2686_v33 = vld [vmem:[%s3158_s28 + $0x408] ss:$16 sps:$4 sm:$0xff]  }
  0xb6   : > { %1133 = vmatmul.mubr.bf16.vlgmr.msra.gmra.mrb[8].mxu0 %v3204_v58  ;;  %1186 = vmatmul.mubr.bf16.vlgmr.msra.gmra.mrb[8].mxu1 %v3204_v58 }
  0xb7   : > { %1456 = vmatpush1.bf16.msra.mxu0 %v2599_v34  ;;  %1509 = vmatpush1.bf16.msra.mxu1 %v2602_v35  ;;  %v2694_v34 = vld [vmem:[%s3158_s28 + $0x42c] ss:$16 sps:$4 sm:$0xff]   ;;  %v2689_v35 = vld [vmem:[%s3158_s28 + $0x420] ss:$16 sps:$4 sm:$0xff]  }
  0xb8   : > { %1457 = vmatprep.subr.bf16.mxu0 %v2607_v36  ;;  %1510 = vmatprep.subr.bf16.mxu1 %v2610_v37  ;;  %v2692_v36 = vld [vmem:[%s3158_s28 + $0x428] ss:$16 sps:$4 sm:$0xff]   ;;  %v2697_v37 = vld [vmem:[%s3158_s28 + $0x444] ss:$16 sps:$4 sm:$0xff]  }
  0xb9   : > { %2246 = vmatprep.mubr.msk.bf16.mxu0 %vm754_vm0, %v3213_v63  ;;  %2248 = vmatprep.mubr.msk.bf16.mxu1 %vm754_vm0, %v3213_v63 }
  0xbb   : > { %1458 = vmatpush1.bf16.msra.mxu0 %v2605_v38  ;;  %1511 = vmatpush1.bf16.msra.mxu1 %v2608_v39  ;;  %v2700_v38 = vld [vmem:[%s3158_s28 + $0x44c] ss:$16 sps:$4 sm:$0xff]   ;;  %v2695_v39 = vld [vmem:[%s3158_s28 + $0x440] ss:$16 sps:$4 sm:$0xff]  }
  0xbc   : > { %1459 = vmatprep.subr.bf16.mxu0 %v2613_v40  ;;  %1512 = vmatprep.subr.bf16.mxu1 %v2616_v41  ;;  %v2698_v40 = vld [vmem:[%s3158_s28 + $0x448] ss:$16 sps:$4 sm:$0xff]   ;;  %v2703_v41 = vld [vmem:[%s3158_s28 + $0x464] ss:$16 sps:$4 sm:$0xff]  }
  0xbe   : > { %1143 = vmatmul.mubr.bf16.gmra.mrb[12].mxu0 %v3228_v4  ;;  %1196 = vmatmul.mubr.bf16.gmra.mrb[12].mxu1 %v3228_v4 }
  0xbf   : > { %1460 = vmatpush1.bf16.msra.mxu0 %v2611_v42  ;;  %1513 = vmatpush1.bf16.msra.mxu1 %v2614_v43  ;;  %v2706_v42 = vld [vmem:[%s3158_s28 + $0x46c] ss:$16 sps:$4 sm:$0xff]   ;;  %v2701_v43 = vld [vmem:[%s3158_s28 + $0x460] ss:$16 sps:$4 sm:$0xff]  }
  0xc0   : > { %1461 = vmatprep.subr.bf16.mxu0 %v2619_v44  ;;  %1514 = vmatprep.subr.bf16.mxu1 %v2622_v45  ;;  %v2704_v44 = vld [vmem:[%s3158_s28 + $0x468] ss:$16 sps:$4 sm:$0xff]  }
  0xc1   : > { %2321 = vmatprep.mubr.msk.bf16.mxu0 %vm754_vm0, %v3147_v16  ;;  %2323 = vmatprep.mubr.msk.bf16.mxu1 %vm754_vm0, %v3147_v16 }
  0xc3   : > { %1462 = vmatpush1.bf16.msra.mxu0 %v2617_v46  ;;  %1515 = vmatpush1.bf16.msra.mxu1 %v2620_v47 }
  0xc4   : > { %1463 = vmatprep.subr.bf16.mxu0 %v2625_v48  ;;  %1516 = vmatprep.subr.bf16.mxu1 %v2628_v49 }
  0xc7   : > { %1464 = vmatpush1.bf16.msra.mxu0 %v2623_v50  ;;  %1517 = vmatpush1.bf16.msra.mxu1 %v2626_v51 }
  0xc8   : > { %1465 = vmatprep.subr.bf16.mxu0 %v2631_v52  ;;  %1518 = vmatprep.subr.bf16.mxu1 %v2634_v53 }
  0xcb   : > { %1466 = vmatpush1.bf16.msra.mxu0 %v2629_v54  ;;  %1519 = vmatpush1.bf16.msra.mxu1 %v2632_v55 }
  0xcc   : > { %1467 = vmatprep.subr.bf16.mxu0 %v2637_v56  ;;  %1520 = vmatprep.subr.bf16.mxu1 %v2640_v57 }
  0xcf   : > { %1468 = vmatpush1.bf16.msra.mxu0 %v2635_v59  ;;  %1521 = vmatpush1.bf16.msra.mxu1 %v2638_v60 }
  0xd0   : > { %1469 = vmatprep.subr.bf16.mxu0 %v2643_v62  ;;  %1522 = vmatprep.subr.bf16.mxu1 %v2646_v0 }
  0xd3   : > { %1470 = vmatpush1.bf16.msra.mxu0 %v2641_v2  ;;  %1523 = vmatpush1.bf16.msra.mxu1 %v2644_v3 }
  0xd4   : > { %1471 = vmatprep.subr.bf16.mxu0 %v2649_v5  ;;  %1524 = vmatprep.subr.bf16.mxu1 %v2652_v6 }
  0xd7   : > { %1472 = vmatpush1.bf16.msra.mxu0 %v2647_v7  ;;  %1525 = vmatpush1.bf16.msra.mxu1 %v2650_v8 }
  0xd8   : > { %1794 = vmatprep.subr.bf16.mxu0 %v2655_v9  ;;  %1847 = vmatprep.subr.bf16.mxu1 %v2658_v10 }
  0xda   : > { %1488 = vmatmul.mubr.bf16.vlgmr.msra.gmra.mrb[16].mxu0 %v3204_v58  ;;  %1541 = vmatmul.mubr.bf16.vlgmr.msra.gmra.mrb[16].mxu1 %v3204_v58 }
  0xdb   : > { %1795 = vmatpush1.bf16.msra.mxu0 %v2653_v11  ;;  %1848 = vmatpush1.bf16.msra.mxu1 %v2656_v12 }
  0xdc   : > { %1796 = vmatprep.subr.bf16.mxu0 %v2661_v13  ;;  %1849 = vmatprep.subr.bf16.mxu1 %v2664_v14 }
  0xdd   : > { %2322 = vmatprep.mubr.msk.bf16.mxu0 %vm754_vm0, %v3213_v63  ;;  %2324 = vmatprep.mubr.msk.bf16.mxu1 %vm754_vm0, %v3213_v63 }
  0xdf   : > { %1797 = vmatpush1.bf16.msra.mxu0 %v2659_v15  ;;  %1850 = vmatpush1.bf16.msra.mxu1 %v2662_v17 }
  0xe0   : > { %1798 = vmatprep.subr.bf16.mxu0 %v2667_v18  ;;  %1851 = vmatprep.subr.bf16.mxu1 %v2670_v19 }
  0xe2   : > { %1498 = vmatmul.mubr.bf16.gmra.mrb[20].mxu0 %v3228_v4  ;;  %1551 = vmatmul.mubr.bf16.gmra.mrb[20].mxu1 %v3228_v4 }
  0xe3   : > { %1799 = vmatpush1.bf16.msra.mxu0 %v2665_v20  ;;  %1852 = vmatpush1.bf16.msra.mxu1 %v2668_v21 }
  0xe4   : > { %1800 = vmatprep.subr.bf16.mxu0 %v2673_v22  ;;  %1853 = vmatprep.subr.bf16.mxu1 %v2676_v23 }
  0xe5   : > { %2397 = vmatprep.mubr.msk.bf16.mxu0 %vm754_vm0, %v3147_v16  ;;  %2399 = vmatprep.mubr.msk.bf16.mxu1 %vm754_vm0, %v3147_v16  ;;  %v2691_v16 = vld [vmem:[%s3158_s28 + $0x424] ss:$16 sps:$4 sm:$0xff]   ;;  %s2013_s28 = sadd.s32 (%p2832_p6), %s2411_s26, %s2410_s11 }
  0xe6   : > { %s2412_s23 = sshll.u32 (%p2832_p6), %s2013_s28, 2 }
  0xe7   : > { %1801 = vmatpush1.bf16.msra.mxu0 %v2671_v24  ;;  %1854 = vmatpush1.bf16.msra.mxu1 %v2674_v25  ;;  %s2015_s4 = scalar_lea.vmem (%p2832_p6), %s3610_s3, %s2412_s23 }
  0xe8   : > { %1802 = vmatprep.subr.bf16.mxu0 %v2679_v26  ;;  %1855 = vmatprep.subr.bf16.mxu1 %v2682_v27 }
  0xea   : > { %v3372_v60 = vpop.permute.xlu0 %538 }
  0xeb   : > { %1803 = vmatpush1.bf16.msra.mxu0 %v2677_v28  ;;  %1856 = vmatpush1.bf16.msra.mxu1 %v2680_v29 }
  0xec   : > { %1804 = vmatprep.subr.bf16.mxu0 %v2685_v30  ;;  %1857 = vmatprep.subr.bf16.mxu1 %v2688_v31 }
  0xef   : > { %1805 = vmatpush1.bf16.msra.mxu0 %v2683_v32  ;;  %1858 = vmatpush1.bf16.msra.mxu1 %v2686_v33  ;;  %v3374_v61 = vpop.permute.xlu0 %543 }
  0xf0   : > { %1806 = vmatprep.subr.bf16.mxu0 %v2691_v16  ;;  %1859 = vmatprep.subr.bf16.mxu1 %v2694_v34 }
  0xf3   : > { %1807 = vmatpush1.bf16.msra.mxu0 %v2689_v35  ;;  %1860 = vmatpush1.bf16.msra.mxu1 %v2692_v36 }
  0xf4   : > { %1808 = vmatprep.subr.bf16.mxu0 %v2697_v37  ;;  %1861 = vmatprep.subr.bf16.mxu1 %v2700_v38 }
  0xf7   : > { %1809 = vmatpush1.bf16.msra.mxu0 %v2695_v39  ;;  %1862 = vmatpush1.bf16.msra.mxu1 %v2698_v40 }
  0xf8   : > { %1810 = vmatprep.subr.bf16.mxu0 %v2703_v41  ;;  %1863 = vmatprep.subr.bf16.mxu1 %v2706_v42 }
  0xfb   : > { %1811 = vmatpush1.bf16.msra.mxu0 %v2701_v43  ;;  %1864 = vmatpush1.bf16.msra.mxu1 %v2704_v44 }
  0xfe   : > { %1827 = vmatmul.mubr.bf16.vlgmr.msra.gmra.mrb[24].mxu0 %v3204_v58  ;;  %1880 = vmatmul.mubr.bf16.vlgmr.msra.gmra.mrb[24].mxu1 %v3204_v58 }
  0xff   : > { %2398 = vmatprep.mubr.msk.bf16.mxu0 %vm754_vm0, %v3213_v63  ;;  %2400 = vmatprep.mubr.msk.bf16.mxu1 %vm754_vm0, %v3213_v63 }
 0x106   : > { %1837 = vmatmul.mubr.bf16.gmra.mrb[28].mxu0 %v3228_v4  ;;  %1890 = vmatmul.mubr.bf16.gmra.mrb[28].mxu1 %v3228_v4 }
 0x115   : > { %v3376_v4 = vpop.permute.xlu1 %548 }
 0x11d   : > { %v3386_v12 = vpop.permute.xlu1 %553 }
 0x165   : > { %v795_v45 = vpop.f32.mrb[0].mxu0  ;;  %v848_v46 = vpop.f32.mrb[0].mxu1 }
 0x166   : > { %v797_v47 = vpop.f32.mrb[1].mxu0  ;;  %v850_v48 = vpop.f32.mrb[1].mxu1  ;;  %v796_v62 = vadd.f32 %v795_v45, %v3372_v60  ;;  %v849_v0 = vadd.f32 %v848_v46, %v3372_v60 }
 0x167   : > { %v799_v49 = vpop.f32.mrb[2].mxu0  ;;  %v852_v50 = vpop.f32.mrb[2].mxu1  ;;  %v798_v1 = vadd.f32 %v797_v47, %v3372_v60  ;;  %v851_v2 = vadd.f32 %v850_v48, %v3372_v60 }
 0x168   : > { %v801_v51 = vpop.f32.mrb[3].mxu0  ;;  %v854_v52 = vpop.f32.mrb[3].mxu1  ;;  %v800_v3 = vadd.f32 %v799_v49, %v3374_v61  ;;  %v853_v5 = vadd.f32 %v852_v50, %v3374_v61  ;;  %v867_v8 = vmax.f32 %v796_v62, 0.0  ;;  %v869_v9 = vmax.f32 %v849_v0, 0.0 }
 0x169   : > { %v802_v6 = vadd.f32 %v801_v51, %v3374_v61  ;;  %v855_v7 = vadd.f32 %v854_v52, %v3374_v61  ;;  %v868_v10 = vmax.f32 %v798_v1, 0.0  ;;  %v870_v11 = vmax.f32 %v851_v2, 0.0 }
 0x16a   : > { %v871_v13 = vmax.f32 %v800_v3, 0.0  ;;  %v873_v14 = vmax.f32 %v853_v5, 0.0 }
 0x16b   : > { %v872_v15 = vmax.f32 %v802_v6, 0.0  ;;  %v874_v17 = vmax.f32 %v855_v7, 0.0 }
 0x16d   : > { %v805_v53 = vpop.f32.mrb[4].mxu0  ;;  %v858_v58 = vpop.f32.mrb[4].mxu1 }
 0x16e   : > { %v807_v54 = vpop.f32.mrb[5].mxu0  ;;  %v860_v55 = vpop.f32.mrb[5].mxu1  ;;  %v3389_v18 = vadd.f32 %v805_v53, %v3376_v4  ;;  %v3392_v19 = vadd.f32 %v858_v58, %v3376_v4 }
 0x16f   : > { %v809_v56 = vpop.f32.mrb[6].mxu0  ;;  %v862_v57 = vpop.f32.mrb[6].mxu1  ;;  %v3395_v20 = vadd.f32 %v807_v54, %v3376_v4  ;;  %v3398_v21 = vadd.f32 %v860_v55, %v3376_v4 }
 0x170   : > { %v811_v59 = vpop.f32.mrb[7].mxu0  ;;  %v864_v63 = vpop.f32.mrb[7].mxu1  ;;  %v3403_v28 = vadd.f32 %v809_v56, %v3386_v12  ;;  %v3406_v29 = vadd.f32 %v862_v57, %v3386_v12  ;;  %v875_v53 = vmax.f32 %v3389_v18, 0.0  ;;  %v877_v58 = vmax.f32 %v3392_v19, 0.0 }
 0x171   : > { %v3409_v30 = vadd.f32 %v811_v59, %v3386_v12  ;;  %v3412_v31 = vadd.f32 %v864_v63, %v3386_v12  ;;  %v876_v56 = vmax.f32 %v3395_v20, 0.0  ;;  %v878_v57 = vmax.f32 %v3398_v21, 0.0 }
 0x172   : > { %v879_v6 = vmax.f32 %v3403_v28, 0.0  ;;  %v881_v7 = vmax.f32 %v3406_v29, 0.0 }
 0x189   : > { %v1134_v22 = vpop.f32.mrb[8].mxu0  ;;  %v1187_v23 = vpop.f32.mrb[8].mxu1 }
 0x18a   : > { %v1135_v24 = vadd.f32 %v1134_v22, %v3372_v60  ;;  %v1188_v25 = vadd.f32 %v1187_v23, %v3372_v60  ;;  %v1136_v26 = vpop.f32.mrb[9].mxu0  ;;  %v1189_v27 = vpop.f32.mrb[9].mxu1 }
 0x18b   : > { %v1137_v32 = vadd.f32 %v1136_v26, %v3372_v60  ;;  %v1190_v33 = vadd.f32 %v1189_v27, %v3372_v60  ;;  %v1138_v16 = vpop.f32.mrb[10].mxu0  ;;  %v1191_v34 = vpop.f32.mrb[10].mxu1 }
 0x18c   : > { %v1206_v35 = vmax.f32 %v1135_v24, 0.0  ;;  %v1208_v36 = vmax.f32 %v1188_v25, 0.0  ;;  %v1139_v37 = vadd.f32 %v1138_v16, %v3374_v61  ;;  %v1192_v38 = vadd.f32 %v1191_v34, %v3374_v61  ;;  %v1140_v39 = vpop.f32.mrb[11].mxu0  ;;  %v1193_v40 = vpop.f32.mrb[11].mxu1 }
 0x18d   : > { %v1207_v41 = vmax.f32 %v1137_v32, 0.0  ;;  %v1209_v42 = vmax.f32 %v1190_v33, 0.0  ;;  %v1141_v43 = vadd.f32 %v1140_v39, %v3374_v61  ;;  %v1194_v44 = vadd.f32 %v1193_v40, %v3374_v61 }
 0x18e   : > { %v3420_v45 = vmax.f32 %v867_v8, %v1206_v35  ;;  %v3422_v46 = vmax.f32 %v869_v9, %v1208_v36  ;;  %v1210_v47 = vmax.f32 %v1139_v37, 0.0  ;;  %v1212_v48 = vmax.f32 %v1192_v38, 0.0 }
 0x18f   : > { %v3424_v49 = vmax.f32 %v868_v10, %v1207_v41  ;;  %v3426_v50 = vmax.f32 %v870_v11, %v1209_v42  ;;  %v1211_v51 = vmax.f32 %v1141_v43, 0.0  ;;  %v1213_v52 = vmax.f32 %v1194_v44, 0.0 }
 0x190   : > { %v3430_v54 = vmax.f32 %v871_v13, %v1210_v47  ;;  %v3432_v55 = vmax.f32 %v873_v14, %v1212_v48  ;;  %v880_v8 = vmax.f32 %v3409_v30, 0.0  ;;  %v882_v9 = vmax.f32 %v3412_v31, 0.0 }
 0x191   : > { %v3436_v59 = vmax.f32 %v872_v15, %v1211_v51  ;;  %v3438_v63 = vmax.f32 %v874_v17, %v1213_v52  ;;  %v1144_v62 = vpop.f32.mrb[12].mxu0  ;;  %v1197_v0 = vpop.f32.mrb[12].mxu1 }
 0x192   : > { %v1145_v1 = vadd.f32 %v1144_v62, %v3376_v4  ;;  %v1198_v2 = vadd.f32 %v1197_v0, %v3376_v4  ;;  %v1146_v3 = vpop.f32.mrb[13].mxu0  ;;  %v1199_v5 = vpop.f32.mrb[13].mxu1 }
 0x193   : > { %v1147_v10 = vadd.f32 %v1146_v3, %v3376_v4  ;;  %v1200_v11 = vadd.f32 %v1199_v5, %v3376_v4  ;;  %v1148_v13 = vpop.f32.mrb[14].mxu0  ;;  %v1201_v14 = vpop.f32.mrb[14].mxu1 }
 0x194   : > { %v1214_v15 = vmax.f32 %v1145_v1, 0.0  ;;  %v1216_v17 = vmax.f32 %v1198_v2, 0.0  ;;  %v1149_v18 = vadd.f32 %v1148_v13, %v3386_v12  ;;  %v1202_v19 = vadd.f32 %v1201_v14, %v3386_v12  ;;  %v1150_v20 = vpop.f32.mrb[15].mxu0  ;;  %v1203_v21 = vpop.f32.mrb[15].mxu1 }
 0x195   : > { %v1215_v22 = vmax.f32 %v1147_v10, 0.0  ;;  %v1217_v23 = vmax.f32 %v1200_v11, 0.0  ;;  %v1151_v24 = vadd.f32 %v1150_v20, %v3386_v12  ;;  %v1204_v25 = vadd.f32 %v1203_v21, %v3386_v12 }
 0x196   : > { %v3452_v26 = vmax.f32 %v875_v53, %v1214_v15  ;;  %v3454_v27 = vmax.f32 %v877_v58, %v1216_v17  ;;  %v1218_v28 = vmax.f32 %v1149_v18, 0.0  ;;  %v1220_v29 = vmax.f32 %v1202_v19, 0.0 }
 0x197   : > { %v3456_v30 = vmax.f32 %v876_v56, %v1215_v22  ;;  %v3458_v31 = vmax.f32 %v878_v57, %v1217_v23  ;;  %v1219_v32 = vmax.f32 %v1151_v24, 0.0  ;;  %v1221_v33 = vmax.f32 %v1204_v25, 0.0 }
 0x198   : > { %v3460_v16 = vmax.f32 %v879_v6, %v1218_v28  ;;  %v3462_v34 = vmax.f32 %v881_v7, %v1220_v29 }
 0x199   : > { %v3464_v35 = vmax.f32 %v880_v8, %v1219_v32  ;;  %v3466_v36 = vmax.f32 %v882_v9, %v1221_v33 }
 0x1ad   : > { %v1489_v37 = vpop.f32.mrb[16].mxu0  ;;  %v1542_v38 = vpop.f32.mrb[16].mxu1 }
 0x1ae   : > { %v1491_v39 = vpop.f32.mrb[17].mxu0  ;;  %v1544_v40 = vpop.f32.mrb[17].mxu1  ;;  %v1490_v62 = vadd.f32 %v1489_v37, %v3372_v60  ;;  %v1543_v0 = vadd.f32 %v1542_v38, %v3372_v60 }
 0x1af   : > { %v1493_v41 = vpop.f32.mrb[18].mxu0  ;;  %v1546_v42 = vpop.f32.mrb[18].mxu1  ;;  %v1492_v1 = vadd.f32 %v1491_v39, %v3372_v60  ;;  %v1545_v2 = vadd.f32 %v1544_v40, %v3372_v60 }
 0x1b0   : > { %v1495_v43 = vpop.f32.mrb[19].mxu0  ;;  %v1548_v44 = vpop.f32.mrb[19].mxu1  ;;  %v1494_v3 = vadd.f32 %v1493_v41, %v3374_v61  ;;  %v1547_v5 = vadd.f32 %v1546_v42, %v3374_v61  ;;  %v1561_v13 = vmax.f32 %v1490_v62, 0.0  ;;  %v1563_v14 = vmax.f32 %v1543_v0, 0.0 }
 0x1b1   : > { %v1496_v6 = vadd.f32 %v1495_v43, %v3374_v61  ;;  %v1549_v7 = vadd.f32 %v1548_v44, %v3374_v61  ;;  %v1562_v18 = vmax.f32 %v1492_v1, 0.0  ;;  %v1564_v19 = vmax.f32 %v1545_v2, 0.0 }
 0x1b2   : > { %v1565_v22 = vmax.f32 %v1494_v3, 0.0  ;;  %v1567_v23 = vmax.f32 %v1547_v5, 0.0 }
 0x1b3   : > { %v1566_v24 = vmax.f32 %v1496_v6, 0.0  ;;  %v1568_v25 = vmax.f32 %v1549_v7, 0.0 }
 0x1b5   : > { %v1499_v47 = vpop.f32.mrb[20].mxu0  ;;  %v1552_v48 = vpop.f32.mrb[20].mxu1 }
 0x1b6   : > { %v1501_v51 = vpop.f32.mrb[21].mxu0  ;;  %v1554_v52 = vpop.f32.mrb[21].mxu1  ;;  %v3477_v8 = vadd.f32 %v1499_v47, %v3376_v4  ;;  %v3480_v9 = vadd.f32 %v1552_v48, %v3376_v4 }
 0x1b7   : > { %v1503_v53 = vpop.f32.mrb[22].mxu0  ;;  %v1556_v58 = vpop.f32.mrb[22].mxu1  ;;  %v3483_v10 = vadd.f32 %v1501_v51, %v3376_v4  ;;  %v3486_v11 = vadd.f32 %v1554_v52, %v3376_v4 }
 0x1b8   : > { %v1505_v56 = vpop.f32.mrb[23].mxu0  ;;  %v1558_v57 = vpop.f32.mrb[23].mxu1  ;;  %v3489_v15 = vadd.f32 %v1503_v53, %v3386_v12  ;;  %v3492_v17 = vadd.f32 %v1556_v58, %v3386_v12  ;;  %v1569_v28 = vmax.f32 %v3477_v8, 0.0  ;;  %v1571_v29 = vmax.f32 %v3480_v9, 0.0 }
 0x1b9   : > { %v3495_v20 = vadd.f32 %v1505_v56, %v3386_v12  ;;  %v3498_v21 = vadd.f32 %v1558_v57, %v3386_v12  ;;  %v1570_v32 = vmax.f32 %v3483_v10, 0.0  ;;  %v1572_v33 = vmax.f32 %v3486_v11, 0.0 }
 0x1ba   : > { %v1573_v39 = vmax.f32 %v3489_v15, 0.0  ;;  %v1575_v40 = vmax.f32 %v3492_v17, 0.0 }
 0x1bb   : > { %v1574_v47 = vmax.f32 %v3495_v20, 0.0 }
 0x1d1   : > { %v1828_v37 = vpop.f32.mrb[24].mxu0  ;;  %v1881_v38 = vpop.f32.mrb[24].mxu1 }
 0x1d2   : > { %v1829_v41 = vadd.f32 %v1828_v37, %v3372_v60  ;;  %v1882_v42 = vadd.f32 %v1881_v38, %v3372_v60  ;;  %v1830_v43 = vpop.f32.mrb[25].mxu0  ;;  %v1883_v44 = vpop.f32.mrb[25].mxu1 }
 0x1d3   : > { %v1831_v51 = vadd.f32 %v1830_v43, %v3372_v60  ;;  %v1884_v52 = vadd.f32 %v1883_v44, %v3372_v60  ;;  %v1832_v53 = vpop.f32.mrb[26].mxu0  ;;  %v1885_v58 = vpop.f32.mrb[26].mxu1 }
 0x1d4   : > { %v1900_v56 = vmax.f32 %v1829_v41, 0.0  ;;  %v1902_v57 = vmax.f32 %v1882_v42, 0.0  ;;  %v1833_v62 = vadd.f32 %v1832_v53, %v3374_v61  ;;  %v1886_v0 = vadd.f32 %v1885_v58, %v3374_v61  ;;  %v1834_v1 = vpop.f32.mrb[27].mxu0  ;;  %v1887_v2 = vpop.f32.mrb[27].mxu1 }
 0x1d5   : > { %v1901_v3 = vmax.f32 %v1831_v51, 0.0  ;;  %v1903_v5 = vmax.f32 %v1884_v52, 0.0  ;;  %v1835_v6 = vadd.f32 %v1834_v1, %v3374_v61  ;;  %v1888_v7 = vadd.f32 %v1887_v2, %v3374_v61 }
 0x1d6   : > { %v1916_v37 = vmax.f32 %v1561_v13, %v1900_v56  ;;  %v1918_v38 = vmax.f32 %v1563_v14, %v1902_v57  ;;  %v1904_v60 = vmax.f32 %v1833_v62, 0.0  ;;  %v1906_v43 = vmax.f32 %v1886_v0, 0.0 }
 0x1d7   : > { %v1917_v41 = vmax.f32 %v1562_v18, %v1901_v3  ;;  %v1919_v42 = vmax.f32 %v1564_v19, %v1903_v5  ;;  %v1905_v44 = vmax.f32 %v1835_v6, 0.0  ;;  %v1907_v53 = vmax.f32 %v1888_v7, 0.0 }
 0x1d8   : > { %v1932_v58 = vmax.f32 %v3420_v45, %v1916_v37  ;;  %v1934_v51 = vmax.f32 %v3422_v46, %v1918_v38  ;;  %v1920_v52 = vmax.f32 %v1565_v22, %v1904_v60  ;;  %v1922_v48 = vmax.f32 %v1567_v23, %v1906_v43 }
 0x1d9   : > { %v1933_v1 = vmax.f32 %v3424_v49, %v1917_v41  ;;  %v1935_v61 = vmax.f32 %v3426_v50, %v1919_v42  ;;  %v1921_v13 = vmax.f32 %v1566_v24, %v1905_v44  ;;  %v1923_v14 = vmax.f32 %v1568_v25, %v1907_v53  ;;  %v1838_v56 = vpop.f32.mrb[28].mxu0  ;;  %v1891_v57 = vpop.f32.mrb[28].mxu1 }
 0x1da   : > { %v1936_v62 = vmax.f32 %v3430_v54, %v1920_v52  ;;  %v1938_v18 = vmax.f32 %v3432_v55, %v1922_v48  ;;  %v1839_v19 = vadd.f32 %v1838_v56, %v3376_v4  ;;  %v1892_v45 = vadd.f32 %v1891_v57, %v3376_v4  ;;  %v1840_v46 = vpop.f32.mrb[29].mxu0  ;;  %v1893_v22 = vpop.f32.mrb[29].mxu1 }
 0x1db   : > { %v2415_v23 = vpack.c.bf16 %v1933_v1, %v1932_v58  ;;  %v2416_v0 = vpack.c.bf16 %v1935_v61, %v1934_v51  ;;  %v1937_v49 = vmax.f32 %v3436_v59, %v1921_v13  ;;  %v1939_v50 = vmax.f32 %v3438_v63, %v1923_v14  ;;  %v1842_v24 = vpop.f32.mrb[30].mxu0  ;;  %v1895_v25 = vpop.f32.mrb[30].mxu1 }
 0x1dc   : > { %v1908_v2 = vmax.f32 %v1839_v19, 0.0  ;;  %v1910_v3 = vmax.f32 %v1892_v45, 0.0  ;;  %v1841_v54 = vadd.f32 %v1840_v46, %v3376_v4  ;;  %v1894_v55 = vadd.f32 %v1893_v22, %v3376_v4  ;;  %v1844_v48 = vpop.f32.mrb[31].mxu0  ;;  %v1897_v5 = vpop.f32.mrb[31].mxu1 }
 0x1dd   : > { %1996 = vst [vmem:[%s3533_s12] sm:$0xff] %v2415_v23  ;;  %1997 = vst [vmem:[%s3533_s12 + $0x8] sm:$0xff] %v2416_v0  ;;  %v2417_v59 = vpack.c.bf16 %v1937_v49, %v1936_v62  ;;  %v2418_v63 = vpack.c.bf16 %v1939_v50, %v1938_v18  ;;  %v1843_v6 = vadd.f32 %v1842_v24, %v3386_v12 }
 0x1de   : > { %v1896_v7 = vadd.f32 %v1895_v25, %v3386_v12  ;;  %v1924_v37 = vmax.f32 %v1569_v28, %v1908_v2  ;;  %v1926_v4 = vmax.f32 %v1571_v29, %v1910_v3  ;;  %v1909_v38 = vmax.f32 %v1841_v54, 0.0 }
 0x1df   : > { %v1911_v60 = vmax.f32 %v1894_v55, 0.0  ;;  %1998 = vst [vmem:[%s3533_s12 + $0x10] sm:$0xff] %v2417_v59  ;;  %1999 = vst [vmem:[%s3533_s12 + $0x18] sm:$0xff] %v2418_v63  ;;  %v1912_v43 = vmax.f32 %v1843_v6, 0.0  ;;  %v1845_v42 = vadd.f32 %v1844_v48, %v3386_v12  ;;  %v1898_v44 = vadd.f32 %v1897_v5, %v3386_v12 }
 0x1e0   : > { %v1914_v41 = vmax.f32 %v1896_v7, 0.0  ;;  %v1940_v53 = vmax.f32 %v3452_v26, %v1924_v37  ;;  %v1942_v58 = vmax.f32 %v3454_v27, %v1926_v4  ;;  %v1925_v8 = vmax.f32 %v1570_v32, %v1909_v38 }
 0x1e1   : > { %v1927_v9 = vmax.f32 %v1572_v33, %v1911_v60  ;;  %v1928_v28 = vmax.f32 %v1573_v39, %v1912_v43  ;;  %v1913_v51 = vmax.f32 %v1845_v42, 0.0  ;;  %v1915_v12 = vmax.f32 %v1898_v44, 0.0 }
 0x1e2   : > { %v1930_v29 = vmax.f32 %v1575_v40, %v1914_v41  ;;  %v1941_v26 = vmax.f32 %v3456_v30, %v1925_v8  ;;  %v3612_v32 = vmax.f32 %v3498_v21, 0.0 }
 0x1e3   : > { %v1943_v27 = vmax.f32 %v3458_v31, %v1927_v9  ;;  %v1944_v10 = vmax.f32 %v3460_v16, %v1928_v28  ;;  %v1929_v15 = vmax.f32 %v1574_v47, %v1913_v51 }
 0x1e4   : > { %v1946_v11 = vmax.f32 %v3462_v34, %v1930_v29  ;;  %v1931_v33 = vmax.f32 %v3612_v32, %v1915_v12  ;;  %v2419_v17 = vpack.c.bf16 %v1941_v26, %v1940_v53  ;;  %2010 = sbr.rel (!%p2832_p6) target bundleno = 499 (0x1f3), region = 59  ;;  %v2028_v16 = vld [vmem:[%s3533_s12] sm:$0xff] (%p2832_p6)  ;;  %v2030_v34 = vld [vmem:[%s3533_s12 + $0x8] sm:$0xff] (%p2832_p6) }
 0x1e5   : > { %v2420_v39 = vpack.c.bf16 %v1943_v27, %v1942_v58  ;;  %v1945_v40 = vmax.f32 %v3464_v35, %v1929_v15  ;;  %2029 = vst [vmem:[%s2015_s4] sm:$0xff] (%p2832_p6), %v2028_v16  ;;  %2031 = vst [vmem:[%s2015_s4 + $0x8] sm:$0xff] (%p2832_p6), %v2030_v34 }
 0x1e6   : > { %v1947_v52 = vmax.f32 %v3466_v36, %v1931_v33  ;;  %2000 = vst [vmem:[%s3533_s12 + $0x20] sm:$0xff] %v2419_v17  ;;  %v2032_v35 = vld [vmem:[%s3533_s12 + $0x10] sm:$0xff] (%p2832_p6)  ;;  %v2034_v36 = vld [vmem:[%s3533_s12 + $0x18] sm:$0xff] (%p2832_p6) }
 0x1e7   : > { %2001 = vst [vmem:[%s3533_s12 + $0x28] sm:$0xff] %v2420_v39  ;;  %v2421_v30 = vpack.c.bf16 %v1945_v40, %v1944_v10  ;;  %2033 = vst [vmem:[%s2015_s4 + $0x20] sm:$0xff] (%p2832_p6), %v2032_v35 }
 0x1e8   : > { %v2422_v31 = vpack.c.bf16 %v1947_v52, %v1946_v11  ;;  %2035 = vst [vmem:[%s2015_s4 + $0x28] sm:$0xff] (%p2832_p6), %v2034_v36 }
 0x1e9   : > { %2002 = vst [vmem:[%s3533_s12 + $0x30] sm:$0xff] %v2421_v30 }
 0x1ea   : > { %2003 = vst [vmem:[%s3533_s12 + $0x38] sm:$0xff] %v2422_v31 }
 0x1ed   : > { %v2036_v20 = vld [vmem:[%s3533_s12 + $0x20] sm:$0xff] }
 0x1ee   : > { %v2038_v21 = vld [vmem:[%s3533_s12 + $0x28] sm:$0xff]  ;;  %2037 = vst [vmem:[%s2015_s4 + $0x40] sm:$0xff] %v2036_v20 }
 0x1ef   : > { %2039 = vst [vmem:[%s2015_s4 + $0x48] sm:$0xff] %v2038_v21 }
 0x1f0   : > { %v2040_v47 = vld [vmem:[%s3533_s12 + $0x30] sm:$0xff] }
 0x1f1   : > { %v2042_v1 = vld [vmem:[%s3533_s12 + $0x38] sm:$0xff]  ;;  %2041 = vst [vmem:[%s2015_s4 + $0x60] sm:$0xff] %v2040_v47 }
 0x1f2   : > { %2043 = vst [vmem:[%s2015_s4 + $0x68] sm:$0xff] %v2042_v1 }
 0x1f3 PF: > { %s13_s18 = sadd.s32 1, %s2761_s18   ;;  %s3613_s12 = smov %s2741_s13 }
 0x1f4   : > { %p10_p12 = scmp.ge.s32.totalorder %s13_s18, 6   ;;  %s3614_s13 = smov %s2840_s27 }
 0x1f5   : > { %s3615_s14 = smov %s2753_s16  ;;  %s3616_s15 = smov %s2757_s17 }
 0x1f6   : > { %s3617_s16 = smov %s3620_s19  ;;  %s3618_s17 = smov %s3624_s20 }
 0x1f7   :  { %12 = sbr.rel (!%p10_p12) target bundleno = 4 (0x4), region = 116 }

// kernel: model128_forward.5
= control target key start
LH: loop header
LB: loop body
LE: loop exit
PB: predicated region body
PF: predicated region fallthrough
CT: control target
= control target key end

     0   :  { %10 = vsyncpa [#allocation4], 0  ;;  %s9603_s0 = inlined_call_operand.vmem [shape: bf16[2,32768], index: 0, kind: input, shape index: {}]   ;;  %s9604_s1 = inlined_call_operand.hbm [shape: s8[32768,1024], index: 1, kind: input, shape index: {}]   ;;  %s9605_s2 = inlined_call_operand.vmem [shape: f32[1,1024], index: 2, kind: input, shape index: {}]   ;;  %s9606_s3 = inlined_call_operand.vmem [shape: f32[2,1024], index: 3, kind: input, shape index: {}]   ;;  %s9607_s4 = inlined_call_operand.vmem [shape: f32[1024,10], index: 4, kind: input, shape index: {}]   ;;  %s9608_s5 = inlined_call_operand.vmem [shape: f32[1,2,10], index: 5, kind: output, shape index: {}]  }
   0x1   :  { %12 = vsyncpa [#allocation4 + $0x1], 0  ;;  %s7704_s18 = smov 0   ;;  %s7706_s19 = smov 0  }
   0x2   :  { %s7708_s20 = smov 0   ;;  %s7710_s21 = smov 0  }
   0x3   :  { %s7712_s22 = smov 0   ;;  %s7714_s23 = smov 0  }
   0x4 LB: > { %s6994_s24 = sadd.s32 4294967295, %s7666_s23   ;;  %s27_s25 = sadd.s32 1, %s7662_s22  ;;  %s7666_s23 = sphi %s7714_s23, %s18_s23   ;;  %s7662_s22 = sphi %s7712_s22, %s9616_s22   ;;  %s7658_s21 = sphi %s7710_s21, %s9615_s21   ;;  %s7654_s20 = sphi %s7708_s20, %s9614_s20   ;;  %s7650_s19 = sphi %s7706_s19, %s9613_s19   ;;  %s7646_s18 = sphi %s7704_s18, %s9612_s18  }
   0x5   : > { %p28_p0 = scmp.ge.s32.totalorder %s27_s25, 8  ;;  %s65_s26 = sadd.s32 1, %s7654_s20 }
   0x6   : > { %p72_p1 = scmp.ne.s32.totalorder %s7654_s20, %s7650_s19  ;;  %p73_p2 = scmp.eq.s32.totalorder %s7666_s23, 0 }
   0x7   : > { %s9618_s25 = smov (%p28_p0, %s27_s25), 0  ;;  %p78_p4 = scmp.ne.s32.totalorder %s7650_s19, %s7646_s18 }
   0x8   : > { %p7740_p3 = por %p73_p2, %p72_p1  ;;  %s60_s28 = ssub.s32 %s7662_s22, %s9618_s25 }
   0x9   : > { %p79_p5 = scmp.eq.s32.totalorder %s6994_s24, 0  ;;  %p63_p6 = scmp.eq.s32.totalorder %s60_s28, 0 }
   0xa   : > { %p7528_p8 = scmp.lt.s32.totalorder %s7666_s23, 8  ;;  %s240_s6 = sand.u32 1, %s7654_s20  }
   0xb   : > { %p7747_p7 = por %p79_p5, %p78_p4  ;;  %s7013_s7 = sshll.u32 %s7662_s22, 17 }
   0xc   : > { %s7753_s30 = scalar_select %p63_p6, %s7654_s20, %s65_s26  }
   0xd   : > { %s7000_s8 = sshll.u32 %s240_s6, 13  ;;  %s7760_s11 = scalar_lea.hbm %s9604_s1, %s7013_s7 }
   0xe   : > { %s244_s12 = scalar_lea.vmem [#allocation3], %s7000_s8  ;;  %p7764_p9 = pnand %p7528_p8, %p7740_p3 }
   0xf   : > { %s254_s13 = sshll.u32 %s244_s12, 4  ;;  %s7770_s15 = scalar_lea.sflag [#allocation4], %s240_s6  ;;  %s7768_s13 = int_to_ptr.vmem [resolvable:$true] %s254_s13 }
  0x10   : > { %s7586_s16 = scalar_lea.hbm %s7760_s11, 131072  ;;  %p7588_p11 = pneg %p7764_p9 }
  0x11   : > { %p7587_p10 = scmp.ne.s32.totalorder %s7760_s11, %s7586_s16  ;;  %s7591_s24 = scalar_lea.hbm %s9604_s1, 1048576 }
  0x12   : > { %p7592_p0 = scmp.lt.u32.totalorder %s7760_s11, %s9604_s1  ;;  %p7593_p1 = scmp.lt.u32.totalorder %s7591_s24, %s7586_s16 }
  0x13   : > { %p7589_p12 = pnand %p7588_p11, %p7587_p10  ;;  %p7595_p3 = scmp.lt.u32.totalorder %s7586_s16, %s7760_s11 }
  0x14   : > { %p7594_p2 = por %p7593_p1, %p7592_p0 }
  0x15   : > { %p7590_p13 = pneg %p7589_p12 }
  0x16   : > { %p7596_p4 = por %p7595_p3, %p7594_p2 }
  0x18   : > { %p7597_p5 = pnand %p7596_p4, %p7590_p13 }
  0x1a   : > { %7600 = shalt.err (!%p7597_p5)
}
  0x1b   : > { %s7601_s28 = scalar_lea.vmem %s7768_s13, 131072  ;;  %s7668_s6 = smov [#allocation3]  }
  0x1c   : > { %p7602_p6 = scmp.ne.s32.totalorder %s7768_s13, %s7601_s28  ;;  %s7606_s7 = sshll.u32 %s7668_s6, 4  ;;  %s7607_s7 = int_to_ptr.vmem [resolvable:$false] %s7606_s7 }
  0x1d   : > { %s7608_s8 = scalar_lea.vmem %s7607_s7, 262144  ;;  %p7609_p12 = scmp.lt.s32.totalorder %s7768_s13, %s7607_s7 }
  0x1e   : > { %p7604_p8 = pnand %p7602_p6, %p7588_p11  ;;  %p7610_p0 = scmp.lt.s32.totalorder %s7608_s8, %s7601_s28 }
  0x20   : > { %p7605_p10 = pneg %p7604_p8  ;;  %p7611_p1 = por %p7610_p0, %p7609_p12 }
  0x22   : > { %p7612_p2 = pnand %p7611_p1, %p7605_p10 }
  0x24   : > { %7615 = shalt.err (!%p7612_p2)
}
  0x25   : > { %s7669_s9 = smov 1024   ;;  %s7670_s10 = smov 64  }
  0x26   : > { %7527 = dma.hbm_to_vmem [thread:$0]  (!%p7764_p9), %s7760_s11, 131072, %s7768_s13, %s7770_s15, %s7669_s9, %s7669_s9, %s7670_s10  }
  0x27   : > { %p7004_p11 = scmp.ge.s32.totalorder %s7666_s23, 1  ;;  %p262_p13 = scmp.lt.s32.totalorder %s7666_s23, 9 }
  0x29   : > { %p263_p3 = pnand %p7004_p11, %p262_p13 }
  0x2a   : > { %s268_s12 = sand.u32 (!%p263_p3), 1, %s7650_s19  }
  0x2b   : > { %266 = sbr.rel (%p263_p3) target bundleno = 2597 (0xa25), region = 40  ;;  %s7005_s16 = sshll.u32 (!%p263_p3), %s268_s12, 13 }
  0x2c   : > { %s269_s17 = scalar_lea.sflag (!%p263_p3), [#allocation4], %s268_s12  ;;  %s7801_s18 = scalar_lea.vmem (!%p263_p3), [#allocation3], %s7005_s16 }
  0x32   : > { %7641 = dma.done.wait (%p7747_p7), %s269_s17, 131072  }
  0x33   : > { %7643 = vsyncadd (%p7747_p7), %s269_s17, 4294836224  ;;  %s7006_s24 = sshll.u32 %s7658_s21, 5  ;;  %p7007_p9 = scmp.ne.s32.totalorder %s7658_s21, 0 }
  0x34   : > { %p317_p4 = scmp.lt.s32.totalorder %s7006_s24, 255  ;;  %v7671_v0 = vmov (!%p7007_p9), 0.0  }
  0x35   : > { %347 = sbr.rel (%p7007_p9) target bundleno = 60 (0x3c), region = 48  ;;  %348 = vst [vmem:[#allocation2] sm:$0xff] (!%p7007_p9), %v7671_v0  ;;  %349 = vst [vmem:[#allocation2 + $0x8] sm:$0xff] (!%p7007_p9), %v7671_v0 }
  0x36   : > { %s9620_s24 = smov (!%p317_p4, %s7006_s24), 255 }
  0x37   : > { %s7811_s14 = scalar_lea.vmem %s9603_s0, %s9620_s24 }
  0x3c PF: > { %v357_v1 = vld [vmem:[%s7801_s18 + $0x8] sm:$0xff]  ;;  %v359_v2 = vld [vmem:[%s7801_s18 + $0x18] sm:$0xff]  ;;  %v356_v3 = vld [vmem:[%s7801_s18] sm:$0xff]  ;;  %v3436_v31 = vlaneseq  ;;  %v7672_v36 = vmov 1966171168   ;;  %p7008_p7 = scmp.ne.s32.totalorder %s7658_s21, 7 }
  0x3d   : > { %v1381_v4 = vunpack.c.l.s8.bf16 %v357_v1  ;;  %v1389_v5 = vunpack.c.h.s8.bf16 %v357_v1  ;;  %v1383_v6 = vunpack.c.l.s8.bf16 %v359_v2  ;;  %v1391_v7 = vunpack.c.h.s8.bf16 %v359_v2  ;;  %v358_v8 = vld [vmem:[%s7801_s18 + $0x10] sm:$0xff]  ;;  %v365_v11 = vld [vmem:[%s7801_s18 + $0x48] sm:$0xff]  ;;  %v367_v12 = vld [vmem:[%s7801_s18 + $0x58] sm:$0xff] }
  0x3e   : > { %v1380_v9 = vunpack.c.l.s8.bf16 %v356_v3  ;;  %v1382_v10 = vunpack.c.l.s8.bf16 %v358_v8  ;;  %v1388_v13 = vunpack.c.h.s8.bf16 %v356_v3  ;;  %v1390_v14 = vunpack.c.h.s8.bf16 %v358_v8  ;;  %v364_v17 = vld [vmem:[%s7801_s18 + $0x40] sm:$0xff]  ;;  %v366_v18 = vld [vmem:[%s7801_s18 + $0x50] sm:$0xff]  ;;  %v373_v23 = vld [vmem:[%s7801_s18 + $0x88] sm:$0xff] }
  0x3f   : > { %3660 = vmatprep.subr.bf16.mxu0 %v1381_v4  ;;  %4316 = vmatprep.subr.bf16.mxu1 %v1383_v6  ;;  %v1397_v15 = vunpack.c.l.s8.bf16 %v365_v11  ;;  %v1399_v16 = vunpack.c.l.s8.bf16 %v367_v12  ;;  %v1396_v19 = vunpack.c.l.s8.bf16 %v364_v17  ;;  %v1398_v20 = vunpack.c.l.s8.bf16 %v366_v18  ;;  %v375_v24 = vld [vmem:[%s7801_s18 + $0x98] sm:$0xff]  ;;  %v372_v29 = vld [vmem:[%s7801_s18 + $0x80] sm:$0xff]  ;;  %v374_v30 = vld [vmem:[%s7801_s18 + $0x90] sm:$0xff] }
  0x40   : > { %3661 = vmatpush1.bf16.msra.mxu0 %v1380_v9  ;;  %4317 = vmatpush1.bf16.msra.mxu1 %v1382_v10  ;;  %v1405_v21 = vunpack.c.h.s8.bf16 %v365_v11  ;;  %v1407_v22 = vunpack.c.h.s8.bf16 %v367_v12  ;;  %v1404_v25 = vunpack.c.h.s8.bf16 %v364_v17  ;;  %v1406_v26 = vunpack.c.h.s8.bf16 %v366_v18  ;;  %v381_v39 = vld [vmem:[%s7801_s18 + $0xc8] sm:$0xff]  ;;  %v383_v40 = vld [vmem:[%s7801_s18 + $0xd8] sm:$0xff]  ;;  %v7831_v44 = vld [vmem:[%s7811_s14] sm:$0xff] }
  0x41   : > { %3662 = vmatprep.subr.bf16.mxu0 %v1389_v5  ;;  %4318 = vmatprep.subr.bf16.mxu1 %v1391_v7  ;;  %v1413_v27 = vunpack.c.l.s8.bf16 %v373_v23  ;;  %v1415_v28 = vunpack.c.l.s8.bf16 %v375_v24  ;;  %v1412_v32 = vunpack.c.l.s8.bf16 %v372_v29  ;;  %v1414_v33 = vunpack.c.l.s8.bf16 %v374_v30  ;;  %v380_v47 = vld [vmem:[%s7801_s18 + $0xc0] sm:$0xff]  ;;  %v382_v48 = vld [vmem:[%s7801_s18 + $0xd0] sm:$0xff]  ;;  %v389_v56 = vld [vmem:[%s7801_s18 + $0x108] sm:$0xff] }
  0x42   : > { %v1421_v34 = vunpack.c.h.s8.bf16 %v373_v23  ;;  %v1423_v35 = vunpack.c.h.s8.bf16 %v375_v24  ;;  %v3434_v37 = vunpack.c.l.s4 %v7672_v36  ;;  %v7826_v38 = vshrl.u32 %v3436_v31, 7  ;;  %v391_v57 = vld [vmem:[%s7801_s18 + $0x118] sm:$0xff]  ;;  %v388_v63 = vld [vmem:[%s7801_s18 + $0x100] sm:$0xff]  ;;  %v390_v0 = vld [vmem:[%s7801_s18 + $0x110] sm:$0xff] }
  0x43   : > { %v1420_v42 = vunpack.c.h.s8.bf16 %v372_v29  ;;  %v1422_v43 = vunpack.c.h.s8.bf16 %v374_v30  ;;  %v1429_v45 = vunpack.c.l.s8.bf16 %v381_v39  ;;  %v1431_v46 = vunpack.c.l.s8.bf16 %v383_v40  ;;  %v397_v5 = vld [vmem:[%s7801_s18 + $0x148] sm:$0xff]  ;;  %v399_v6 = vld [vmem:[%s7801_s18 + $0x158] sm:$0xff]  ;;  %v396_v11 = vld [vmem:[%s7801_s18 + $0x140] sm:$0xff] }
  0x44   : > { %3663 = vmatpush1.bf16.msra.mxu0 %v1388_v13  ;;  %4319 = vmatpush1.bf16.msra.mxu1 %v1390_v14  ;;  %v3435_v41 = vunpack.c.0.s8 %v3434_v37  ;;  %v1428_v51 = vunpack.c.l.s8.bf16 %v380_v47  ;;  %v1430_v52 = vunpack.c.l.s8.bf16 %v382_v48  ;;  %v1437_v53 = vunpack.c.h.s8.bf16 %v381_v39  ;;  %v398_v12 = vld [vmem:[%s7801_s18 + $0x150] sm:$0xff]  ;;  %v405_v17 = vld [vmem:[%s7801_s18 + $0x188] sm:$0xff]  ;;  %v407_v18 = vld [vmem:[%s7801_s18 + $0x198] sm:$0xff] }
  0x45   : > { %3664 = vmatprep.subr.bf16.mxu0 %v1397_v15  ;;  %4320 = vmatprep.subr.bf16.mxu1 %v1399_v16  ;;  %v1439_v54 = vunpack.c.h.s8.bf16 %v383_v40  ;;  %v1436_v59 = vunpack.c.h.s8.bf16 %v380_v47  ;;  %v1438_v60 = vunpack.c.h.s8.bf16 %v382_v48  ;;  %v1445_v61 = vunpack.c.l.s8.bf16 %v389_v56  ;;  %v404_v23 = vld [vmem:[%s7801_s18 + $0x180] sm:$0xff]  ;;  %v406_v24 = vld [vmem:[%s7801_s18 + $0x190] sm:$0xff]  ;;  %v413_v29 = vld [vmem:[%s7801_s18 + $0x1c8] sm:$0xff] }
  0x46   : > { %v7836_v49 = vsub.s32 %v3435_v41, %v7826_v38  ;;  %v1447_v62 = vunpack.c.l.s8.bf16 %v391_v57  ;;  %v1444_v1 = vunpack.c.l.s8.bf16 %v388_v63  ;;  %v1446_v2 = vunpack.c.l.s8.bf16 %v390_v0  ;;  %v415_v30 = vld [vmem:[%s7801_s18 + $0x1d8] sm:$0xff]  ;;  %v414_v36 = vld [vmem:[%s7801_s18 + $0x1d0] sm:$0xff] }
  0x47   : > { %v1453_v3 = vunpack.c.h.s8.bf16 %v389_v56  ;;  %v1455_v4 = vunpack.c.h.s8.bf16 %v391_v57  ;;  %v1452_v7 = vunpack.c.h.s8.bf16 %v388_v63  ;;  %v1454_v8 = vunpack.c.h.s8.bf16 %v390_v0 }
  0x48   : > { %3665 = vmatpush1.bf16.msra.mxu0 %v1396_v19  ;;  %4321 = vmatpush1.bf16.msra.mxu1 %v1398_v20  ;;  %v7840_v50 = vrot.slane %v7831_v44, %v7836_v49  ;;  %v1461_v9 = vunpack.c.l.s8.bf16 %v397_v5  ;;  %v1463_v10 = vunpack.c.l.s8.bf16 %v399_v6  ;;  %v1460_v13 = vunpack.c.l.s8.bf16 %v396_v11 }
  0x49   : > { %3666 = vmatprep.subr.bf16.mxu0 %v1405_v21  ;;  %4322 = vmatprep.subr.bf16.mxu1 %v1407_v22  ;;  %v1462_v14 = vunpack.c.l.s8.bf16 %v398_v12  ;;  %v1469_v15 = vunpack.c.h.s8.bf16 %v397_v5  ;;  %v1471_v16 = vunpack.c.h.s8.bf16 %v399_v6  ;;  %v1468_v19 = vunpack.c.h.s8.bf16 %v396_v11 }
  0x4a   : > { %v3447_v55 = vcombine.high %v7840_v50, %v7840_v50  ;;  %v1470_v20 = vunpack.c.h.s8.bf16 %v398_v12  ;;  %v1477_v21 = vunpack.c.l.s8.bf16 %v405_v17  ;;  %v1479_v22 = vunpack.c.l.s8.bf16 %v407_v18 }
  0x4b   : > { %v1484_v31 = vunpack.c.h.s8.bf16 %v404_v23  ;;  %v1494_v39 = vunpack.c.l.s8.bf16 %v414_v36  ;;  %v1501_v40 = vunpack.c.h.s8.bf16 %v413_v29  ;;  %v1503_v41 = vunpack.c.h.s8.bf16 %v415_v30 }
  0x4c   : > { %3667 = vmatpush1.bf16.msra.mxu0 %v1404_v25  ;;  %4323 = vmatpush1.bf16.msra.mxu1 %v1406_v26  ;;  %v7847_v58 = vrot.slane %v3447_v55, %v7836_v49  ;;  %v1476_v25 = vunpack.c.l.s8.bf16 %v404_v23  ;;  %v1478_v26 = vunpack.c.l.s8.bf16 %v406_v24  ;;  %vm6868_vm0 = vcmask (!%p7008_p7), 74752  }
  0x4d   : > { %3668 = vmatprep.subr.bf16.mxu0 %v1413_v27  ;;  %4324 = vmatprep.subr.bf16.mxu1 %v1415_v28  ;;  %v1485_v27 = vunpack.c.h.s8.bf16 %v405_v17  ;;  %v1487_v28 = vunpack.c.h.s8.bf16 %v407_v18 }
  0x4e   : > { %3692 = vmatprep.mubr.bf16.mxu0 %v7847_v58  ;;  %4348 = vmatprep.mubr.bf16.mxu1 %v7847_v58 }
  0x50   : > { %3669 = vmatpush1.bf16.msra.mxu0 %v1412_v32  ;;  %4325 = vmatpush1.bf16.msra.mxu1 %v1414_v33  ;;  %v1486_v32 = vunpack.c.h.s8.bf16 %v406_v24  ;;  %v1493_v33 = vunpack.c.l.s8.bf16 %v413_v29 }
  0x51   : > { %3670 = vmatprep.subr.bf16.mxu0 %v1421_v34  ;;  %4326 = vmatprep.subr.bf16.mxu1 %v1423_v35  ;;  %v1495_v34 = vunpack.c.l.s8.bf16 %v415_v30  ;;  %v412_v35 = vld [vmem:[%s7801_s18 + $0x1c0] sm:$0xff] }
  0x52   : > { %v1492_v37 = vunpack.c.l.s8.bf16 %v412_v35 }
  0x54   : > { %3671 = vmatpush1.bf16.msra.mxu0 %v1420_v42  ;;  %4327 = vmatpush1.bf16.msra.mxu1 %v1422_v43  ;;  %v421_v42 = vld [vmem:[%s7801_s18 + $0x208] sm:$0xff]  ;;  %v423_v43 = vld [vmem:[%s7801_s18 + $0x218] sm:$0xff] }
  0x55   : > { %3672 = vmatprep.subr.bf16.mxu0 %v1429_v45  ;;  %4328 = vmatprep.subr.bf16.mxu1 %v1431_v46  ;;  %v1500_v45 = vunpack.c.h.s8.bf16 %v412_v35  ;;  %v1502_v46 = vunpack.c.h.s8.bf16 %v414_v36  ;;  %v1509_v47 = vunpack.c.l.s8.bf16 %v421_v42  ;;  %v1511_v48 = vunpack.c.l.s8.bf16 %v423_v43 }
  0x56   : > { %v1517_v56 = vunpack.c.h.s8.bf16 %v421_v42  ;;  %v1519_v57 = vunpack.c.h.s8.bf16 %v423_v43 }
  0x58   : > { %3673 = vmatpush1.bf16.msra.mxu0 %v1428_v51  ;;  %4329 = vmatpush1.bf16.msra.mxu1 %v1430_v52  ;;  %v420_v51 = vld [vmem:[%s7801_s18 + $0x200] sm:$0xff]  ;;  %v422_v52 = vld [vmem:[%s7801_s18 + $0x210] sm:$0xff] }
  0x59   : > { %3674 = vmatprep.subr.bf16.mxu0 %v1437_v53  ;;  %4330 = vmatprep.subr.bf16.mxu1 %v1439_v54  ;;  %v7871_v53 = vrot.slane %v7840_v50, %v7836_v49  ;;  %v1508_v54 = vunpack.c.l.s8.bf16 %v420_v51  ;;  %v1510_v55 = vunpack.c.l.s8.bf16 %v422_v52  ;;  %v1516_v50 = vunpack.c.h.s8.bf16 %v420_v51 }
  0x5c   : > { %3675 = vmatpush1.bf16.msra.mxu0 %v1436_v59  ;;  %4331 = vmatpush1.bf16.msra.mxu1 %v1438_v60  ;;  %v429_v59 = vld [vmem:[%s7801_s18 + $0x248] sm:$0xff]  ;;  %v431_v60 = vld [vmem:[%s7801_s18 + $0x258] sm:$0xff] }
  0x5d   : > { %3676 = vmatprep.subr.bf16.mxu0 %v1445_v61  ;;  %4332 = vmatprep.subr.bf16.mxu1 %v1447_v62  ;;  %v7877_v61 = vcombine.high %v7847_v58, %v7847_v58  ;;  %v1518_v62 = vunpack.c.h.s8.bf16 %v422_v52  ;;  %v1525_v63 = vunpack.c.l.s8.bf16 %v429_v59  ;;  %v1527_v0 = vunpack.c.l.s8.bf16 %v431_v60 }
  0x5e   : > { %v1533_v5 = vunpack.c.h.s8.bf16 %v429_v59  ;;  %v1535_v6 = vunpack.c.h.s8.bf16 %v431_v60 }
  0x60   : > { %3677 = vmatpush1.bf16.msra.mxu0 %v1444_v1  ;;  %4333 = vmatpush1.bf16.msra.mxu1 %v1446_v2  ;;  %v428_v1 = vld [vmem:[%s7801_s18 + $0x240] sm:$0xff]  ;;  %v430_v2 = vld [vmem:[%s7801_s18 + $0x250] sm:$0xff] }
  0x61   : > { %3678 = vmatprep.subr.bf16.mxu0 %v1453_v3  ;;  %4334 = vmatprep.subr.bf16.mxu1 %v1455_v4  ;;  %v1524_v3 = vunpack.c.l.s8.bf16 %v428_v1  ;;  %v1526_v4 = vunpack.c.l.s8.bf16 %v430_v2 }
  0x64   : > { %3679 = vmatpush1.bf16.msra.mxu0 %v1452_v7  ;;  %4335 = vmatpush1.bf16.msra.mxu1 %v1454_v8  ;;  %v437_v7 = vld [vmem:[%s7801_s18 + $0x288] sm:$0xff]  ;;  %v439_v8 = vld [vmem:[%s7801_s18 + $0x298] sm:$0xff] }
  0x65   : > { %3680 = vmatprep.subr.bf16.mxu0 %v1461_v9  ;;  %4336 = vmatprep.subr.bf16.mxu1 %v1463_v10  ;;  %v1532_v9 = vunpack.c.h.s8.bf16 %v428_v1  ;;  %v1534_v10 = vunpack.c.h.s8.bf16 %v430_v2  ;;  %v1541_v11 = vunpack.c.l.s8.bf16 %v437_v7  ;;  %v1543_v12 = vunpack.c.l.s8.bf16 %v439_v8 }
  0x66   : > { %v1549_v17 = vunpack.c.h.s8.bf16 %v437_v7  ;;  %v1551_v18 = vunpack.c.h.s8.bf16 %v439_v8 }
  0x68   : > { %3681 = vmatpush1.bf16.msra.mxu0 %v1460_v13  ;;  %4337 = vmatpush1.bf16.msra.mxu1 %v1462_v14  ;;  %v436_v13 = vld [vmem:[%s7801_s18 + $0x280] sm:$0xff]  ;;  %v438_v14 = vld [vmem:[%s7801_s18 + $0x290] sm:$0xff] }
  0x69   : > { %3682 = vmatprep.subr.bf16.mxu0 %v1469_v15  ;;  %4338 = vmatprep.subr.bf16.mxu1 %v1471_v16  ;;  %v1540_v15 = vunpack.c.l.s8.bf16 %v436_v13  ;;  %v1542_v16 = vunpack.c.l.s8.bf16 %v438_v14 }
  0x6c   : > { %3683 = vmatpush1.bf16.msra.mxu0 %v1468_v19  ;;  %4339 = vmatpush1.bf16.msra.mxu1 %v1470_v20  ;;  %v445_v19 = vld [vmem:[%s7801_s18 + $0x2c8] sm:$0xff]  ;;  %v447_v20 = vld [vmem:[%s7801_s18 + $0x2d8] sm:$0xff] }
  0x6d   : > { %3684 = vmatprep.subr.bf16.mxu0 %v1477_v21  ;;  %4340 = vmatprep.subr.bf16.mxu1 %v1479_v22  ;;  %v1548_v21 = vunpack.c.h.s8.bf16 %v436_v13  ;;  %v1550_v22 = vunpack.c.h.s8.bf16 %v438_v14  ;;  %v1557_v23 = vunpack.c.l.s8.bf16 %v445_v19  ;;  %v1559_v24 = vunpack.c.l.s8.bf16 %v447_v20 }
  0x6e   : > { %v1565_v29 = vunpack.c.h.s8.bf16 %v445_v19  ;;  %v1567_v30 = vunpack.c.h.s8.bf16 %v447_v20 }
  0x70   : > { %3685 = vmatpush1.bf16.msra.mxu0 %v1476_v25  ;;  %4341 = vmatpush1.bf16.msra.mxu1 %v1478_v26  ;;  %v444_v25 = vld [vmem:[%s7801_s18 + $0x2c0] sm:$0xff]  ;;  %v446_v26 = vld [vmem:[%s7801_s18 + $0x2d0] sm:$0xff] }
  0x71   : > { %3686 = vmatprep.subr.bf16.mxu0 %v1485_v27  ;;  %4342 = vmatprep.subr.bf16.mxu1 %v1487_v28  ;;  %v1556_v27 = vunpack.c.l.s8.bf16 %v444_v25  ;;  %v1558_v28 = vunpack.c.l.s8.bf16 %v446_v26 }
  0x74   : > { %3687 = vmatpush1.bf16.msra.mxu0 %v1484_v31  ;;  %4343 = vmatpush1.bf16.msra.mxu1 %v1486_v32  ;;  %v453_v31 = vld [vmem:[%s7801_s18 + $0x308] sm:$0xff]  ;;  %v455_v32 = vld [vmem:[%s7801_s18 + $0x318] sm:$0xff] }
  0x75   : > { %3688 = vmatprep.subr.bf16.mxu0 %v1493_v33  ;;  %4344 = vmatprep.subr.bf16.mxu1 %v1495_v34  ;;  %v1564_v33 = vunpack.c.h.s8.bf16 %v444_v25  ;;  %v1566_v34 = vunpack.c.h.s8.bf16 %v446_v26  ;;  %v1573_v35 = vunpack.c.l.s8.bf16 %v453_v31  ;;  %v1575_v36 = vunpack.c.l.s8.bf16 %v455_v32 }
  0x76   : > { %v1581_v42 = vunpack.c.h.s8.bf16 %v453_v31  ;;  %v1583_v43 = vunpack.c.h.s8.bf16 %v455_v32  ;;  %v7922_v31 = vcombine.high %v7871_v53, %v7871_v53 }
  0x78   : > { %3689 = vmatpush1.bf16.msra.mxu0 %v1492_v37  ;;  %4345 = vmatpush1.bf16.msra.mxu1 %v1494_v39  ;;  %v452_v37 = vld [vmem:[%s7801_s18 + $0x300] sm:$0xff]  ;;  %v454_v39 = vld [vmem:[%s7801_s18 + $0x310] sm:$0xff] }
  0x79   : > { %3690 = vmatprep.subr.bf16.mxu0 %v1501_v40  ;;  %4346 = vmatprep.subr.bf16.mxu1 %v1503_v41  ;;  %v1572_v40 = vunpack.c.l.s8.bf16 %v452_v37  ;;  %v1574_v41 = vunpack.c.l.s8.bf16 %v454_v39 }
  0x7c   : > { %3691 = vmatpush1.bf16.msra.mxu0 %v1500_v45  ;;  %4347 = vmatpush1.bf16.msra.mxu1 %v1502_v46  ;;  %v461_v45 = vld [vmem:[%s7801_s18 + $0x348] sm:$0xff]  ;;  %v463_v46 = vld [vmem:[%s7801_s18 + $0x358] sm:$0xff] }
  0x7d   : > { %3701 = vmatprep.subr.bf16.mxu0 %v1509_v47  ;;  %4357 = vmatprep.subr.bf16.mxu1 %v1511_v48  ;;  %v1580_v47 = vunpack.c.h.s8.bf16 %v452_v37  ;;  %v1582_v48 = vunpack.c.h.s8.bf16 %v454_v39  ;;  %v1589_v51 = vunpack.c.l.s8.bf16 %v461_v45  ;;  %v1591_v52 = vunpack.c.l.s8.bf16 %v463_v46  ;;  %v495_v37 = vld [vmem:[%s7801_s18 + $0x458] sm:$0xff] }
  0x7e   : > { %v1597_v59 = vunpack.c.h.s8.bf16 %v461_v45  ;;  %v1599_v60 = vunpack.c.h.s8.bf16 %v463_v46  ;;  %v492_v45 = vld [vmem:[%s7801_s18 + $0x440] sm:$0xff]  ;;  %v494_v46 = vld [vmem:[%s7801_s18 + $0x450] sm:$0xff] }
  0x7f   : > { %3693 = vmatmul.mubr.bf16.vlgmr.msra.gmra.mrb[0].mxu0 %v7871_v53  ;;  %4349 = vmatmul.mubr.bf16.vlgmr.msra.gmra.mrb[0].mxu1 %v7871_v53 }
  0x80   : > { %3702 = vmatpush1.bf16.msra.mxu0 %v1508_v54  ;;  %4358 = vmatpush1.bf16.msra.mxu1 %v1510_v55  ;;  %v460_v54 = vld [vmem:[%s7801_s18 + $0x340] sm:$0xff]  ;;  %v462_v55 = vld [vmem:[%s7801_s18 + $0x350] sm:$0xff] }
  0x81   : > { %3703 = vmatprep.subr.bf16.mxu0 %v1517_v56  ;;  %4359 = vmatprep.subr.bf16.mxu1 %v1519_v57  ;;  %v1588_v56 = vunpack.c.l.s8.bf16 %v460_v54  ;;  %v1590_v57 = vunpack.c.l.s8.bf16 %v462_v55 }
  0x82   : > { %3733 = vmatprep.mubr.bf16.mxu0 %v7877_v61  ;;  %4389 = vmatprep.mubr.bf16.mxu1 %v7877_v61 }
  0x84   : > { %3704 = vmatpush1.bf16.msra.mxu0 %v1516_v50  ;;  %4360 = vmatpush1.bf16.msra.mxu1 %v1518_v62  ;;  %v469_v50 = vld [vmem:[%s7801_s18 + $0x388] sm:$0xff]  ;;  %v471_v62 = vld [vmem:[%s7801_s18 + $0x398] sm:$0xff] }
  0x85   : > { %3705 = vmatprep.subr.bf16.mxu0 %v1525_v63  ;;  %4361 = vmatprep.subr.bf16.mxu1 %v1527_v0  ;;  %v1596_v63 = vunpack.c.h.s8.bf16 %v460_v54  ;;  %v1598_v0 = vunpack.c.h.s8.bf16 %v462_v55  ;;  %v1605_v1 = vunpack.c.l.s8.bf16 %v469_v50  ;;  %v1607_v2 = vunpack.c.l.s8.bf16 %v471_v62  ;;  %v501_v54 = vld [vmem:[%s7801_s18 + $0x488] sm:$0xff]  ;;  %v503_v55 = vld [vmem:[%s7801_s18 + $0x498] sm:$0xff] }
  0x86   : > { %v1613_v7 = vunpack.c.h.s8.bf16 %v469_v50  ;;  %v1615_v8 = vunpack.c.h.s8.bf16 %v471_v62  ;;  %v500_v50 = vld [vmem:[%s7801_s18 + $0x480] sm:$0xff]  ;;  %v502_v62 = vld [vmem:[%s7801_s18 + $0x490] sm:$0xff] }
  0x88   : > { %3706 = vmatpush1.bf16.msra.mxu0 %v1524_v3  ;;  %4362 = vmatpush1.bf16.msra.mxu1 %v1526_v4  ;;  %v468_v3 = vld [vmem:[%s7801_s18 + $0x380] sm:$0xff]  ;;  %v470_v4 = vld [vmem:[%s7801_s18 + $0x390] sm:$0xff] }
  0x89   : > { %3707 = vmatprep.subr.bf16.mxu0 %v1533_v5  ;;  %4363 = vmatprep.subr.bf16.mxu1 %v1535_v6  ;;  %v1604_v5 = vunpack.c.l.s8.bf16 %v468_v3  ;;  %v1606_v6 = vunpack.c.l.s8.bf16 %v470_v4 }
  0x8c   : > { %3708 = vmatpush1.bf16.msra.mxu0 %v1532_v9  ;;  %4364 = vmatpush1.bf16.msra.mxu1 %v1534_v10  ;;  %v477_v9 = vld [vmem:[%s7801_s18 + $0x3c8] sm:$0xff]  ;;  %v479_v10 = vld [vmem:[%s7801_s18 + $0x3d8] sm:$0xff] }
  0x8d   : > { %3709 = vmatprep.subr.bf16.mxu0 %v1541_v11  ;;  %4365 = vmatprep.subr.bf16.mxu1 %v1543_v12  ;;  %v1612_v11 = vunpack.c.h.s8.bf16 %v468_v3  ;;  %v1614_v12 = vunpack.c.h.s8.bf16 %v470_v4  ;;  %v1621_v13 = vunpack.c.l.s8.bf16 %v477_v9  ;;  %v1623_v14 = vunpack.c.l.s8.bf16 %v479_v10  ;;  %v509_v3 = vld [vmem:[%s7801_s18 + $0x4c8] sm:$0xff]  ;;  %v511_v4 = vld [vmem:[%s7801_s18 + $0x4d8] sm:$0xff] }
  0x8e   : > { %v1629_v20 = vunpack.c.h.s8.bf16 %v477_v9  ;;  %v508_v9 = vld [vmem:[%s7801_s18 + $0x4c0] sm:$0xff] }
  0x90   : > { %3710 = vmatpush1.bf16.msra.mxu0 %v1540_v15  ;;  %4366 = vmatpush1.bf16.msra.mxu1 %v1542_v16  ;;  %v476_v15 = vld [vmem:[%s7801_s18 + $0x3c0] sm:$0xff]  ;;  %v478_v16 = vld [vmem:[%s7801_s18 + $0x3d0] sm:$0xff] }
  0x91   : > { %3711 = vmatprep.subr.bf16.mxu0 %v1549_v17  ;;  %4367 = vmatprep.subr.bf16.mxu1 %v1551_v18  ;;  %v3432_v17 = vcombine.high %v7831_v44, %v7831_v44  ;;  %v1620_v18 = vunpack.c.l.s8.bf16 %v476_v15  ;;  %v1622_v19 = vunpack.c.l.s8.bf16 %v478_v16  ;;  %v1628_v25 = vunpack.c.h.s8.bf16 %v476_v15  ;;  %v517_v15 = vld [vmem:[%s7801_s18 + $0x508] sm:$0xff] }
  0x92   : > { %v1630_v26 = vunpack.c.h.s8.bf16 %v478_v16  ;;  %v519_v16 = vld [vmem:[%s7801_s18 + $0x518] sm:$0xff] }
  0x94   : > { %3712 = vmatpush1.bf16.msra.mxu0 %v1548_v21  ;;  %4368 = vmatpush1.bf16.msra.mxu1 %v1550_v22  ;;  %v1631_v21 = vunpack.c.h.s8.bf16 %v479_v10  ;;  %v485_v22 = vld [vmem:[%s7801_s18 + $0x408] sm:$0xff]  ;;  %v510_v10 = vld [vmem:[%s7801_s18 + $0x4d0] sm:$0xff] }
  0x95   : > { %3713 = vmatprep.subr.bf16.mxu0 %v1557_v23  ;;  %4369 = vmatprep.subr.bf16.mxu1 %v1559_v24  ;;  %v487_v23 = vld [vmem:[%s7801_s18 + $0x418] sm:$0xff]  ;;  %v7914_v24 = vrot.slane %v3432_v17, %v7836_v49  ;;  %v1637_v44 = vunpack.c.l.s8.bf16 %v485_v22  ;;  %v1692_v17 = vunpack.c.h.s8.bf16 %v508_v9 }
  0x98   : > { %3714 = vmatpush1.bf16.msra.mxu0 %v1556_v27  ;;  %4370 = vmatpush1.bf16.msra.mxu1 %v1558_v28  ;;  %v1639_v27 = vunpack.c.l.s8.bf16 %v487_v23  ;;  %v484_v28 = vld [vmem:[%s7801_s18 + $0x400] sm:$0xff] }
  0x99   : > { %3715 = vmatprep.subr.bf16.mxu0 %v1565_v29  ;;  %4371 = vmatprep.subr.bf16.mxu1 %v1567_v30  ;;  %v486_v29 = vld [vmem:[%s7801_s18 + $0x410] sm:$0xff]  ;;  %v3448_v30 = vcombine.high %v7914_v24, %v7914_v24  ;;  %v1636_v32 = vunpack.c.l.s8.bf16 %v484_v28 }
  0x9b   : > { %v7927_v39 = vrot.slane %v3448_v30, %v7836_v49 }
  0x9c   : > { %3716 = vmatpush1.bf16.msra.mxu0 %v1564_v33  ;;  %4372 = vmatpush1.bf16.msra.mxu1 %v1566_v34  ;;  %v1638_v33 = vunpack.c.l.s8.bf16 %v486_v29  ;;  %v1645_v34 = vunpack.c.h.s8.bf16 %v485_v22  ;;  %v518_v22 = vld [vmem:[%s7801_s18 + $0x510] sm:$0xff] }
  0x9d   : > { %3717 = vmatprep.subr.bf16.mxu0 %v1573_v35  ;;  %4373 = vmatprep.subr.bf16.mxu1 %v1575_v36  ;;  %v1647_v35 = vunpack.c.h.s8.bf16 %v487_v23  ;;  %v493_v36 = vld [vmem:[%s7801_s18 + $0x448] sm:$0xff]  ;;  %v1710_v30 = vunpack.c.h.s8.bf16 %v518_v22 }
  0xa0   : > { %3718 = vmatpush1.bf16.msra.mxu0 %v1572_v40  ;;  %4374 = vmatpush1.bf16.msra.mxu1 %v1574_v41  ;;  %v1644_v40 = vunpack.c.h.s8.bf16 %v484_v28  ;;  %v1646_v41 = vunpack.c.h.s8.bf16 %v486_v29  ;;  %v527_v28 = vld [vmem:[%s7801_s18 + $0x558] sm:$0xff] }
  0xa1   : > { %3719 = vmatprep.subr.bf16.mxu0 %v1581_v42  ;;  %4375 = vmatprep.subr.bf16.mxu1 %v1583_v43  ;;  %v1653_v42 = vunpack.c.l.s8.bf16 %v493_v36  ;;  %v1655_v43 = vunpack.c.l.s8.bf16 %v495_v37 }
  0xa4   : > { %3720 = vmatpush1.bf16.msra.mxu0 %v1580_v47  ;;  %4376 = vmatpush1.bf16.msra.mxu1 %v1582_v48  ;;  %v1652_v47 = vunpack.c.l.s8.bf16 %v492_v45  ;;  %v1654_v48 = vunpack.c.l.s8.bf16 %v494_v46 }
  0xa5   : > { %3721 = vmatprep.subr.bf16.mxu0 %v1589_v51  ;;  %4377 = vmatprep.subr.bf16.mxu1 %v1591_v52  ;;  %v1661_v51 = vunpack.c.h.s8.bf16 %v493_v36  ;;  %v1663_v52 = vunpack.c.h.s8.bf16 %v495_v37 }
  0xa8   : > { %3722 = vmatpush1.bf16.msra.mxu0 %v1588_v56  ;;  %4378 = vmatpush1.bf16.msra.mxu1 %v1590_v57  ;;  %v1660_v56 = vunpack.c.h.s8.bf16 %v492_v45  ;;  %v1662_v57 = vunpack.c.h.s8.bf16 %v494_v46 }
  0xa9   : > { %3723 = vmatprep.subr.bf16.mxu0 %v1597_v59  ;;  %4379 = vmatprep.subr.bf16.mxu1 %v1599_v60  ;;  %v1669_v59 = vunpack.c.l.s8.bf16 %v501_v54  ;;  %v1671_v60 = vunpack.c.l.s8.bf16 %v503_v55 }
  0xac   : > { %3724 = vmatpush1.bf16.msra.mxu0 %v1596_v63  ;;  %4380 = vmatpush1.bf16.msra.mxu1 %v1598_v0  ;;  %v1668_v63 = vunpack.c.l.s8.bf16 %v500_v50  ;;  %v1670_v0 = vunpack.c.l.s8.bf16 %v502_v62 }
  0xad   : > { %3725 = vmatprep.subr.bf16.mxu0 %v1605_v1  ;;  %4381 = vmatprep.subr.bf16.mxu1 %v1607_v2  ;;  %v1677_v1 = vunpack.c.h.s8.bf16 %v501_v54  ;;  %v1679_v2 = vunpack.c.h.s8.bf16 %v503_v55 }
  0xb0   : > { %3726 = vmatpush1.bf16.msra.mxu0 %v1604_v5  ;;  %4382 = vmatpush1.bf16.msra.mxu1 %v1606_v6  ;;  %v1676_v5 = vunpack.c.h.s8.bf16 %v500_v50  ;;  %v1678_v6 = vunpack.c.h.s8.bf16 %v502_v62 }
  0xb1   : > { %3727 = vmatprep.subr.bf16.mxu0 %v1613_v7  ;;  %4383 = vmatprep.subr.bf16.mxu1 %v1615_v8  ;;  %v1685_v7 = vunpack.c.l.s8.bf16 %v509_v3  ;;  %v1687_v8 = vunpack.c.l.s8.bf16 %v511_v4 }
  0xb4   : > { %3728 = vmatpush1.bf16.msra.mxu0 %v1612_v11  ;;  %4384 = vmatpush1.bf16.msra.mxu1 %v1614_v12  ;;  %v1684_v11 = vunpack.c.l.s8.bf16 %v508_v9  ;;  %v1686_v12 = vunpack.c.l.s8.bf16 %v510_v10 }
  0xb5   : > { %3729 = vmatprep.subr.bf16.mxu0 %v1621_v13  ;;  %4385 = vmatprep.subr.bf16.mxu1 %v1623_v14  ;;  %v1693_v13 = vunpack.c.h.s8.bf16 %v509_v3  ;;  %v1695_v14 = vunpack.c.h.s8.bf16 %v511_v4 }
  0xb8   : > { %3730 = vmatpush1.bf16.msra.mxu0 %v1620_v18  ;;  %4386 = vmatpush1.bf16.msra.mxu1 %v1622_v19  ;;  %v1694_v18 = vunpack.c.h.s8.bf16 %v510_v10  ;;  %v1701_v19 = vunpack.c.l.s8.bf16 %v517_v15 }
  0xb9   : > { %3731 = vmatprep.subr.bf16.mxu0 %v1629_v20  ;;  %4387 = vmatprep.subr.bf16.mxu1 %v1631_v21  ;;  %v1703_v20 = vunpack.c.l.s8.bf16 %v519_v16  ;;  %v516_v21 = vld [vmem:[%s7801_s18 + $0x500] sm:$0xff] }
  0xba   : > { %v1700_v23 = vunpack.c.l.s8.bf16 %v516_v21  ;;  %v1708_v29 = vunpack.c.h.s8.bf16 %v516_v21  ;;  %v559_v21 = vld [vmem:[%s7801_s18 + $0x658] sm:$0xff] }
  0xbc   : > { %3732 = vmatpush1.bf16.msra.mxu0 %v1628_v25  ;;  %4388 = vmatpush1.bf16.msra.mxu1 %v1630_v26  ;;  %v1702_v25 = vunpack.c.l.s8.bf16 %v518_v22  ;;  %v1709_v26 = vunpack.c.h.s8.bf16 %v517_v15  ;;  %v7965_v15 = vrot.slane %v7914_v24, %v7836_v49  ;;  %v7971_v22 = vcombine.high %v7927_v39, %v7927_v39 }
  0xbd   : > { %3742 = vmatprep.subr.bf16.mxu0 %v1637_v44  ;;  %4398 = vmatprep.subr.bf16.mxu1 %v1639_v27  ;;  %v1711_v44 = vunpack.c.h.s8.bf16 %v519_v16  ;;  %v525_v27 = vld [vmem:[%s7801_s18 + $0x548] sm:$0xff] }
  0xbf   : > { %3734 = vmatmul.mubr.bf16.vlgmr.msra.gmra.mrb[0].mxu0 %v7922_v31  ;;  %4390 = vmatmul.mubr.bf16.vlgmr.msra.gmra.mrb[0].mxu1 %v7922_v31 }
  0xc0   : > { %3743 = vmatpush1.bf16.msra.mxu0 %v1636_v32  ;;  %4399 = vmatpush1.bf16.msra.mxu1 %v1638_v33  ;;  %v1717_v32 = vunpack.c.l.s8.bf16 %v525_v27  ;;  %v1719_v33 = vunpack.c.l.s8.bf16 %v527_v28 }
  0xc1   : > { %3744 = vmatprep.subr.bf16.mxu0 %v1645_v34  ;;  %4400 = vmatprep.subr.bf16.mxu1 %v1647_v35  ;;  %v524_v34 = vld [vmem:[%s7801_s18 + $0x540] sm:$0xff]  ;;  %v526_v35 = vld [vmem:[%s7801_s18 + $0x550] sm:$0xff] }
  0xc2   : > { %3774 = vmatprep.mubr.bf16.mxu0 %v7927_v39  ;;  %4430 = vmatprep.mubr.bf16.mxu1 %v7927_v39  ;;  %v1716_v36 = vunpack.c.l.s8.bf16 %v524_v34  ;;  %v1718_v37 = vunpack.c.l.s8.bf16 %v526_v35  ;;  %v1724_v45 = vunpack.c.h.s8.bf16 %v524_v34  ;;  %v1726_v46 = vunpack.c.h.s8.bf16 %v526_v35  ;;  %v567_v34 = vld [vmem:[%s7801_s18 + $0x698] sm:$0xff] }
  0xc4   : > { %3745 = vmatpush1.bf16.msra.mxu0 %v1644_v40  ;;  %4401 = vmatpush1.bf16.msra.mxu1 %v1646_v41  ;;  %v1725_v40 = vunpack.c.h.s8.bf16 %v525_v27  ;;  %v1727_v41 = vunpack.c.h.s8.bf16 %v527_v28  ;;  %v558_v27 = vld [vmem:[%s7801_s18 + $0x650] sm:$0xff] }
  0xc5   : > { %3746 = vmatprep.subr.bf16.mxu0 %v1653_v42  ;;  %4402 = vmatprep.subr.bf16.mxu1 %v1655_v43  ;;  %v533_v42 = vld [vmem:[%s7801_s18 + $0x588] sm:$0xff]  ;;  %v535_v43 = vld [vmem:[%s7801_s18 + $0x598] sm:$0xff] }
  0xc8   : > { %3747 = vmatpush1.bf16.msra.mxu0 %v1652_v47  ;;  %4403 = vmatpush1.bf16.msra.mxu1 %v1654_v48  ;;  %v1733_v47 = vunpack.c.l.s8.bf16 %v533_v42  ;;  %v1735_v48 = vunpack.c.l.s8.bf16 %v535_v43 }
  0xc9   : > { %3748 = vmatprep.subr.bf16.mxu0 %v1661_v51  ;;  %4404 = vmatprep.subr.bf16.mxu1 %v1663_v52  ;;  %v532_v51 = vld [vmem:[%s7801_s18 + $0x580] sm:$0xff]  ;;  %v534_v52 = vld [vmem:[%s7801_s18 + $0x590] sm:$0xff] }
  0xca   : > { %v1732_v54 = vunpack.c.l.s8.bf16 %v532_v51  ;;  %v1734_v55 = vunpack.c.l.s8.bf16 %v534_v52  ;;  %v1740_v50 = vunpack.c.h.s8.bf16 %v532_v51  ;;  %v1742_v62 = vunpack.c.h.s8.bf16 %v534_v52  ;;  %v575_v51 = vld [vmem:[%s7801_s18 + $0x6d8] sm:$0xff] }
  0xcc   : > { %3749 = vmatpush1.bf16.msra.mxu0 %v1660_v56  ;;  %4405 = vmatpush1.bf16.msra.mxu1 %v1662_v57  ;;  %v1741_v56 = vunpack.c.h.s8.bf16 %v533_v42  ;;  %v1743_v57 = vunpack.c.h.s8.bf16 %v535_v43  ;;  %v566_v42 = vld [vmem:[%s7801_s18 + $0x690] sm:$0xff] }
  0xcd   : > { %3750 = vmatprep.subr.bf16.mxu0 %v1669_v59  ;;  %4406 = vmatprep.subr.bf16.mxu1 %v1671_v60  ;;  %v541_v59 = vld [vmem:[%s7801_s18 + $0x5c8] sm:$0xff]  ;;  %v543_v60 = vld [vmem:[%s7801_s18 + $0x5d8] sm:$0xff] }
  0xd0   : > { %3751 = vmatpush1.bf16.msra.mxu0 %v1668_v63  ;;  %4407 = vmatpush1.bf16.msra.mxu1 %v1670_v0  ;;  %v1749_v63 = vunpack.c.l.s8.bf16 %v541_v59  ;;  %v1751_v0 = vunpack.c.l.s8.bf16 %v543_v60 }
  0xd1   : > { %3752 = vmatprep.subr.bf16.mxu0 %v1677_v1  ;;  %4408 = vmatprep.subr.bf16.mxu1 %v1679_v2  ;;  %v540_v1 = vld [vmem:[%s7801_s18 + $0x5c0] sm:$0xff]  ;;  %v542_v2 = vld [vmem:[%s7801_s18 + $0x5d0] sm:$0xff] }
  0xd2   : > { %v1748_v3 = vunpack.c.l.s8.bf16 %v540_v1  ;;  %v1750_v4 = vunpack.c.l.s8.bf16 %v542_v2  ;;  %v1756_v9 = vunpack.c.h.s8.bf16 %v540_v1  ;;  %v1758_v10 = vunpack.c.h.s8.bf16 %v542_v2  ;;  %v583_v1 = vld [vmem:[%s7801_s18 + $0x718] sm:$0xff] }
  0xd4   : > { %3753 = vmatpush1.bf16.msra.mxu0 %v1676_v5  ;;  %4409 = vmatpush1.bf16.msra.mxu1 %v1678_v6  ;;  %v1757_v5 = vunpack.c.h.s8.bf16 %v541_v59  ;;  %v1759_v6 = vunpack.c.h.s8.bf16 %v543_v60  ;;  %v574_v59 = vld [vmem:[%s7801_s18 + $0x6d0] sm:$0xff] }
  0xd5   : > { %3754 = vmatprep.subr.bf16.mxu0 %v1685_v7  ;;  %4410 = vmatprep.subr.bf16.mxu1 %v1687_v8  ;;  %v549_v7 = vld [vmem:[%s7801_s18 + $0x608] sm:$0xff]  ;;  %v551_v8 = vld [vmem:[%s7801_s18 + $0x618] sm:$0xff] }
  0xd8   : > { %3755 = vmatpush1.bf16.msra.mxu0 %v1684_v11  ;;  %4411 = vmatpush1.bf16.msra.mxu1 %v1686_v12  ;;  %v1765_v11 = vunpack.c.l.s8.bf16 %v549_v7  ;;  %v1767_v12 = vunpack.c.l.s8.bf16 %v551_v8 }
  0xd9   : > { %3756 = vmatprep.subr.bf16.mxu0 %v1693_v13  ;;  %4412 = vmatprep.subr.bf16.mxu1 %v1695_v14  ;;  %v548_v13 = vld [vmem:[%s7801_s18 + $0x600] sm:$0xff]  ;;  %v550_v14 = vld [vmem:[%s7801_s18 + $0x610] sm:$0xff] }
  0xda   : > { %v1764_v16 = vunpack.c.l.s8.bf16 %v548_v13  ;;  %v1772_v24 = vunpack.c.h.s8.bf16 %v548_v13  ;;  %v591_v13 = vld [vmem:[%s7801_s18 + $0x758] sm:$0xff] }
  0xdc   : > { %3757 = vmatpush1.bf16.msra.mxu0 %v1692_v17  ;;  %4413 = vmatpush1.bf16.msra.mxu1 %v1694_v18  ;;  %v1766_v17 = vunpack.c.l.s8.bf16 %v550_v14  ;;  %v1773_v18 = vunpack.c.h.s8.bf16 %v549_v7  ;;  %v582_v7 = vld [vmem:[%s7801_s18 + $0x710] sm:$0xff] }
  0xdd   : > { %3758 = vmatprep.subr.bf16.mxu0 %v1701_v19  ;;  %4414 = vmatprep.subr.bf16.mxu1 %v1703_v20  ;;  %v1775_v19 = vunpack.c.h.s8.bf16 %v551_v8  ;;  %v557_v20 = vld [vmem:[%s7801_s18 + $0x648] sm:$0xff] }
  0xe0   : > { %3759 = vmatpush1.bf16.msra.mxu0 %v1700_v23  ;;  %4415 = vmatpush1.bf16.msra.mxu1 %v1702_v25  ;;  %v1774_v23 = vunpack.c.h.s8.bf16 %v550_v14  ;;  %v1781_v25 = vunpack.c.l.s8.bf16 %v557_v20 }
  0xe1   : > { %3760 = vmatprep.subr.bf16.mxu0 %v1709_v26  ;;  %4416 = vmatprep.subr.bf16.mxu1 %v1711_v44  ;;  %v1783_v26 = vunpack.c.l.s8.bf16 %v559_v21  ;;  %v556_v44 = vld [vmem:[%s7801_s18 + $0x640] sm:$0xff] }
  0xe2   : > { %v1780_v28 = vunpack.c.l.s8.bf16 %v556_v44  ;;  %v1788_v35 = vunpack.c.h.s8.bf16 %v556_v44  ;;  %v599_v44 = vld [vmem:[%s7801_s18 + $0x798] sm:$0xff] }
  0xe4   : > { %3761 = vmatpush1.bf16.msra.mxu0 %v1708_v29  ;;  %4417 = vmatpush1.bf16.msra.mxu1 %v1710_v30  ;;  %v1782_v29 = vunpack.c.l.s8.bf16 %v558_v27  ;;  %v1789_v30 = vunpack.c.h.s8.bf16 %v557_v20  ;;  %v590_v20 = vld [vmem:[%s7801_s18 + $0x750] sm:$0xff] }
  0xe5   : > { %3762 = vmatprep.subr.bf16.mxu0 %v1717_v32  ;;  %4418 = vmatprep.subr.bf16.mxu1 %v1719_v33  ;;  %v1791_v32 = vunpack.c.h.s8.bf16 %v559_v21  ;;  %v565_v33 = vld [vmem:[%s7801_s18 + $0x688] sm:$0xff] }
  0xe8   : > { %3763 = vmatpush1.bf16.msra.mxu0 %v1716_v36  ;;  %4419 = vmatpush1.bf16.msra.mxu1 %v1718_v37  ;;  %v1790_v36 = vunpack.c.h.s8.bf16 %v558_v27  ;;  %v1797_v37 = vunpack.c.l.s8.bf16 %v565_v33 }
  0xe9   : > { %3764 = vmatprep.subr.bf16.mxu0 %v1725_v40  ;;  %4420 = vmatprep.subr.bf16.mxu1 %v1727_v41  ;;  %v1799_v40 = vunpack.c.l.s8.bf16 %v567_v34  ;;  %v564_v41 = vld [vmem:[%s7801_s18 + $0x680] sm:$0xff] }
  0xea   : > { %v1796_v43 = vunpack.c.l.s8.bf16 %v564_v41  ;;  %v1804_v52 = vunpack.c.h.s8.bf16 %v564_v41  ;;  %v607_v41 = vld [vmem:[%s7801_s18 + $0x7d8] sm:$0xff] }
  0xec   : > { %3765 = vmatpush1.bf16.msra.mxu0 %v1724_v45  ;;  %4421 = vmatpush1.bf16.msra.mxu1 %v1726_v46  ;;  %v1798_v45 = vunpack.c.l.s8.bf16 %v566_v42  ;;  %v1805_v46 = vunpack.c.h.s8.bf16 %v565_v33  ;;  %v598_v33 = vld [vmem:[%s7801_s18 + $0x790] sm:$0xff] }
  0xed   : > { %3766 = vmatprep.subr.bf16.mxu0 %v1733_v47  ;;  %4422 = vmatprep.subr.bf16.mxu1 %v1735_v48  ;;  %v1807_v47 = vunpack.c.h.s8.bf16 %v567_v34  ;;  %v573_v48 = vld [vmem:[%s7801_s18 + $0x6c8] sm:$0xff] }
  0xf0   : > { %3767 = vmatpush1.bf16.msra.mxu0 %v1732_v54  ;;  %4423 = vmatpush1.bf16.msra.mxu1 %v1734_v55  ;;  %v1806_v54 = vunpack.c.h.s8.bf16 %v566_v42  ;;  %v1813_v55 = vunpack.c.l.s8.bf16 %v573_v48 }
  0xf1   : > { %3768 = vmatprep.subr.bf16.mxu0 %v1741_v56  ;;  %4424 = vmatprep.subr.bf16.mxu1 %v1743_v57  ;;  %v1815_v56 = vunpack.c.l.s8.bf16 %v575_v51  ;;  %v572_v57 = vld [vmem:[%s7801_s18 + $0x6c0] sm:$0xff] }
  0xf2   : > { %v1812_v60 = vunpack.c.l.s8.bf16 %v572_v57  ;;  %v1820_v2 = vunpack.c.h.s8.bf16 %v572_v57  ;;  %v613_v57 = vld [vmem:[%s7801_s18 + $0x808] sm:$0xff] }
  0xf4   : > { %3769 = vmatpush1.bf16.msra.mxu0 %v1740_v50  ;;  %4425 = vmatpush1.bf16.msra.mxu1 %v1742_v62  ;;  %v1814_v50 = vunpack.c.l.s8.bf16 %v574_v59  ;;  %v1821_v62 = vunpack.c.h.s8.bf16 %v573_v48  ;;  %v606_v48 = vld [vmem:[%s7801_s18 + $0x7d0] sm:$0xff] }
  0xf5   : > { %3770 = vmatprep.subr.bf16.mxu0 %v1749_v63  ;;  %4426 = vmatprep.subr.bf16.mxu1 %v1751_v0  ;;  %v1823_v63 = vunpack.c.h.s8.bf16 %v575_v51  ;;  %v581_v0 = vld [vmem:[%s7801_s18 + $0x708] sm:$0xff]  ;;  %v8004_v51 = vld [vmem:[%s7811_s14 + $0x8] sm:$0xff] }
  0xf8   : > { %3771 = vmatpush1.bf16.msra.mxu0 %v1748_v3  ;;  %4427 = vmatpush1.bf16.msra.mxu1 %v1750_v4  ;;  %v1822_v3 = vunpack.c.h.s8.bf16 %v574_v59  ;;  %v1829_v4 = vunpack.c.l.s8.bf16 %v581_v0  ;;  %v615_v59 = vld [vmem:[%s7801_s18 + $0x818] sm:$0xff] }
  0xf9   : > { %3772 = vmatprep.subr.bf16.mxu0 %v1757_v5  ;;  %4428 = vmatprep.subr.bf16.mxu1 %v1759_v6  ;;  %v1831_v5 = vunpack.c.l.s8.bf16 %v583_v1  ;;  %v580_v6 = vld [vmem:[%s7801_s18 + $0x700] sm:$0xff] }
  0xfa   : > { %v1828_v8 = vunpack.c.l.s8.bf16 %v580_v6  ;;  %v1836_v14 = vunpack.c.h.s8.bf16 %v580_v6 }
  0xfc   : > { %3773 = vmatpush1.bf16.msra.mxu0 %v1756_v9  ;;  %4429 = vmatpush1.bf16.msra.mxu1 %v1758_v10  ;;  %v1830_v9 = vunpack.c.l.s8.bf16 %v582_v7  ;;  %v1837_v10 = vunpack.c.h.s8.bf16 %v581_v0  ;;  %v1895_v0 = vunpack.c.l.s8.bf16 %v615_v59 }
  0xfd   : > { %3783 = vmatprep.subr.bf16.mxu0 %v1765_v11  ;;  %4439 = vmatprep.subr.bf16.mxu1 %v1767_v12  ;;  %v1839_v11 = vunpack.c.h.s8.bf16 %v583_v1  ;;  %v589_v12 = vld [vmem:[%s7801_s18 + $0x748] sm:$0xff]  ;;  %v612_v1 = vld [vmem:[%s7801_s18 + $0x800] sm:$0xff] }
  0xff   : > { %3775 = vmatmul.mubr.bf16.vlgmr.msra.gmra.mrb[0].mxu0 %v7965_v15  ;;  %4431 = vmatmul.mubr.bf16.vlgmr.msra.gmra.mrb[0].mxu1 %v7965_v15 }
 0x100   : > { %3784 = vmatpush1.bf16.msra.mxu0 %v1764_v16  ;;  %4440 = vmatpush1.bf16.msra.mxu1 %v1766_v17  ;;  %v1838_v16 = vunpack.c.h.s8.bf16 %v582_v7  ;;  %v1845_v17 = vunpack.c.l.s8.bf16 %v589_v12  ;;  %v1901_v7 = vunpack.c.h.s8.bf16 %v613_v57 }
 0x101   : > { %3785 = vmatprep.subr.bf16.mxu0 %v1773_v18  ;;  %4441 = vmatprep.subr.bf16.mxu1 %v1775_v19  ;;  %v1847_v18 = vunpack.c.l.s8.bf16 %v591_v13  ;;  %v588_v19 = vld [vmem:[%s7801_s18 + $0x740] sm:$0xff] }
 0x102   : > { %3815 = vmatprep.mubr.bf16.mxu0 %v7971_v22  ;;  %4471 = vmatprep.mubr.bf16.mxu1 %v7971_v22  ;;  %v1844_v21 = vunpack.c.l.s8.bf16 %v588_v19  ;;  %v1852_v27 = vunpack.c.h.s8.bf16 %v588_v19 }
 0x104   : > { %3786 = vmatpush1.bf16.msra.mxu0 %v1772_v24  ;;  %4442 = vmatpush1.bf16.msra.mxu1 %v1774_v23  ;;  %v1846_v24 = vunpack.c.l.s8.bf16 %v590_v20  ;;  %v1853_v23 = vunpack.c.h.s8.bf16 %v589_v12  ;;  %v1900_v12 = vunpack.c.h.s8.bf16 %v612_v1 }
 0x105   : > { %3787 = vmatprep.subr.bf16.mxu0 %v1781_v25  ;;  %4443 = vmatprep.subr.bf16.mxu1 %v1783_v26  ;;  %v1855_v25 = vunpack.c.h.s8.bf16 %v591_v13  ;;  %v597_v26 = vld [vmem:[%s7801_s18 + $0x788] sm:$0xff] }
 0x108   : > { %3788 = vmatpush1.bf16.msra.mxu0 %v1780_v28  ;;  %4444 = vmatpush1.bf16.msra.mxu1 %v1782_v29  ;;  %v1854_v28 = vunpack.c.h.s8.bf16 %v590_v20  ;;  %v1861_v29 = vunpack.c.l.s8.bf16 %v597_v26 }
 0x109   : > { %3789 = vmatprep.subr.bf16.mxu0 %v1789_v30  ;;  %4445 = vmatprep.subr.bf16.mxu1 %v1791_v32  ;;  %v1863_v30 = vunpack.c.l.s8.bf16 %v599_v44  ;;  %v596_v32 = vld [vmem:[%s7801_s18 + $0x780] sm:$0xff] }
 0x10a   : > { %v1860_v34 = vunpack.c.l.s8.bf16 %v596_v32  ;;  %v1868_v42 = vunpack.c.h.s8.bf16 %v596_v32 }
 0x10c   : > { %3790 = vmatpush1.bf16.msra.mxu0 %v1788_v35  ;;  %4446 = vmatpush1.bf16.msra.mxu1 %v1790_v36  ;;  %v1862_v35 = vunpack.c.l.s8.bf16 %v598_v33  ;;  %v1869_v36 = vunpack.c.h.s8.bf16 %v597_v26 }
 0x10d   : > { %3791 = vmatprep.subr.bf16.mxu0 %v1797_v37  ;;  %4447 = vmatprep.subr.bf16.mxu1 %v1799_v40  ;;  %v1871_v37 = vunpack.c.h.s8.bf16 %v599_v44  ;;  %v605_v40 = vld [vmem:[%s7801_s18 + $0x7c8] sm:$0xff] }
 0x110   : > { %3792 = vmatpush1.bf16.msra.mxu0 %v1796_v43  ;;  %4448 = vmatpush1.bf16.msra.mxu1 %v1798_v45  ;;  %v1870_v43 = vunpack.c.h.s8.bf16 %v598_v33  ;;  %v1877_v45 = vunpack.c.l.s8.bf16 %v605_v40 }
 0x111   : > { %3793 = vmatprep.subr.bf16.mxu0 %v1805_v46  ;;  %4449 = vmatprep.subr.bf16.mxu1 %v1807_v47  ;;  %v1879_v46 = vunpack.c.l.s8.bf16 %v607_v41  ;;  %v604_v47 = vld [vmem:[%s7801_s18 + $0x7c0] sm:$0xff] }
 0x114   : > { %3794 = vmatpush1.bf16.msra.mxu0 %v1804_v52  ;;  %4450 = vmatpush1.bf16.msra.mxu1 %v1806_v54  ;;  %v1876_v52 = vunpack.c.l.s8.bf16 %v604_v47  ;;  %v1878_v54 = vunpack.c.l.s8.bf16 %v606_v48 }
 0x115   : > { %3795 = vmatprep.subr.bf16.mxu0 %v1813_v55  ;;  %4451 = vmatprep.subr.bf16.mxu1 %v1815_v56  ;;  %v1885_v55 = vunpack.c.h.s8.bf16 %v605_v40  ;;  %v1887_v56 = vunpack.c.h.s8.bf16 %v607_v41 }
 0x118   : > { %3796 = vmatpush1.bf16.msra.mxu0 %v1812_v60  ;;  %4452 = vmatpush1.bf16.msra.mxu1 %v1814_v50  ;;  %v8010_v60 = vrot.slane %v8004_v51, %v7836_v49  ;;  %v1884_v50 = vunpack.c.h.s8.bf16 %v604_v47 }
 0x119   : > { %3797 = vmatprep.subr.bf16.mxu0 %v1821_v62  ;;  %4453 = vmatprep.subr.bf16.mxu1 %v1823_v63  ;;  %v1886_v62 = vunpack.c.h.s8.bf16 %v606_v48  ;;  %v1893_v63 = vunpack.c.l.s8.bf16 %v613_v57 }
 0x11c   : > { %3798 = vmatpush1.bf16.msra.mxu0 %v1820_v2  ;;  %4454 = vmatpush1.bf16.msra.mxu1 %v1822_v3  ;;  %v614_v2 = vld [vmem:[%s7801_s18 + $0x810] sm:$0xff]  ;;  %v3496_v3 = vcombine.high %v8010_v60, %v8010_v60 }
 0x11d   : > { %3799 = vmatprep.subr.bf16.mxu0 %v1829_v4  ;;  %4455 = vmatprep.subr.bf16.mxu1 %v1831_v5  ;;  %v8018_v4 = vcombine.high %v7965_v15, %v7965_v15  ;;  %v1892_v5 = vunpack.c.l.s8.bf16 %v612_v1  ;;  %v1894_v6 = vunpack.c.l.s8.bf16 %v614_v2  ;;  %v1902_v13 = vunpack.c.h.s8.bf16 %v614_v2 }
 0x120   : > { %3800 = vmatpush1.bf16.msra.mxu0 %v1828_v8  ;;  %4456 = vmatpush1.bf16.msra.mxu1 %v1830_v9  ;;  %v1903_v8 = vunpack.c.h.s8.bf16 %v615_v59  ;;  %v621_v9 = vld [vmem:[%s7801_s18 + $0x848] sm:$0xff] }
 0x121   : > { %3801 = vmatprep.subr.bf16.mxu0 %v1837_v10  ;;  %4457 = vmatprep.subr.bf16.mxu1 %v1839_v11  ;;  %v623_v10 = vld [vmem:[%s7801_s18 + $0x858] sm:$0xff]  ;;  %v8023_v11 = vrot.slane %v3496_v3, %v7836_v49 }
 0x124   : > { %3802 = vmatpush1.bf16.msra.mxu0 %v1836_v14  ;;  %4458 = vmatpush1.bf16.msra.mxu1 %v1838_v16  ;;  %v1909_v14 = vunpack.c.l.s8.bf16 %v621_v9  ;;  %v1911_v16 = vunpack.c.l.s8.bf16 %v623_v10 }
 0x125   : > { %3803 = vmatprep.subr.bf16.mxu0 %v1845_v17  ;;  %4459 = vmatprep.subr.bf16.mxu1 %v1847_v18  ;;  %v620_v17 = vld [vmem:[%s7801_s18 + $0x840] sm:$0xff]  ;;  %v622_v18 = vld [vmem:[%s7801_s18 + $0x850] sm:$0xff] }
 0x126   : > { %v1908_v19 = vunpack.c.l.s8.bf16 %v620_v17  ;;  %v1910_v20 = vunpack.c.l.s8.bf16 %v622_v18  ;;  %v1916_v26 = vunpack.c.h.s8.bf16 %v620_v17  ;;  %v1918_v44 = vunpack.c.h.s8.bf16 %v622_v18 }
 0x128   : > { %3804 = vmatpush1.bf16.msra.mxu0 %v1844_v21  ;;  %4460 = vmatpush1.bf16.msra.mxu1 %v1846_v24  ;;  %v1917_v21 = vunpack.c.h.s8.bf16 %v621_v9  ;;  %v1919_v24 = vunpack.c.h.s8.bf16 %v623_v10 }
 0x129   : > { %3805 = vmatprep.subr.bf16.mxu0 %v1853_v23  ;;  %4461 = vmatprep.subr.bf16.mxu1 %v1855_v25  ;;  %v629_v23 = vld [vmem:[%s7801_s18 + $0x888] sm:$0xff]  ;;  %v631_v25 = vld [vmem:[%s7801_s18 + $0x898] sm:$0xff] }
 0x12c   : > { %3806 = vmatpush1.bf16.msra.mxu0 %v1852_v27  ;;  %4462 = vmatpush1.bf16.msra.mxu1 %v1854_v28  ;;  %v1925_v27 = vunpack.c.l.s8.bf16 %v629_v23  ;;  %v1927_v28 = vunpack.c.l.s8.bf16 %v631_v25 }
 0x12d   : > { %3807 = vmatprep.subr.bf16.mxu0 %v1861_v29  ;;  %4463 = vmatprep.subr.bf16.mxu1 %v1863_v30  ;;  %v628_v29 = vld [vmem:[%s7801_s18 + $0x880] sm:$0xff]  ;;  %v630_v30 = vld [vmem:[%s7801_s18 + $0x890] sm:$0xff] }
 0x12e   : > { %v1924_v32 = vunpack.c.l.s8.bf16 %v628_v29  ;;  %v1926_v33 = vunpack.c.l.s8.bf16 %v630_v30  ;;  %v1932_v40 = vunpack.c.h.s8.bf16 %v628_v29  ;;  %v1934_v41 = vunpack.c.h.s8.bf16 %v630_v30 }
 0x130   : > { %3808 = vmatpush1.bf16.msra.mxu0 %v1860_v34  ;;  %4464 = vmatpush1.bf16.msra.mxu1 %v1862_v35  ;;  %v1933_v34 = vunpack.c.h.s8.bf16 %v629_v23  ;;  %v1935_v35 = vunpack.c.h.s8.bf16 %v631_v25 }
 0x131   : > { %3809 = vmatprep.subr.bf16.mxu0 %v1869_v36  ;;  %4465 = vmatprep.subr.bf16.mxu1 %v1871_v37  ;;  %v637_v36 = vld [vmem:[%s7801_s18 + $0x8c8] sm:$0xff]  ;;  %v639_v37 = vld [vmem:[%s7801_s18 + $0x8d8] sm:$0xff] }
 0x134   : > { %3810 = vmatpush1.bf16.msra.mxu0 %v1868_v42  ;;  %4466 = vmatpush1.bf16.msra.mxu1 %v1870_v43  ;;  %v1941_v42 = vunpack.c.l.s8.bf16 %v637_v36  ;;  %v1943_v43 = vunpack.c.l.s8.bf16 %v639_v37 }
 0x135   : > { %3811 = vmatprep.subr.bf16.mxu0 %v1877_v45  ;;  %4467 = vmatprep.subr.bf16.mxu1 %v1879_v46  ;;  %v636_v45 = vld [vmem:[%s7801_s18 + $0x8c0] sm:$0xff]  ;;  %v638_v46 = vld [vmem:[%s7801_s18 + $0x8d0] sm:$0xff] }
 0x136   : > { %v1940_v47 = vunpack.c.l.s8.bf16 %v636_v45  ;;  %v1942_v48 = vunpack.c.l.s8.bf16 %v638_v46  ;;  %v1948_v57 = vunpack.c.h.s8.bf16 %v636_v45  ;;  %v1950_v59 = vunpack.c.h.s8.bf16 %v638_v46 }
 0x138   : > { %3812 = vmatpush1.bf16.msra.mxu0 %v1876_v52  ;;  %4468 = vmatpush1.bf16.msra.mxu1 %v1878_v54  ;;  %v1949_v52 = vunpack.c.h.s8.bf16 %v637_v36  ;;  %v1951_v54 = vunpack.c.h.s8.bf16 %v639_v37 }
 0x139   : > { %3813 = vmatprep.subr.bf16.mxu0 %v1885_v55  ;;  %4469 = vmatprep.subr.bf16.mxu1 %v1887_v56  ;;  %v645_v55 = vld [vmem:[%s7801_s18 + $0x908] sm:$0xff]  ;;  %v647_v56 = vld [vmem:[%s7801_s18 + $0x918] sm:$0xff] }
 0x13a   : > { %v1965_v3 = vunpack.c.h.s8.bf16 %v645_v55 }
 0x13c   : > { %3814 = vmatpush1.bf16.msra.mxu0 %v1884_v50  ;;  %4470 = vmatpush1.bf16.msra.mxu1 %v1886_v62  ;;  %v1957_v50 = vunpack.c.l.s8.bf16 %v645_v55  ;;  %v1959_v62 = vunpack.c.l.s8.bf16 %v647_v56 }
 0x13d   : > { %3824 = vmatprep.subr.bf16.mxu0 %v1893_v63  ;;  %4480 = vmatprep.subr.bf16.mxu1 %v1895_v0  ;;  %v644_v63 = vld [vmem:[%s7801_s18 + $0x900] sm:$0xff]  ;;  %v646_v0 = vld [vmem:[%s7801_s18 + $0x910] sm:$0xff] }
 0x13e   : > { %v1956_v1 = vunpack.c.l.s8.bf16 %v644_v63  ;;  %v1958_v2 = vunpack.c.l.s8.bf16 %v646_v0  ;;  %v1966_v9 = vunpack.c.h.s8.bf16 %v646_v0 }
 0x13f   : > { %3816 = vmatmul.mubr.bf16.vlgmr.msra.gmra.mrb[0].mxu0 %v8018_v4  ;;  %4472 = vmatmul.mubr.bf16.vlgmr.msra.gmra.mrb[0].mxu1 %v8018_v4 }
 0x140   : > { %3825 = vmatpush1.bf16.msra.mxu0 %v1892_v5  ;;  %4481 = vmatpush1.bf16.msra.mxu1 %v1894_v6  ;;  %v1967_v5 = vunpack.c.h.s8.bf16 %v647_v56  ;;  %v653_v6 = vld [vmem:[%s7801_s18 + $0x948] sm:$0xff] }
 0x141   : > { %3826 = vmatprep.subr.bf16.mxu0 %v1901_v7  ;;  %4482 = vmatprep.subr.bf16.mxu1 %v1903_v8  ;;  %v655_v7 = vld [vmem:[%s7801_s18 + $0x958] sm:$0xff]  ;;  %v1964_v8 = vunpack.c.h.s8.bf16 %v644_v63  ;;  %v1973_v10 = vunpack.c.l.s8.bf16 %v653_v6  ;;  %v1981_v18 = vunpack.c.h.s8.bf16 %v653_v6  ;;  %v8067_v6 = vcombine.high %v8023_v11, %v8023_v11 }
 0x142   : > { %3856 = vmatprep.mubr.bf16.mxu0 %v8023_v11  ;;  %4512 = vmatprep.mubr.bf16.mxu1 %v8023_v11 }
 0x144   : > { %3827 = vmatpush1.bf16.msra.mxu0 %v1900_v12  ;;  %4483 = vmatpush1.bf16.msra.mxu1 %v1902_v13  ;;  %v1975_v12 = vunpack.c.l.s8.bf16 %v655_v7  ;;  %v652_v13 = vld [vmem:[%s7801_s18 + $0x940] sm:$0xff] }
 0x145   : > { %3828 = vmatprep.subr.bf16.mxu0 %v1909_v14  ;;  %4484 = vmatprep.subr.bf16.mxu1 %v1911_v16  ;;  %v654_v14 = vld [vmem:[%s7801_s18 + $0x950] sm:$0xff]  ;;  %v1972_v16 = vunpack.c.l.s8.bf16 %v652_v13 }
 0x146   : > { %v1974_v17 = vunpack.c.l.s8.bf16 %v654_v14  ;;  %v1982_v23 = vunpack.c.h.s8.bf16 %v654_v14 }
 0x148   : > { %3829 = vmatpush1.bf16.msra.mxu0 %v1908_v19  ;;  %4485 = vmatpush1.bf16.msra.mxu1 %v1910_v20  ;;  %v1983_v19 = vunpack.c.h.s8.bf16 %v655_v7  ;;  %v661_v20 = vld [vmem:[%s7801_s18 + $0x988] sm:$0xff] }
 0x149   : > { %3830 = vmatprep.subr.bf16.mxu0 %v1917_v21  ;;  %4486 = vmatprep.subr.bf16.mxu1 %v1919_v24  ;;  %v663_v21 = vld [vmem:[%s7801_s18 + $0x998] sm:$0xff]  ;;  %v1980_v24 = vunpack.c.h.s8.bf16 %v652_v13  ;;  %v1989_v25 = vunpack.c.l.s8.bf16 %v661_v20  ;;  %v1997_v30 = vunpack.c.h.s8.bf16 %v661_v20 }
 0x14c   : > { %3831 = vmatpush1.bf16.msra.mxu0 %v1916_v26  ;;  %4487 = vmatpush1.bf16.msra.mxu1 %v1918_v44  ;;  %v1991_v26 = vunpack.c.l.s8.bf16 %v663_v21  ;;  %v660_v44 = vld [vmem:[%s7801_s18 + $0x980] sm:$0xff] }
 0x14d   : > { %3832 = vmatprep.subr.bf16.mxu0 %v1925_v27  ;;  %4488 = vmatprep.subr.bf16.mxu1 %v1927_v28  ;;  %v662_v27 = vld [vmem:[%s7801_s18 + $0x990] sm:$0xff]  ;;  %v1988_v28 = vunpack.c.l.s8.bf16 %v660_v44 }
 0x14e   : > { %v1990_v29 = vunpack.c.l.s8.bf16 %v662_v27  ;;  %v1998_v36 = vunpack.c.h.s8.bf16 %v662_v27 }
 0x150   : > { %3833 = vmatpush1.bf16.msra.mxu0 %v1924_v32  ;;  %4489 = vmatpush1.bf16.msra.mxu1 %v1926_v33  ;;  %v1999_v32 = vunpack.c.h.s8.bf16 %v663_v21  ;;  %v669_v33 = vld [vmem:[%s7801_s18 + $0x9c8] sm:$0xff] }
 0x151   : > { %3834 = vmatprep.subr.bf16.mxu0 %v1933_v34  ;;  %4490 = vmatprep.subr.bf16.mxu1 %v1935_v35  ;;  %v671_v34 = vld [vmem:[%s7801_s18 + $0x9d8] sm:$0xff]  ;;  %v1996_v35 = vunpack.c.h.s8.bf16 %v660_v44  ;;  %v2005_v37 = vunpack.c.l.s8.bf16 %v669_v33  ;;  %v2013_v46 = vunpack.c.h.s8.bf16 %v669_v33 }
 0x154   : > { %3835 = vmatpush1.bf16.msra.mxu0 %v1932_v40  ;;  %4491 = vmatpush1.bf16.msra.mxu1 %v1934_v41  ;;  %v2007_v40 = vunpack.c.l.s8.bf16 %v671_v34  ;;  %v668_v41 = vld [vmem:[%s7801_s18 + $0x9c0] sm:$0xff] }
 0x155   : > { %3836 = vmatprep.subr.bf16.mxu0 %v1941_v42  ;;  %4492 = vmatprep.subr.bf16.mxu1 %v1943_v43  ;;  %v670_v42 = vld [vmem:[%s7801_s18 + $0x9d0] sm:$0xff]  ;;  %v2004_v43 = vunpack.c.l.s8.bf16 %v668_v41 }
 0x156   : > { %v2006_v45 = vunpack.c.l.s8.bf16 %v670_v42  ;;  %v2014_v55 = vunpack.c.h.s8.bf16 %v670_v42 }
 0x158   : > { %3837 = vmatpush1.bf16.msra.mxu0 %v1940_v47  ;;  %4493 = vmatpush1.bf16.msra.mxu1 %v1942_v48  ;;  %v2015_v47 = vunpack.c.h.s8.bf16 %v671_v34  ;;  %v677_v48 = vld [vmem:[%s7801_s18 + $0xa08] sm:$0xff] }
 0x159   : > { %3838 = vmatprep.subr.bf16.mxu0 %v1949_v52  ;;  %4494 = vmatprep.subr.bf16.mxu1 %v1951_v54  ;;  %v679_v52 = vld [vmem:[%s7801_s18 + $0xa18] sm:$0xff]  ;;  %v2012_v54 = vunpack.c.h.s8.bf16 %v668_v41  ;;  %v2021_v56 = vunpack.c.l.s8.bf16 %v677_v48 }
 0x15c   : > { %3839 = vmatpush1.bf16.msra.mxu0 %v1948_v57  ;;  %4495 = vmatpush1.bf16.msra.mxu1 %v1950_v59  ;;  %v2023_v57 = vunpack.c.l.s8.bf16 %v679_v52  ;;  %v676_v59 = vld [vmem:[%s7801_s18 + $0xa00] sm:$0xff] }
 0x15d   : > { %3840 = vmatprep.subr.bf16.mxu0 %v1957_v50  ;;  %4496 = vmatprep.subr.bf16.mxu1 %v1959_v62  ;;  %v678_v50 = vld [vmem:[%s7801_s18 + $0xa10] sm:$0xff]  ;;  %v8061_v62 = vrot.slane %v8010_v60, %v7836_v49  ;;  %v2020_v63 = vunpack.c.l.s8.bf16 %v676_v59  ;;  %v2028_v60 = vunpack.c.h.s8.bf16 %v676_v59 }
 0x15e   : > { %v2022_v0 = vunpack.c.l.s8.bf16 %v678_v50  ;;  %v2030_v7 = vunpack.c.h.s8.bf16 %v678_v50 }
 0x160   : > { %3841 = vmatpush1.bf16.msra.mxu0 %v1956_v1  ;;  %4497 = vmatpush1.bf16.msra.mxu1 %v1958_v2  ;;  %v2029_v1 = vunpack.c.h.s8.bf16 %v677_v48  ;;  %v2031_v2 = vunpack.c.h.s8.bf16 %v679_v52 }
 0x161   : > { %3842 = vmatprep.subr.bf16.mxu0 %v1965_v3  ;;  %4498 = vmatprep.subr.bf16.mxu1 %v1967_v5  ;;  %v685_v3 = vld [vmem:[%s7801_s18 + $0xa48] sm:$0xff]  ;;  %v687_v5 = vld [vmem:[%s7801_s18 + $0xa58] sm:$0xff] }
 0x164   : > { %3843 = vmatpush1.bf16.msra.mxu0 %v1964_v8  ;;  %4499 = vmatpush1.bf16.msra.mxu1 %v1966_v9  ;;  %v2037_v8 = vunpack.c.l.s8.bf16 %v685_v3  ;;  %v2039_v9 = vunpack.c.l.s8.bf16 %v687_v5 }
 0x165   : > { %3844 = vmatprep.subr.bf16.mxu0 %v1973_v10  ;;  %4500 = vmatprep.subr.bf16.mxu1 %v1975_v12  ;;  %v684_v10 = vld [vmem:[%s7801_s18 + $0xa40] sm:$0xff]  ;;  %v686_v12 = vld [vmem:[%s7801_s18 + $0xa50] sm:$0xff] }
 0x166   : > { %v2036_v13 = vunpack.c.l.s8.bf16 %v684_v10  ;;  %v2038_v14 = vunpack.c.l.s8.bf16 %v686_v12  ;;  %v2044_v20 = vunpack.c.h.s8.bf16 %v684_v10  ;;  %v2046_v21 = vunpack.c.h.s8.bf16 %v686_v12 }
 0x168   : > { %3845 = vmatpush1.bf16.msra.mxu0 %v1972_v16  ;;  %4501 = vmatpush1.bf16.msra.mxu1 %v1974_v17  ;;  %v2045_v16 = vunpack.c.h.s8.bf16 %v685_v3  ;;  %v2047_v17 = vunpack.c.h.s8.bf16 %v687_v5 }
 0x169   : > { %3846 = vmatprep.subr.bf16.mxu0 %v1981_v18  ;;  %4502 = vmatprep.subr.bf16.mxu1 %v1983_v19  ;;  %v693_v18 = vld [vmem:[%s7801_s18 + $0xa88] sm:$0xff]  ;;  %v695_v19 = vld [vmem:[%s7801_s18 + $0xa98] sm:$0xff] }
 0x16c   : > { %3847 = vmatpush1.bf16.msra.mxu0 %v1980_v24  ;;  %4503 = vmatpush1.bf16.msra.mxu1 %v1982_v23  ;;  %v2053_v24 = vunpack.c.l.s8.bf16 %v693_v18  ;;  %v2055_v23 = vunpack.c.l.s8.bf16 %v695_v19 }
 0x16d   : > { %3848 = vmatprep.subr.bf16.mxu0 %v1989_v25  ;;  %4504 = vmatprep.subr.bf16.mxu1 %v1991_v26  ;;  %v692_v25 = vld [vmem:[%s7801_s18 + $0xa80] sm:$0xff]  ;;  %v694_v26 = vld [vmem:[%s7801_s18 + $0xa90] sm:$0xff] }
 0x16e   : > { %v2052_v44 = vunpack.c.l.s8.bf16 %v692_v25  ;;  %v2054_v27 = vunpack.c.l.s8.bf16 %v694_v26  ;;  %v2060_v33 = vunpack.c.h.s8.bf16 %v692_v25  ;;  %v2062_v34 = vunpack.c.h.s8.bf16 %v694_v26 }
 0x170   : > { %3849 = vmatpush1.bf16.msra.mxu0 %v1988_v28  ;;  %4505 = vmatpush1.bf16.msra.mxu1 %v1990_v29  ;;  %v2061_v28 = vunpack.c.h.s8.bf16 %v693_v18  ;;  %v2063_v29 = vunpack.c.h.s8.bf16 %v695_v19 }
 0x171   : > { %3850 = vmatprep.subr.bf16.mxu0 %v1997_v30  ;;  %4506 = vmatprep.subr.bf16.mxu1 %v1999_v32  ;;  %v701_v30 = vld [vmem:[%s7801_s18 + $0xac8] sm:$0xff]  ;;  %v703_v32 = vld [vmem:[%s7801_s18 + $0xad8] sm:$0xff] }
 0x174   : > { %3851 = vmatpush1.bf16.msra.mxu0 %v1996_v35  ;;  %4507 = vmatpush1.bf16.msra.mxu1 %v1998_v36  ;;  %v2069_v35 = vunpack.c.l.s8.bf16 %v701_v30  ;;  %v2071_v36 = vunpack.c.l.s8.bf16 %v703_v32 }
 0x175   : > { %3852 = vmatprep.subr.bf16.mxu0 %v2005_v37  ;;  %4508 = vmatprep.subr.bf16.mxu1 %v2007_v40  ;;  %v700_v37 = vld [vmem:[%s7801_s18 + $0xac0] sm:$0xff]  ;;  %v702_v40 = vld [vmem:[%s7801_s18 + $0xad0] sm:$0xff] }
 0x176   : > { %v2068_v41 = vunpack.c.l.s8.bf16 %v700_v37  ;;  %v2070_v42 = vunpack.c.l.s8.bf16 %v702_v40  ;;  %v2076_v48 = vunpack.c.h.s8.bf16 %v700_v37  ;;  %v2078_v52 = vunpack.c.h.s8.bf16 %v702_v40 }
 0x177   : > { %v3481_v37 = vcombine.high %v8004_v51, %v8004_v51 }
 0x178   : > { %3853 = vmatpush1.bf16.msra.mxu0 %v2004_v43  ;;  %4509 = vmatpush1.bf16.msra.mxu1 %v2006_v45  ;;  %v2077_v43 = vunpack.c.h.s8.bf16 %v701_v30  ;;  %v2079_v45 = vunpack.c.h.s8.bf16 %v703_v32 }
 0x179   : > { %3854 = vmatprep.subr.bf16.mxu0 %v2013_v46  ;;  %4510 = vmatprep.subr.bf16.mxu1 %v2015_v47  ;;  %v709_v46 = vld [vmem:[%s7801_s18 + $0xb08] sm:$0xff]  ;;  %v711_v47 = vld [vmem:[%s7801_s18 + $0xb18] sm:$0xff] }
 0x17c   : > { %3855 = vmatpush1.bf16.msra.mxu0 %v2012_v54  ;;  %4511 = vmatpush1.bf16.msra.mxu1 %v2014_v55  ;;  %v2085_v54 = vunpack.c.l.s8.bf16 %v709_v46  ;;  %v2087_v55 = vunpack.c.l.s8.bf16 %v711_v47 }
 0x17d   : > { %3865 = vmatprep.subr.bf16.mxu0 %v2021_v56  ;;  %4521 = vmatprep.subr.bf16.mxu1 %v2023_v57  ;;  %v708_v56 = vld [vmem:[%s7801_s18 + $0xb00] sm:$0xff]  ;;  %v710_v57 = vld [vmem:[%s7801_s18 + $0xb10] sm:$0xff] }
 0x17e   : > { %v2084_v59 = vunpack.c.l.s8.bf16 %v708_v56  ;;  %v2086_v50 = vunpack.c.l.s8.bf16 %v710_v57  ;;  %v2092_v3 = vunpack.c.h.s8.bf16 %v708_v56  ;;  %v2094_v5 = vunpack.c.h.s8.bf16 %v710_v57  ;;  %v742_v56 = vld [vmem:[%s7801_s18 + $0xc10] sm:$0xff] }
 0x17f   : > { %3857 = vmatmul.mubr.bf16.vlgmr.msra.gmra.mrb[0].mxu0 %v8061_v62  ;;  %4513 = vmatmul.mubr.bf16.vlgmr.msra.gmra.mrb[0].mxu1 %v8061_v62 }
 0x180   : > { %3866 = vmatpush1.bf16.msra.mxu0 %v2020_v63  ;;  %4522 = vmatpush1.bf16.msra.mxu1 %v2022_v0  ;;  %v2093_v63 = vunpack.c.h.s8.bf16 %v709_v46  ;;  %v2095_v0 = vunpack.c.h.s8.bf16 %v711_v47  ;;  %v743_v46 = vld [vmem:[%s7801_s18 + $0xc18] sm:$0xff]  ;;  %v8104_v47 = vrot.slane %v3481_v37, %v7836_v49  ;;  %v764_v37 = vld [vmem:[%s7801_s18 + $0xcc0] sm:$0xff] }
 0x181   : > { %3867 = vmatprep.subr.bf16.mxu0 %v2029_v1  ;;  %4523 = vmatprep.subr.bf16.mxu1 %v2031_v2  ;;  %v717_v1 = vld [vmem:[%s7801_s18 + $0xb48] sm:$0xff]  ;;  %v719_v2 = vld [vmem:[%s7801_s18 + $0xb58] sm:$0xff] }
 0x182   : > { %3897 = vmatprep.mubr.bf16.mxu0 %v8067_v6  ;;  %4553 = vmatprep.mubr.bf16.mxu1 %v8067_v6  ;;  %v3497_v57 = vcombine.high %v8104_v47, %v8104_v47 }
 0x184   : > { %3868 = vmatpush1.bf16.msra.mxu0 %v2028_v60  ;;  %4524 = vmatpush1.bf16.msra.mxu1 %v2030_v7  ;;  %v2101_v60 = vunpack.c.l.s8.bf16 %v717_v1  ;;  %v2103_v7 = vunpack.c.l.s8.bf16 %v719_v2 }
 0x185   : > { %3869 = vmatprep.subr.bf16.mxu0 %v2037_v8  ;;  %4525 = vmatprep.subr.bf16.mxu1 %v2039_v9  ;;  %v716_v8 = vld [vmem:[%s7801_s18 + $0xb40] sm:$0xff]  ;;  %v718_v9 = vld [vmem:[%s7801_s18 + $0xb50] sm:$0xff] }
 0x186   : > { %v2100_v10 = vunpack.c.l.s8.bf16 %v716_v8  ;;  %v2102_v12 = vunpack.c.l.s8.bf16 %v718_v9  ;;  %v2108_v18 = vunpack.c.h.s8.bf16 %v716_v8  ;;  %v2110_v19 = vunpack.c.h.s8.bf16 %v718_v9 }
 0x188   : > { %3870 = vmatpush1.bf16.msra.mxu0 %v2036_v13  ;;  %4526 = vmatpush1.bf16.msra.mxu1 %v2038_v14  ;;  %v2109_v13 = vunpack.c.h.s8.bf16 %v717_v1  ;;  %v2111_v14 = vunpack.c.h.s8.bf16 %v719_v2  ;;  %v2159_v1 = vunpack.c.h.s8.bf16 %v743_v46  ;;  %v749_v2 = vld [vmem:[%s7801_s18 + $0xc48] sm:$0xff] }
 0x189   : > { %3871 = vmatprep.subr.bf16.mxu0 %v2045_v16  ;;  %4527 = vmatprep.subr.bf16.mxu1 %v2047_v17  ;;  %v725_v16 = vld [vmem:[%s7801_s18 + $0xb88] sm:$0xff]  ;;  %v727_v17 = vld [vmem:[%s7801_s18 + $0xb98] sm:$0xff]  ;;  %v2165_v8 = vunpack.c.l.s8.bf16 %v749_v2 }
 0x18c   : > { %3872 = vmatpush1.bf16.msra.mxu0 %v2044_v20  ;;  %4528 = vmatpush1.bf16.msra.mxu1 %v2046_v21  ;;  %v2117_v20 = vunpack.c.l.s8.bf16 %v725_v16  ;;  %v2119_v21 = vunpack.c.l.s8.bf16 %v727_v17 }
 0x18d   : > { %3873 = vmatprep.subr.bf16.mxu0 %v2053_v24  ;;  %4529 = vmatprep.subr.bf16.mxu1 %v2055_v23  ;;  %v724_v24 = vld [vmem:[%s7801_s18 + $0xb80] sm:$0xff]  ;;  %v726_v23 = vld [vmem:[%s7801_s18 + $0xb90] sm:$0xff] }
 0x18e   : > { %v2116_v25 = vunpack.c.l.s8.bf16 %v724_v24  ;;  %v2118_v26 = vunpack.c.l.s8.bf16 %v726_v23  ;;  %v2124_v30 = vunpack.c.h.s8.bf16 %v724_v24  ;;  %v2126_v32 = vunpack.c.h.s8.bf16 %v726_v23 }
 0x190   : > { %3874 = vmatpush1.bf16.msra.mxu0 %v2052_v44  ;;  %4530 = vmatpush1.bf16.msra.mxu1 %v2054_v27  ;;  %v2125_v44 = vunpack.c.h.s8.bf16 %v725_v16  ;;  %v2127_v27 = vunpack.c.h.s8.bf16 %v727_v17  ;;  %v2173_v16 = vunpack.c.h.s8.bf16 %v749_v2  ;;  %v781_v2 = vld [vmem:[%s7801_s18 + $0xd48] sm:$0xff] }
 0x191   : > { %3875 = vmatprep.subr.bf16.mxu0 %v2061_v28  ;;  %4531 = vmatprep.subr.bf16.mxu1 %v2063_v29  ;;  %v733_v28 = vld [vmem:[%s7801_s18 + $0xbc8] sm:$0xff]  ;;  %v735_v29 = vld [vmem:[%s7801_s18 + $0xbd8] sm:$0xff] }
 0x194   : > { %3876 = vmatpush1.bf16.msra.mxu0 %v2060_v33  ;;  %4532 = vmatpush1.bf16.msra.mxu1 %v2062_v34  ;;  %v2133_v33 = vunpack.c.l.s8.bf16 %v733_v28  ;;  %v2135_v34 = vunpack.c.l.s8.bf16 %v735_v29 }
 0x195   : > { %3877 = vmatprep.subr.bf16.mxu0 %v2069_v35  ;;  %4533 = vmatprep.subr.bf16.mxu1 %v2071_v36  ;;  %v732_v35 = vld [vmem:[%s7801_s18 + $0xbc0] sm:$0xff]  ;;  %v734_v36 = vld [vmem:[%s7801_s18 + $0xbd0] sm:$0xff] }
 0x196   : > { %v2132_v40 = vunpack.c.l.s8.bf16 %v732_v35 }
 0x198   : > { %3878 = vmatpush1.bf16.msra.mxu0 %v2068_v41  ;;  %4534 = vmatpush1.bf16.msra.mxu1 %v2070_v42  ;;  %v2134_v41 = vunpack.c.l.s8.bf16 %v734_v36  ;;  %v2141_v42 = vunpack.c.h.s8.bf16 %v733_v28 }
 0x199   : > { %3879 = vmatprep.subr.bf16.mxu0 %v2077_v43  ;;  %4535 = vmatprep.subr.bf16.mxu1 %v2079_v45  ;;  %v2143_v43 = vunpack.c.h.s8.bf16 %v735_v29  ;;  %v741_v45 = vld [vmem:[%s7801_s18 + $0xc08] sm:$0xff] }
 0x19a   : > { %v2149_v51 = vunpack.c.l.s8.bf16 %v741_v45 }
 0x19c   : > { %3880 = vmatpush1.bf16.msra.mxu0 %v2076_v48  ;;  %4536 = vmatpush1.bf16.msra.mxu1 %v2078_v52  ;;  %v2140_v48 = vunpack.c.h.s8.bf16 %v732_v35  ;;  %v2142_v52 = vunpack.c.h.s8.bf16 %v734_v36 }
 0x19d   : > { %3881 = vmatprep.subr.bf16.mxu0 %v2085_v54  ;;  %4537 = vmatprep.subr.bf16.mxu1 %v2087_v55  ;;  %v2151_v54 = vunpack.c.l.s8.bf16 %v743_v46  ;;  %v740_v55 = vld [vmem:[%s7801_s18 + $0xc00] sm:$0xff]  ;;  %v773_v46 = vld [vmem:[%s7801_s18 + $0xd08] sm:$0xff] }
 0x1a0   : > { %3882 = vmatpush1.bf16.msra.mxu0 %v2084_v59  ;;  %4538 = vmatpush1.bf16.msra.mxu1 %v2086_v50  ;;  %v8112_v59 = vcombine.high %v8061_v62, %v8061_v62  ;;  %v2148_v50 = vunpack.c.l.s8.bf16 %v740_v55 }
 0x1a1   : > { %3883 = vmatprep.subr.bf16.mxu0 %v2093_v63  ;;  %4539 = vmatprep.subr.bf16.mxu1 %v2095_v0  ;;  %v2150_v63 = vunpack.c.l.s8.bf16 %v742_v56  ;;  %v2157_v0 = vunpack.c.h.s8.bf16 %v741_v45 }
 0x1a4   : > { %3884 = vmatpush1.bf16.msra.mxu0 %v2092_v3  ;;  %4540 = vmatpush1.bf16.msra.mxu1 %v2094_v5  ;;  %v751_v3 = vld [vmem:[%s7801_s18 + $0xc58] sm:$0xff]  ;;  %v8117_v5 = vrot.slane %v3497_v57, %v7836_v49  ;;  %v774_v57 = vld [vmem:[%s7801_s18 + $0xd10] sm:$0xff] }
 0x1a5   : > { %3885 = vmatprep.subr.bf16.mxu0 %v2101_v60  ;;  %4541 = vmatprep.subr.bf16.mxu1 %v2103_v7  ;;  %v2156_v60 = vunpack.c.h.s8.bf16 %v740_v55  ;;  %v2158_v7 = vunpack.c.h.s8.bf16 %v742_v56  ;;  %v2167_v9 = vunpack.c.l.s8.bf16 %v751_v3  ;;  %v2175_v17 = vunpack.c.h.s8.bf16 %v751_v3  ;;  %v772_v56 = vld [vmem:[%s7801_s18 + $0xd00] sm:$0xff]  ;;  %v783_v3 = vld [vmem:[%s7801_s18 + $0xd58] sm:$0xff] }
 0x1a8   : > { %3886 = vmatpush1.bf16.msra.mxu0 %v2100_v10  ;;  %4542 = vmatpush1.bf16.msra.mxu1 %v2102_v12  ;;  %v748_v10 = vld [vmem:[%s7801_s18 + $0xc40] sm:$0xff]  ;;  %v750_v12 = vld [vmem:[%s7801_s18 + $0xc50] sm:$0xff] }
 0x1a9   : > { %3887 = vmatprep.subr.bf16.mxu0 %v2109_v13  ;;  %4543 = vmatprep.subr.bf16.mxu1 %v2111_v14  ;;  %v2164_v13 = vunpack.c.l.s8.bf16 %v748_v10  ;;  %v2166_v14 = vunpack.c.l.s8.bf16 %v750_v12 }
 0x1ac   : > { %3888 = vmatpush1.bf16.msra.mxu0 %v2108_v18  ;;  %4544 = vmatpush1.bf16.msra.mxu1 %v2110_v19  ;;  %v757_v18 = vld [vmem:[%s7801_s18 + $0xc88] sm:$0xff]  ;;  %v759_v19 = vld [vmem:[%s7801_s18 + $0xc98] sm:$0xff] }
 0x1ad   : > { %3889 = vmatprep.subr.bf16.mxu0 %v2117_v20  ;;  %4545 = vmatprep.subr.bf16.mxu1 %v2119_v21  ;;  %v2172_v20 = vunpack.c.h.s8.bf16 %v748_v10  ;;  %v2174_v21 = vunpack.c.h.s8.bf16 %v750_v12  ;;  %v2181_v24 = vunpack.c.l.s8.bf16 %v757_v18  ;;  %v2183_v23 = vunpack.c.l.s8.bf16 %v759_v19  ;;  %v780_v10 = vld [vmem:[%s7801_s18 + $0xd40] sm:$0xff]  ;;  %v782_v12 = vld [vmem:[%s7801_s18 + $0xd50] sm:$0xff] }
 0x1ae   : > { %v2189_v28 = vunpack.c.h.s8.bf16 %v757_v18  ;;  %v2191_v29 = vunpack.c.h.s8.bf16 %v759_v19  ;;  %v789_v18 = vld [vmem:[%s7801_s18 + $0xd88] sm:$0xff]  ;;  %v791_v19 = vld [vmem:[%s7801_s18 + $0xd98] sm:$0xff] }
 0x1b0   : > { %3890 = vmatpush1.bf16.msra.mxu0 %v2116_v25  ;;  %4546 = vmatpush1.bf16.msra.mxu1 %v2118_v26  ;;  %v756_v25 = vld [vmem:[%s7801_s18 + $0xc80] sm:$0xff]  ;;  %v758_v26 = vld [vmem:[%s7801_s18 + $0xc90] sm:$0xff] }
 0x1b1   : > { %3891 = vmatprep.subr.bf16.mxu0 %v2125_v44  ;;  %4547 = vmatprep.subr.bf16.mxu1 %v2127_v27  ;;  %v2180_v44 = vunpack.c.l.s8.bf16 %v756_v25  ;;  %v2182_v27 = vunpack.c.l.s8.bf16 %v758_v26 }
 0x1b4   : > { %3892 = vmatpush1.bf16.msra.mxu0 %v2124_v30  ;;  %4548 = vmatpush1.bf16.msra.mxu1 %v2126_v32  ;;  %v765_v30 = vld [vmem:[%s7801_s18 + $0xcc8] sm:$0xff]  ;;  %v767_v32 = vld [vmem:[%s7801_s18 + $0xcd8] sm:$0xff] }
 0x1b5   : > { %3893 = vmatprep.subr.bf16.mxu0 %v2133_v33  ;;  %4549 = vmatprep.subr.bf16.mxu1 %v2135_v34  ;;  %v2188_v33 = vunpack.c.h.s8.bf16 %v756_v25  ;;  %v2190_v34 = vunpack.c.h.s8.bf16 %v758_v26  ;;  %v2197_v35 = vunpack.c.l.s8.bf16 %v765_v30  ;;  %v2199_v36 = vunpack.c.l.s8.bf16 %v767_v32  ;;  %v788_v25 = vld [vmem:[%s7801_s18 + $0xd80] sm:$0xff]  ;;  %v790_v26 = vld [vmem:[%s7801_s18 + $0xd90] sm:$0xff] }
 0x1b6   : > { %v2207_v45 = vunpack.c.h.s8.bf16 %v767_v32  ;;  %v799_v32 = vld [vmem:[%s7801_s18 + $0xdd8] sm:$0xff] }
 0x1b8   : > { %3894 = vmatpush1.bf16.msra.mxu0 %v2132_v40  ;;  %4550 = vmatpush1.bf16.msra.mxu1 %v2134_v41  ;;  %v766_v40 = vld [vmem:[%s7801_s18 + $0xcd0] sm:$0xff]  ;;  %v2196_v41 = vunpack.c.l.s8.bf16 %v764_v37 }
 0x1b9   : > { %3895 = vmatprep.subr.bf16.mxu0 %v2141_v42  ;;  %4551 = vmatprep.subr.bf16.mxu1 %v2143_v43  ;;  %v2198_v42 = vunpack.c.l.s8.bf16 %v766_v40  ;;  %v2205_v43 = vunpack.c.h.s8.bf16 %v765_v30  ;;  %v797_v30 = vld [vmem:[%s7801_s18 + $0xdc8] sm:$0xff] }
 0x1bc   : > { %3896 = vmatpush1.bf16.msra.mxu0 %v2140_v48  ;;  %4552 = vmatpush1.bf16.msra.mxu1 %v2142_v52  ;;  %v775_v48 = vld [vmem:[%s7801_s18 + $0xd18] sm:$0xff]  ;;  %v2204_v52 = vunpack.c.h.s8.bf16 %v764_v37  ;;  %v796_v37 = vld [vmem:[%s7801_s18 + $0xdc0] sm:$0xff] }
 0x1bd   : > { %3906 = vmatprep.subr.bf16.mxu0 %v2149_v51  ;;  %4562 = vmatprep.subr.bf16.mxu1 %v2151_v54  ;;  %v2206_v51 = vunpack.c.h.s8.bf16 %v766_v40  ;;  %v2213_v54 = vunpack.c.l.s8.bf16 %v773_v46  ;;  %v2215_v55 = vunpack.c.l.s8.bf16 %v775_v48  ;;  %v798_v40 = vld [vmem:[%s7801_s18 + $0xdd0] sm:$0xff] }
 0x1bf   : > { %3898 = vmatmul.mubr.bf16.vlgmr.msra.gmra.mrb[0].mxu0 %v8112_v59  ;;  %4554 = vmatmul.mubr.bf16.vlgmr.msra.gmra.mrb[0].mxu1 %v8112_v59 }
 0x1c0   : > { %3907 = vmatpush1.bf16.msra.mxu0 %v2148_v50  ;;  %4563 = vmatpush1.bf16.msra.mxu1 %v2150_v63  ;;  %v2212_v50 = vunpack.c.l.s8.bf16 %v772_v56  ;;  %v2214_v63 = vunpack.c.l.s8.bf16 %v774_v57 }
 0x1c1   : > { %3908 = vmatprep.subr.bf16.mxu0 %v2157_v0  ;;  %4564 = vmatprep.subr.bf16.mxu1 %v2159_v1  ;;  %v2221_v0 = vunpack.c.h.s8.bf16 %v773_v46  ;;  %v2223_v1 = vunpack.c.h.s8.bf16 %v775_v48  ;;  %v805_v46 = vld [vmem:[%s7801_s18 + $0xe08] sm:$0xff]  ;;  %v807_v48 = vld [vmem:[%s7801_s18 + $0xe18] sm:$0xff] }
 0x1c2   : > { %3938 = vmatprep.mubr.bf16.mxu0 %v8117_v5  ;;  %4594 = vmatprep.mubr.bf16.mxu1 %v8117_v5 }
 0x1c4   : > { %3909 = vmatpush1.bf16.msra.mxu0 %v2156_v60  ;;  %4565 = vmatpush1.bf16.msra.mxu1 %v2158_v7  ;;  %v2220_v60 = vunpack.c.h.s8.bf16 %v772_v56  ;;  %v2222_v7 = vunpack.c.h.s8.bf16 %v774_v57  ;;  %v804_v56 = vld [vmem:[%s7801_s18 + $0xe00] sm:$0xff]  ;;  %v806_v57 = vld [vmem:[%s7801_s18 + $0xe10] sm:$0xff] }
 0x1c5   : > { %3910 = vmatprep.subr.bf16.mxu0 %v2165_v8  ;;  %4566 = vmatprep.subr.bf16.mxu1 %v2167_v9  ;;  %v2229_v8 = vunpack.c.l.s8.bf16 %v781_v2  ;;  %v2231_v9 = vunpack.c.l.s8.bf16 %v783_v3 }
 0x1c8   : > { %3911 = vmatpush1.bf16.msra.mxu0 %v2164_v13  ;;  %4567 = vmatpush1.bf16.msra.mxu1 %v2166_v14  ;;  %v2228_v13 = vunpack.c.l.s8.bf16 %v780_v10  ;;  %v2230_v14 = vunpack.c.l.s8.bf16 %v782_v12 }
 0x1c9   : > { %3912 = vmatprep.subr.bf16.mxu0 %v2173_v16  ;;  %4568 = vmatprep.subr.bf16.mxu1 %v2175_v17  ;;  %v2237_v16 = vunpack.c.h.s8.bf16 %v781_v2  ;;  %v2239_v17 = vunpack.c.h.s8.bf16 %v783_v3  ;;  %v2287_v2 = vunpack.c.h.s8.bf16 %v807_v48  ;;  %v813_v3 = vld [vmem:[%s7801_s18 + $0xe48] sm:$0xff] }
 0x1cc   : > { %3913 = vmatpush1.bf16.msra.mxu0 %v2172_v20  ;;  %4569 = vmatpush1.bf16.msra.mxu1 %v2174_v21  ;;  %v2236_v20 = vunpack.c.h.s8.bf16 %v780_v10  ;;  %v2238_v21 = vunpack.c.h.s8.bf16 %v782_v12  ;;  %v812_v12 = vld [vmem:[%s7801_s18 + $0xe40] sm:$0xff] }
 0x1cd   : > { %3914 = vmatprep.subr.bf16.mxu0 %v2181_v24  ;;  %4570 = vmatprep.subr.bf16.mxu1 %v2183_v23  ;;  %v2245_v24 = vunpack.c.l.s8.bf16 %v789_v18  ;;  %v2247_v23 = vunpack.c.l.s8.bf16 %v791_v19 }
 0x1d0   : > { %3915 = vmatpush1.bf16.msra.mxu0 %v2180_v44  ;;  %4571 = vmatpush1.bf16.msra.mxu1 %v2182_v27  ;;  %v2244_v44 = vunpack.c.l.s8.bf16 %v788_v25  ;;  %v2246_v27 = vunpack.c.l.s8.bf16 %v790_v26 }
 0x1d1   : > { %3916 = vmatprep.subr.bf16.mxu0 %v2189_v28  ;;  %4572 = vmatprep.subr.bf16.mxu1 %v2191_v29  ;;  %v2253_v28 = vunpack.c.h.s8.bf16 %v789_v18  ;;  %v2255_v29 = vunpack.c.h.s8.bf16 %v791_v19  ;;  %v821_v19 = vld [vmem:[%s7801_s18 + $0xe88] sm:$0xff] }
 0x1d4   : > { %3917 = vmatpush1.bf16.msra.mxu0 %v2188_v33  ;;  %4573 = vmatpush1.bf16.msra.mxu1 %v2190_v34  ;;  %v2252_v33 = vunpack.c.h.s8.bf16 %v788_v25  ;;  %v2254_v34 = vunpack.c.h.s8.bf16 %v790_v26  ;;  %v820_v26 = vld [vmem:[%s7801_s18 + $0xe80] sm:$0xff] }
 0x1d5   : > { %3918 = vmatprep.subr.bf16.mxu0 %v2197_v35  ;;  %4574 = vmatprep.subr.bf16.mxu1 %v2199_v36  ;;  %v2261_v35 = vunpack.c.l.s8.bf16 %v797_v30  ;;  %v2263_v36 = vunpack.c.l.s8.bf16 %v799_v32 }
 0x1d8   : > { %3919 = vmatpush1.bf16.msra.mxu0 %v2196_v41  ;;  %4575 = vmatpush1.bf16.msra.mxu1 %v2198_v42  ;;  %v2260_v41 = vunpack.c.l.s8.bf16 %v796_v37  ;;  %v2262_v42 = vunpack.c.l.s8.bf16 %v798_v40 }
 0x1d9   : > { %3920 = vmatprep.subr.bf16.mxu0 %v2205_v43  ;;  %4576 = vmatprep.subr.bf16.mxu1 %v2207_v45  ;;  %v2269_v43 = vunpack.c.h.s8.bf16 %v797_v30  ;;  %v2271_v45 = vunpack.c.h.s8.bf16 %v799_v32  ;;  %v829_v32 = vld [vmem:[%s7801_s18 + $0xec8] sm:$0xff] }
 0x1dc   : > { %3921 = vmatpush1.bf16.msra.mxu0 %v2204_v52  ;;  %4577 = vmatpush1.bf16.msra.mxu1 %v2206_v51  ;;  %v2268_v52 = vunpack.c.h.s8.bf16 %v796_v37  ;;  %v2270_v51 = vunpack.c.h.s8.bf16 %v798_v40  ;;  %v828_v40 = vld [vmem:[%s7801_s18 + $0xec0] sm:$0xff] }
 0x1dd   : > { %3922 = vmatprep.subr.bf16.mxu0 %v2213_v54  ;;  %4578 = vmatprep.subr.bf16.mxu1 %v2215_v55  ;;  %v2277_v54 = vunpack.c.l.s8.bf16 %v805_v46  ;;  %v2279_v55 = vunpack.c.l.s8.bf16 %v807_v48  ;;  %v837_v48 = vld [vmem:[%s7801_s18 + $0xf08] sm:$0xff] }
 0x1e0   : > { %3923 = vmatpush1.bf16.msra.mxu0 %v2212_v50  ;;  %4579 = vmatpush1.bf16.msra.mxu1 %v2214_v63  ;;  %v8155_v50 = vrot.slane %v8104_v47, %v7836_v49  ;;  %v2276_v63 = vunpack.c.l.s8.bf16 %v804_v56  ;;  %v2284_v47 = vunpack.c.h.s8.bf16 %v804_v56 }
 0x1e1   : > { %3924 = vmatprep.subr.bf16.mxu0 %v2221_v0  ;;  %4580 = vmatprep.subr.bf16.mxu1 %v2223_v1  ;;  %v2278_v0 = vunpack.c.l.s8.bf16 %v806_v57  ;;  %v2285_v1 = vunpack.c.h.s8.bf16 %v805_v46 }
 0x1e4   : > { %3925 = vmatpush1.bf16.msra.mxu0 %v2220_v60  ;;  %4581 = vmatpush1.bf16.msra.mxu1 %v2222_v7  ;;  %v815_v60 = vld [vmem:[%s7801_s18 + $0xe58] sm:$0xff]  ;;  %v8161_v7 = vcombine.high %v8117_v5, %v8117_v5 }
 0x1e5   : > { %3926 = vmatprep.subr.bf16.mxu0 %v2229_v8  ;;  %4582 = vmatprep.subr.bf16.mxu1 %v2231_v9  ;;  %v2286_v8 = vunpack.c.h.s8.bf16 %v806_v57  ;;  %v2293_v9 = vunpack.c.l.s8.bf16 %v813_v3  ;;  %v2295_v10 = vunpack.c.l.s8.bf16 %v815_v60  ;;  %v2303_v18 = vunpack.c.h.s8.bf16 %v815_v60  ;;  %v836_v57 = vld [vmem:[%s7801_s18 + $0xf00] sm:$0xff]  ;;  %v845_v60 = vld [vmem:[%s7801_s18 + $0xf48] sm:$0xff] }
 0x1e8   : > { %3927 = vmatpush1.bf16.msra.mxu0 %v2228_v13  ;;  %4583 = vmatpush1.bf16.msra.mxu1 %v2230_v14  ;;  %v814_v13 = vld [vmem:[%s7801_s18 + $0xe50] sm:$0xff]  ;;  %v2292_v14 = vunpack.c.l.s8.bf16 %v812_v12 }
 0x1e9   : > { %3928 = vmatprep.subr.bf16.mxu0 %v2237_v16  ;;  %4584 = vmatprep.subr.bf16.mxu1 %v2239_v17  ;;  %v2294_v16 = vunpack.c.l.s8.bf16 %v814_v13  ;;  %v2301_v17 = vunpack.c.h.s8.bf16 %v813_v3 }
 0x1ec   : > { %3929 = vmatpush1.bf16.msra.mxu0 %v2236_v20  ;;  %4585 = vmatpush1.bf16.msra.mxu1 %v2238_v21  ;;  %v823_v20 = vld [vmem:[%s7801_s18 + $0xe98] sm:$0xff]  ;;  %v2300_v21 = vunpack.c.h.s8.bf16 %v812_v12 }
 0x1ed   : > { %3930 = vmatprep.subr.bf16.mxu0 %v2245_v24  ;;  %4586 = vmatprep.subr.bf16.mxu1 %v2247_v23  ;;  %v2302_v24 = vunpack.c.h.s8.bf16 %v814_v13  ;;  %v2309_v23 = vunpack.c.l.s8.bf16 %v821_v19  ;;  %v2311_v25 = vunpack.c.l.s8.bf16 %v823_v20  ;;  %v2319_v30 = vunpack.c.h.s8.bf16 %v823_v20  ;;  %v844_v13 = vld [vmem:[%s7801_s18 + $0xf40] sm:$0xff]  ;;  %v853_v20 = vld [vmem:[%s7801_s18 + $0xf88] sm:$0xff] }
 0x1f0   : > { %3931 = vmatpush1.bf16.msra.mxu0 %v2244_v44  ;;  %4587 = vmatpush1.bf16.msra.mxu1 %v2246_v27  ;;  %v822_v44 = vld [vmem:[%s7801_s18 + $0xe90] sm:$0xff]  ;;  %v2308_v27 = vunpack.c.l.s8.bf16 %v820_v26 }
 0x1f1   : > { %3932 = vmatprep.subr.bf16.mxu0 %v2253_v28  ;;  %4588 = vmatprep.subr.bf16.mxu1 %v2255_v29  ;;  %v2310_v28 = vunpack.c.l.s8.bf16 %v822_v44  ;;  %v2317_v29 = vunpack.c.h.s8.bf16 %v821_v19 }
 0x1f4   : > { %3933 = vmatpush1.bf16.msra.mxu0 %v2252_v33  ;;  %4589 = vmatpush1.bf16.msra.mxu1 %v2254_v34  ;;  %v831_v33 = vld [vmem:[%s7801_s18 + $0xed8] sm:$0xff]  ;;  %v2316_v34 = vunpack.c.h.s8.bf16 %v820_v26 }
 0x1f5   : > { %3934 = vmatprep.subr.bf16.mxu0 %v2261_v35  ;;  %4590 = vmatprep.subr.bf16.mxu1 %v2263_v36  ;;  %v2318_v35 = vunpack.c.h.s8.bf16 %v822_v44  ;;  %v2325_v36 = vunpack.c.l.s8.bf16 %v829_v32  ;;  %v2327_v37 = vunpack.c.l.s8.bf16 %v831_v33  ;;  %v2335_v46 = vunpack.c.h.s8.bf16 %v831_v33  ;;  %v852_v44 = vld [vmem:[%s7801_s18 + $0xf80] sm:$0xff]  ;;  %v861_v33 = vld [vmem:[%s7801_s18 + $0xfc8] sm:$0xff] }
 0x1f8   : > { %3935 = vmatpush1.bf16.msra.mxu0 %v2260_v41  ;;  %4591 = vmatpush1.bf16.msra.mxu1 %v2262_v42  ;;  %v830_v41 = vld [vmem:[%s7801_s18 + $0xed0] sm:$0xff]  ;;  %v2324_v42 = vunpack.c.l.s8.bf16 %v828_v40 }
 0x1f9   : > { %3936 = vmatprep.subr.bf16.mxu0 %v2269_v43  ;;  %4592 = vmatprep.subr.bf16.mxu1 %v2271_v45  ;;  %v2326_v43 = vunpack.c.l.s8.bf16 %v830_v41  ;;  %v2333_v45 = vunpack.c.h.s8.bf16 %v829_v32 }
 0x1fc   : > { %3937 = vmatpush1.bf16.msra.mxu0 %v2268_v52  ;;  %4593 = vmatpush1.bf16.msra.mxu1 %v2270_v51  ;;  %v839_v52 = vld [vmem:[%s7801_s18 + $0xf18] sm:$0xff]  ;;  %v2332_v51 = vunpack.c.h.s8.bf16 %v828_v40 }
 0x1fd   : > { %3947 = vmatprep.subr.bf16.mxu0 %v2277_v54  ;;  %4603 = vmatprep.subr.bf16.mxu1 %v2279_v55  ;;  %v2334_v54 = vunpack.c.h.s8.bf16 %v830_v41  ;;  %v2341_v55 = vunpack.c.l.s8.bf16 %v837_v48  ;;  %v2343_v56 = vunpack.c.l.s8.bf16 %v839_v52  ;;  %v2351_v3 = vunpack.c.h.s8.bf16 %v839_v52  ;;  %v860_v41 = vld [vmem:[%s7801_s18 + $0xfc0] sm:$0xff] }
 0x1ff   : > { %3939 = vmatmul.mubr.bf16.vlgmr.msra.gmra.mrb[0].mxu0 %v8155_v50  ;;  %4595 = vmatmul.mubr.bf16.vlgmr.msra.gmra.mrb[0].mxu1 %v8155_v50 }
 0x200   : > { %3948 = vmatpush1.bf16.msra.mxu0 %v2276_v63  ;;  %4604 = vmatpush1.bf16.msra.mxu1 %v2278_v0  ;;  %v838_v63 = vld [vmem:[%s7801_s18 + $0xf10] sm:$0xff]  ;;  %v2340_v0 = vunpack.c.l.s8.bf16 %v836_v57 }
 0x201   : > { %3949 = vmatprep.subr.bf16.mxu0 %v2285_v1  ;;  %4605 = vmatprep.subr.bf16.mxu1 %v2287_v2  ;;  %v2342_v1 = vunpack.c.l.s8.bf16 %v838_v63  ;;  %v2349_v2 = vunpack.c.h.s8.bf16 %v837_v48  ;;  %v2397_v48 = vunpack.c.h.s8.bf16 %v861_v33 }
 0x202   : > { %3979 = vmatprep.mubr.bf16.mxu0 %v8161_v7  ;;  %4635 = vmatprep.mubr.bf16.mxu1 %v8161_v7 }
 0x204   : > { %3950 = vmatpush1.bf16.msra.mxu0 %v2284_v47  ;;  %4606 = vmatpush1.bf16.msra.mxu1 %v2286_v8  ;;  %v847_v47 = vld [vmem:[%s7801_s18 + $0xf58] sm:$0xff]  ;;  %v2348_v8 = vunpack.c.h.s8.bf16 %v836_v57 }
 0x205   : > { %3951 = vmatprep.subr.bf16.mxu0 %v2293_v9  ;;  %4607 = vmatprep.subr.bf16.mxu1 %v2295_v10  ;;  %v2350_v9 = vunpack.c.h.s8.bf16 %v838_v63  ;;  %v2357_v10 = vunpack.c.l.s8.bf16 %v845_v60  ;;  %v2359_v12 = vunpack.c.l.s8.bf16 %v847_v47  ;;  %v2367_v19 = vunpack.c.h.s8.bf16 %v847_v47 }
 0x208   : > { %3952 = vmatpush1.bf16.msra.mxu0 %v2292_v14  ;;  %4608 = vmatpush1.bf16.msra.mxu1 %v2294_v16  ;;  %v846_v14 = vld [vmem:[%s7801_s18 + $0xf50] sm:$0xff]  ;;  %v2356_v16 = vunpack.c.l.s8.bf16 %v844_v13 }
 0x209   : > { %3953 = vmatprep.subr.bf16.mxu0 %v2301_v17  ;;  %4609 = vmatprep.subr.bf16.mxu1 %v2303_v18  ;;  %v2358_v17 = vunpack.c.l.s8.bf16 %v846_v14  ;;  %v2365_v18 = vunpack.c.h.s8.bf16 %v845_v60  ;;  %v8208_v60 = vcombine.high %v8155_v50, %v8155_v50 }
 0x20c   : > { %3954 = vmatpush1.bf16.msra.mxu0 %v2300_v21  ;;  %4610 = vmatpush1.bf16.msra.mxu1 %v2302_v24  ;;  %v855_v21 = vld [vmem:[%s7801_s18 + $0xf98] sm:$0xff]  ;;  %v2364_v24 = vunpack.c.h.s8.bf16 %v844_v13 }
 0x20d   : > { %3955 = vmatprep.subr.bf16.mxu0 %v2309_v23  ;;  %4611 = vmatprep.subr.bf16.mxu1 %v2311_v25  ;;  %v2366_v23 = vunpack.c.h.s8.bf16 %v846_v14  ;;  %v2373_v25 = vunpack.c.l.s8.bf16 %v853_v20  ;;  %v2375_v26 = vunpack.c.l.s8.bf16 %v855_v21  ;;  %v2383_v32 = vunpack.c.h.s8.bf16 %v855_v21  ;;  %v879_v13 = vld [vmem:[%s7801_s18 + $0x1058] sm:$0xff]  ;;  %v878_v21 = vld [vmem:[%s7801_s18 + $0x1050] sm:$0xff] }
 0x210   : > { %3956 = vmatpush1.bf16.msra.mxu0 %v2308_v27  ;;  %4612 = vmatpush1.bf16.msra.mxu1 %v2310_v28  ;;  %v854_v27 = vld [vmem:[%s7801_s18 + $0xf90] sm:$0xff]  ;;  %v2372_v28 = vunpack.c.l.s8.bf16 %v852_v44 }
 0x211   : > { %3957 = vmatprep.subr.bf16.mxu0 %v2317_v29  ;;  %4613 = vmatprep.subr.bf16.mxu1 %v2319_v30  ;;  %v2374_v29 = vunpack.c.l.s8.bf16 %v854_v27  ;;  %v2381_v30 = vunpack.c.h.s8.bf16 %v853_v20  ;;  %v876_v20 = vld [vmem:[%s7801_s18 + $0x1040] sm:$0xff] }
 0x214   : > { %3958 = vmatpush1.bf16.msra.mxu0 %v2316_v34  ;;  %4614 = vmatpush1.bf16.msra.mxu1 %v2318_v35  ;;  %v863_v34 = vld [vmem:[%s7801_s18 + $0xfd8] sm:$0xff]  ;;  %v2380_v35 = vunpack.c.h.s8.bf16 %v852_v44  ;;  %v885_v44 = vld [vmem:[%s7801_s18 + $0x1088] sm:$0xff] }
 0x215   : > { %3959 = vmatprep.subr.bf16.mxu0 %v2325_v36  ;;  %4615 = vmatprep.subr.bf16.mxu1 %v2327_v37  ;;  %v2382_v36 = vunpack.c.h.s8.bf16 %v854_v27  ;;  %v2389_v37 = vunpack.c.l.s8.bf16 %v861_v33  ;;  %v2391_v40 = vunpack.c.l.s8.bf16 %v863_v34  ;;  %v2399_v52 = vunpack.c.h.s8.bf16 %v863_v34  ;;  %v887_v27 = vld [vmem:[%s7801_s18 + $0x1098] sm:$0xff]  ;;  %v884_v33 = vld [vmem:[%s7801_s18 + $0x1080] sm:$0xff]  ;;  %v886_v34 = vld [vmem:[%s7801_s18 + $0x1090] sm:$0xff] }
 0x218   : > { %3960 = vmatpush1.bf16.msra.mxu0 %v2324_v42  ;;  %4616 = vmatpush1.bf16.msra.mxu1 %v2326_v43  ;;  %v862_v42 = vld [vmem:[%s7801_s18 + $0xfd0] sm:$0xff]  ;;  %v8194_v43 = vld [vmem:[%s7811_s14 + $0x10] sm:$0xff] }
 0x219   : > { %3961 = vmatprep.subr.bf16.mxu0 %v2333_v45  ;;  %4617 = vmatprep.subr.bf16.mxu1 %v2335_v46  ;;  %v2388_v45 = vunpack.c.l.s8.bf16 %v860_v41  ;;  %v2390_v46 = vunpack.c.l.s8.bf16 %v862_v42  ;;  %v2398_v57 = vunpack.c.h.s8.bf16 %v862_v42  ;;  %v895_v42 = vld [vmem:[%s7801_s18 + $0x10d8] sm:$0xff] }
 0x21c   : > { %3962 = vmatpush1.bf16.msra.mxu0 %v2332_v51  ;;  %4618 = vmatpush1.bf16.msra.mxu1 %v2334_v54  ;;  %v869_v51 = vld [vmem:[%s7801_s18 + $0x1008] sm:$0xff]  ;;  %v871_v54 = vld [vmem:[%s7801_s18 + $0x1018] sm:$0xff] }
 0x21d   : > { %3963 = vmatprep.subr.bf16.mxu0 %v2341_v55  ;;  %4619 = vmatprep.subr.bf16.mxu1 %v2343_v56  ;;  %v8200_v55 = vrot.slane %v8194_v43, %v7836_v49  ;;  %v2396_v56 = vunpack.c.h.s8.bf16 %v860_v41  ;;  %v2405_v63 = vunpack.c.l.s8.bf16 %v869_v51  ;;  %v893_v41 = vld [vmem:[%s7801_s18 + $0x10c8] sm:$0xff] }
 0x220   : > { %3964 = vmatpush1.bf16.msra.mxu0 %v2340_v0  ;;  %4620 = vmatpush1.bf16.msra.mxu1 %v2342_v1  ;;  %v2407_v0 = vunpack.c.l.s8.bf16 %v871_v54  ;;  %v868_v1 = vld [vmem:[%s7801_s18 + $0x1000] sm:$0xff] }
 0x221   : > { %3965 = vmatprep.subr.bf16.mxu0 %v2349_v2  ;;  %4621 = vmatprep.subr.bf16.mxu1 %v2351_v3  ;;  %v870_v2 = vld [vmem:[%s7801_s18 + $0x1010] sm:$0xff]  ;;  %v3545_v3 = vcombine.high %v8200_v55, %v8200_v55  ;;  %v2404_v47 = vunpack.c.l.s8.bf16 %v868_v1 }
 0x223   : > { %v8213_v14 = vrot.slane %v3545_v3, %v7836_v49 }
 0x224   : > { %3966 = vmatpush1.bf16.msra.mxu0 %v2348_v8  ;;  %4622 = vmatpush1.bf16.msra.mxu1 %v2350_v9  ;;  %v2406_v8 = vunpack.c.l.s8.bf16 %v870_v2  ;;  %v2413_v9 = vunpack.c.h.s8.bf16 %v869_v51  ;;  %v892_v51 = vld [vmem:[%s7801_s18 + $0x10c0] sm:$0xff] }
 0x225   : > { %3967 = vmatprep.subr.bf16.mxu0 %v2357_v10  ;;  %4623 = vmatprep.subr.bf16.mxu1 %v2359_v12  ;;  %v2415_v10 = vunpack.c.h.s8.bf16 %v871_v54  ;;  %v877_v12 = vld [vmem:[%s7801_s18 + $0x1048] sm:$0xff]  ;;  %v894_v54 = vld [vmem:[%s7801_s18 + $0x10d0] sm:$0xff]  ;;  %v2460_v3 = vunpack.c.h.s8.bf16 %v892_v51 }
 0x228   : > { %3968 = vmatpush1.bf16.msra.mxu0 %v2356_v16  ;;  %4624 = vmatpush1.bf16.msra.mxu1 %v2358_v17  ;;  %v2412_v16 = vunpack.c.h.s8.bf16 %v868_v1  ;;  %v2414_v17 = vunpack.c.h.s8.bf16 %v870_v2  ;;  %v901_v1 = vld [vmem:[%s7801_s18 + $0x1108] sm:$0xff]  ;;  %v903_v2 = vld [vmem:[%s7801_s18 + $0x1118] sm:$0xff] }
 0x229   : > { %3969 = vmatprep.subr.bf16.mxu0 %v2365_v18  ;;  %4625 = vmatprep.subr.bf16.mxu1 %v2367_v19  ;;  %v2421_v18 = vunpack.c.l.s8.bf16 %v877_v12  ;;  %v2423_v19 = vunpack.c.l.s8.bf16 %v879_v13 }
 0x22c   : > { %3970 = vmatpush1.bf16.msra.mxu0 %v2364_v24  ;;  %4626 = vmatpush1.bf16.msra.mxu1 %v2366_v23  ;;  %v2420_v24 = vunpack.c.l.s8.bf16 %v876_v20  ;;  %v2422_v23 = vunpack.c.l.s8.bf16 %v878_v21 }
 0x22d   : > { %3971 = vmatprep.subr.bf16.mxu0 %v2373_v25  ;;  %4627 = vmatprep.subr.bf16.mxu1 %v2375_v26  ;;  %v2429_v25 = vunpack.c.h.s8.bf16 %v877_v12  ;;  %v2431_v26 = vunpack.c.h.s8.bf16 %v879_v13  ;;  %v902_v12 = vld [vmem:[%s7801_s18 + $0x1110] sm:$0xff] }
 0x230   : > { %3972 = vmatpush1.bf16.msra.mxu0 %v2372_v28  ;;  %4628 = vmatpush1.bf16.msra.mxu1 %v2374_v29  ;;  %v2428_v28 = vunpack.c.h.s8.bf16 %v876_v20  ;;  %v2430_v29 = vunpack.c.h.s8.bf16 %v878_v21  ;;  %v911_v20 = vld [vmem:[%s7801_s18 + $0x1158] sm:$0xff] }
 0x231   : > { %3973 = vmatprep.subr.bf16.mxu0 %v2381_v30  ;;  %4629 = vmatprep.subr.bf16.mxu1 %v2383_v32  ;;  %v2437_v30 = vunpack.c.l.s8.bf16 %v885_v44  ;;  %v2439_v32 = vunpack.c.l.s8.bf16 %v887_v27 }
 0x234   : > { %3974 = vmatpush1.bf16.msra.mxu0 %v2380_v35  ;;  %4630 = vmatpush1.bf16.msra.mxu1 %v2382_v36  ;;  %v2436_v35 = vunpack.c.l.s8.bf16 %v884_v33  ;;  %v2438_v36 = vunpack.c.l.s8.bf16 %v886_v34 }
 0x235   : > { %3975 = vmatprep.subr.bf16.mxu0 %v2389_v37  ;;  %4631 = vmatprep.subr.bf16.mxu1 %v2391_v40  ;;  %v2445_v37 = vunpack.c.h.s8.bf16 %v885_v44  ;;  %v2447_v40 = vunpack.c.h.s8.bf16 %v887_v27  ;;  %v910_v44 = vld [vmem:[%s7801_s18 + $0x1150] sm:$0xff] }
 0x238   : > { %3976 = vmatpush1.bf16.msra.mxu0 %v2388_v45  ;;  %4632 = vmatpush1.bf16.msra.mxu1 %v2390_v46  ;;  %v2444_v45 = vunpack.c.h.s8.bf16 %v884_v33  ;;  %v2446_v46 = vunpack.c.h.s8.bf16 %v886_v34  ;;  %v919_v33 = vld [vmem:[%s7801_s18 + $0x1198] sm:$0xff] }
 0x239   : > { %3977 = vmatprep.subr.bf16.mxu0 %v2397_v48  ;;  %4633 = vmatprep.subr.bf16.mxu1 %v2399_v52  ;;  %v2453_v48 = vunpack.c.l.s8.bf16 %v893_v41  ;;  %v2455_v52 = vunpack.c.l.s8.bf16 %v895_v42 }
 0x23c   : > { %3978 = vmatpush1.bf16.msra.mxu0 %v2396_v56  ;;  %4634 = vmatpush1.bf16.msra.mxu1 %v2398_v57  ;;  %v2452_v56 = vunpack.c.l.s8.bf16 %v892_v51  ;;  %v2454_v57 = vunpack.c.l.s8.bf16 %v894_v54  ;;  %v927_v51 = vld [vmem:[%s7801_s18 + $0x11d8] sm:$0xff] }
 0x23d   : > { %3988 = vmatprep.subr.bf16.mxu0 %v2405_v63  ;;  %4644 = vmatprep.subr.bf16.mxu1 %v2407_v0  ;;  %v2461_v63 = vunpack.c.h.s8.bf16 %v893_v41  ;;  %v2463_v0 = vunpack.c.h.s8.bf16 %v895_v42  ;;  %v918_v41 = vld [vmem:[%s7801_s18 + $0x1190] sm:$0xff] }
 0x23f   : > { %3980 = vmatmul.mubr.bf16.vlgmr.msra.gmra.mrb[0].mxu0 %v8208_v60  ;;  %4636 = vmatmul.mubr.bf16.vlgmr.msra.gmra.mrb[0].mxu1 %v8208_v60 }
 0x240   : > { %3989 = vmatpush1.bf16.msra.mxu0 %v2404_v47  ;;  %4645 = vmatpush1.bf16.msra.mxu1 %v2406_v8  ;;  %v2462_v47 = vunpack.c.h.s8.bf16 %v894_v54  ;;  %v2469_v8 = vunpack.c.l.s8.bf16 %v901_v1 }
 0x241   : > { %3990 = vmatprep.subr.bf16.mxu0 %v2413_v9  ;;  %4646 = vmatprep.subr.bf16.mxu1 %v2415_v10  ;;  %v2471_v9 = vunpack.c.l.s8.bf16 %v903_v2  ;;  %v900_v10 = vld [vmem:[%s7801_s18 + $0x1100] sm:$0xff] }
 0x242   : > { %4020 = vmatprep.mubr.bf16.mxu0 %v8213_v14  ;;  %4676 = vmatprep.mubr.bf16.mxu1 %v8213_v14  ;;  %v2468_v13 = vunpack.c.l.s8.bf16 %v900_v10  ;;  %v2476_v21 = vunpack.c.h.s8.bf16 %v900_v10  ;;  %v935_v10 = vld [vmem:[%s7801_s18 + $0x1218] sm:$0xff] }
 0x244   : > { %3991 = vmatpush1.bf16.msra.mxu0 %v2412_v16  ;;  %4647 = vmatpush1.bf16.msra.mxu1 %v2414_v17  ;;  %v2470_v16 = vunpack.c.l.s8.bf16 %v902_v12  ;;  %v2477_v17 = vunpack.c.h.s8.bf16 %v901_v1  ;;  %v926_v1 = vld [vmem:[%s7801_s18 + $0x11d0] sm:$0xff] }
 0x245   : > { %3992 = vmatprep.subr.bf16.mxu0 %v2421_v18  ;;  %4648 = vmatprep.subr.bf16.mxu1 %v2423_v19  ;;  %v2479_v18 = vunpack.c.h.s8.bf16 %v903_v2  ;;  %v909_v19 = vld [vmem:[%s7801_s18 + $0x1148] sm:$0xff] }
 0x248   : > { %3993 = vmatpush1.bf16.msra.mxu0 %v2420_v24  ;;  %4649 = vmatpush1.bf16.msra.mxu1 %v2422_v23  ;;  %v2478_v24 = vunpack.c.h.s8.bf16 %v902_v12  ;;  %v2485_v23 = vunpack.c.l.s8.bf16 %v909_v19 }
 0x249   : > { %3994 = vmatprep.subr.bf16.mxu0 %v2429_v25  ;;  %4650 = vmatprep.subr.bf16.mxu1 %v2431_v26  ;;  %v2487_v25 = vunpack.c.l.s8.bf16 %v911_v20  ;;  %v908_v26 = vld [vmem:[%s7801_s18 + $0x1140] sm:$0xff] }
 0x24a   : > { %v2484_v27 = vunpack.c.l.s8.bf16 %v908_v26  ;;  %v2492_v34 = vunpack.c.h.s8.bf16 %v908_v26  ;;  %v941_v26 = vld [vmem:[%s7801_s18 + $0x1248] sm:$0xff] }
 0x24c   : > { %3995 = vmatpush1.bf16.msra.mxu0 %v2428_v28  ;;  %4651 = vmatpush1.bf16.msra.mxu1 %v2430_v29  ;;  %v2486_v28 = vunpack.c.l.s8.bf16 %v910_v44  ;;  %v2493_v29 = vunpack.c.h.s8.bf16 %v909_v19  ;;  %v934_v19 = vld [vmem:[%s7801_s18 + $0x1210] sm:$0xff] }
 0x24d   : > { %3996 = vmatprep.subr.bf16.mxu0 %v2437_v30  ;;  %4652 = vmatprep.subr.bf16.mxu1 %v2439_v32  ;;  %v2495_v30 = vunpack.c.h.s8.bf16 %v911_v20  ;;  %v917_v32 = vld [vmem:[%s7801_s18 + $0x1188] sm:$0xff]  ;;  %v8251_v20 = vrot.slane %v8200_v55, %v7836_v49 }
 0x250   : > { %3997 = vmatpush1.bf16.msra.mxu0 %v2436_v35  ;;  %4653 = vmatpush1.bf16.msra.mxu1 %v2438_v36  ;;  %v2494_v35 = vunpack.c.h.s8.bf16 %v910_v44  ;;  %v2501_v36 = vunpack.c.l.s8.bf16 %v917_v32  ;;  %v943_v44 = vld [vmem:[%s7801_s18 + $0x1258] sm:$0xff] }
 0x251   : > { %3998 = vmatprep.subr.bf16.mxu0 %v2445_v37  ;;  %4654 = vmatprep.subr.bf16.mxu1 %v2447_v40  ;;  %v2503_v37 = vunpack.c.l.s8.bf16 %v919_v33  ;;  %v916_v40 = vld [vmem:[%s7801_s18 + $0x1180] sm:$0xff] }
 0x252   : > { %v2500_v42 = vunpack.c.l.s8.bf16 %v916_v40  ;;  %v2508_v54 = vunpack.c.h.s8.bf16 %v916_v40  ;;  %v949_v40 = vld [vmem:[%s7801_s18 + $0x1288] sm:$0xff] }
 0x254   : > { %3999 = vmatpush1.bf16.msra.mxu0 %v2444_v45  ;;  %4655 = vmatpush1.bf16.msra.mxu1 %v2446_v46  ;;  %v2502_v45 = vunpack.c.l.s8.bf16 %v918_v41  ;;  %v2509_v46 = vunpack.c.h.s8.bf16 %v917_v32  ;;  %v940_v32 = vld [vmem:[%s7801_s18 + $0x1240] sm:$0xff] }
 0x255   : > { %4000 = vmatprep.subr.bf16.mxu0 %v2453_v48  ;;  %4656 = vmatprep.subr.bf16.mxu1 %v2455_v52  ;;  %v2511_v48 = vunpack.c.h.s8.bf16 %v919_v33  ;;  %v925_v52 = vld [vmem:[%s7801_s18 + $0x11c8] sm:$0xff]  ;;  %v942_v33 = vld [vmem:[%s7801_s18 + $0x1250] sm:$0xff] }
 0x258   : > { %4001 = vmatpush1.bf16.msra.mxu0 %v2452_v56  ;;  %4657 = vmatpush1.bf16.msra.mxu1 %v2454_v57  ;;  %v2510_v56 = vunpack.c.h.s8.bf16 %v918_v41  ;;  %v2517_v57 = vunpack.c.l.s8.bf16 %v925_v52  ;;  %v951_v41 = vld [vmem:[%s7801_s18 + $0x1298] sm:$0xff] }
 0x259   : > { %4002 = vmatprep.subr.bf16.mxu0 %v2461_v63  ;;  %4658 = vmatprep.subr.bf16.mxu1 %v2463_v0  ;;  %v2519_v63 = vunpack.c.l.s8.bf16 %v927_v51  ;;  %v924_v0 = vld [vmem:[%s7801_s18 + $0x11c0] sm:$0xff] }
 0x25a   : > { %v2516_v2 = vunpack.c.l.s8.bf16 %v924_v0  ;;  %v2524_v12 = vunpack.c.h.s8.bf16 %v924_v0  ;;  %v957_v0 = vld [vmem:[%s7801_s18 + $0x12c8] sm:$0xff] }
 0x25c   : > { %4003 = vmatpush1.bf16.msra.mxu0 %v2460_v3  ;;  %4659 = vmatpush1.bf16.msra.mxu1 %v2462_v47  ;;  %v2518_v3 = vunpack.c.l.s8.bf16 %v926_v1  ;;  %v2525_v47 = vunpack.c.h.s8.bf16 %v925_v52  ;;  %v948_v52 = vld [vmem:[%s7801_s18 + $0x1280] sm:$0xff] }
 0x25d   : > { %4004 = vmatprep.subr.bf16.mxu0 %v2469_v8  ;;  %4660 = vmatprep.subr.bf16.mxu1 %v2471_v9  ;;  %v2527_v8 = vunpack.c.h.s8.bf16 %v927_v51  ;;  %v933_v9 = vld [vmem:[%s7801_s18 + $0x1208] sm:$0xff]  ;;  %v950_v51 = vld [vmem:[%s7801_s18 + $0x1290] sm:$0xff] }
 0x260   : > { %4005 = vmatpush1.bf16.msra.mxu0 %v2468_v13  ;;  %4661 = vmatpush1.bf16.msra.mxu1 %v2470_v16  ;;  %v2526_v13 = vunpack.c.h.s8.bf16 %v926_v1  ;;  %v2533_v16 = vunpack.c.l.s8.bf16 %v933_v9  ;;  %v959_v1 = vld [vmem:[%s7801_s18 + $0x12d8] sm:$0xff] }
 0x261   : > { %4006 = vmatprep.subr.bf16.mxu0 %v2477_v17  ;;  %4662 = vmatprep.subr.bf16.mxu1 %v2479_v18  ;;  %v2535_v17 = vunpack.c.l.s8.bf16 %v935_v10  ;;  %v932_v18 = vld [vmem:[%s7801_s18 + $0x1200] sm:$0xff] }
 0x262   : > { %v2540_v55 = vunpack.c.h.s8.bf16 %v932_v18 }
 0x264   : > { %4007 = vmatpush1.bf16.msra.mxu0 %v2476_v21  ;;  %4663 = vmatpush1.bf16.msra.mxu1 %v2478_v24  ;;  %v2532_v21 = vunpack.c.l.s8.bf16 %v932_v18  ;;  %v2534_v24 = vunpack.c.l.s8.bf16 %v934_v19  ;;  %v965_v18 = vld [vmem:[%s7801_s18 + $0x1308] sm:$0xff] }
 0x265   : > { %4008 = vmatprep.subr.bf16.mxu0 %v2485_v23  ;;  %4664 = vmatprep.subr.bf16.mxu1 %v2487_v25  ;;  %v2541_v23 = vunpack.c.h.s8.bf16 %v933_v9  ;;  %v2543_v25 = vunpack.c.h.s8.bf16 %v935_v10  ;;  %v956_v9 = vld [vmem:[%s7801_s18 + $0x12c0] sm:$0xff]  ;;  %v958_v10 = vld [vmem:[%s7801_s18 + $0x12d0] sm:$0xff] }
 0x268   : > { %4009 = vmatpush1.bf16.msra.mxu0 %v2484_v27  ;;  %4665 = vmatpush1.bf16.msra.mxu1 %v2486_v28  ;;  %v8257_v27 = vcombine.high %v8213_v14, %v8213_v14  ;;  %v2542_v28 = vunpack.c.h.s8.bf16 %v934_v19  ;;  %v967_v19 = vld [vmem:[%s7801_s18 + $0x1318] sm:$0xff] }
 0x269   : > { %4010 = vmatprep.subr.bf16.mxu0 %v2493_v29  ;;  %4666 = vmatprep.subr.bf16.mxu1 %v2495_v30  ;;  %v2549_v29 = vunpack.c.l.s8.bf16 %v941_v26  ;;  %v2551_v30 = vunpack.c.l.s8.bf16 %v943_v44 }
 0x26c   : > { %4011 = vmatpush1.bf16.msra.mxu0 %v2492_v34  ;;  %4667 = vmatpush1.bf16.msra.mxu1 %v2494_v35  ;;  %v2548_v34 = vunpack.c.l.s8.bf16 %v940_v32  ;;  %v2550_v35 = vunpack.c.l.s8.bf16 %v942_v33 }
 0x26d   : > { %4012 = vmatprep.subr.bf16.mxu0 %v2501_v36  ;;  %4668 = vmatprep.subr.bf16.mxu1 %v2503_v37  ;;  %v2557_v36 = vunpack.c.h.s8.bf16 %v941_v26  ;;  %v2559_v37 = vunpack.c.h.s8.bf16 %v943_v44  ;;  %v964_v26 = vld [vmem:[%s7801_s18 + $0x1300] sm:$0xff]  ;;  %v966_v44 = vld [vmem:[%s7801_s18 + $0x1310] sm:$0xff] }
 0x270   : > { %4013 = vmatpush1.bf16.msra.mxu0 %v2500_v42  ;;  %4669 = vmatpush1.bf16.msra.mxu1 %v2502_v45  ;;  %v2556_v42 = vunpack.c.h.s8.bf16 %v940_v32  ;;  %v2558_v45 = vunpack.c.h.s8.bf16 %v942_v33  ;;  %v973_v32 = vld [vmem:[%s7801_s18 + $0x1348] sm:$0xff]  ;;  %v975_v33 = vld [vmem:[%s7801_s18 + $0x1358] sm:$0xff] }
 0x271   : > { %4014 = vmatprep.subr.bf16.mxu0 %v2509_v46  ;;  %4670 = vmatprep.subr.bf16.mxu1 %v2511_v48  ;;  %v2565_v46 = vunpack.c.l.s8.bf16 %v949_v40  ;;  %v2567_v48 = vunpack.c.l.s8.bf16 %v951_v41 }
 0x274   : > { %4015 = vmatpush1.bf16.msra.mxu0 %v2508_v54  ;;  %4671 = vmatpush1.bf16.msra.mxu1 %v2510_v56  ;;  %v2564_v54 = vunpack.c.l.s8.bf16 %v948_v52  ;;  %v2566_v56 = vunpack.c.l.s8.bf16 %v950_v51 }
 0x275   : > { %4016 = vmatprep.subr.bf16.mxu0 %v2517_v57  ;;  %4672 = vmatprep.subr.bf16.mxu1 %v2519_v63  ;;  %v2573_v57 = vunpack.c.h.s8.bf16 %v949_v40  ;;  %v2575_v63 = vunpack.c.h.s8.bf16 %v951_v41  ;;  %v972_v40 = vld [vmem:[%s7801_s18 + $0x1340] sm:$0xff]  ;;  %v974_v41 = vld [vmem:[%s7801_s18 + $0x1350] sm:$0xff] }
 0x278   : > { %4017 = vmatpush1.bf16.msra.mxu0 %v2516_v2  ;;  %4673 = vmatpush1.bf16.msra.mxu1 %v2518_v3  ;;  %v2572_v2 = vunpack.c.h.s8.bf16 %v948_v52  ;;  %v2574_v3 = vunpack.c.h.s8.bf16 %v950_v51  ;;  %v981_v52 = vld [vmem:[%s7801_s18 + $0x1388] sm:$0xff]  ;;  %v983_v51 = vld [vmem:[%s7801_s18 + $0x1398] sm:$0xff] }
 0x279   : > { %4018 = vmatprep.subr.bf16.mxu0 %v2525_v47  ;;  %4674 = vmatprep.subr.bf16.mxu1 %v2527_v8  ;;  %v2581_v47 = vunpack.c.l.s8.bf16 %v957_v0  ;;  %v2583_v8 = vunpack.c.l.s8.bf16 %v959_v1 }
 0x27c   : > { %4019 = vmatpush1.bf16.msra.mxu0 %v2524_v12  ;;  %4675 = vmatpush1.bf16.msra.mxu1 %v2526_v13  ;;  %v2580_v12 = vunpack.c.l.s8.bf16 %v956_v9  ;;  %v2582_v13 = vunpack.c.l.s8.bf16 %v958_v10 }
 0x27d   : > { %4029 = vmatprep.subr.bf16.mxu0 %v2533_v16  ;;  %4685 = vmatprep.subr.bf16.mxu1 %v2535_v17  ;;  %v2589_v16 = vunpack.c.h.s8.bf16 %v957_v0  ;;  %v2591_v17 = vunpack.c.h.s8.bf16 %v959_v1  ;;  %v980_v0 = vld [vmem:[%s7801_s18 + $0x1380] sm:$0xff]  ;;  %v982_v1 = vld [vmem:[%s7801_s18 + $0x1390] sm:$0xff] }
 0x27f   : > { %4021 = vmatmul.mubr.bf16.vlgmr.msra.gmra.mrb[0].mxu0 %v8251_v20  ;;  %4677 = vmatmul.mubr.bf16.vlgmr.msra.gmra.mrb[0].mxu1 %v8251_v20 }
 0x280   : > { %4030 = vmatpush1.bf16.msra.mxu0 %v2532_v21  ;;  %4686 = vmatpush1.bf16.msra.mxu1 %v2534_v24  ;;  %v2588_v21 = vunpack.c.h.s8.bf16 %v956_v9  ;;  %v2590_v24 = vunpack.c.h.s8.bf16 %v958_v10  ;;  %v989_v9 = vld [vmem:[%s7801_s18 + $0x13c8] sm:$0xff]  ;;  %v991_v10 = vld [vmem:[%s7801_s18 + $0x13d8] sm:$0xff] }
 0x281   : > { %4031 = vmatprep.subr.bf16.mxu0 %v2541_v23  ;;  %4687 = vmatprep.subr.bf16.mxu1 %v2543_v25  ;;  %v2597_v23 = vunpack.c.l.s8.bf16 %v965_v18  ;;  %v2599_v25 = vunpack.c.l.s8.bf16 %v967_v19 }
 0x282   : > { %4061 = vmatprep.mubr.bf16.mxu0 %v8257_v27  ;;  %4717 = vmatprep.mubr.bf16.mxu1 %v8257_v27 }
 0x284   : > { %4032 = vmatpush1.bf16.msra.mxu0 %v2540_v55  ;;  %4688 = vmatpush1.bf16.msra.mxu1 %v2542_v28  ;;  %v2596_v55 = vunpack.c.l.s8.bf16 %v964_v26  ;;  %v2598_v28 = vunpack.c.l.s8.bf16 %v966_v44 }
 0x285   : > { %4033 = vmatprep.subr.bf16.mxu0 %v2549_v29  ;;  %4689 = vmatprep.subr.bf16.mxu1 %v2551_v30  ;;  %v2605_v29 = vunpack.c.h.s8.bf16 %v965_v18  ;;  %v2607_v30 = vunpack.c.h.s8.bf16 %v967_v19  ;;  %v988_v18 = vld [vmem:[%s7801_s18 + $0x13c0] sm:$0xff]  ;;  %v990_v19 = vld [vmem:[%s7801_s18 + $0x13d0] sm:$0xff] }
 0x288   : > { %4034 = vmatpush1.bf16.msra.mxu0 %v2548_v34  ;;  %4690 = vmatpush1.bf16.msra.mxu1 %v2550_v35  ;;  %v2604_v34 = vunpack.c.h.s8.bf16 %v964_v26  ;;  %v2606_v35 = vunpack.c.h.s8.bf16 %v966_v44  ;;  %v2655_v26 = vunpack.c.h.s8.bf16 %v991_v10  ;;  %v997_v44 = vld [vmem:[%s7801_s18 + $0x1408] sm:$0xff] }
 0x289   : > { %4035 = vmatprep.subr.bf16.mxu0 %v2557_v36  ;;  %4691 = vmatprep.subr.bf16.mxu1 %v2559_v37  ;;  %v2613_v36 = vunpack.c.l.s8.bf16 %v973_v32  ;;  %v2615_v37 = vunpack.c.l.s8.bf16 %v975_v33 }
 0x28c   : > { %4036 = vmatpush1.bf16.msra.mxu0 %v2556_v42  ;;  %4692 = vmatpush1.bf16.msra.mxu1 %v2558_v45  ;;  %v2612_v42 = vunpack.c.l.s8.bf16 %v972_v40  ;;  %v2614_v45 = vunpack.c.l.s8.bf16 %v974_v41 }
 0x28d   : > { %4037 = vmatprep.subr.bf16.mxu0 %v2565_v46  ;;  %4693 = vmatprep.subr.bf16.mxu1 %v2567_v48  ;;  %v2621_v46 = vunpack.c.h.s8.bf16 %v973_v32  ;;  %v2623_v48 = vunpack.c.h.s8.bf16 %v975_v33  ;;  %v996_v33 = vld [vmem:[%s7801_s18 + $0x1400] sm:$0xff] }
 0x290   : > { %4038 = vmatpush1.bf16.msra.mxu0 %v2564_v54  ;;  %4694 = vmatpush1.bf16.msra.mxu1 %v2566_v56  ;;  %v2620_v54 = vunpack.c.h.s8.bf16 %v972_v40  ;;  %v2622_v56 = vunpack.c.h.s8.bf16 %v974_v41  ;;  %v2669_v41 = vunpack.c.h.s8.bf16 %v997_v44 }
 0x291   : > { %4039 = vmatprep.subr.bf16.mxu0 %v2573_v57  ;;  %4695 = vmatprep.subr.bf16.mxu1 %v2575_v63  ;;  %v2629_v57 = vunpack.c.l.s8.bf16 %v981_v52  ;;  %v2631_v63 = vunpack.c.l.s8.bf16 %v983_v51 }
 0x294   : > { %4040 = vmatpush1.bf16.msra.mxu0 %v2572_v2  ;;  %4696 = vmatpush1.bf16.msra.mxu1 %v2574_v3  ;;  %v2628_v2 = vunpack.c.l.s8.bf16 %v980_v0  ;;  %v2630_v3 = vunpack.c.l.s8.bf16 %v982_v1 }
 0x295   : > { %4041 = vmatprep.subr.bf16.mxu0 %v2581_v47  ;;  %4697 = vmatprep.subr.bf16.mxu1 %v2583_v8  ;;  %v2637_v47 = vunpack.c.h.s8.bf16 %v981_v52  ;;  %v2639_v8 = vunpack.c.h.s8.bf16 %v983_v51  ;;  %v2668_v52 = vunpack.c.h.s8.bf16 %v996_v33 }
 0x298   : > { %4042 = vmatpush1.bf16.msra.mxu0 %v2580_v12  ;;  %4698 = vmatpush1.bf16.msra.mxu1 %v2582_v13  ;;  %v2636_v12 = vunpack.c.h.s8.bf16 %v980_v0  ;;  %v2638_v13 = vunpack.c.h.s8.bf16 %v982_v1 }
 0x299   : > { %4043 = vmatprep.subr.bf16.mxu0 %v2589_v16  ;;  %4699 = vmatprep.subr.bf16.mxu1 %v2591_v17  ;;  %v2645_v16 = vunpack.c.l.s8.bf16 %v989_v9  ;;  %v2647_v17 = vunpack.c.l.s8.bf16 %v991_v10 }
 0x29c   : > { %4044 = vmatpush1.bf16.msra.mxu0 %v2588_v21  ;;  %4700 = vmatpush1.bf16.msra.mxu1 %v2590_v24  ;;  %v3530_v21 = vcombine.high %v8194_v43, %v8194_v43  ;;  %v2644_v24 = vunpack.c.l.s8.bf16 %v988_v18  ;;  %v2661_v43 = vunpack.c.l.s8.bf16 %v997_v44 }
 0x29d   : > { %4045 = vmatprep.subr.bf16.mxu0 %v2597_v23  ;;  %4701 = vmatprep.subr.bf16.mxu1 %v2599_v25  ;;  %v2646_v23 = vunpack.c.l.s8.bf16 %v990_v19  ;;  %v2653_v25 = vunpack.c.h.s8.bf16 %v989_v9 }
 0x2a0   : > { %4046 = vmatpush1.bf16.msra.mxu0 %v2596_v55  ;;  %4702 = vmatpush1.bf16.msra.mxu1 %v2598_v28  ;;  %v999_v55 = vld [vmem:[%s7801_s18 + $0x1418] sm:$0xff]  ;;  %v8294_v28 = vrot.slane %v3530_v21, %v7836_v49 }
 0x2a1   : > { %4047 = vmatprep.subr.bf16.mxu0 %v2605_v29  ;;  %4703 = vmatprep.subr.bf16.mxu1 %v2607_v30  ;;  %v2652_v29 = vunpack.c.h.s8.bf16 %v988_v18  ;;  %v2654_v30 = vunpack.c.h.s8.bf16 %v990_v19  ;;  %v2663_v32 = vunpack.c.l.s8.bf16 %v999_v55 }
 0x2a4   : > { %4048 = vmatpush1.bf16.msra.mxu0 %v2604_v34  ;;  %4704 = vmatpush1.bf16.msra.mxu1 %v2606_v35  ;;  %v998_v34 = vld [vmem:[%s7801_s18 + $0x1410] sm:$0xff]  ;;  %v3546_v35 = vcombine.high %v8294_v28, %v8294_v28 }
 0x2a5   : > { %4049 = vmatprep.subr.bf16.mxu0 %v2613_v36  ;;  %4705 = vmatprep.subr.bf16.mxu1 %v2615_v37  ;;  %v8302_v36 = vcombine.high %v8251_v20, %v8251_v20  ;;  %v2660_v37 = vunpack.c.l.s8.bf16 %v996_v33  ;;  %v2662_v40 = vunpack.c.l.s8.bf16 %v998_v34  ;;  %v2670_v51 = vunpack.c.h.s8.bf16 %v998_v34 }
 0x2a8   : > { %4050 = vmatpush1.bf16.msra.mxu0 %v2612_v42  ;;  %4706 = vmatpush1.bf16.msra.mxu1 %v2614_v45  ;;  %v2671_v42 = vunpack.c.h.s8.bf16 %v999_v55  ;;  %v1005_v45 = vld [vmem:[%s7801_s18 + $0x1448] sm:$0xff] }
 0x2a9   : > { %4051 = vmatprep.subr.bf16.mxu0 %v2621_v46  ;;  %4707 = vmatprep.subr.bf16.mxu1 %v2623_v48  ;;  %v1007_v46 = vld [vmem:[%s7801_s18 + $0x1458] sm:$0xff]  ;;  %v8307_v48 = vrot.slane %v3546_v35, %v7836_v49 }
 0x2ac   : > { %4052 = vmatpush1.bf16.msra.mxu0 %v2620_v54  ;;  %4708 = vmatpush1.bf16.msra.mxu1 %v2622_v56  ;;  %v2677_v54 = vunpack.c.l.s8.bf16 %v1005_v45  ;;  %v2679_v56 = vunpack.c.l.s8.bf16 %v1007_v46 }
 0x2ad   : > { %4053 = vmatprep.subr.bf16.mxu0 %v2629_v57  ;;  %4709 = vmatprep.subr.bf16.mxu1 %v2631_v63  ;;  %v1004_v57 = vld [vmem:[%s7801_s18 + $0x1440] sm:$0xff]  ;;  %v1006_v63 = vld [vmem:[%s7801_s18 + $0x1450] sm:$0xff] }
 0x2ae   : > { %v2676_v0 = vunpack.c.l.s8.bf16 %v1004_v57  ;;  %v2678_v1 = vunpack.c.l.s8.bf16 %v1006_v63  ;;  %v2684_v9 = vunpack.c.h.s8.bf16 %v1004_v57  ;;  %v2686_v10 = vunpack.c.h.s8.bf16 %v1006_v63 }
 0x2b0   : > { %4054 = vmatpush1.bf16.msra.mxu0 %v2628_v2  ;;  %4710 = vmatpush1.bf16.msra.mxu1 %v2630_v3  ;;  %v2685_v2 = vunpack.c.h.s8.bf16 %v1005_v45  ;;  %v2687_v3 = vunpack.c.h.s8.bf16 %v1007_v46 }
 0x2b1   : > { %4055 = vmatprep.subr.bf16.mxu0 %v2637_v47  ;;  %4711 = vmatprep.subr.bf16.mxu1 %v2639_v8  ;;  %v1013_v47 = vld [vmem:[%s7801_s18 + $0x1488] sm:$0xff]  ;;  %v1015_v8 = vld [vmem:[%s7801_s18 + $0x1498] sm:$0xff] }
 0x2b2   : > { %v2701_v21 = vunpack.c.h.s8.bf16 %v1013_v47 }
 0x2b4   : > { %4056 = vmatpush1.bf16.msra.mxu0 %v2636_v12  ;;  %4712 = vmatpush1.bf16.msra.mxu1 %v2638_v13  ;;  %v2693_v12 = vunpack.c.l.s8.bf16 %v1013_v47  ;;  %v2695_v13 = vunpack.c.l.s8.bf16 %v1015_v8 }
 0x2b5   : > { %4057 = vmatprep.subr.bf16.mxu0 %v2645_v16  ;;  %4713 = vmatprep.subr.bf16.mxu1 %v2647_v17  ;;  %v1012_v16 = vld [vmem:[%s7801_s18 + $0x1480] sm:$0xff]  ;;  %v1014_v17 = vld [vmem:[%s7801_s18 + $0x1490] sm:$0xff] }
 0x2b6   : > { %v2692_v18 = vunpack.c.l.s8.bf16 %v1012_v16  ;;  %v2694_v19 = vunpack.c.l.s8.bf16 %v1014_v17  ;;  %v2702_v44 = vunpack.c.h.s8.bf16 %v1014_v17 }
 0x2b8   : > { %4058 = vmatpush1.bf16.msra.mxu0 %v2644_v24  ;;  %4714 = vmatpush1.bf16.msra.mxu1 %v2646_v23  ;;  %v2703_v24 = vunpack.c.h.s8.bf16 %v1015_v8  ;;  %v1021_v23 = vld [vmem:[%s7801_s18 + $0x14c8] sm:$0xff] }
 0x2b9   : > { %4059 = vmatprep.subr.bf16.mxu0 %v2653_v25  ;;  %4715 = vmatprep.subr.bf16.mxu1 %v2655_v26  ;;  %v1023_v25 = vld [vmem:[%s7801_s18 + $0x14d8] sm:$0xff]  ;;  %v2700_v26 = vunpack.c.h.s8.bf16 %v1012_v16  ;;  %v2709_v55 = vunpack.c.l.s8.bf16 %v1021_v23  ;;  %v2717_v34 = vunpack.c.h.s8.bf16 %v1021_v23 }
 0x2ba   : > { %v2719_v35 = vunpack.c.h.s8.bf16 %v1023_v25 }
 0x2bc   : > { %4060 = vmatpush1.bf16.msra.mxu0 %v2652_v29  ;;  %4716 = vmatpush1.bf16.msra.mxu1 %v2654_v30  ;;  %v2711_v29 = vunpack.c.l.s8.bf16 %v1023_v25  ;;  %v1020_v30 = vld [vmem:[%s7801_s18 + $0x14c0] sm:$0xff] }
 0x2bd   : > { %4070 = vmatprep.subr.bf16.mxu0 %v2661_v43  ;;  %4726 = vmatprep.subr.bf16.mxu1 %v2663_v32  ;;  %v1022_v43 = vld [vmem:[%s7801_s18 + $0x14d0] sm:$0xff]  ;;  %v2708_v32 = vunpack.c.l.s8.bf16 %v1020_v30 }
 0x2be   : > { %v2710_v33 = vunpack.c.l.s8.bf16 %v1022_v43 }
 0x2bf   : > { %4062 = vmatmul.mubr.bf16.vlgmr.msra.gmra.mrb[0].mxu0 %v8302_v36  ;;  %4718 = vmatmul.mubr.bf16.vlgmr.msra.gmra.mrb[0].mxu1 %v8302_v36 }
 0x2c0   : > { %4071 = vmatpush1.bf16.msra.mxu0 %v2660_v37  ;;  %4727 = vmatpush1.bf16.msra.mxu1 %v2662_v40  ;;  %v1029_v37 = vld [vmem:[%s7801_s18 + $0x1508] sm:$0xff]  ;;  %v1031_v40 = vld [vmem:[%s7801_s18 + $0x1518] sm:$0xff] }
 0x2c1   : > { %4072 = vmatprep.subr.bf16.mxu0 %v2669_v41  ;;  %4728 = vmatprep.subr.bf16.mxu1 %v2671_v42  ;;  %v2716_v41 = vunpack.c.h.s8.bf16 %v1020_v30  ;;  %v2718_v42 = vunpack.c.h.s8.bf16 %v1022_v43  ;;  %v2725_v45 = vunpack.c.l.s8.bf16 %v1029_v37  ;;  %v2727_v46 = vunpack.c.l.s8.bf16 %v1031_v40 }
 0x2c2   : > { %4102 = vmatprep.mubr.bf16.mxu0 %v8307_v48  ;;  %4758 = vmatprep.mubr.bf16.mxu1 %v8307_v48  ;;  %v2733_v57 = vunpack.c.h.s8.bf16 %v1029_v37  ;;  %v2735_v63 = vunpack.c.h.s8.bf16 %v1031_v40 }
 0x2c4   : > { %4073 = vmatpush1.bf16.msra.mxu0 %v2668_v52  ;;  %4729 = vmatpush1.bf16.msra.mxu1 %v2670_v51  ;;  %v1028_v52 = vld [vmem:[%s7801_s18 + $0x1500] sm:$0xff]  ;;  %v1030_v51 = vld [vmem:[%s7801_s18 + $0x1510] sm:$0xff] }
 0x2c5   : > { %4074 = vmatprep.subr.bf16.mxu0 %v2677_v54  ;;  %4730 = vmatprep.subr.bf16.mxu1 %v2679_v56  ;;  %v2724_v54 = vunpack.c.l.s8.bf16 %v1028_v52  ;;  %v2726_v56 = vunpack.c.l.s8.bf16 %v1030_v51 }
 0x2c8   : > { %4075 = vmatpush1.bf16.msra.mxu0 %v2676_v0  ;;  %4731 = vmatpush1.bf16.msra.mxu1 %v2678_v1  ;;  %v1037_v0 = vld [vmem:[%s7801_s18 + $0x1548] sm:$0xff]  ;;  %v1039_v1 = vld [vmem:[%s7801_s18 + $0x1558] sm:$0xff] }
 0x2c9   : > { %4076 = vmatprep.subr.bf16.mxu0 %v2685_v2  ;;  %4732 = vmatprep.subr.bf16.mxu1 %v2687_v3  ;;  %v2732_v2 = vunpack.c.h.s8.bf16 %v1028_v52  ;;  %v2734_v3 = vunpack.c.h.s8.bf16 %v1030_v51  ;;  %v2741_v47 = vunpack.c.l.s8.bf16 %v1037_v0  ;;  %v2743_v8 = vunpack.c.l.s8.bf16 %v1039_v1 }
 0x2ca   : > { %v2749_v16 = vunpack.c.h.s8.bf16 %v1037_v0  ;;  %v2751_v17 = vunpack.c.h.s8.bf16 %v1039_v1 }
 0x2cc   : > { %4077 = vmatpush1.bf16.msra.mxu0 %v2684_v9  ;;  %4733 = vmatpush1.bf16.msra.mxu1 %v2686_v10  ;;  %v1036_v9 = vld [vmem:[%s7801_s18 + $0x1540] sm:$0xff]  ;;  %v1038_v10 = vld [vmem:[%s7801_s18 + $0x1550] sm:$0xff] }
 0x2cd   : > { %4078 = vmatprep.subr.bf16.mxu0 %v2693_v12  ;;  %4734 = vmatprep.subr.bf16.mxu1 %v2695_v13  ;;  %v2740_v12 = vunpack.c.l.s8.bf16 %v1036_v9  ;;  %v2742_v13 = vunpack.c.l.s8.bf16 %v1038_v10 }
 0x2d0   : > { %4079 = vmatpush1.bf16.msra.mxu0 %v2692_v18  ;;  %4735 = vmatpush1.bf16.msra.mxu1 %v2694_v19  ;;  %v1045_v18 = vld [vmem:[%s7801_s18 + $0x1588] sm:$0xff]  ;;  %v1047_v19 = vld [vmem:[%s7801_s18 + $0x1598] sm:$0xff] }
 0x2d1   : > { %4080 = vmatprep.subr.bf16.mxu0 %v2701_v21  ;;  %4736 = vmatprep.subr.bf16.mxu1 %v2703_v24  ;;  %v2748_v21 = vunpack.c.h.s8.bf16 %v1036_v9  ;;  %v2750_v24 = vunpack.c.h.s8.bf16 %v1038_v10  ;;  %v2757_v23 = vunpack.c.l.s8.bf16 %v1045_v18  ;;  %v2759_v25 = vunpack.c.l.s8.bf16 %v1047_v19 }
 0x2d2   : > { %v2765_v30 = vunpack.c.h.s8.bf16 %v1045_v18  ;;  %v2767_v43 = vunpack.c.h.s8.bf16 %v1047_v19 }
 0x2d4   : > { %4081 = vmatpush1.bf16.msra.mxu0 %v2700_v26  ;;  %4737 = vmatpush1.bf16.msra.mxu1 %v2702_v44  ;;  %v1044_v26 = vld [vmem:[%s7801_s18 + $0x1580] sm:$0xff]  ;;  %v1046_v44 = vld [vmem:[%s7801_s18 + $0x1590] sm:$0xff] }
 0x2d5   : > { %4082 = vmatprep.subr.bf16.mxu0 %v2709_v55  ;;  %4738 = vmatprep.subr.bf16.mxu1 %v2711_v29  ;;  %v2756_v55 = vunpack.c.l.s8.bf16 %v1044_v26  ;;  %v2758_v29 = vunpack.c.l.s8.bf16 %v1046_v44 }
 0x2d8   : > { %4083 = vmatpush1.bf16.msra.mxu0 %v2708_v32  ;;  %4739 = vmatpush1.bf16.msra.mxu1 %v2710_v33  ;;  %v1053_v32 = vld [vmem:[%s7801_s18 + $0x15c8] sm:$0xff]  ;;  %v1055_v33 = vld [vmem:[%s7801_s18 + $0x15d8] sm:$0xff] }
 0x2d9   : > { %4084 = vmatprep.subr.bf16.mxu0 %v2717_v34  ;;  %4740 = vmatprep.subr.bf16.mxu1 %v2719_v35  ;;  %v2764_v34 = vunpack.c.h.s8.bf16 %v1044_v26  ;;  %v2766_v35 = vunpack.c.h.s8.bf16 %v1046_v44  ;;  %v2773_v37 = vunpack.c.l.s8.bf16 %v1053_v32  ;;  %v2775_v40 = vunpack.c.l.s8.bf16 %v1055_v33 }
 0x2da   : > { %v2781_v52 = vunpack.c.h.s8.bf16 %v1053_v32  ;;  %v2783_v51 = vunpack.c.h.s8.bf16 %v1055_v33 }
 0x2dc   : > { %4085 = vmatpush1.bf16.msra.mxu0 %v2716_v41  ;;  %4741 = vmatpush1.bf16.msra.mxu1 %v2718_v42  ;;  %v1052_v41 = vld [vmem:[%s7801_s18 + $0x15c0] sm:$0xff]  ;;  %v1054_v42 = vld [vmem:[%s7801_s18 + $0x15d0] sm:$0xff] }
 0x2dd   : > { %4086 = vmatprep.subr.bf16.mxu0 %v2725_v45  ;;  %4742 = vmatprep.subr.bf16.mxu1 %v2727_v46  ;;  %v2772_v45 = vunpack.c.l.s8.bf16 %v1052_v41  ;;  %v2774_v46 = vunpack.c.l.s8.bf16 %v1054_v42 }
 0x2e0   : > { %4087 = vmatpush1.bf16.msra.mxu0 %v2724_v54  ;;  %4743 = vmatpush1.bf16.msra.mxu1 %v2726_v56  ;;  %v1061_v54 = vld [vmem:[%s7801_s18 + $0x1608] sm:$0xff]  ;;  %v1063_v56 = vld [vmem:[%s7801_s18 + $0x1618] sm:$0xff] }
 0x2e1   : > { %4088 = vmatprep.subr.bf16.mxu0 %v2733_v57  ;;  %4744 = vmatprep.subr.bf16.mxu1 %v2735_v63  ;;  %v2780_v57 = vunpack.c.h.s8.bf16 %v1052_v41  ;;  %v2782_v63 = vunpack.c.h.s8.bf16 %v1054_v42  ;;  %v2789_v0 = vunpack.c.l.s8.bf16 %v1061_v54  ;;  %v2791_v1 = vunpack.c.l.s8.bf16 %v1063_v56 }
 0x2e2   : > { %v2797_v10 = vunpack.c.h.s8.bf16 %v1061_v54 }
 0x2e4   : > { %4089 = vmatpush1.bf16.msra.mxu0 %v2732_v2  ;;  %4745 = vmatpush1.bf16.msra.mxu1 %v2734_v3  ;;  %v1060_v2 = vld [vmem:[%s7801_s18 + $0x1600] sm:$0xff]  ;;  %v1062_v3 = vld [vmem:[%s7801_s18 + $0x1610] sm:$0xff] }
 0x2e5   : > { %4090 = vmatprep.subr.bf16.mxu0 %v2741_v47  ;;  %4746 = vmatprep.subr.bf16.mxu1 %v2743_v8  ;;  %v8345_v47 = vrot.slane %v8294_v28, %v7836_v49  ;;  %v2788_v8 = vunpack.c.l.s8.bf16 %v1060_v2  ;;  %v2790_v9 = vunpack.c.l.s8.bf16 %v1062_v3  ;;  %v2796_v28 = vunpack.c.h.s8.bf16 %v1060_v2 }
 0x2e6   : > { %v2798_v18 = vunpack.c.h.s8.bf16 %v1062_v3 }
 0x2e8   : > { %4091 = vmatpush1.bf16.msra.mxu0 %v2740_v12  ;;  %4747 = vmatpush1.bf16.msra.mxu1 %v2742_v13  ;;  %v2799_v12 = vunpack.c.h.s8.bf16 %v1063_v56  ;;  %v1069_v13 = vld [vmem:[%s7801_s18 + $0x1648] sm:$0xff] }
 0x2e9   : > { %4092 = vmatprep.subr.bf16.mxu0 %v2749_v16  ;;  %4748 = vmatprep.subr.bf16.mxu1 %v2751_v17  ;;  %v1071_v16 = vld [vmem:[%s7801_s18 + $0x1658] sm:$0xff]  ;;  %v8351_v17 = vcombine.high %v8307_v48, %v8307_v48  ;;  %v2805_v19 = vunpack.c.l.s8.bf16 %v1069_v13  ;;  %v2813_v44 = vunpack.c.h.s8.bf16 %v1069_v13 }
 0x2ec   : > { %4093 = vmatpush1.bf16.msra.mxu0 %v2748_v21  ;;  %4749 = vmatpush1.bf16.msra.mxu1 %v2750_v24  ;;  %v2807_v21 = vunpack.c.l.s8.bf16 %v1071_v16  ;;  %v1068_v24 = vld [vmem:[%s7801_s18 + $0x1640] sm:$0xff] }
 0x2ed   : > { %4094 = vmatprep.subr.bf16.mxu0 %v2757_v23  ;;  %4750 = vmatprep.subr.bf16.mxu1 %v2759_v25  ;;  %v1070_v23 = vld [vmem:[%s7801_s18 + $0x1650] sm:$0xff]  ;;  %v2804_v25 = vunpack.c.l.s8.bf16 %v1068_v24 }
 0x2ee   : > { %v2806_v26 = vunpack.c.l.s8.bf16 %v1070_v23  ;;  %v2814_v32 = vunpack.c.h.s8.bf16 %v1070_v23 }
 0x2f0   : > { %4095 = vmatpush1.bf16.msra.mxu0 %v2756_v55  ;;  %4751 = vmatpush1.bf16.msra.mxu1 %v2758_v29  ;;  %v2815_v55 = vunpack.c.h.s8.bf16 %v1071_v16  ;;  %v1077_v29 = vld [vmem:[%s7801_s18 + $0x1688] sm:$0xff] }
 0x2f1   : > { %4096 = vmatprep.subr.bf16.mxu0 %v2765_v30  ;;  %4752 = vmatprep.subr.bf16.mxu1 %v2767_v43  ;;  %v1079_v30 = vld [vmem:[%s7801_s18 + $0x1698] sm:$0xff]  ;;  %v2812_v43 = vunpack.c.h.s8.bf16 %v1068_v24  ;;  %v2821_v33 = vunpack.c.l.s8.bf16 %v1077_v29  ;;  %v2829_v42 = vunpack.c.h.s8.bf16 %v1077_v29 }
 0x2f4   : > { %4097 = vmatpush1.bf16.msra.mxu0 %v2764_v34  ;;  %4753 = vmatpush1.bf16.msra.mxu1 %v2766_v35  ;;  %v2823_v34 = vunpack.c.l.s8.bf16 %v1079_v30  ;;  %v1076_v35 = vld [vmem:[%s7801_s18 + $0x1680] sm:$0xff] }
 0x2f5   : > { %4098 = vmatprep.subr.bf16.mxu0 %v2773_v37  ;;  %4754 = vmatprep.subr.bf16.mxu1 %v2775_v40  ;;  %v1078_v37 = vld [vmem:[%s7801_s18 + $0x1690] sm:$0xff]  ;;  %v2820_v40 = vunpack.c.l.s8.bf16 %v1076_v35 }
 0x2f6   : > { %v2822_v41 = vunpack.c.l.s8.bf16 %v1078_v37  ;;  %v2830_v54 = vunpack.c.h.s8.bf16 %v1078_v37 }
 0x2f8   : > { %4099 = vmatpush1.bf16.msra.mxu0 %v2772_v45  ;;  %4755 = vmatpush1.bf16.msra.mxu1 %v2774_v46  ;;  %v2831_v45 = vunpack.c.h.s8.bf16 %v1079_v30  ;;  %v1085_v46 = vld [vmem:[%s7801_s18 + $0x16c8] sm:$0xff] }
 0x2f9   : > { %4100 = vmatprep.subr.bf16.mxu0 %v2781_v52  ;;  %4756 = vmatprep.subr.bf16.mxu1 %v2783_v51  ;;  %v1087_v52 = vld [vmem:[%s7801_s18 + $0x16d8] sm:$0xff]  ;;  %v2828_v51 = vunpack.c.h.s8.bf16 %v1076_v35  ;;  %v2837_v56 = vunpack.c.l.s8.bf16 %v1085_v46  ;;  %v2845_v3 = vunpack.c.h.s8.bf16 %v1085_v46 }
 0x2fc   : > { %4101 = vmatpush1.bf16.msra.mxu0 %v2780_v57  ;;  %4757 = vmatpush1.bf16.msra.mxu1 %v2782_v63  ;;  %v2839_v57 = vunpack.c.l.s8.bf16 %v1087_v52  ;;  %v1084_v63 = vld [vmem:[%s7801_s18 + $0x16c0] sm:$0xff] }
 0x2fd   : > { %4111 = vmatprep.subr.bf16.mxu0 %v2789_v0  ;;  %4767 = vmatprep.subr.bf16.mxu1 %v2791_v1  ;;  %v1086_v0 = vld [vmem:[%s7801_s18 + $0x16d0] sm:$0xff]  ;;  %v2836_v1 = vunpack.c.l.s8.bf16 %v1084_v63 }
 0x2fe   : > { %v2838_v2 = vunpack.c.l.s8.bf16 %v1086_v0  ;;  %v2846_v13 = vunpack.c.h.s8.bf16 %v1086_v0 }
 0x2ff   : > { %4103 = vmatmul.mubr.bf16.vlgmr.msra.gmra.mrb[0].mxu0 %v8345_v47  ;;  %4759 = vmatmul.mubr.bf16.vlgmr.msra.gmra.mrb[0].mxu1 %v8345_v47 }
 0x300   : > { %4112 = vmatpush1.bf16.msra.mxu0 %v2788_v8  ;;  %4768 = vmatpush1.bf16.msra.mxu1 %v2790_v9  ;;  %v2847_v8 = vunpack.c.h.s8.bf16 %v1087_v52  ;;  %v1093_v9 = vld [vmem:[%s7801_s18 + $0x1708] sm:$0xff] }
 0x301   : > { %4113 = vmatprep.subr.bf16.mxu0 %v2797_v10  ;;  %4769 = vmatprep.subr.bf16.mxu1 %v2799_v12  ;;  %v1095_v10 = vld [vmem:[%s7801_s18 + $0x1718] sm:$0xff]  ;;  %v2844_v12 = vunpack.c.h.s8.bf16 %v1084_v63  ;;  %v2853_v16 = vunpack.c.l.s8.bf16 %v1093_v9  ;;  %v2861_v23 = vunpack.c.h.s8.bf16 %v1093_v9 }
 0x302   : > { %4143 = vmatprep.mubr.bf16.mxu0 %v8351_v17  ;;  %4799 = vmatprep.mubr.bf16.mxu1 %v8351_v17 }
 0x304   : > { %4114 = vmatpush1.bf16.msra.mxu0 %v2796_v28  ;;  %4770 = vmatpush1.bf16.msra.mxu1 %v2798_v18  ;;  %v2855_v28 = vunpack.c.l.s8.bf16 %v1095_v10  ;;  %v1092_v18 = vld [vmem:[%s7801_s18 + $0x1700] sm:$0xff] }
 0x305   : > { %4115 = vmatprep.subr.bf16.mxu0 %v2805_v19  ;;  %4771 = vmatprep.subr.bf16.mxu1 %v2807_v21  ;;  %v1094_v19 = vld [vmem:[%s7801_s18 + $0x1710] sm:$0xff]  ;;  %v2852_v21 = vunpack.c.l.s8.bf16 %v1092_v18 }
 0x306   : > { %v2854_v24 = vunpack.c.l.s8.bf16 %v1094_v19  ;;  %v2862_v29 = vunpack.c.h.s8.bf16 %v1094_v19 }
 0x308   : > { %4116 = vmatpush1.bf16.msra.mxu0 %v2804_v25  ;;  %4772 = vmatpush1.bf16.msra.mxu1 %v2806_v26  ;;  %v2863_v25 = vunpack.c.h.s8.bf16 %v1095_v10  ;;  %v1101_v26 = vld [vmem:[%s7801_s18 + $0x1748] sm:$0xff] }
 0x309   : > { %4117 = vmatprep.subr.bf16.mxu0 %v2813_v44  ;;  %4773 = vmatprep.subr.bf16.mxu1 %v2815_v55  ;;  %v1103_v44 = vld [vmem:[%s7801_s18 + $0x1758] sm:$0xff]  ;;  %v2860_v55 = vunpack.c.h.s8.bf16 %v1092_v18  ;;  %v2869_v30 = vunpack.c.l.s8.bf16 %v1101_v26  ;;  %v2877_v37 = vunpack.c.h.s8.bf16 %v1101_v26 }
 0x30c   : > { %4118 = vmatpush1.bf16.msra.mxu0 %v2812_v43  ;;  %4774 = vmatpush1.bf16.msra.mxu1 %v2814_v32  ;;  %v2871_v43 = vunpack.c.l.s8.bf16 %v1103_v44  ;;  %v1100_v32 = vld [vmem:[%s7801_s18 + $0x1740] sm:$0xff] }
 0x30d   : > { %4119 = vmatprep.subr.bf16.mxu0 %v2821_v33  ;;  %4775 = vmatprep.subr.bf16.mxu1 %v2823_v34  ;;  %v1102_v33 = vld [vmem:[%s7801_s18 + $0x1750] sm:$0xff]  ;;  %v2868_v34 = vunpack.c.l.s8.bf16 %v1100_v32 }
 0x30e   : > { %v2870_v35 = vunpack.c.l.s8.bf16 %v1102_v33  ;;  %v2878_v46 = vunpack.c.h.s8.bf16 %v1102_v33 }
 0x310   : > { %4120 = vmatpush1.bf16.msra.mxu0 %v2820_v40  ;;  %4776 = vmatpush1.bf16.msra.mxu1 %v2822_v41  ;;  %v2879_v40 = vunpack.c.h.s8.bf16 %v1103_v44  ;;  %v1109_v41 = vld [vmem:[%s7801_s18 + $0x1788] sm:$0xff] }
 0x311   : > { %4121 = vmatprep.subr.bf16.mxu0 %v2829_v42  ;;  %4777 = vmatprep.subr.bf16.mxu1 %v2831_v45  ;;  %v1111_v42 = vld [vmem:[%s7801_s18 + $0x1798] sm:$0xff]  ;;  %v2876_v45 = vunpack.c.h.s8.bf16 %v1100_v32  ;;  %v2885_v52 = vunpack.c.l.s8.bf16 %v1109_v41  ;;  %v2893_v0 = vunpack.c.h.s8.bf16 %v1109_v41  ;;  %v1126_v32 = vld [vmem:[%s7801_s18 + $0x1810] sm:$0xff] }
 0x314   : > { %4122 = vmatpush1.bf16.msra.mxu0 %v2828_v51  ;;  %4778 = vmatpush1.bf16.msra.mxu1 %v2830_v54  ;;  %v2887_v51 = vunpack.c.l.s8.bf16 %v1111_v42  ;;  %v1108_v54 = vld [vmem:[%s7801_s18 + $0x1780] sm:$0xff] }
 0x315   : > { %4123 = vmatprep.subr.bf16.mxu0 %v2837_v56  ;;  %4779 = vmatprep.subr.bf16.mxu1 %v2839_v57  ;;  %v1110_v56 = vld [vmem:[%s7801_s18 + $0x1790] sm:$0xff]  ;;  %v2884_v57 = vunpack.c.l.s8.bf16 %v1108_v54 }
 0x316   : > { %v2886_v63 = vunpack.c.l.s8.bf16 %v1110_v56  ;;  %v2894_v9 = vunpack.c.h.s8.bf16 %v1110_v56 }
 0x318   : > { %4124 = vmatpush1.bf16.msra.mxu0 %v2836_v1  ;;  %4780 = vmatpush1.bf16.msra.mxu1 %v2838_v2  ;;  %v2895_v1 = vunpack.c.h.s8.bf16 %v1111_v42  ;;  %v1117_v2 = vld [vmem:[%s7801_s18 + $0x17c8] sm:$0xff] }
 0x319   : > { %4125 = vmatprep.subr.bf16.mxu0 %v2845_v3  ;;  %4781 = vmatprep.subr.bf16.mxu1 %v2847_v8  ;;  %v1119_v3 = vld [vmem:[%s7801_s18 + $0x17d8] sm:$0xff]  ;;  %v2892_v8 = vunpack.c.h.s8.bf16 %v1108_v54  ;;  %v2901_v10 = vunpack.c.l.s8.bf16 %v1117_v2  ;;  %v1133_v42 = vld [vmem:[%s7801_s18 + $0x1848] sm:$0xff] }
 0x31a   : > { %v2933_v54 = vunpack.c.l.s8.bf16 %v1133_v42 }
 0x31c   : > { %4126 = vmatpush1.bf16.msra.mxu0 %v2844_v12  ;;  %4782 = vmatpush1.bf16.msra.mxu1 %v2846_v13  ;;  %v2903_v12 = vunpack.c.l.s8.bf16 %v1119_v3  ;;  %v1116_v13 = vld [vmem:[%s7801_s18 + $0x17c0] sm:$0xff] }
 0x31d   : > { %4127 = vmatprep.subr.bf16.mxu0 %v2853_v16  ;;  %4783 = vmatprep.subr.bf16.mxu1 %v2855_v28  ;;  %v1118_v16 = vld [vmem:[%s7801_s18 + $0x17d0] sm:$0xff]  ;;  %v8384_v28 = vld [vmem:[%s7811_s14 + $0x18] sm:$0xff]  ;;  %v2900_v18 = vunpack.c.l.s8.bf16 %v1116_v13  ;;  %v2908_v44 = vunpack.c.h.s8.bf16 %v1116_v13 }
 0x31e   : > { %v2902_v19 = vunpack.c.l.s8.bf16 %v1118_v16  ;;  %v8390_v26 = vrot.slane %v8384_v28, %v7836_v49 }
 0x320   : > { %4128 = vmatpush1.bf16.msra.mxu0 %v2852_v21  ;;  %4784 = vmatpush1.bf16.msra.mxu1 %v2854_v24  ;;  %v2909_v21 = vunpack.c.h.s8.bf16 %v1117_v2  ;;  %v2911_v24 = vunpack.c.h.s8.bf16 %v1119_v3  ;;  %v3594_v33 = vcombine.high %v8390_v26, %v8390_v26  ;;  %v2941_v2 = vunpack.c.h.s8.bf16 %v1133_v42 }
 0x321   : > { %4129 = vmatprep.subr.bf16.mxu0 %v2861_v23  ;;  %4785 = vmatprep.subr.bf16.mxu1 %v2863_v25  ;;  %v1125_v23 = vld [vmem:[%s7801_s18 + $0x1808] sm:$0xff]  ;;  %v1127_v25 = vld [vmem:[%s7801_s18 + $0x1818] sm:$0xff] }
 0x322   : > { %v2927_v41 = vunpack.c.h.s8.bf16 %v1127_v25 }
 0x324   : > { %4130 = vmatpush1.bf16.msra.mxu0 %v2860_v55  ;;  %4786 = vmatpush1.bf16.msra.mxu1 %v2862_v29  ;;  %v2910_v55 = vunpack.c.h.s8.bf16 %v1118_v16  ;;  %v2917_v29 = vunpack.c.l.s8.bf16 %v1125_v23 }
 0x325   : > { %4131 = vmatprep.subr.bf16.mxu0 %v2869_v30  ;;  %4787 = vmatprep.subr.bf16.mxu1 %v2871_v43  ;;  %v2919_v30 = vunpack.c.l.s8.bf16 %v1127_v25  ;;  %v1124_v43 = vld [vmem:[%s7801_s18 + $0x1800] sm:$0xff] }
 0x328   : > { %4132 = vmatpush1.bf16.msra.mxu0 %v2868_v34  ;;  %4788 = vmatpush1.bf16.msra.mxu1 %v2870_v35  ;;  %v8398_v34 = vcombine.high %v8345_v47, %v8345_v47  ;;  %v2916_v35 = vunpack.c.l.s8.bf16 %v1124_v43 }
 0x329   : > { %4133 = vmatprep.subr.bf16.mxu0 %v2877_v37  ;;  %4789 = vmatprep.subr.bf16.mxu1 %v2879_v40  ;;  %v2918_v37 = vunpack.c.l.s8.bf16 %v1126_v32  ;;  %v2925_v40 = vunpack.c.h.s8.bf16 %v1125_v23 }
 0x32c   : > { %4134 = vmatpush1.bf16.msra.mxu0 %v2876_v45  ;;  %4790 = vmatpush1.bf16.msra.mxu1 %v2878_v46  ;;  %v1135_v45 = vld [vmem:[%s7801_s18 + $0x1858] sm:$0xff]  ;;  %v8403_v46 = vrot.slane %v3594_v33, %v7836_v49  ;;  %v1148_v33 = vld [vmem:[%s7801_s18 + $0x18c0] sm:$0xff] }
 0x32d   : > { %4135 = vmatprep.subr.bf16.mxu0 %v2885_v52  ;;  %4791 = vmatprep.subr.bf16.mxu1 %v2887_v51  ;;  %v2924_v52 = vunpack.c.h.s8.bf16 %v1124_v43  ;;  %v2926_v51 = vunpack.c.h.s8.bf16 %v1126_v32  ;;  %v2935_v56 = vunpack.c.l.s8.bf16 %v1135_v45  ;;  %v2943_v3 = vunpack.c.h.s8.bf16 %v1135_v45  ;;  %v1157_v45 = vld [vmem:[%s7801_s18 + $0x1908] sm:$0xff] }
 0x330   : > { %4136 = vmatpush1.bf16.msra.mxu0 %v2884_v57  ;;  %4792 = vmatpush1.bf16.msra.mxu1 %v2886_v63  ;;  %v1132_v57 = vld [vmem:[%s7801_s18 + $0x1840] sm:$0xff]  ;;  %v1134_v63 = vld [vmem:[%s7801_s18 + $0x1850] sm:$0xff] }
 0x331   : > { %4137 = vmatprep.subr.bf16.mxu0 %v2893_v0  ;;  %4793 = vmatprep.subr.bf16.mxu1 %v2895_v1  ;;  %v2932_v0 = vunpack.c.l.s8.bf16 %v1132_v57  ;;  %v2934_v1 = vunpack.c.l.s8.bf16 %v1134_v63 }
 0x334   : > { %4138 = vmatpush1.bf16.msra.mxu0 %v2892_v8  ;;  %4794 = vmatpush1.bf16.msra.mxu1 %v2894_v9  ;;  %v1141_v8 = vld [vmem:[%s7801_s18 + $0x1888] sm:$0xff]  ;;  %v1143_v9 = vld [vmem:[%s7801_s18 + $0x1898] sm:$0xff] }
 0x335   : > { %4139 = vmatprep.subr.bf16.mxu0 %v2901_v10  ;;  %4795 = vmatprep.subr.bf16.mxu1 %v2903_v12  ;;  %v2940_v10 = vunpack.c.h.s8.bf16 %v1132_v57  ;;  %v2942_v12 = vunpack.c.h.s8.bf16 %v1134_v63  ;;  %v2949_v13 = vunpack.c.l.s8.bf16 %v1141_v8  ;;  %v2951_v16 = vunpack.c.l.s8.bf16 %v1143_v9  ;;  %v1156_v63 = vld [vmem:[%s7801_s18 + $0x1900] sm:$0xff] }
 0x336   : > { %v2957_v23 = vunpack.c.h.s8.bf16 %v1141_v8  ;;  %v2959_v25 = vunpack.c.h.s8.bf16 %v1143_v9  ;;  %v1165_v9 = vld [vmem:[%s7801_s18 + $0x1948] sm:$0xff] }
 0x338   : > { %4140 = vmatpush1.bf16.msra.mxu0 %v2900_v18  ;;  %4796 = vmatpush1.bf16.msra.mxu1 %v2902_v19  ;;  %v1140_v18 = vld [vmem:[%s7801_s18 + $0x1880] sm:$0xff]  ;;  %v1142_v19 = vld [vmem:[%s7801_s18 + $0x1890] sm:$0xff] }
 0x339   : > { %4141 = vmatprep.subr.bf16.mxu0 %v2909_v21  ;;  %4797 = vmatprep.subr.bf16.mxu1 %v2911_v24  ;;  %v2948_v21 = vunpack.c.l.s8.bf16 %v1140_v18  ;;  %v2950_v24 = vunpack.c.l.s8.bf16 %v1142_v19 }
 0x33c   : > { %4142 = vmatpush1.bf16.msra.mxu0 %v2908_v44  ;;  %4798 = vmatpush1.bf16.msra.mxu1 %v2910_v55  ;;  %v1149_v44 = vld [vmem:[%s7801_s18 + $0x18c8] sm:$0xff]  ;;  %v1151_v55 = vld [vmem:[%s7801_s18 + $0x18d8] sm:$0xff] }
 0x33d   : > { %4152 = vmatprep.subr.bf16.mxu0 %v2917_v29  ;;  %4808 = vmatprep.subr.bf16.mxu1 %v2919_v30  ;;  %v2956_v29 = vunpack.c.h.s8.bf16 %v1140_v18  ;;  %v2958_v30 = vunpack.c.h.s8.bf16 %v1142_v19  ;;  %v2965_v43 = vunpack.c.l.s8.bf16 %v1149_v44  ;;  %v2967_v32 = vunpack.c.l.s8.bf16 %v1151_v55  ;;  %v1164_v19 = vld [vmem:[%s7801_s18 + $0x1940] sm:$0xff] }
 0x33e   : > { %v2975_v42 = vunpack.c.h.s8.bf16 %v1151_v55  ;;  %v1173_v55 = vld [vmem:[%s7801_s18 + $0x1988] sm:$0xff] }
 0x33f   : > { %4144 = vmatmul.mubr.bf16.vlgmr.msra.gmra.mrb[0].mxu0 %v8398_v34  ;;  %4800 = vmatmul.mubr.bf16.vlgmr.msra.gmra.mrb[0].mxu1 %v8398_v34 }
 0x340   : > { %4153 = vmatpush1.bf16.msra.mxu0 %v2916_v35  ;;  %4809 = vmatpush1.bf16.msra.mxu1 %v2918_v37  ;;  %v1150_v35 = vld [vmem:[%s7801_s18 + $0x18d0] sm:$0xff]  ;;  %v2964_v37 = vunpack.c.l.s8.bf16 %v1148_v33 }
 0x341   : > { %4154 = vmatprep.subr.bf16.mxu0 %v2925_v40  ;;  %4810 = vmatprep.subr.bf16.mxu1 %v2927_v41  ;;  %v2966_v40 = vunpack.c.l.s8.bf16 %v1150_v35  ;;  %v2973_v41 = vunpack.c.h.s8.bf16 %v1149_v44 }
 0x342   : > { %4184 = vmatprep.mubr.bf16.mxu0 %v8403_v46  ;;  %4840 = vmatprep.mubr.bf16.mxu1 %v8403_v46 }
 0x344   : > { %4155 = vmatpush1.bf16.msra.mxu0 %v2924_v52  ;;  %4811 = vmatpush1.bf16.msra.mxu1 %v2926_v51  ;;  %v1159_v52 = vld [vmem:[%s7801_s18 + $0x1918] sm:$0xff]  ;;  %v2972_v51 = vunpack.c.h.s8.bf16 %v1148_v33 }
 0x345   : > { %4156 = vmatprep.subr.bf16.mxu0 %v2933_v54  ;;  %4812 = vmatprep.subr.bf16.mxu1 %v2935_v56  ;;  %v2974_v54 = vunpack.c.h.s8.bf16 %v1150_v35  ;;  %v2981_v56 = vunpack.c.l.s8.bf16 %v1157_v45  ;;  %v2983_v57 = vunpack.c.l.s8.bf16 %v1159_v52  ;;  %v2991_v8 = vunpack.c.h.s8.bf16 %v1159_v52  ;;  %v1172_v35 = vld [vmem:[%s7801_s18 + $0x1980] sm:$0xff]  ;;  %v1181_v52 = vld [vmem:[%s7801_s18 + $0x19c8] sm:$0xff] }
 0x348   : > { %4157 = vmatpush1.bf16.msra.mxu0 %v2932_v0  ;;  %4813 = vmatpush1.bf16.msra.mxu1 %v2934_v1  ;;  %v1158_v0 = vld [vmem:[%s7801_s18 + $0x1910] sm:$0xff]  ;;  %v2980_v1 = vunpack.c.l.s8.bf16 %v1156_v63 }
 0x349   : > { %4158 = vmatprep.subr.bf16.mxu0 %v2941_v2  ;;  %4814 = vmatprep.subr.bf16.mxu1 %v2943_v3  ;;  %v2982_v2 = vunpack.c.l.s8.bf16 %v1158_v0  ;;  %v2989_v3 = vunpack.c.h.s8.bf16 %v1157_v45 }
 0x34c   : > { %4159 = vmatpush1.bf16.msra.mxu0 %v2940_v10  ;;  %4815 = vmatpush1.bf16.msra.mxu1 %v2942_v12  ;;  %v1167_v10 = vld [vmem:[%s7801_s18 + $0x1958] sm:$0xff]  ;;  %v2988_v12 = vunpack.c.h.s8.bf16 %v1156_v63 }
 0x34d   : > { %4160 = vmatprep.subr.bf16.mxu0 %v2949_v13  ;;  %4816 = vmatprep.subr.bf16.mxu1 %v2951_v16  ;;  %v2990_v13 = vunpack.c.h.s8.bf16 %v1158_v0  ;;  %v2997_v16 = vunpack.c.l.s8.bf16 %v1165_v9  ;;  %v2999_v18 = vunpack.c.l.s8.bf16 %v1167_v10  ;;  %v3007_v44 = vunpack.c.h.s8.bf16 %v1167_v10  ;;  %v1180_v0 = vld [vmem:[%s7801_s18 + $0x19c0] sm:$0xff]  ;;  %v1189_v10 = vld [vmem:[%s7801_s18 + $0x1a08] sm:$0xff] }
 0x350   : > { %4161 = vmatpush1.bf16.msra.mxu0 %v2948_v21  ;;  %4817 = vmatpush1.bf16.msra.mxu1 %v2950_v24  ;;  %v1166_v21 = vld [vmem:[%s7801_s18 + $0x1950] sm:$0xff]  ;;  %v2996_v24 = vunpack.c.l.s8.bf16 %v1164_v19 }
 0x351   : > { %4162 = vmatprep.subr.bf16.mxu0 %v2957_v23  ;;  %4818 = vmatprep.subr.bf16.mxu1 %v2959_v25  ;;  %v2998_v23 = vunpack.c.l.s8.bf16 %v1166_v21  ;;  %v3005_v25 = vunpack.c.h.s8.bf16 %v1165_v9 }
 0x354   : > { %4163 = vmatpush1.bf16.msra.mxu0 %v2956_v29  ;;  %4819 = vmatpush1.bf16.msra.mxu1 %v2958_v30  ;;  %v1175_v29 = vld [vmem:[%s7801_s18 + $0x1998] sm:$0xff]  ;;  %v3004_v30 = vunpack.c.h.s8.bf16 %v1164_v19 }
 0x355   : > { %4164 = vmatprep.subr.bf16.mxu0 %v2965_v43  ;;  %4820 = vmatprep.subr.bf16.mxu1 %v2967_v32  ;;  %v3006_v43 = vunpack.c.h.s8.bf16 %v1166_v21  ;;  %v3013_v32 = vunpack.c.l.s8.bf16 %v1173_v55  ;;  %v3015_v33 = vunpack.c.l.s8.bf16 %v1175_v29  ;;  %v3023_v45 = vunpack.c.h.s8.bf16 %v1175_v29  ;;  %v1188_v21 = vld [vmem:[%s7801_s18 + $0x1a00] sm:$0xff] }
 0x358   : > { %4165 = vmatpush1.bf16.msra.mxu0 %v2964_v37  ;;  %4821 = vmatpush1.bf16.msra.mxu1 %v2966_v40  ;;  %v1174_v37 = vld [vmem:[%s7801_s18 + $0x1990] sm:$0xff]  ;;  %v3012_v40 = vunpack.c.l.s8.bf16 %v1172_v35 }
 0x359   : > { %4166 = vmatprep.subr.bf16.mxu0 %v2973_v41  ;;  %4822 = vmatprep.subr.bf16.mxu1 %v2975_v42  ;;  %v3014_v41 = vunpack.c.l.s8.bf16 %v1174_v37  ;;  %v3021_v42 = vunpack.c.h.s8.bf16 %v1173_v55  ;;  %v3053_v55 = vunpack.c.h.s8.bf16 %v1189_v10 }
 0x35c   : > { %4167 = vmatpush1.bf16.msra.mxu0 %v2972_v51  ;;  %4823 = vmatpush1.bf16.msra.mxu1 %v2974_v54  ;;  %v1183_v51 = vld [vmem:[%s7801_s18 + $0x19d8] sm:$0xff]  ;;  %v3020_v54 = vunpack.c.h.s8.bf16 %v1172_v35 }
 0x35d   : > { %4168 = vmatprep.subr.bf16.mxu0 %v2981_v56  ;;  %4824 = vmatprep.subr.bf16.mxu1 %v2983_v57  ;;  %v3022_v56 = vunpack.c.h.s8.bf16 %v1174_v37  ;;  %v3029_v57 = vunpack.c.l.s8.bf16 %v1181_v52  ;;  %v3031_v63 = vunpack.c.l.s8.bf16 %v1183_v51  ;;  %v3039_v9 = vunpack.c.h.s8.bf16 %v1183_v51 }
 0x360   : > { %4169 = vmatpush1.bf16.msra.mxu0 %v2980_v1  ;;  %4825 = vmatpush1.bf16.msra.mxu1 %v2982_v2  ;;  %v1182_v1 = vld [vmem:[%s7801_s18 + $0x19d0] sm:$0xff]  ;;  %v3028_v2 = vunpack.c.l.s8.bf16 %v1180_v0 }
 0x361   : > { %4170 = vmatprep.subr.bf16.mxu0 %v2989_v3  ;;  %4826 = vmatprep.subr.bf16.mxu1 %v2991_v8  ;;  %v3030_v3 = vunpack.c.l.s8.bf16 %v1182_v1  ;;  %v3037_v8 = vunpack.c.h.s8.bf16 %v1181_v52 }
 0x364   : > { %4171 = vmatpush1.bf16.msra.mxu0 %v2988_v12  ;;  %4827 = vmatpush1.bf16.msra.mxu1 %v2990_v13  ;;  %v1191_v12 = vld [vmem:[%s7801_s18 + $0x1a18] sm:$0xff]  ;;  %v3036_v13 = vunpack.c.h.s8.bf16 %v1180_v0 }
 0x365   : > { %4172 = vmatprep.subr.bf16.mxu0 %v2997_v16  ;;  %4828 = vmatprep.subr.bf16.mxu1 %v2999_v18  ;;  %v3038_v16 = vunpack.c.h.s8.bf16 %v1182_v1  ;;  %v3045_v18 = vunpack.c.l.s8.bf16 %v1189_v10  ;;  %v3047_v19 = vunpack.c.l.s8.bf16 %v1191_v12  ;;  %v3055_v29 = vunpack.c.h.s8.bf16 %v1191_v12 }
 0x368   : > { %4173 = vmatpush1.bf16.msra.mxu0 %v2996_v24  ;;  %4829 = vmatpush1.bf16.msra.mxu1 %v2998_v23  ;;  %v1190_v24 = vld [vmem:[%s7801_s18 + $0x1a10] sm:$0xff]  ;;  %v8441_v23 = vrot.slane %v8390_v26, %v7836_v49  ;;  %v3052_v26 = vunpack.c.h.s8.bf16 %v1188_v21 }
 0x369   : > { %4174 = vmatprep.subr.bf16.mxu0 %v3005_v25  ;;  %4830 = vmatprep.subr.bf16.mxu1 %v3007_v44  ;;  %v3044_v25 = vunpack.c.l.s8.bf16 %v1188_v21  ;;  %v3046_v44 = vunpack.c.l.s8.bf16 %v1190_v24 }
 0x36c   : > { %4175 = vmatpush1.bf16.msra.mxu0 %v3004_v30  ;;  %4831 = vmatpush1.bf16.msra.mxu1 %v3006_v43  ;;  %v1197_v30 = vld [vmem:[%s7801_s18 + $0x1a48] sm:$0xff]  ;;  %v1199_v43 = vld [vmem:[%s7801_s18 + $0x1a58] sm:$0xff] }
 0x36d   : > { %4176 = vmatprep.subr.bf16.mxu0 %v3013_v32  ;;  %4832 = vmatprep.subr.bf16.mxu1 %v3015_v33  ;;  %v8447_v32 = vcombine.high %v8403_v46, %v8403_v46  ;;  %v3054_v33 = vunpack.c.h.s8.bf16 %v1190_v24  ;;  %v3061_v35 = vunpack.c.l.s8.bf16 %v1197_v30  ;;  %v3063_v37 = vunpack.c.l.s8.bf16 %v1199_v43 }
 0x36e   : > { %v3069_v52 = vunpack.c.h.s8.bf16 %v1197_v30  ;;  %v3071_v51 = vunpack.c.h.s8.bf16 %v1199_v43 }
 0x370   : > { %4177 = vmatpush1.bf16.msra.mxu0 %v3012_v40  ;;  %4833 = vmatpush1.bf16.msra.mxu1 %v3014_v41  ;;  %v1196_v40 = vld [vmem:[%s7801_s18 + $0x1a40] sm:$0xff]  ;;  %v1198_v41 = vld [vmem:[%s7801_s18 + $0x1a50] sm:$0xff] }
 0x371   : > { %4178 = vmatprep.subr.bf16.mxu0 %v3021_v42  ;;  %4834 = vmatprep.subr.bf16.mxu1 %v3023_v45  ;;  %v3060_v42 = vunpack.c.l.s8.bf16 %v1196_v40  ;;  %v3062_v45 = vunpack.c.l.s8.bf16 %v1198_v41 }
 0x374   : > { %4179 = vmatpush1.bf16.msra.mxu0 %v3020_v54  ;;  %4835 = vmatpush1.bf16.msra.mxu1 %v3022_v56  ;;  %v1205_v54 = vld [vmem:[%s7801_s18 + $0x1a88] sm:$0xff]  ;;  %v1207_v56 = vld [vmem:[%s7801_s18 + $0x1a98] sm:$0xff] }
 0x375   : > { %4180 = vmatprep.subr.bf16.mxu0 %v3029_v57  ;;  %4836 = vmatprep.subr.bf16.mxu1 %v3031_v63  ;;  %v3068_v57 = vunpack.c.h.s8.bf16 %v1196_v40  ;;  %v3070_v63 = vunpack.c.h.s8.bf16 %v1198_v41  ;;  %v3077_v0 = vunpack.c.l.s8.bf16 %v1205_v54  ;;  %v3079_v1 = vunpack.c.l.s8.bf16 %v1207_v56 }
 0x376   : > { %v3085_v10 = vunpack.c.h.s8.bf16 %v1205_v54  ;;  %v3087_v12 = vunpack.c.h.s8.bf16 %v1207_v56 }
 0x378   : > { %4181 = vmatpush1.bf16.msra.mxu0 %v3028_v2  ;;  %4837 = vmatpush1.bf16.msra.mxu1 %v3030_v3  ;;  %v1204_v2 = vld [vmem:[%s7801_s18 + $0x1a80] sm:$0xff]  ;;  %v1206_v3 = vld [vmem:[%s7801_s18 + $0x1a90] sm:$0xff] }
 0x379   : > { %4182 = vmatprep.subr.bf16.mxu0 %v3037_v8  ;;  %4838 = vmatprep.subr.bf16.mxu1 %v3039_v9  ;;  %v3076_v8 = vunpack.c.l.s8.bf16 %v1204_v2  ;;  %v3078_v9 = vunpack.c.l.s8.bf16 %v1206_v3 }
 0x37c   : > { %4183 = vmatpush1.bf16.msra.mxu0 %v3036_v13  ;;  %4839 = vmatpush1.bf16.msra.mxu1 %v3038_v16  ;;  %v1213_v13 = vld [vmem:[%s7801_s18 + $0x1ac8] sm:$0xff]  ;;  %v1215_v16 = vld [vmem:[%s7801_s18 + $0x1ad8] sm:$0xff] }
 0x37d   : > { %4193 = vmatprep.subr.bf16.mxu0 %v3045_v18  ;;  %4849 = vmatprep.subr.bf16.mxu1 %v3047_v19  ;;  %v3084_v18 = vunpack.c.h.s8.bf16 %v1204_v2  ;;  %v3086_v19 = vunpack.c.h.s8.bf16 %v1206_v3  ;;  %v3093_v21 = vunpack.c.l.s8.bf16 %v1213_v13  ;;  %v3095_v24 = vunpack.c.l.s8.bf16 %v1215_v16 }
 0x37e   : > { %v3101_v30 = vunpack.c.h.s8.bf16 %v1213_v13  ;;  %v3103_v43 = vunpack.c.h.s8.bf16 %v1215_v16 }
 0x37f   : > { %4185 = vmatmul.mubr.bf16.vlgmr.msra.gmra.mrb[0].mxu0 %v8441_v23  ;;  %4841 = vmatmul.mubr.bf16.vlgmr.msra.gmra.mrb[0].mxu1 %v8441_v23 }
 0x380   : > { %4194 = vmatpush1.bf16.msra.mxu0 %v3044_v25  ;;  %4850 = vmatpush1.bf16.msra.mxu1 %v3046_v44  ;;  %v1212_v25 = vld [vmem:[%s7801_s18 + $0x1ac0] sm:$0xff]  ;;  %v1214_v44 = vld [vmem:[%s7801_s18 + $0x1ad0] sm:$0xff] }
 0x381   : > { %4195 = vmatprep.subr.bf16.mxu0 %v3053_v55  ;;  %4851 = vmatprep.subr.bf16.mxu1 %v3055_v29  ;;  %v3092_v55 = vunpack.c.l.s8.bf16 %v1212_v25  ;;  %v3094_v29 = vunpack.c.l.s8.bf16 %v1214_v44 }
 0x382   : > { %4225 = vmatprep.mubr.bf16.mxu0 %v8447_v32  ;;  %4881 = vmatprep.mubr.bf16.mxu1 %v8447_v32 }
 0x384   : > { %4196 = vmatpush1.bf16.msra.mxu0 %v3052_v26  ;;  %4852 = vmatpush1.bf16.msra.mxu1 %v3054_v33  ;;  %v1221_v26 = vld [vmem:[%s7801_s18 + $0x1b08] sm:$0xff]  ;;  %v1223_v33 = vld [vmem:[%s7801_s18 + $0x1b18] sm:$0xff] }
 0x385   : > { %4197 = vmatprep.subr.bf16.mxu0 %v3061_v35  ;;  %4853 = vmatprep.subr.bf16.mxu1 %v3063_v37  ;;  %v3100_v35 = vunpack.c.h.s8.bf16 %v1212_v25  ;;  %v3102_v37 = vunpack.c.h.s8.bf16 %v1214_v44  ;;  %v3109_v40 = vunpack.c.l.s8.bf16 %v1221_v26  ;;  %v3111_v41 = vunpack.c.l.s8.bf16 %v1223_v33 }
 0x386   : > { %v3117_v54 = vunpack.c.h.s8.bf16 %v1221_v26  ;;  %v3119_v56 = vunpack.c.h.s8.bf16 %v1223_v33 }
 0x388   : > { %4198 = vmatpush1.bf16.msra.mxu0 %v3060_v42  ;;  %4854 = vmatpush1.bf16.msra.mxu1 %v3062_v45  ;;  %v1220_v42 = vld [vmem:[%s7801_s18 + $0x1b00] sm:$0xff]  ;;  %v1222_v45 = vld [vmem:[%s7801_s18 + $0x1b10] sm:$0xff] }
 0x389   : > { %4199 = vmatprep.subr.bf16.mxu0 %v3069_v52  ;;  %4855 = vmatprep.subr.bf16.mxu1 %v3071_v51  ;;  %v3108_v52 = vunpack.c.l.s8.bf16 %v1220_v42  ;;  %v3110_v51 = vunpack.c.l.s8.bf16 %v1222_v45 }
 0x38c   : > { %4200 = vmatpush1.bf16.msra.mxu0 %v3068_v57  ;;  %4856 = vmatpush1.bf16.msra.mxu1 %v3070_v63  ;;  %v1229_v57 = vld [vmem:[%s7801_s18 + $0x1b48] sm:$0xff]  ;;  %v1231_v63 = vld [vmem:[%s7801_s18 + $0x1b58] sm:$0xff] }
 0x38d   : > { %4201 = vmatprep.subr.bf16.mxu0 %v3077_v0  ;;  %4857 = vmatprep.subr.bf16.mxu1 %v3079_v1  ;;  %v3116_v0 = vunpack.c.h.s8.bf16 %v1220_v42  ;;  %v3118_v1 = vunpack.c.h.s8.bf16 %v1222_v45  ;;  %v3125_v2 = vunpack.c.l.s8.bf16 %v1229_v57  ;;  %v3127_v3 = vunpack.c.l.s8.bf16 %v1231_v63 }
 0x38e   : > { %v3133_v13 = vunpack.c.h.s8.bf16 %v1229_v57  ;;  %v3135_v16 = vunpack.c.h.s8.bf16 %v1231_v63 }
 0x390   : > { %4202 = vmatpush1.bf16.msra.mxu0 %v3076_v8  ;;  %4858 = vmatpush1.bf16.msra.mxu1 %v3078_v9  ;;  %v1228_v8 = vld [vmem:[%s7801_s18 + $0x1b40] sm:$0xff]  ;;  %v1230_v9 = vld [vmem:[%s7801_s18 + $0x1b50] sm:$0xff] }
 0x391   : > { %4203 = vmatprep.subr.bf16.mxu0 %v3085_v10  ;;  %4859 = vmatprep.subr.bf16.mxu1 %v3087_v12  ;;  %v3124_v10 = vunpack.c.l.s8.bf16 %v1228_v8  ;;  %v3126_v12 = vunpack.c.l.s8.bf16 %v1230_v9 }
 0x394   : > { %4204 = vmatpush1.bf16.msra.mxu0 %v3084_v18  ;;  %4860 = vmatpush1.bf16.msra.mxu1 %v3086_v19  ;;  %v1237_v18 = vld [vmem:[%s7801_s18 + $0x1b88] sm:$0xff]  ;;  %v1239_v19 = vld [vmem:[%s7801_s18 + $0x1b98] sm:$0xff] }
 0x395   : > { %4205 = vmatprep.subr.bf16.mxu0 %v3093_v21  ;;  %4861 = vmatprep.subr.bf16.mxu1 %v3095_v24  ;;  %v3132_v21 = vunpack.c.h.s8.bf16 %v1228_v8  ;;  %v3134_v24 = vunpack.c.h.s8.bf16 %v1230_v9  ;;  %v3141_v25 = vunpack.c.l.s8.bf16 %v1237_v18  ;;  %v3143_v44 = vunpack.c.l.s8.bf16 %v1239_v19 }
 0x396   : > { %v3149_v26 = vunpack.c.h.s8.bf16 %v1237_v18  ;;  %v3151_v33 = vunpack.c.h.s8.bf16 %v1239_v19  ;;  %v8492_v18 = vcombine.high %v8441_v23, %v8441_v23 }
 0x398   : > { %4206 = vmatpush1.bf16.msra.mxu0 %v3092_v55  ;;  %4862 = vmatpush1.bf16.msra.mxu1 %v3094_v29  ;;  %v1236_v55 = vld [vmem:[%s7801_s18 + $0x1b80] sm:$0xff]  ;;  %v1238_v29 = vld [vmem:[%s7801_s18 + $0x1b90] sm:$0xff] }
 0x399   : > { %4207 = vmatprep.subr.bf16.mxu0 %v3101_v30  ;;  %4863 = vmatprep.subr.bf16.mxu1 %v3103_v43  ;;  %v3140_v30 = vunpack.c.l.s8.bf16 %v1236_v55  ;;  %v3142_v43 = vunpack.c.l.s8.bf16 %v1238_v29 }
 0x39c   : > { %4208 = vmatpush1.bf16.msra.mxu0 %v3100_v35  ;;  %4864 = vmatpush1.bf16.msra.mxu1 %v3102_v37  ;;  %v1245_v35 = vld [vmem:[%s7801_s18 + $0x1bc8] sm:$0xff]  ;;  %v1247_v37 = vld [vmem:[%s7801_s18 + $0x1bd8] sm:$0xff] }
 0x39d   : > { %4209 = vmatprep.subr.bf16.mxu0 %v3109_v40  ;;  %4865 = vmatprep.subr.bf16.mxu1 %v3111_v41  ;;  %v3148_v40 = vunpack.c.h.s8.bf16 %v1236_v55  ;;  %v3150_v41 = vunpack.c.h.s8.bf16 %v1238_v29  ;;  %v3157_v42 = vunpack.c.l.s8.bf16 %v1245_v35  ;;  %v3159_v45 = vunpack.c.l.s8.bf16 %v1247_v37  ;;  %v1263_v55 = vld [vmem:[%s7801_s18 + $0x1c58] sm:$0xff] }
 0x39e   : > { %v3165_v63 = vunpack.c.h.s8.bf16 %v1245_v35  ;;  %v1260_v35 = vld [vmem:[%s7801_s18 + $0x1c40] sm:$0xff] }
 0x3a0   : > { %4210 = vmatpush1.bf16.msra.mxu0 %v3108_v52  ;;  %4866 = vmatpush1.bf16.msra.mxu1 %v3110_v51  ;;  %v1244_v52 = vld [vmem:[%s7801_s18 + $0x1bc0] sm:$0xff]  ;;  %v1246_v51 = vld [vmem:[%s7801_s18 + $0x1bd0] sm:$0xff] }
 0x3a1   : > { %4211 = vmatprep.subr.bf16.mxu0 %v3117_v54  ;;  %4867 = vmatprep.subr.bf16.mxu1 %v3119_v56  ;;  %v3579_v54 = vcombine.high %v8384_v28, %v8384_v28  ;;  %v3156_v56 = vunpack.c.l.s8.bf16 %v1244_v52  ;;  %v3158_v57 = vunpack.c.l.s8.bf16 %v1246_v51  ;;  %v3164_v8 = vunpack.c.h.s8.bf16 %v1244_v52  ;;  %v1269_v52 = vld [vmem:[%s7801_s18 + $0x1c88] sm:$0xff] }
 0x3a2   : > { %v3166_v9 = vunpack.c.h.s8.bf16 %v1246_v51  ;;  %v1271_v51 = vld [vmem:[%s7801_s18 + $0x1c98] sm:$0xff] }
 0x3a4   : > { %4212 = vmatpush1.bf16.msra.mxu0 %v3116_v0  ;;  %4868 = vmatpush1.bf16.msra.mxu1 %v3118_v1  ;;  %v3167_v0 = vunpack.c.h.s8.bf16 %v1247_v37  ;;  %v1253_v1 = vld [vmem:[%s7801_s18 + $0x1c08] sm:$0xff]  ;;  %v1262_v37 = vld [vmem:[%s7801_s18 + $0x1c50] sm:$0xff] }
 0x3a5   : > { %4213 = vmatprep.subr.bf16.mxu0 %v3125_v2  ;;  %4869 = vmatprep.subr.bf16.mxu1 %v3127_v3  ;;  %v1255_v2 = vld [vmem:[%s7801_s18 + $0x1c18] sm:$0xff]  ;;  %v8484_v3 = vrot.slane %v3579_v54, %v7836_v49  ;;  %v3173_v28 = vunpack.c.l.s8.bf16 %v1253_v1  ;;  %v3196_v54 = vunpack.c.h.s8.bf16 %v1260_v35 }
 0x3a8   : > { %4214 = vmatpush1.bf16.msra.mxu0 %v3124_v10  ;;  %4870 = vmatpush1.bf16.msra.mxu1 %v3126_v12  ;;  %v3175_v10 = vunpack.c.l.s8.bf16 %v1255_v2  ;;  %v1252_v12 = vld [vmem:[%s7801_s18 + $0x1c00] sm:$0xff] }
 0x3a9   : > { %4215 = vmatprep.subr.bf16.mxu0 %v3133_v13  ;;  %4871 = vmatprep.subr.bf16.mxu1 %v3135_v16  ;;  %v1254_v13 = vld [vmem:[%s7801_s18 + $0x1c10] sm:$0xff]  ;;  %v3595_v16 = vcombine.high %v8484_v3, %v8484_v3  ;;  %v3172_v19 = vunpack.c.l.s8.bf16 %v1252_v12 }
 0x3ab   : > { %v8497_v29 = vrot.slane %v3595_v16, %v7836_v49 }
 0x3ac   : > { %4216 = vmatpush1.bf16.msra.mxu0 %v3132_v21  ;;  %4872 = vmatpush1.bf16.msra.mxu1 %v3134_v24  ;;  %v3174_v21 = vunpack.c.l.s8.bf16 %v1254_v13  ;;  %v3181_v24 = vunpack.c.h.s8.bf16 %v1253_v1  ;;  %v1270_v1 = vld [vmem:[%s7801_s18 + $0x1c90] sm:$0xff] }
 0x3ad   : > { %4217 = vmatprep.subr.bf16.mxu0 %v3141_v25  ;;  %4873 = vmatprep.subr.bf16.mxu1 %v3143_v44  ;;  %v3183_v25 = vunpack.c.h.s8.bf16 %v1255_v2  ;;  %v1261_v44 = vld [vmem:[%s7801_s18 + $0x1c48] sm:$0xff]  ;;  %v3214_v16 = vunpack.c.h.s8.bf16 %v1270_v1 }
 0x3b0   : > { %4218 = vmatpush1.bf16.msra.mxu0 %v3140_v30  ;;  %4874 = vmatpush1.bf16.msra.mxu1 %v3142_v43  ;;  %v3180_v30 = vunpack.c.h.s8.bf16 %v1252_v12  ;;  %v3182_v43 = vunpack.c.h.s8.bf16 %v1254_v13  ;;  %v1279_v12 = vld [vmem:[%s7801_s18 + $0x1cd8] sm:$0xff] }
 0x3b1   : > { %4219 = vmatprep.subr.bf16.mxu0 %v3149_v26  ;;  %4875 = vmatprep.subr.bf16.mxu1 %v3151_v33  ;;  %v3189_v26 = vunpack.c.l.s8.bf16 %v1261_v44  ;;  %v3191_v33 = vunpack.c.l.s8.bf16 %v1263_v55 }
 0x3b4   : > { %4220 = vmatpush1.bf16.msra.mxu0 %v3148_v40  ;;  %4876 = vmatpush1.bf16.msra.mxu1 %v3150_v41  ;;  %v3188_v40 = vunpack.c.l.s8.bf16 %v1260_v35  ;;  %v3190_v41 = vunpack.c.l.s8.bf16 %v1262_v37 }
 0x3b5   : > { %4221 = vmatprep.subr.bf16.mxu0 %v3157_v42  ;;  %4877 = vmatprep.subr.bf16.mxu1 %v3159_v45  ;;  %v3197_v42 = vunpack.c.h.s8.bf16 %v1261_v44  ;;  %v3199_v45 = vunpack.c.h.s8.bf16 %v1263_v55 }
 0x3b8   : > { %4222 = vmatpush1.bf16.msra.mxu0 %v3156_v56  ;;  %4878 = vmatpush1.bf16.msra.mxu1 %v3158_v57  ;;  %v3198_v56 = vunpack.c.h.s8.bf16 %v1262_v37  ;;  %v3205_v57 = vunpack.c.l.s8.bf16 %v1269_v52 }
 0x3b9   : > { %4223 = vmatprep.subr.bf16.mxu0 %v3165_v63  ;;  %4879 = vmatprep.subr.bf16.mxu1 %v3167_v0  ;;  %v3207_v63 = vunpack.c.l.s8.bf16 %v1271_v51  ;;  %v1268_v0 = vld [vmem:[%s7801_s18 + $0x1c80] sm:$0xff] }
 0x3ba   : > { %v3204_v2 = vunpack.c.l.s8.bf16 %v1268_v0  ;;  %v3212_v13 = vunpack.c.h.s8.bf16 %v1268_v0 }
 0x3bc   : > { %4224 = vmatpush1.bf16.msra.mxu0 %v3164_v8  ;;  %4880 = vmatpush1.bf16.msra.mxu1 %v3166_v9  ;;  %v3206_v8 = vunpack.c.l.s8.bf16 %v1270_v1  ;;  %v3213_v9 = vunpack.c.h.s8.bf16 %v1269_v52 }
 0x3bd   : > { %4234 = vmatprep.subr.bf16.mxu0 %v3173_v28  ;;  %4890 = vmatprep.subr.bf16.mxu1 %v3175_v10  ;;  %v3215_v28 = vunpack.c.h.s8.bf16 %v1271_v51  ;;  %v1277_v10 = vld [vmem:[%s7801_s18 + $0x1cc8] sm:$0xff] }
 0x3bf   : > { %4226 = vmatmul.mubr.bf16.vlgmr.msra.gmra.mrb[0].mxu0 %v8492_v18  ;;  %4882 = vmatmul.mubr.bf16.vlgmr.msra.gmra.mrb[0].mxu1 %v8492_v18 }
 0x3c0   : > { %4235 = vmatpush1.bf16.msra.mxu0 %v3172_v19  ;;  %4891 = vmatpush1.bf16.msra.mxu1 %v3174_v21  ;;  %v3221_v19 = vunpack.c.l.s8.bf16 %v1277_v10  ;;  %v3223_v21 = vunpack.c.l.s8.bf16 %v1279_v12 }
 0x3c1   : > { %4236 = vmatprep.subr.bf16.mxu0 %v3181_v24  ;;  %4892 = vmatprep.subr.bf16.mxu1 %v3183_v25  ;;  %v1276_v24 = vld [vmem:[%s7801_s18 + $0x1cc0] sm:$0xff]  ;;  %v1278_v25 = vld [vmem:[%s7801_s18 + $0x1cd0] sm:$0xff] }
 0x3c2   : > { %4266 = vmatprep.mubr.bf16.mxu0 %v8497_v29  ;;  %4922 = vmatprep.mubr.bf16.mxu1 %v8497_v29  ;;  %v3220_v44 = vunpack.c.l.s8.bf16 %v1276_v24  ;;  %v3222_v55 = vunpack.c.l.s8.bf16 %v1278_v25  ;;  %v3228_v35 = vunpack.c.h.s8.bf16 %v1276_v24  ;;  %v3230_v37 = vunpack.c.h.s8.bf16 %v1278_v25 }
 0x3c4   : > { %4237 = vmatpush1.bf16.msra.mxu0 %v3180_v30  ;;  %4893 = vmatpush1.bf16.msra.mxu1 %v3182_v43  ;;  %v3229_v30 = vunpack.c.h.s8.bf16 %v1277_v10  ;;  %v3231_v43 = vunpack.c.h.s8.bf16 %v1279_v12 }
 0x3c5   : > { %4238 = vmatprep.subr.bf16.mxu0 %v3189_v26  ;;  %4894 = vmatprep.subr.bf16.mxu1 %v3191_v33  ;;  %v1285_v26 = vld [vmem:[%s7801_s18 + $0x1d08] sm:$0xff]  ;;  %v1287_v33 = vld [vmem:[%s7801_s18 + $0x1d18] sm:$0xff] }
 0x3c8   : > { %4239 = vmatpush1.bf16.msra.mxu0 %v3188_v40  ;;  %4895 = vmatpush1.bf16.msra.mxu1 %v3190_v41  ;;  %v3237_v40 = vunpack.c.l.s8.bf16 %v1285_v26  ;;  %v3239_v41 = vunpack.c.l.s8.bf16 %v1287_v33 }
 0x3c9   : > { %4240 = vmatprep.subr.bf16.mxu0 %v3197_v42  ;;  %4896 = vmatprep.subr.bf16.mxu1 %v3199_v45  ;;  %v1284_v42 = vld [vmem:[%s7801_s18 + $0x1d00] sm:$0xff]  ;;  %v1286_v45 = vld [vmem:[%s7801_s18 + $0x1d10] sm:$0xff] }
 0x3ca   : > { %v3236_v52 = vunpack.c.l.s8.bf16 %v1284_v42  ;;  %v3238_v51 = vunpack.c.l.s8.bf16 %v1286_v45  ;;  %v3244_v0 = vunpack.c.h.s8.bf16 %v1284_v42  ;;  %v3246_v1 = vunpack.c.h.s8.bf16 %v1286_v45 }
 0x3cc   : > { %4241 = vmatpush1.bf16.msra.mxu0 %v3196_v54  ;;  %4897 = vmatpush1.bf16.msra.mxu1 %v3198_v56  ;;  %v3245_v54 = vunpack.c.h.s8.bf16 %v1285_v26  ;;  %v3247_v56 = vunpack.c.h.s8.bf16 %v1287_v33 }
 0x3cd   : > { %4242 = vmatprep.subr.bf16.mxu0 %v3205_v57  ;;  %4898 = vmatprep.subr.bf16.mxu1 %v3207_v63  ;;  %v1293_v57 = vld [vmem:[%s7801_s18 + $0x1d48] sm:$0xff]  ;;  %v1295_v63 = vld [vmem:[%s7801_s18 + $0x1d58] sm:$0xff] }
 0x3d0   : > { %4243 = vmatpush1.bf16.msra.mxu0 %v3204_v2  ;;  %4899 = vmatpush1.bf16.msra.mxu1 %v3206_v8  ;;  %v3253_v2 = vunpack.c.l.s8.bf16 %v1293_v57  ;;  %v3255_v8 = vunpack.c.l.s8.bf16 %v1295_v63 }
 0x3d1   : > { %4244 = vmatprep.subr.bf16.mxu0 %v3213_v9  ;;  %4900 = vmatprep.subr.bf16.mxu1 %v3215_v28  ;;  %v1292_v9 = vld [vmem:[%s7801_s18 + $0x1d40] sm:$0xff]  ;;  %v1294_v28 = vld [vmem:[%s7801_s18 + $0x1d50] sm:$0xff] }
 0x3d2   : > { %v3252_v10 = vunpack.c.l.s8.bf16 %v1292_v9  ;;  %v3254_v12 = vunpack.c.l.s8.bf16 %v1294_v28  ;;  %v3260_v24 = vunpack.c.h.s8.bf16 %v1292_v9  ;;  %v3262_v25 = vunpack.c.h.s8.bf16 %v1294_v28 }
 0x3d4   : > { %4245 = vmatpush1.bf16.msra.mxu0 %v3212_v13  ;;  %4901 = vmatpush1.bf16.msra.mxu1 %v3214_v16  ;;  %v3261_v13 = vunpack.c.h.s8.bf16 %v1293_v57  ;;  %v3263_v16 = vunpack.c.h.s8.bf16 %v1295_v63 }
 0x3d5   : > { %4246 = vmatprep.subr.bf16.mxu0 %v3221_v19  ;;  %4902 = vmatprep.subr.bf16.mxu1 %v3223_v21  ;;  %v1301_v19 = vld [vmem:[%s7801_s18 + $0x1d88] sm:$0xff]  ;;  %v1303_v21 = vld [vmem:[%s7801_s18 + $0x1d98] sm:$0xff] }
 0x3d8   : > { %4247 = vmatpush1.bf16.msra.mxu0 %v3220_v44  ;;  %4903 = vmatpush1.bf16.msra.mxu1 %v3222_v55  ;;  %v3269_v44 = vunpack.c.l.s8.bf16 %v1301_v19  ;;  %v3271_v55 = vunpack.c.l.s8.bf16 %v1303_v21 }
 0x3d9   : > { %4248 = vmatprep.subr.bf16.mxu0 %v3229_v30  ;;  %4904 = vmatprep.subr.bf16.mxu1 %v3231_v43  ;;  %v1300_v30 = vld [vmem:[%s7801_s18 + $0x1d80] sm:$0xff]  ;;  %v1302_v43 = vld [vmem:[%s7801_s18 + $0x1d90] sm:$0xff] }
 0x3da   : > { %v3268_v26 = vunpack.c.l.s8.bf16 %v1300_v30  ;;  %v3270_v33 = vunpack.c.l.s8.bf16 %v1302_v43  ;;  %v3276_v42 = vunpack.c.h.s8.bf16 %v1300_v30  ;;  %v3278_v45 = vunpack.c.h.s8.bf16 %v1302_v43  ;;  %v1327_v30 = vld [vmem:[%s7801_s18 + $0x1e58] sm:$0xff] }
 0x3db   : > { %v8541_v43 = vcombine.high %v8497_v29, %v8497_v29 }
 0x3dc   : > { %4249 = vmatpush1.bf16.msra.mxu0 %v3228_v35  ;;  %4905 = vmatpush1.bf16.msra.mxu1 %v3230_v37  ;;  %v3277_v35 = vunpack.c.h.s8.bf16 %v1301_v19  ;;  %v3279_v37 = vunpack.c.h.s8.bf16 %v1303_v21  ;;  %v8535_v19 = vrot.slane %v8484_v3, %v7836_v49 }
 0x3dd   : > { %4250 = vmatprep.subr.bf16.mxu0 %v3237_v40  ;;  %4906 = vmatprep.subr.bf16.mxu1 %v3239_v41  ;;  %v1309_v40 = vld [vmem:[%s7801_s18 + $0x1dc8] sm:$0xff]  ;;  %v1311_v41 = vld [vmem:[%s7801_s18 + $0x1dd8] sm:$0xff] }
 0x3e0   : > { %4251 = vmatpush1.bf16.msra.mxu0 %v3236_v52  ;;  %4907 = vmatpush1.bf16.msra.mxu1 %v3238_v51  ;;  %v3285_v52 = vunpack.c.l.s8.bf16 %v1309_v40  ;;  %v3287_v51 = vunpack.c.l.s8.bf16 %v1311_v41 }
 0x3e1   : > { %4252 = vmatprep.subr.bf16.mxu0 %v3245_v54  ;;  %4908 = vmatprep.subr.bf16.mxu1 %v3247_v56  ;;  %v1308_v54 = vld [vmem:[%s7801_s18 + $0x1dc0] sm:$0xff]  ;;  %v1310_v56 = vld [vmem:[%s7801_s18 + $0x1dd0] sm:$0xff] }
 0x3e2   : > { %v3284_v57 = vunpack.c.l.s8.bf16 %v1308_v54  ;;  %v3286_v63 = vunpack.c.l.s8.bf16 %v1310_v56  ;;  %v3292_v9 = vunpack.c.h.s8.bf16 %v1308_v54  ;;  %v3294_v28 = vunpack.c.h.s8.bf16 %v1310_v56 }
 0x3e4   : > { %4253 = vmatpush1.bf16.msra.mxu0 %v3244_v0  ;;  %4909 = vmatpush1.bf16.msra.mxu1 %v3246_v1  ;;  %v3293_v0 = vunpack.c.h.s8.bf16 %v1309_v40  ;;  %v3295_v1 = vunpack.c.h.s8.bf16 %v1311_v41 }
 0x3e5   : > { %4254 = vmatprep.subr.bf16.mxu0 %v3253_v2  ;;  %4910 = vmatprep.subr.bf16.mxu1 %v3255_v8  ;;  %v1317_v2 = vld [vmem:[%s7801_s18 + $0x1e08] sm:$0xff]  ;;  %v1319_v8 = vld [vmem:[%s7801_s18 + $0x1e18] sm:$0xff] }
 0x3e8   : > { %4255 = vmatpush1.bf16.msra.mxu0 %v3252_v10  ;;  %4911 = vmatpush1.bf16.msra.mxu1 %v3254_v12  ;;  %v3301_v10 = vunpack.c.l.s8.bf16 %v1317_v2  ;;  %v3303_v12 = vunpack.c.l.s8.bf16 %v1319_v8 }
 0x3e9   : > { %4256 = vmatprep.subr.bf16.mxu0 %v3261_v13  ;;  %4912 = vmatprep.subr.bf16.mxu1 %v3263_v16  ;;  %v1316_v13 = vld [vmem:[%s7801_s18 + $0x1e00] sm:$0xff]  ;;  %v1318_v16 = vld [vmem:[%s7801_s18 + $0x1e10] sm:$0xff] }
 0x3ea   : > { %v3300_v21 = vunpack.c.l.s8.bf16 %v1316_v13  ;;  %v3308_v49 = vunpack.c.h.s8.bf16 %v1316_v13  ;;  %v3310_v3 = vunpack.c.h.s8.bf16 %v1318_v16 }
 0x3ec   : > { %4257 = vmatpush1.bf16.msra.mxu0 %v3260_v24  ;;  %4913 = vmatpush1.bf16.msra.mxu1 %v3262_v25  ;;  %v3302_v24 = vunpack.c.l.s8.bf16 %v1318_v16  ;;  %v3309_v25 = vunpack.c.h.s8.bf16 %v1317_v2 }
 0x3ed   : > { %4258 = vmatprep.subr.bf16.mxu0 %v3269_v44  ;;  %4914 = vmatprep.subr.bf16.mxu1 %v3271_v55  ;;  %v3311_v44 = vunpack.c.h.s8.bf16 %v1319_v8  ;;  %v1325_v55 = vld [vmem:[%s7801_s18 + $0x1e48] sm:$0xff] }
 0x3f0   : > { %4259 = vmatpush1.bf16.msra.mxu0 %v3268_v26  ;;  %4915 = vmatpush1.bf16.msra.mxu1 %v3270_v33  ;;  %v3317_v26 = vunpack.c.l.s8.bf16 %v1325_v55  ;;  %v3319_v33 = vunpack.c.l.s8.bf16 %v1327_v30 }
 0x3f1   : > { %4260 = vmatprep.subr.bf16.mxu0 %v3277_v35  ;;  %4916 = vmatprep.subr.bf16.mxu1 %v3279_v37  ;;  %v1324_v35 = vld [vmem:[%s7801_s18 + $0x1e40] sm:$0xff]  ;;  %v1326_v37 = vld [vmem:[%s7801_s18 + $0x1e50] sm:$0xff] }
 0x3f2   : > { %v3316_v40 = vunpack.c.l.s8.bf16 %v1324_v35  ;;  %v3318_v41 = vunpack.c.l.s8.bf16 %v1326_v37  ;;  %v3324_v54 = vunpack.c.h.s8.bf16 %v1324_v35  ;;  %v3326_v56 = vunpack.c.h.s8.bf16 %v1326_v37 }
 0x3f4   : > { %4261 = vmatpush1.bf16.msra.mxu0 %v3276_v42  ;;  %4917 = vmatpush1.bf16.msra.mxu1 %v3278_v45  ;;  %v3325_v42 = vunpack.c.h.s8.bf16 %v1325_v55  ;;  %v3327_v45 = vunpack.c.h.s8.bf16 %v1327_v30 }
 0x3f5   : > { %4262 = vmatprep.subr.bf16.mxu0 %v3285_v52  ;;  %4918 = vmatprep.subr.bf16.mxu1 %v3287_v51  ;;  %v1333_v52 = vld [vmem:[%s7801_s18 + $0x1e88] sm:$0xff]  ;;  %v1335_v51 = vld [vmem:[%s7801_s18 + $0x1e98] sm:$0xff] }
 0x3f8   : > { %4263 = vmatpush1.bf16.msra.mxu0 %v3284_v57  ;;  %4919 = vmatpush1.bf16.msra.mxu1 %v3286_v63  ;;  %v3333_v57 = vunpack.c.l.s8.bf16 %v1333_v52  ;;  %v3335_v63 = vunpack.c.l.s8.bf16 %v1335_v51 }
 0x3f9   : > { %4264 = vmatprep.subr.bf16.mxu0 %v3293_v0  ;;  %4920 = vmatprep.subr.bf16.mxu1 %v3295_v1  ;;  %v1332_v0 = vld [vmem:[%s7801_s18 + $0x1e80] sm:$0xff]  ;;  %v1334_v1 = vld [vmem:[%s7801_s18 + $0x1e90] sm:$0xff] }
 0x3fa   : > { %v3332_v2 = vunpack.c.l.s8.bf16 %v1332_v0  ;;  %v3334_v8 = vunpack.c.l.s8.bf16 %v1334_v1  ;;  %v3340_v13 = vunpack.c.h.s8.bf16 %v1332_v0  ;;  %v3342_v16 = vunpack.c.h.s8.bf16 %v1334_v1 }
 0x3fc   : > { %4265 = vmatpush1.bf16.msra.mxu0 %v3292_v9  ;;  %4921 = vmatpush1.bf16.msra.mxu1 %v3294_v28  ;;  %v3341_v9 = vunpack.c.h.s8.bf16 %v1333_v52  ;;  %v3343_v28 = vunpack.c.h.s8.bf16 %v1335_v51 }
 0x3fd   : > { %4275 = vmatprep.subr.bf16.mxu0 %v3301_v10  ;;  %4931 = vmatprep.subr.bf16.mxu1 %v3303_v12  ;;  %v1341_v10 = vld [vmem:[%s7801_s18 + $0x1ec8] sm:$0xff]  ;;  %v1343_v12 = vld [vmem:[%s7801_s18 + $0x1ed8] sm:$0xff] }
 0x3ff   : > { %4267 = vmatmul.mubr.bf16.vlgmr.msra.gmra.mrb[0].mxu0 %v8535_v19  ;;  %4923 = vmatmul.mubr.bf16.vlgmr.msra.gmra.mrb[0].mxu1 %v8535_v19 }
 0x400   : > { %4276 = vmatpush1.bf16.msra.mxu0 %v3300_v21  ;;  %4932 = vmatpush1.bf16.msra.mxu1 %v3302_v24  ;;  %v3349_v21 = vunpack.c.l.s8.bf16 %v1341_v10  ;;  %v3351_v24 = vunpack.c.l.s8.bf16 %v1343_v12 }
 0x401   : > { %4277 = vmatprep.subr.bf16.mxu0 %v3309_v25  ;;  %4933 = vmatprep.subr.bf16.mxu1 %v3311_v44  ;;  %v1340_v25 = vld [vmem:[%s7801_s18 + $0x1ec0] sm:$0xff]  ;;  %v1342_v44 = vld [vmem:[%s7801_s18 + $0x1ed0] sm:$0xff] }
 0x402   : > { %4307 = vmatprep.mubr.bf16.mxu0 %v8541_v43  ;;  %4963 = vmatprep.mubr.bf16.mxu1 %v8541_v43  ;;  %v3348_v55 = vunpack.c.l.s8.bf16 %v1340_v25  ;;  %v3350_v30 = vunpack.c.l.s8.bf16 %v1342_v44  ;;  %v3356_v35 = vunpack.c.h.s8.bf16 %v1340_v25  ;;  %v3358_v37 = vunpack.c.h.s8.bf16 %v1342_v44 }
 0x404   : > { %4278 = vmatpush1.bf16.msra.mxu0 %v3308_v49  ;;  %4934 = vmatpush1.bf16.msra.mxu1 %v3310_v3  ;;  %v3357_v49 = vunpack.c.h.s8.bf16 %v1341_v10  ;;  %v3359_v3 = vunpack.c.h.s8.bf16 %v1343_v12 }
 0x405   : > { %4279 = vmatprep.subr.bf16.mxu0 %v3317_v26  ;;  %4935 = vmatprep.subr.bf16.mxu1 %v3319_v33  ;;  %v1349_v26 = vld [vmem:[%s7801_s18 + $0x1f08] sm:$0xff]  ;;  %v1351_v33 = vld [vmem:[%s7801_s18 + $0x1f18] sm:$0xff] }
 0x408   : > { %4280 = vmatpush1.bf16.msra.mxu0 %v3316_v40  ;;  %4936 = vmatpush1.bf16.msra.mxu1 %v3318_v41  ;;  %v3365_v40 = vunpack.c.l.s8.bf16 %v1349_v26  ;;  %v3367_v41 = vunpack.c.l.s8.bf16 %v1351_v33 }
 0x409   : > { %4281 = vmatprep.subr.bf16.mxu0 %v3325_v42  ;;  %4937 = vmatprep.subr.bf16.mxu1 %v3327_v45  ;;  %v1348_v42 = vld [vmem:[%s7801_s18 + $0x1f00] sm:$0xff]  ;;  %v1350_v45 = vld [vmem:[%s7801_s18 + $0x1f10] sm:$0xff] }
 0x40a   : > { %v3364_v52 = vunpack.c.l.s8.bf16 %v1348_v42  ;;  %v3366_v51 = vunpack.c.l.s8.bf16 %v1350_v45  ;;  %v3372_v0 = vunpack.c.h.s8.bf16 %v1348_v42  ;;  %v3374_v1 = vunpack.c.h.s8.bf16 %v1350_v45 }
 0x40c   : > { %4282 = vmatpush1.bf16.msra.mxu0 %v3324_v54  ;;  %4938 = vmatpush1.bf16.msra.mxu1 %v3326_v56  ;;  %v3373_v54 = vunpack.c.h.s8.bf16 %v1349_v26  ;;  %v3375_v56 = vunpack.c.h.s8.bf16 %v1351_v33 }
 0x40d   : > { %4283 = vmatprep.subr.bf16.mxu0 %v3333_v57  ;;  %4939 = vmatprep.subr.bf16.mxu1 %v3335_v63  ;;  %v1357_v57 = vld [vmem:[%s7801_s18 + $0x1f48] sm:$0xff]  ;;  %v1359_v63 = vld [vmem:[%s7801_s18 + $0x1f58] sm:$0xff] }
 0x410   : > { %4284 = vmatpush1.bf16.msra.mxu0 %v3332_v2  ;;  %4940 = vmatpush1.bf16.msra.mxu1 %v3334_v8  ;;  %v3381_v2 = vunpack.c.l.s8.bf16 %v1357_v57  ;;  %v3383_v8 = vunpack.c.l.s8.bf16 %v1359_v63 }
 0x411   : > { %4285 = vmatprep.subr.bf16.mxu0 %v3341_v9  ;;  %4941 = vmatprep.subr.bf16.mxu1 %v3343_v28  ;;  %v1356_v9 = vld [vmem:[%s7801_s18 + $0x1f40] sm:$0xff]  ;;  %v1358_v28 = vld [vmem:[%s7801_s18 + $0x1f50] sm:$0xff] }
 0x412   : > { %v3380_v10 = vunpack.c.l.s8.bf16 %v1356_v9  ;;  %v3382_v12 = vunpack.c.l.s8.bf16 %v1358_v28  ;;  %v3388_v25 = vunpack.c.h.s8.bf16 %v1356_v9  ;;  %v3390_v44 = vunpack.c.h.s8.bf16 %v1358_v28 }
 0x414   : > { %4286 = vmatpush1.bf16.msra.mxu0 %v3340_v13  ;;  %4942 = vmatpush1.bf16.msra.mxu1 %v3342_v16  ;;  %v3389_v13 = vunpack.c.h.s8.bf16 %v1357_v57  ;;  %v3391_v16 = vunpack.c.h.s8.bf16 %v1359_v63 }
 0x415   : > { %4287 = vmatprep.subr.bf16.mxu0 %v3349_v21  ;;  %4943 = vmatprep.subr.bf16.mxu1 %v3351_v24  ;;  %v1365_v21 = vld [vmem:[%s7801_s18 + $0x1f88] sm:$0xff]  ;;  %v1367_v24 = vld [vmem:[%s7801_s18 + $0x1f98] sm:$0xff] }
 0x418   : > { %4288 = vmatpush1.bf16.msra.mxu0 %v3348_v55  ;;  %4944 = vmatpush1.bf16.msra.mxu1 %v3350_v30  ;;  %v3397_v55 = vunpack.c.l.s8.bf16 %v1365_v21  ;;  %v3399_v30 = vunpack.c.l.s8.bf16 %v1367_v24 }
 0x419   : > { %4289 = vmatprep.subr.bf16.mxu0 %v3357_v49  ;;  %4945 = vmatprep.subr.bf16.mxu1 %v3359_v3  ;;  %v1364_v49 = vld [vmem:[%s7801_s18 + $0x1f80] sm:$0xff]  ;;  %v1366_v3 = vld [vmem:[%s7801_s18 + $0x1f90] sm:$0xff] }
 0x41a   : > { %v3396_v26 = vunpack.c.l.s8.bf16 %v1364_v49  ;;  %v3398_v33 = vunpack.c.l.s8.bf16 %v1366_v3  ;;  %v3404_v42 = vunpack.c.h.s8.bf16 %v1364_v49  ;;  %v3406_v45 = vunpack.c.h.s8.bf16 %v1366_v3  ;;  %v371_v49 = vld [vmem:[%s7801_s18 + $0x78] sm:$0xff] }
 0x41c   : > { %4290 = vmatpush1.bf16.msra.mxu0 %v3356_v35  ;;  %4946 = vmatpush1.bf16.msra.mxu1 %v3358_v37  ;;  %v3405_v35 = vunpack.c.h.s8.bf16 %v1365_v21  ;;  %v3407_v37 = vunpack.c.h.s8.bf16 %v1367_v24  ;;  %v8579_v21 = vcombine.high %v8535_v19, %v8535_v19 }
 0x41d   : > { %4291 = vmatprep.subr.bf16.mxu0 %v3365_v40  ;;  %4947 = vmatprep.subr.bf16.mxu1 %v3367_v41  ;;  %v1373_v40 = vld [vmem:[%s7801_s18 + $0x1fc8] sm:$0xff]  ;;  %v1375_v41 = vld [vmem:[%s7801_s18 + $0x1fd8] sm:$0xff] }
 0x420   : > { %4292 = vmatpush1.bf16.msra.mxu0 %v3364_v52  ;;  %4948 = vmatpush1.bf16.msra.mxu1 %v3366_v51  ;;  %v3413_v52 = vunpack.c.l.s8.bf16 %v1373_v40  ;;  %v3415_v51 = vunpack.c.l.s8.bf16 %v1375_v41 }
 0x421   : > { %4293 = vmatprep.subr.bf16.mxu0 %v3373_v54  ;;  %4949 = vmatprep.subr.bf16.mxu1 %v3375_v56  ;;  %v1372_v54 = vld [vmem:[%s7801_s18 + $0x1fc0] sm:$0xff]  ;;  %v1374_v56 = vld [vmem:[%s7801_s18 + $0x1fd0] sm:$0xff] }
 0x422   : > { %v3412_v57 = vunpack.c.l.s8.bf16 %v1372_v54  ;;  %v3414_v63 = vunpack.c.l.s8.bf16 %v1374_v56  ;;  %v3420_v9 = vunpack.c.h.s8.bf16 %v1372_v54  ;;  %v3422_v28 = vunpack.c.h.s8.bf16 %v1374_v56  ;;  %v379_v54 = vld [vmem:[%s7801_s18 + $0xb8] sm:$0xff] }
 0x424   : > { %4294 = vmatpush1.bf16.msra.mxu0 %v3372_v0  ;;  %4950 = vmatpush1.bf16.msra.mxu1 %v3374_v1  ;;  %v3421_v0 = vunpack.c.h.s8.bf16 %v1373_v40  ;;  %v3423_v1 = vunpack.c.h.s8.bf16 %v1375_v41  ;;  %v370_v40 = vld [vmem:[%s7801_s18 + $0x70] sm:$0xff] }
 0x425   : > { %4295 = vmatprep.subr.bf16.mxu0 %v3381_v2  ;;  %4951 = vmatprep.subr.bf16.mxu1 %v3383_v8  ;;  %v361_v2 = vld [vmem:[%s7801_s18 + $0x28] sm:$0xff]  ;;  %v363_v8 = vld [vmem:[%s7801_s18 + $0x38] sm:$0xff] }
 0x428   : > { %4296 = vmatpush1.bf16.msra.mxu0 %v3380_v10  ;;  %4952 = vmatpush1.bf16.msra.mxu1 %v3382_v12  ;;  %v1385_v10 = vunpack.c.l.s8.bf16 %v361_v2  ;;  %v1387_v12 = vunpack.c.l.s8.bf16 %v363_v8 }
 0x429   : > { %4297 = vmatprep.subr.bf16.mxu0 %v3389_v13  ;;  %4953 = vmatprep.subr.bf16.mxu1 %v3391_v16  ;;  %v360_v13 = vld [vmem:[%s7801_s18 + $0x20] sm:$0xff]  ;;  %v362_v16 = vld [vmem:[%s7801_s18 + $0x30] sm:$0xff] }
 0x42a   : > { %v1384_v24 = vunpack.c.l.s8.bf16 %v360_v13  ;;  %v1392_v3 = vunpack.c.h.s8.bf16 %v360_v13 }
 0x42c   : > { %4298 = vmatpush1.bf16.msra.mxu0 %v3388_v25  ;;  %4954 = vmatpush1.bf16.msra.mxu1 %v3390_v44  ;;  %v1386_v25 = vunpack.c.l.s8.bf16 %v362_v16  ;;  %v1393_v44 = vunpack.c.h.s8.bf16 %v361_v2 }
 0x42d   : > { %4299 = vmatprep.subr.bf16.mxu0 %v3397_v55  ;;  %4955 = vmatprep.subr.bf16.mxu1 %v3399_v30  ;;  %v1395_v55 = vunpack.c.h.s8.bf16 %v363_v8  ;;  %v369_v30 = vld [vmem:[%s7801_s18 + $0x68] sm:$0xff] }
 0x430   : > { %4300 = vmatpush1.bf16.msra.mxu0 %v3396_v26  ;;  %4956 = vmatpush1.bf16.msra.mxu1 %v3398_v33  ;;  %v1394_v26 = vunpack.c.h.s8.bf16 %v362_v16  ;;  %v1401_v33 = vunpack.c.l.s8.bf16 %v369_v30 }
 0x431   : > { %4301 = vmatprep.subr.bf16.mxu0 %v3405_v35  ;;  %4957 = vmatprep.subr.bf16.mxu1 %v3407_v37  ;;  %v1403_v35 = vunpack.c.l.s8.bf16 %v371_v49  ;;  %v368_v37 = vld [vmem:[%s7801_s18 + $0x60] sm:$0xff] }
 0x432   : > { %v1400_v41 = vunpack.c.l.s8.bf16 %v368_v37  ;;  %v1408_v56 = vunpack.c.h.s8.bf16 %v368_v37 }
 0x434   : > { %4302 = vmatpush1.bf16.msra.mxu0 %v3404_v42  ;;  %4958 = vmatpush1.bf16.msra.mxu1 %v3406_v45  ;;  %v1402_v42 = vunpack.c.l.s8.bf16 %v370_v40  ;;  %v1409_v45 = vunpack.c.h.s8.bf16 %v369_v30 }
 0x435   : > { %4303 = vmatprep.subr.bf16.mxu0 %v3413_v52  ;;  %4959 = vmatprep.subr.bf16.mxu1 %v3415_v51  ;;  %v1411_v52 = vunpack.c.h.s8.bf16 %v371_v49  ;;  %v377_v51 = vld [vmem:[%s7801_s18 + $0xa8] sm:$0xff] }
 0x438   : > { %4304 = vmatpush1.bf16.msra.mxu0 %v3412_v57  ;;  %4960 = vmatpush1.bf16.msra.mxu1 %v3414_v63  ;;  %v1410_v57 = vunpack.c.h.s8.bf16 %v370_v40  ;;  %v1419_v63 = vunpack.c.l.s8.bf16 %v379_v54 }
 0x439   : > { %4305 = vmatprep.subr.bf16.mxu0 %v3421_v0  ;;  %4961 = vmatprep.subr.bf16.mxu1 %v3423_v1  ;;  %v376_v0 = vld [vmem:[%s7801_s18 + $0xa0] sm:$0xff]  ;;  %v378_v1 = vld [vmem:[%s7801_s18 + $0xb0] sm:$0xff] }
 0x43a   : > { %v1416_v2 = vunpack.c.l.s8.bf16 %v376_v0  ;;  %v1418_v8 = vunpack.c.l.s8.bf16 %v378_v1  ;;  %v1424_v13 = vunpack.c.h.s8.bf16 %v376_v0  ;;  %v1426_v16 = vunpack.c.h.s8.bf16 %v378_v1 }
 0x43c   : > { %4306 = vmatpush1.bf16.msra.mxu0 %v3420_v9  ;;  %4962 = vmatpush1.bf16.msra.mxu1 %v3422_v28  ;;  %v1425_v9 = vunpack.c.h.s8.bf16 %v377_v51  ;;  %v1427_v28 = vunpack.c.h.s8.bf16 %v379_v54 }
 0x43d   : > { %4972 = vmatprep.subr.bf16.mxu0 %v1385_v10  ;;  %5628 = vmatprep.subr.bf16.mxu1 %v1387_v12  ;;  %v385_v10 = vld [vmem:[%s7801_s18 + $0xe8] sm:$0xff]  ;;  %v387_v12 = vld [vmem:[%s7801_s18 + $0xf8] sm:$0xff] }
 0x43f   : > { %4308 = vmatmul.mubr.bf16.vlgmr.msra.gmra.mrb[0].mxu0 %v8579_v21  ;;  %4964 = vmatmul.mubr.bf16.vlgmr.msra.gmra.mrb[0].mxu1 %v8579_v21 }
 0x440   : > { %4973 = vmatpush1.bf16.msra.mxu0 %v1384_v24  ;;  %5629 = vmatpush1.bf16.msra.mxu1 %v1386_v25  ;;  %v1433_v24 = vunpack.c.l.s8.bf16 %v385_v10  ;;  %v1435_v25 = vunpack.c.l.s8.bf16 %v387_v12 }
 0x441   : > { %4974 = vmatprep.subr.bf16.mxu0 %v1393_v44  ;;  %5630 = vmatprep.subr.bf16.mxu1 %v1395_v55  ;;  %v384_v44 = vld [vmem:[%s7801_s18 + $0xe0] sm:$0xff]  ;;  %v386_v55 = vld [vmem:[%s7801_s18 + $0xf0] sm:$0xff] }
 0x442   : > { %5004 = vmatprep.mubr.bf16.mxu0 %v7847_v58  ;;  %5660 = vmatprep.mubr.bf16.mxu1 %v7847_v58  ;;  %v1417_v58 = vunpack.c.l.s8.bf16 %v377_v51  ;;  %v1432_v30 = vunpack.c.l.s8.bf16 %v384_v44  ;;  %v1434_v49 = vunpack.c.l.s8.bf16 %v386_v55  ;;  %v1440_v37 = vunpack.c.h.s8.bf16 %v384_v44 }
 0x443   : > { %v1442_v40 = vunpack.c.h.s8.bf16 %v386_v55 }
 0x444   : > { %4975 = vmatpush1.bf16.msra.mxu0 %v1392_v3  ;;  %5631 = vmatpush1.bf16.msra.mxu1 %v1394_v26  ;;  %v1441_v3 = vunpack.c.h.s8.bf16 %v385_v10  ;;  %v1443_v26 = vunpack.c.h.s8.bf16 %v387_v12 }
 0x445   : > { %4976 = vmatprep.subr.bf16.mxu0 %v1401_v33  ;;  %5632 = vmatprep.subr.bf16.mxu1 %v1403_v35  ;;  %v393_v33 = vld [vmem:[%s7801_s18 + $0x128] sm:$0xff]  ;;  %v395_v35 = vld [vmem:[%s7801_s18 + $0x138] sm:$0xff] }
 0x448   : > { %4977 = vmatpush1.bf16.msra.mxu0 %v1400_v41  ;;  %5633 = vmatpush1.bf16.msra.mxu1 %v1402_v42  ;;  %v1449_v41 = vunpack.c.l.s8.bf16 %v393_v33  ;;  %v1451_v42 = vunpack.c.l.s8.bf16 %v395_v35 }
 0x449   : > { %4978 = vmatprep.subr.bf16.mxu0 %v1409_v45  ;;  %5634 = vmatprep.subr.bf16.mxu1 %v1411_v52  ;;  %v392_v45 = vld [vmem:[%s7801_s18 + $0x120] sm:$0xff]  ;;  %v394_v52 = vld [vmem:[%s7801_s18 + $0x130] sm:$0xff] }
 0x44a   : > { %v1448_v51 = vunpack.c.l.s8.bf16 %v392_v45  ;;  %v1450_v54 = vunpack.c.l.s8.bf16 %v394_v52  ;;  %v1456_v0 = vunpack.c.h.s8.bf16 %v392_v45  ;;  %v1458_v1 = vunpack.c.h.s8.bf16 %v394_v52 }
 0x44c   : > { %4979 = vmatpush1.bf16.msra.mxu0 %v1408_v56  ;;  %5635 = vmatpush1.bf16.msra.mxu1 %v1410_v57  ;;  %v1457_v56 = vunpack.c.h.s8.bf16 %v393_v33  ;;  %v1459_v57 = vunpack.c.h.s8.bf16 %v395_v35 }
 0x44d   : > { %4980 = vmatprep.subr.bf16.mxu0 %v1417_v58  ;;  %5636 = vmatprep.subr.bf16.mxu1 %v1419_v63  ;;  %v401_v58 = vld [vmem:[%s7801_s18 + $0x168] sm:$0xff]  ;;  %v403_v63 = vld [vmem:[%s7801_s18 + $0x178] sm:$0xff] }
 0x450   : > { %4981 = vmatpush1.bf16.msra.mxu0 %v1416_v2  ;;  %5637 = vmatpush1.bf16.msra.mxu1 %v1418_v8  ;;  %v1465_v2 = vunpack.c.l.s8.bf16 %v401_v58  ;;  %v1467_v8 = vunpack.c.l.s8.bf16 %v403_v63 }
 0x451   : > { %4982 = vmatprep.subr.bf16.mxu0 %v1425_v9  ;;  %5638 = vmatprep.subr.bf16.mxu1 %v1427_v28  ;;  %v400_v9 = vld [vmem:[%s7801_s18 + $0x160] sm:$0xff]  ;;  %v402_v28 = vld [vmem:[%s7801_s18 + $0x170] sm:$0xff] }
 0x452   : > { %v1464_v10 = vunpack.c.l.s8.bf16 %v400_v9  ;;  %v1466_v12 = vunpack.c.l.s8.bf16 %v402_v28  ;;  %v1472_v44 = vunpack.c.h.s8.bf16 %v400_v9  ;;  %v1474_v55 = vunpack.c.h.s8.bf16 %v402_v28 }
 0x454   : > { %4983 = vmatpush1.bf16.msra.mxu0 %v1424_v13  ;;  %5639 = vmatpush1.bf16.msra.mxu1 %v1426_v16  ;;  %v1473_v13 = vunpack.c.h.s8.bf16 %v401_v58  ;;  %v1475_v16 = vunpack.c.h.s8.bf16 %v403_v63 }
 0x455   : > { %4984 = vmatprep.subr.bf16.mxu0 %v1433_v24  ;;  %5640 = vmatprep.subr.bf16.mxu1 %v1435_v25  ;;  %v409_v24 = vld [vmem:[%s7801_s18 + $0x1a8] sm:$0xff]  ;;  %v411_v25 = vld [vmem:[%s7801_s18 + $0x1b8] sm:$0xff] }
 0x458   : > { %4985 = vmatpush1.bf16.msra.mxu0 %v1432_v30  ;;  %5641 = vmatpush1.bf16.msra.mxu1 %v1434_v49  ;;  %v1481_v30 = vunpack.c.l.s8.bf16 %v409_v24  ;;  %v1483_v49 = vunpack.c.l.s8.bf16 %v411_v25 }
 0x459   : > { %4986 = vmatprep.subr.bf16.mxu0 %v1441_v3  ;;  %5642 = vmatprep.subr.bf16.mxu1 %v1443_v26  ;;  %v408_v3 = vld [vmem:[%s7801_s18 + $0x1a0] sm:$0xff]  ;;  %v410_v26 = vld [vmem:[%s7801_s18 + $0x1b0] sm:$0xff] }
 0x45a   : > { %v1480_v33 = vunpack.c.l.s8.bf16 %v408_v3  ;;  %v1482_v35 = vunpack.c.l.s8.bf16 %v410_v26  ;;  %v1488_v45 = vunpack.c.h.s8.bf16 %v408_v3  ;;  %v1490_v52 = vunpack.c.h.s8.bf16 %v410_v26 }
 0x45c   : > { %4987 = vmatpush1.bf16.msra.mxu0 %v1440_v37  ;;  %5643 = vmatpush1.bf16.msra.mxu1 %v1442_v40  ;;  %v1489_v37 = vunpack.c.h.s8.bf16 %v409_v24  ;;  %v1491_v40 = vunpack.c.h.s8.bf16 %v411_v25 }
 0x45d   : > { %4988 = vmatprep.subr.bf16.mxu0 %v1449_v41  ;;  %5644 = vmatprep.subr.bf16.mxu1 %v1451_v42  ;;  %v417_v41 = vld [vmem:[%s7801_s18 + $0x1e8] sm:$0xff]  ;;  %v419_v42 = vld [vmem:[%s7801_s18 + $0x1f8] sm:$0xff] }
 0x460   : > { %4989 = vmatpush1.bf16.msra.mxu0 %v1448_v51  ;;  %5645 = vmatpush1.bf16.msra.mxu1 %v1450_v54  ;;  %v1497_v51 = vunpack.c.l.s8.bf16 %v417_v41  ;;  %v1499_v54 = vunpack.c.l.s8.bf16 %v419_v42 }
 0x461   : > { %4990 = vmatprep.subr.bf16.mxu0 %v1457_v56  ;;  %5646 = vmatprep.subr.bf16.mxu1 %v1459_v57  ;;  %v416_v56 = vld [vmem:[%s7801_s18 + $0x1e0] sm:$0xff]  ;;  %v418_v57 = vld [vmem:[%s7801_s18 + $0x1f0] sm:$0xff] }
 0x462   : > { %v1496_v58 = vunpack.c.l.s8.bf16 %v416_v56  ;;  %v1498_v63 = vunpack.c.l.s8.bf16 %v418_v57  ;;  %v1504_v9 = vunpack.c.h.s8.bf16 %v416_v56  ;;  %v1506_v28 = vunpack.c.h.s8.bf16 %v418_v57 }
 0x464   : > { %4991 = vmatpush1.bf16.msra.mxu0 %v1456_v0  ;;  %5647 = vmatpush1.bf16.msra.mxu1 %v1458_v1  ;;  %v1505_v0 = vunpack.c.h.s8.bf16 %v417_v41  ;;  %v1507_v1 = vunpack.c.h.s8.bf16 %v419_v42 }
 0x465   : > { %4992 = vmatprep.subr.bf16.mxu0 %v1465_v2  ;;  %5648 = vmatprep.subr.bf16.mxu1 %v1467_v8  ;;  %v425_v2 = vld [vmem:[%s7801_s18 + $0x228] sm:$0xff]  ;;  %v427_v8 = vld [vmem:[%s7801_s18 + $0x238] sm:$0xff] }
 0x468   : > { %4993 = vmatpush1.bf16.msra.mxu0 %v1464_v10  ;;  %5649 = vmatpush1.bf16.msra.mxu1 %v1466_v12  ;;  %v1513_v10 = vunpack.c.l.s8.bf16 %v425_v2  ;;  %v1515_v12 = vunpack.c.l.s8.bf16 %v427_v8 }
 0x469   : > { %4994 = vmatprep.subr.bf16.mxu0 %v1473_v13  ;;  %5650 = vmatprep.subr.bf16.mxu1 %v1475_v16  ;;  %v424_v13 = vld [vmem:[%s7801_s18 + $0x220] sm:$0xff]  ;;  %v426_v16 = vld [vmem:[%s7801_s18 + $0x230] sm:$0xff] }
 0x46a   : > { %v1512_v24 = vunpack.c.l.s8.bf16 %v424_v13  ;;  %v1514_v25 = vunpack.c.l.s8.bf16 %v426_v16  ;;  %v1520_v3 = vunpack.c.h.s8.bf16 %v424_v13  ;;  %v1522_v26 = vunpack.c.h.s8.bf16 %v426_v16 }
 0x46c   : > { %4995 = vmatpush1.bf16.msra.mxu0 %v1472_v44  ;;  %5651 = vmatpush1.bf16.msra.mxu1 %v1474_v55  ;;  %v1521_v44 = vunpack.c.h.s8.bf16 %v425_v2  ;;  %v1523_v55 = vunpack.c.h.s8.bf16 %v427_v8 }
 0x46d   : > { %4996 = vmatprep.subr.bf16.mxu0 %v1481_v30  ;;  %5652 = vmatprep.subr.bf16.mxu1 %v1483_v49  ;;  %v433_v30 = vld [vmem:[%s7801_s18 + $0x268] sm:$0xff]  ;;  %v435_v49 = vld [vmem:[%s7801_s18 + $0x278] sm:$0xff] }
 0x46e   : > { %v1537_v42 = vunpack.c.h.s8.bf16 %v433_v30 }
 0x470   : > { %4997 = vmatpush1.bf16.msra.mxu0 %v1480_v33  ;;  %5653 = vmatpush1.bf16.msra.mxu1 %v1482_v35  ;;  %v1529_v33 = vunpack.c.l.s8.bf16 %v433_v30  ;;  %v1531_v35 = vunpack.c.l.s8.bf16 %v435_v49 }
 0x471   : > { %4998 = vmatprep.subr.bf16.mxu0 %v1489_v37  ;;  %5654 = vmatprep.subr.bf16.mxu1 %v1491_v40  ;;  %v432_v37 = vld [vmem:[%s7801_s18 + $0x260] sm:$0xff]  ;;  %v434_v40 = vld [vmem:[%s7801_s18 + $0x270] sm:$0xff] }
 0x472   : > { %v1528_v41 = vunpack.c.l.s8.bf16 %v432_v37  ;;  %v1538_v56 = vunpack.c.h.s8.bf16 %v434_v40 }
 0x474   : > { %4999 = vmatpush1.bf16.msra.mxu0 %v1488_v45  ;;  %5655 = vmatpush1.bf16.msra.mxu1 %v1490_v52  ;;  %v1539_v45 = vunpack.c.h.s8.bf16 %v435_v49  ;;  %v441_v52 = vld [vmem:[%s7801_s18 + $0x2a8] sm:$0xff] }
 0x475   : > { %5000 = vmatprep.subr.bf16.mxu0 %v1497_v51  ;;  %5656 = vmatprep.subr.bf16.mxu1 %v1499_v54  ;;  %v443_v51 = vld [vmem:[%s7801_s18 + $0x2b8] sm:$0xff]  ;;  %v1536_v54 = vunpack.c.h.s8.bf16 %v432_v37  ;;  %v1553_v2 = vunpack.c.h.s8.bf16 %v441_v52 }
 0x476   : > { %v1547_v57 = vunpack.c.l.s8.bf16 %v443_v51  ;;  %v1555_v8 = vunpack.c.h.s8.bf16 %v443_v51 }
 0x478   : > { %5001 = vmatpush1.bf16.msra.mxu0 %v1496_v58  ;;  %5657 = vmatpush1.bf16.msra.mxu1 %v1498_v63  ;;  %v440_v58 = vld [vmem:[%s7801_s18 + $0x2a0] sm:$0xff]  ;;  %v442_v63 = vld [vmem:[%s7801_s18 + $0x2b0] sm:$0xff] }
 0x479   : > { %5002 = vmatprep.subr.bf16.mxu0 %v1505_v0  ;;  %5658 = vmatprep.subr.bf16.mxu1 %v1507_v1  ;;  %v1544_v0 = vunpack.c.l.s8.bf16 %v440_v58  ;;  %v1546_v1 = vunpack.c.l.s8.bf16 %v442_v63 }
 0x47c   : > { %5003 = vmatpush1.bf16.msra.mxu0 %v1504_v9  ;;  %5659 = vmatpush1.bf16.msra.mxu1 %v1506_v28  ;;  %v449_v9 = vld [vmem:[%s7801_s18 + $0x2e8] sm:$0xff]  ;;  %v451_v28 = vld [vmem:[%s7801_s18 + $0x2f8] sm:$0xff] }
 0x47d   : > { %5013 = vmatprep.subr.bf16.mxu0 %v1513_v10  ;;  %5669 = vmatprep.subr.bf16.mxu1 %v1515_v12  ;;  %v1552_v10 = vunpack.c.h.s8.bf16 %v440_v58  ;;  %v1554_v12 = vunpack.c.h.s8.bf16 %v442_v63  ;;  %v1561_v13 = vunpack.c.l.s8.bf16 %v449_v9  ;;  %v1563_v16 = vunpack.c.l.s8.bf16 %v451_v28 }
 0x47e   : > { %v1569_v30 = vunpack.c.h.s8.bf16 %v449_v9  ;;  %v1571_v49 = vunpack.c.h.s8.bf16 %v451_v28 }
 0x47f   : > { %5005 = vmatmul.mubr.bf16.vlgmr.msra.gmra.mrb[4].mxu0 %v7871_v53  ;;  %5661 = vmatmul.mubr.bf16.vlgmr.msra.gmra.mrb[4].mxu1 %v7871_v53  ;;  %v1530_v53 = vunpack.c.l.s8.bf16 %v434_v40 }
 0x480   : > { %5014 = vmatpush1.bf16.msra.mxu0 %v1512_v24  ;;  %5670 = vmatpush1.bf16.msra.mxu1 %v1514_v25  ;;  %v448_v24 = vld [vmem:[%s7801_s18 + $0x2e0] sm:$0xff]  ;;  %v450_v25 = vld [vmem:[%s7801_s18 + $0x2f0] sm:$0xff] }
 0x481   : > { %5015 = vmatprep.subr.bf16.mxu0 %v1521_v44  ;;  %5671 = vmatprep.subr.bf16.mxu1 %v1523_v55  ;;  %v1560_v44 = vunpack.c.l.s8.bf16 %v448_v24  ;;  %v1562_v55 = vunpack.c.l.s8.bf16 %v450_v25 }
 0x482   : > { %5045 = vmatprep.mubr.bf16.mxu0 %v7877_v61  ;;  %5701 = vmatprep.mubr.bf16.mxu1 %v7877_v61  ;;  %v1545_v61 = vunpack.c.l.s8.bf16 %v441_v52 }
 0x484   : > { %5016 = vmatpush1.bf16.msra.mxu0 %v1520_v3  ;;  %5672 = vmatpush1.bf16.msra.mxu1 %v1522_v26  ;;  %v457_v3 = vld [vmem:[%s7801_s18 + $0x328] sm:$0xff]  ;;  %v459_v26 = vld [vmem:[%s7801_s18 + $0x338] sm:$0xff] }
 0x485   : > { %5017 = vmatprep.subr.bf16.mxu0 %v1529_v33  ;;  %5673 = vmatprep.subr.bf16.mxu1 %v1531_v35  ;;  %v1568_v33 = vunpack.c.h.s8.bf16 %v448_v24  ;;  %v1570_v35 = vunpack.c.h.s8.bf16 %v450_v25  ;;  %v1577_v37 = vunpack.c.l.s8.bf16 %v457_v3  ;;  %v1579_v40 = vunpack.c.l.s8.bf16 %v459_v26 }
 0x486   : > { %v1585_v52 = vunpack.c.h.s8.bf16 %v457_v3  ;;  %v1587_v51 = vunpack.c.h.s8.bf16 %v459_v26 }
 0x488   : > { %5018 = vmatpush1.bf16.msra.mxu0 %v1528_v41  ;;  %5674 = vmatpush1.bf16.msra.mxu1 %v1530_v53  ;;  %v456_v41 = vld [vmem:[%s7801_s18 + $0x320] sm:$0xff]  ;;  %v458_v53 = vld [vmem:[%s7801_s18 + $0x330] sm:$0xff] }
 0x489   : > { %5019 = vmatprep.subr.bf16.mxu0 %v1537_v42  ;;  %5675 = vmatprep.subr.bf16.mxu1 %v1539_v45  ;;  %v1576_v42 = vunpack.c.l.s8.bf16 %v456_v41  ;;  %v1578_v45 = vunpack.c.l.s8.bf16 %v458_v53 }
 0x48c   : > { %5020 = vmatpush1.bf16.msra.mxu0 %v1536_v54  ;;  %5676 = vmatpush1.bf16.msra.mxu1 %v1538_v56  ;;  %v465_v54 = vld [vmem:[%s7801_s18 + $0x368] sm:$0xff]  ;;  %v467_v56 = vld [vmem:[%s7801_s18 + $0x378] sm:$0xff] }
 0x48d   : > { %5021 = vmatprep.subr.bf16.mxu0 %v1545_v61  ;;  %5677 = vmatprep.subr.bf16.mxu1 %v1547_v57  ;;  %v1584_v61 = vunpack.c.h.s8.bf16 %v456_v41  ;;  %v1586_v57 = vunpack.c.h.s8.bf16 %v458_v53  ;;  %v1593_v58 = vunpack.c.l.s8.bf16 %v465_v54  ;;  %v1595_v63 = vunpack.c.l.s8.bf16 %v467_v56 }
 0x48e   : > { %v1601_v9 = vunpack.c.h.s8.bf16 %v465_v54  ;;  %v1603_v28 = vunpack.c.h.s8.bf16 %v467_v56 }
 0x490   : > { %5022 = vmatpush1.bf16.msra.mxu0 %v1544_v0  ;;  %5678 = vmatpush1.bf16.msra.mxu1 %v1546_v1  ;;  %v464_v0 = vld [vmem:[%s7801_s18 + $0x360] sm:$0xff]  ;;  %v466_v1 = vld [vmem:[%s7801_s18 + $0x370] sm:$0xff] }
 0x491   : > { %5023 = vmatprep.subr.bf16.mxu0 %v1553_v2  ;;  %5679 = vmatprep.subr.bf16.mxu1 %v1555_v8  ;;  %v1592_v2 = vunpack.c.l.s8.bf16 %v464_v0  ;;  %v1594_v8 = vunpack.c.l.s8.bf16 %v466_v1 }
 0x494   : > { %5024 = vmatpush1.bf16.msra.mxu0 %v1552_v10  ;;  %5680 = vmatpush1.bf16.msra.mxu1 %v1554_v12  ;;  %v473_v10 = vld [vmem:[%s7801_s18 + $0x3a8] sm:$0xff]  ;;  %v475_v12 = vld [vmem:[%s7801_s18 + $0x3b8] sm:$0xff] }
 0x495   : > { %5025 = vmatprep.subr.bf16.mxu0 %v1561_v13  ;;  %5681 = vmatprep.subr.bf16.mxu1 %v1563_v16  ;;  %v1600_v13 = vunpack.c.h.s8.bf16 %v464_v0  ;;  %v1602_v16 = vunpack.c.h.s8.bf16 %v466_v1  ;;  %v1609_v24 = vunpack.c.l.s8.bf16 %v473_v10  ;;  %v1611_v25 = vunpack.c.l.s8.bf16 %v475_v12 }
 0x496   : > { %v1617_v3 = vunpack.c.h.s8.bf16 %v473_v10  ;;  %v1619_v26 = vunpack.c.h.s8.bf16 %v475_v12 }
 0x498   : > { %5026 = vmatpush1.bf16.msra.mxu0 %v1560_v44  ;;  %5682 = vmatpush1.bf16.msra.mxu1 %v1562_v55  ;;  %v472_v44 = vld [vmem:[%s7801_s18 + $0x3a0] sm:$0xff]  ;;  %v474_v55 = vld [vmem:[%s7801_s18 + $0x3b0] sm:$0xff] }
 0x499   : > { %5027 = vmatprep.subr.bf16.mxu0 %v1569_v30  ;;  %5683 = vmatprep.subr.bf16.mxu1 %v1571_v49  ;;  %v1608_v30 = vunpack.c.l.s8.bf16 %v472_v44  ;;  %v1610_v49 = vunpack.c.l.s8.bf16 %v474_v55 }
 0x49c   : > { %5028 = vmatpush1.bf16.msra.mxu0 %v1568_v33  ;;  %5684 = vmatpush1.bf16.msra.mxu1 %v1570_v35  ;;  %v481_v33 = vld [vmem:[%s7801_s18 + $0x3e8] sm:$0xff]  ;;  %v483_v35 = vld [vmem:[%s7801_s18 + $0x3f8] sm:$0xff] }
 0x49d   : > { %5029 = vmatprep.subr.bf16.mxu0 %v1577_v37  ;;  %5685 = vmatprep.subr.bf16.mxu1 %v1579_v40  ;;  %v1616_v37 = vunpack.c.h.s8.bf16 %v472_v44  ;;  %v1618_v40 = vunpack.c.h.s8.bf16 %v474_v55  ;;  %v1625_v41 = vunpack.c.l.s8.bf16 %v481_v33  ;;  %v1627_v53 = vunpack.c.l.s8.bf16 %v483_v35 }
 0x49e   : > { %v1633_v54 = vunpack.c.h.s8.bf16 %v481_v33  ;;  %v1635_v56 = vunpack.c.h.s8.bf16 %v483_v35  ;;  %v505_v35 = vld [vmem:[%s7801_s18 + $0x4a8] sm:$0xff] }
 0x4a0   : > { %5030 = vmatpush1.bf16.msra.mxu0 %v1576_v42  ;;  %5686 = vmatpush1.bf16.msra.mxu1 %v1578_v45  ;;  %v480_v42 = vld [vmem:[%s7801_s18 + $0x3e0] sm:$0xff]  ;;  %v482_v45 = vld [vmem:[%s7801_s18 + $0x3f0] sm:$0xff] }
 0x4a1   : > { %5031 = vmatprep.subr.bf16.mxu0 %v1585_v52  ;;  %5687 = vmatprep.subr.bf16.mxu1 %v1587_v51  ;;  %v1624_v52 = vunpack.c.l.s8.bf16 %v480_v42  ;;  %v1626_v51 = vunpack.c.l.s8.bf16 %v482_v45 }
 0x4a4   : > { %5032 = vmatpush1.bf16.msra.mxu0 %v1584_v61  ;;  %5688 = vmatpush1.bf16.msra.mxu1 %v1586_v57  ;;  %v489_v61 = vld [vmem:[%s7801_s18 + $0x428] sm:$0xff]  ;;  %v491_v57 = vld [vmem:[%s7801_s18 + $0x438] sm:$0xff] }
 0x4a5   : > { %5033 = vmatprep.subr.bf16.mxu0 %v1593_v58  ;;  %5689 = vmatprep.subr.bf16.mxu1 %v1595_v63  ;;  %v1632_v58 = vunpack.c.h.s8.bf16 %v480_v42  ;;  %v1634_v63 = vunpack.c.h.s8.bf16 %v482_v45  ;;  %v1641_v0 = vunpack.c.l.s8.bf16 %v489_v61  ;;  %v1643_v1 = vunpack.c.l.s8.bf16 %v491_v57  ;;  %v504_v42 = vld [vmem:[%s7801_s18 + $0x4a0] sm:$0xff]  ;;  %v506_v45 = vld [vmem:[%s7801_s18 + $0x4b0] sm:$0xff] }
 0x4a6   : > { %v1649_v10 = vunpack.c.h.s8.bf16 %v489_v61  ;;  %v1651_v12 = vunpack.c.h.s8.bf16 %v491_v57  ;;  %v513_v61 = vld [vmem:[%s7801_s18 + $0x4e8] sm:$0xff]  ;;  %v515_v57 = vld [vmem:[%s7801_s18 + $0x4f8] sm:$0xff] }
 0x4a8   : > { %5034 = vmatpush1.bf16.msra.mxu0 %v1592_v2  ;;  %5690 = vmatpush1.bf16.msra.mxu1 %v1594_v8  ;;  %v488_v2 = vld [vmem:[%s7801_s18 + $0x420] sm:$0xff]  ;;  %v490_v8 = vld [vmem:[%s7801_s18 + $0x430] sm:$0xff] }
 0x4a9   : > { %5035 = vmatprep.subr.bf16.mxu0 %v1601_v9  ;;  %5691 = vmatprep.subr.bf16.mxu1 %v1603_v28  ;;  %v1640_v9 = vunpack.c.l.s8.bf16 %v488_v2  ;;  %v1642_v28 = vunpack.c.l.s8.bf16 %v490_v8 }
 0x4ac   : > { %5036 = vmatpush1.bf16.msra.mxu0 %v1600_v13  ;;  %5692 = vmatpush1.bf16.msra.mxu1 %v1602_v16  ;;  %v497_v13 = vld [vmem:[%s7801_s18 + $0x468] sm:$0xff]  ;;  %v499_v16 = vld [vmem:[%s7801_s18 + $0x478] sm:$0xff] }
 0x4ad   : > { %5037 = vmatprep.subr.bf16.mxu0 %v1609_v24  ;;  %5693 = vmatprep.subr.bf16.mxu1 %v1611_v25  ;;  %v1648_v24 = vunpack.c.h.s8.bf16 %v488_v2  ;;  %v1650_v25 = vunpack.c.h.s8.bf16 %v490_v8  ;;  %v1657_v44 = vunpack.c.l.s8.bf16 %v497_v13  ;;  %v1659_v55 = vunpack.c.l.s8.bf16 %v499_v16  ;;  %v512_v2 = vld [vmem:[%s7801_s18 + $0x4e0] sm:$0xff]  ;;  %v514_v8 = vld [vmem:[%s7801_s18 + $0x4f0] sm:$0xff] }
 0x4ae   : > { %v1667_v33 = vunpack.c.h.s8.bf16 %v499_v16  ;;  %v523_v16 = vld [vmem:[%s7801_s18 + $0x538] sm:$0xff] }
 0x4b0   : > { %5038 = vmatpush1.bf16.msra.mxu0 %v1608_v30  ;;  %5694 = vmatpush1.bf16.msra.mxu1 %v1610_v49  ;;  %v496_v30 = vld [vmem:[%s7801_s18 + $0x460] sm:$0xff]  ;;  %v498_v49 = vld [vmem:[%s7801_s18 + $0x470] sm:$0xff] }
 0x4b1   : > { %5039 = vmatprep.subr.bf16.mxu0 %v1617_v3  ;;  %5695 = vmatprep.subr.bf16.mxu1 %v1619_v26  ;;  %v1656_v3 = vunpack.c.l.s8.bf16 %v496_v30  ;;  %v1665_v26 = vunpack.c.h.s8.bf16 %v497_v13  ;;  %v521_v13 = vld [vmem:[%s7801_s18 + $0x528] sm:$0xff] }
 0x4b4   : > { %5040 = vmatpush1.bf16.msra.mxu0 %v1616_v37  ;;  %5696 = vmatpush1.bf16.msra.mxu1 %v1618_v40  ;;  %v507_v37 = vld [vmem:[%s7801_s18 + $0x4b8] sm:$0xff]  ;;  %v1664_v40 = vunpack.c.h.s8.bf16 %v496_v30  ;;  %v520_v30 = vld [vmem:[%s7801_s18 + $0x520] sm:$0xff] }
 0x4b5   : > { %5041 = vmatprep.subr.bf16.mxu0 %v1625_v41  ;;  %5697 = vmatprep.subr.bf16.mxu1 %v1627_v53  ;;  %v1666_v41 = vunpack.c.h.s8.bf16 %v498_v49  ;;  %v1675_v53 = vunpack.c.l.s8.bf16 %v507_v37 }
 0x4b8   : > { %5042 = vmatpush1.bf16.msra.mxu0 %v1624_v52  ;;  %5698 = vmatpush1.bf16.msra.mxu1 %v1626_v51  ;;  %v1672_v52 = vunpack.c.l.s8.bf16 %v504_v42  ;;  %v1674_v51 = vunpack.c.l.s8.bf16 %v506_v45 }
 0x4b9   : > { %5043 = vmatprep.subr.bf16.mxu0 %v1633_v54  ;;  %5699 = vmatprep.subr.bf16.mxu1 %v1635_v56  ;;  %v1681_v54 = vunpack.c.h.s8.bf16 %v505_v35  ;;  %v1683_v56 = vunpack.c.h.s8.bf16 %v507_v37  ;;  %v531_v37 = vld [vmem:[%s7801_s18 + $0x578] sm:$0xff] }
 0x4bc   : > { %5044 = vmatpush1.bf16.msra.mxu0 %v1632_v58  ;;  %5700 = vmatpush1.bf16.msra.mxu1 %v1634_v63  ;;  %v1680_v58 = vunpack.c.h.s8.bf16 %v504_v42  ;;  %v1682_v63 = vunpack.c.h.s8.bf16 %v506_v45  ;;  %v528_v42 = vld [vmem:[%s7801_s18 + $0x560] sm:$0xff]  ;;  %v530_v45 = vld [vmem:[%s7801_s18 + $0x570] sm:$0xff] }
 0x4bd   : > { %5054 = vmatprep.subr.bf16.mxu0 %v1641_v0  ;;  %5710 = vmatprep.subr.bf16.mxu1 %v1643_v1  ;;  %v1689_v0 = vunpack.c.l.s8.bf16 %v513_v61  ;;  %v1691_v1 = vunpack.c.l.s8.bf16 %v515_v57 }
 0x4bf   : > { %5046 = vmatmul.mubr.bf16.vlgmr.msra.gmra.mrb[4].mxu0 %v7922_v31  ;;  %5702 = vmatmul.mubr.bf16.vlgmr.msra.gmra.mrb[4].mxu1 %v7922_v31  ;;  %v1658_v31 = vunpack.c.l.s8.bf16 %v498_v49  ;;  %v522_v49 = vld [vmem:[%s7801_s18 + $0x530] sm:$0xff] }
 0x4c0   : > { %5055 = vmatpush1.bf16.msra.mxu0 %v1640_v9  ;;  %5711 = vmatpush1.bf16.msra.mxu1 %v1642_v28  ;;  %v1688_v9 = vunpack.c.l.s8.bf16 %v512_v2  ;;  %v1690_v28 = vunpack.c.l.s8.bf16 %v514_v8 }
 0x4c1   : > { %5056 = vmatprep.subr.bf16.mxu0 %v1649_v10  ;;  %5712 = vmatprep.subr.bf16.mxu1 %v1651_v12  ;;  %v1697_v10 = vunpack.c.h.s8.bf16 %v513_v61  ;;  %v1699_v12 = vunpack.c.h.s8.bf16 %v515_v57  ;;  %v537_v61 = vld [vmem:[%s7801_s18 + $0x5a8] sm:$0xff]  ;;  %v539_v57 = vld [vmem:[%s7801_s18 + $0x5b8] sm:$0xff] }
 0x4c2   : > { %5086 = vmatprep.mubr.bf16.mxu0 %v7927_v39  ;;  %5742 = vmatprep.mubr.bf16.mxu1 %v7927_v39  ;;  %v1673_v39 = vunpack.c.l.s8.bf16 %v505_v35  ;;  %v529_v35 = vld [vmem:[%s7801_s18 + $0x568] sm:$0xff] }
 0x4c4   : > { %5057 = vmatpush1.bf16.msra.mxu0 %v1648_v24  ;;  %5713 = vmatpush1.bf16.msra.mxu1 %v1650_v25  ;;  %v1696_v24 = vunpack.c.h.s8.bf16 %v512_v2  ;;  %v1698_v25 = vunpack.c.h.s8.bf16 %v514_v8  ;;  %v536_v2 = vld [vmem:[%s7801_s18 + $0x5a0] sm:$0xff]  ;;  %v538_v8 = vld [vmem:[%s7801_s18 + $0x5b0] sm:$0xff] }
 0x4c5   : > { %5058 = vmatprep.subr.bf16.mxu0 %v1657_v44  ;;  %5714 = vmatprep.subr.bf16.mxu1 %v1659_v55  ;;  %v1705_v44 = vunpack.c.l.s8.bf16 %v521_v13  ;;  %v1707_v55 = vunpack.c.l.s8.bf16 %v523_v16 }
 0x4c8   : > { %5059 = vmatpush1.bf16.msra.mxu0 %v1656_v3  ;;  %5715 = vmatpush1.bf16.msra.mxu1 %v1658_v31  ;;  %v1704_v3 = vunpack.c.l.s8.bf16 %v520_v30  ;;  %v1706_v31 = vunpack.c.l.s8.bf16 %v522_v49 }
 0x4c9   : > { %5060 = vmatprep.subr.bf16.mxu0 %v1665_v26  ;;  %5716 = vmatprep.subr.bf16.mxu1 %v1667_v33  ;;  %v1713_v26 = vunpack.c.h.s8.bf16 %v521_v13  ;;  %v1715_v33 = vunpack.c.h.s8.bf16 %v523_v16  ;;  %v545_v13 = vld [vmem:[%s7801_s18 + $0x5e8] sm:$0xff]  ;;  %v547_v16 = vld [vmem:[%s7801_s18 + $0x5f8] sm:$0xff] }
 0x4cc   : > { %5061 = vmatpush1.bf16.msra.mxu0 %v1664_v40  ;;  %5717 = vmatpush1.bf16.msra.mxu1 %v1666_v41  ;;  %v1712_v40 = vunpack.c.h.s8.bf16 %v520_v30  ;;  %v1714_v41 = vunpack.c.h.s8.bf16 %v522_v49  ;;  %v544_v30 = vld [vmem:[%s7801_s18 + $0x5e0] sm:$0xff]  ;;  %v546_v49 = vld [vmem:[%s7801_s18 + $0x5f0] sm:$0xff] }
 0x4cd   : > { %5062 = vmatprep.subr.bf16.mxu0 %v1673_v39  ;;  %5718 = vmatprep.subr.bf16.mxu1 %v1675_v53  ;;  %v1721_v39 = vunpack.c.l.s8.bf16 %v529_v35  ;;  %v1723_v53 = vunpack.c.l.s8.bf16 %v531_v37 }
 0x4d0   : > { %5063 = vmatpush1.bf16.msra.mxu0 %v1672_v52  ;;  %5719 = vmatpush1.bf16.msra.mxu1 %v1674_v51  ;;  %v1720_v52 = vunpack.c.l.s8.bf16 %v528_v42  ;;  %v1722_v51 = vunpack.c.l.s8.bf16 %v530_v45 }
 0x4d1   : > { %5064 = vmatprep.subr.bf16.mxu0 %v1681_v54  ;;  %5720 = vmatprep.subr.bf16.mxu1 %v1683_v56  ;;  %v1729_v54 = vunpack.c.h.s8.bf16 %v529_v35  ;;  %v1731_v56 = vunpack.c.h.s8.bf16 %v531_v37  ;;  %v553_v35 = vld [vmem:[%s7801_s18 + $0x628] sm:$0xff]  ;;  %v555_v37 = vld [vmem:[%s7801_s18 + $0x638] sm:$0xff] }
 0x4d4   : > { %5065 = vmatpush1.bf16.msra.mxu0 %v1680_v58  ;;  %5721 = vmatpush1.bf16.msra.mxu1 %v1682_v63  ;;  %v1728_v58 = vunpack.c.h.s8.bf16 %v528_v42  ;;  %v1730_v63 = vunpack.c.h.s8.bf16 %v530_v45  ;;  %v552_v42 = vld [vmem:[%s7801_s18 + $0x620] sm:$0xff]  ;;  %v554_v45 = vld [vmem:[%s7801_s18 + $0x630] sm:$0xff] }
 0x4d5   : > { %5066 = vmatprep.subr.bf16.mxu0 %v1689_v0  ;;  %5722 = vmatprep.subr.bf16.mxu1 %v1691_v1  ;;  %v1737_v0 = vunpack.c.l.s8.bf16 %v537_v61  ;;  %v1739_v1 = vunpack.c.l.s8.bf16 %v539_v57 }
 0x4d8   : > { %5067 = vmatpush1.bf16.msra.mxu0 %v1688_v9  ;;  %5723 = vmatpush1.bf16.msra.mxu1 %v1690_v28  ;;  %v1736_v9 = vunpack.c.l.s8.bf16 %v536_v2  ;;  %v1738_v28 = vunpack.c.l.s8.bf16 %v538_v8 }
 0x4d9   : > { %5068 = vmatprep.subr.bf16.mxu0 %v1697_v10  ;;  %5724 = vmatprep.subr.bf16.mxu1 %v1699_v12  ;;  %v1745_v10 = vunpack.c.h.s8.bf16 %v537_v61  ;;  %v1747_v12 = vunpack.c.h.s8.bf16 %v539_v57  ;;  %v561_v61 = vld [vmem:[%s7801_s18 + $0x668] sm:$0xff]  ;;  %v563_v57 = vld [vmem:[%s7801_s18 + $0x678] sm:$0xff] }
 0x4dc   : > { %5069 = vmatpush1.bf16.msra.mxu0 %v1696_v24  ;;  %5725 = vmatpush1.bf16.msra.mxu1 %v1698_v25  ;;  %v1744_v24 = vunpack.c.h.s8.bf16 %v536_v2  ;;  %v1746_v25 = vunpack.c.h.s8.bf16 %v538_v8  ;;  %v560_v2 = vld [vmem:[%s7801_s18 + $0x660] sm:$0xff]  ;;  %v562_v8 = vld [vmem:[%s7801_s18 + $0x670] sm:$0xff] }
 0x4dd   : > { %5070 = vmatprep.subr.bf16.mxu0 %v1705_v44  ;;  %5726 = vmatprep.subr.bf16.mxu1 %v1707_v55  ;;  %v1753_v44 = vunpack.c.l.s8.bf16 %v545_v13  ;;  %v1755_v55 = vunpack.c.l.s8.bf16 %v547_v16 }
 0x4e0   : > { %5071 = vmatpush1.bf16.msra.mxu0 %v1704_v3  ;;  %5727 = vmatpush1.bf16.msra.mxu1 %v1706_v31  ;;  %v1752_v3 = vunpack.c.l.s8.bf16 %v544_v30  ;;  %v1754_v31 = vunpack.c.l.s8.bf16 %v546_v49 }
 0x4e1   : > { %5072 = vmatprep.subr.bf16.mxu0 %v1713_v26  ;;  %5728 = vmatprep.subr.bf16.mxu1 %v1715_v33  ;;  %v1761_v26 = vunpack.c.h.s8.bf16 %v545_v13  ;;  %v1763_v33 = vunpack.c.h.s8.bf16 %v547_v16  ;;  %v571_v13 = vld [vmem:[%s7801_s18 + $0x6b8] sm:$0xff]  ;;  %v1792_v16 = vunpack.c.h.s8.bf16 %v560_v2 }
 0x4e4   : > { %5073 = vmatpush1.bf16.msra.mxu0 %v1712_v40  ;;  %5729 = vmatpush1.bf16.msra.mxu1 %v1714_v41  ;;  %v1760_v40 = vunpack.c.h.s8.bf16 %v544_v30  ;;  %v1762_v41 = vunpack.c.h.s8.bf16 %v546_v49  ;;  %v7673_v30 = vmov 1983009808  }
 0x4e5   : > { %5074 = vmatprep.subr.bf16.mxu0 %v1721_v39  ;;  %5730 = vmatprep.subr.bf16.mxu1 %v1723_v53  ;;  %v1769_v39 = vunpack.c.l.s8.bf16 %v553_v35  ;;  %v1771_v53 = vunpack.c.l.s8.bf16 %v555_v37  ;;  %v6295_v49 = vunpack.c.l.s4 %v7673_v30 }
 0x4e8   : > { %5075 = vmatpush1.bf16.msra.mxu0 %v1720_v52  ;;  %5731 = vmatpush1.bf16.msra.mxu1 %v1722_v51  ;;  %v1768_v52 = vunpack.c.l.s8.bf16 %v552_v42  ;;  %v1770_v51 = vunpack.c.l.s8.bf16 %v554_v45 }
 0x4e9   : > { %5076 = vmatprep.subr.bf16.mxu0 %v1729_v54  ;;  %5732 = vmatprep.subr.bf16.mxu1 %v1731_v56  ;;  %v1777_v54 = vunpack.c.h.s8.bf16 %v553_v35  ;;  %v1779_v56 = vunpack.c.h.s8.bf16 %v555_v37  ;;  %v6296_v35 = vunpack.c.0.s8 %v6295_v49  ;;  %v577_v37 = vld [vmem:[%s7801_s18 + $0x6e8] sm:$0xff] }
 0x4ec   : > { %5077 = vmatpush1.bf16.msra.mxu0 %v1728_v58  ;;  %5733 = vmatpush1.bf16.msra.mxu1 %v1730_v63  ;;  %v1776_v58 = vunpack.c.h.s8.bf16 %v552_v42  ;;  %v1778_v63 = vunpack.c.h.s8.bf16 %v554_v45  ;;  %v576_v45 = vld [vmem:[%s7801_s18 + $0x6e0] sm:$0xff] }
 0x4ed   : > { %5078 = vmatprep.subr.bf16.mxu0 %v1737_v0  ;;  %5734 = vmatprep.subr.bf16.mxu1 %v1739_v1  ;;  %v1785_v0 = vunpack.c.l.s8.bf16 %v561_v61  ;;  %v1787_v1 = vunpack.c.l.s8.bf16 %v563_v57 }
 0x4f0   : > { %5079 = vmatpush1.bf16.msra.mxu0 %v1736_v9  ;;  %5735 = vmatpush1.bf16.msra.mxu1 %v1738_v28  ;;  %v1784_v9 = vunpack.c.l.s8.bf16 %v560_v2  ;;  %v1793_v28 = vunpack.c.h.s8.bf16 %v561_v61  ;;  %v1816_v2 = vunpack.c.l.s8.bf16 %v576_v45 }
 0x4f1   : > { %5080 = vmatprep.subr.bf16.mxu0 %v1745_v10  ;;  %5736 = vmatprep.subr.bf16.mxu1 %v1747_v12  ;;  %v1795_v10 = vunpack.c.h.s8.bf16 %v563_v57  ;;  %v569_v12 = vld [vmem:[%s7801_s18 + $0x6a8] sm:$0xff] }
 0x4f4   : > { %5081 = vmatpush1.bf16.msra.mxu0 %v1744_v24  ;;  %5737 = vmatpush1.bf16.msra.mxu1 %v1746_v25  ;;  %v1794_v24 = vunpack.c.h.s8.bf16 %v562_v8  ;;  %v1803_v25 = vunpack.c.l.s8.bf16 %v571_v13 }
 0x4f5   : > { %5082 = vmatprep.subr.bf16.mxu0 %v1753_v44  ;;  %5738 = vmatprep.subr.bf16.mxu1 %v1755_v55  ;;  %v568_v44 = vld [vmem:[%s7801_s18 + $0x6a0] sm:$0xff]  ;;  %v570_v55 = vld [vmem:[%s7801_s18 + $0x6b0] sm:$0xff] }
 0x4f8   : > { %5083 = vmatpush1.bf16.msra.mxu0 %v1752_v3  ;;  %5739 = vmatpush1.bf16.msra.mxu1 %v1754_v31  ;;  %v1800_v3 = vunpack.c.l.s8.bf16 %v568_v44  ;;  %v1802_v31 = vunpack.c.l.s8.bf16 %v570_v55 }
 0x4f9   : > { %5084 = vmatprep.subr.bf16.mxu0 %v1761_v26  ;;  %5740 = vmatprep.subr.bf16.mxu1 %v1763_v33  ;;  %v1809_v26 = vunpack.c.h.s8.bf16 %v569_v12  ;;  %v1811_v33 = vunpack.c.h.s8.bf16 %v571_v13 }
 0x4fc   : > { %5085 = vmatpush1.bf16.msra.mxu0 %v1760_v40  ;;  %5741 = vmatpush1.bf16.msra.mxu1 %v1762_v41  ;;  %v579_v40 = vld [vmem:[%s7801_s18 + $0x6f8] sm:$0xff]  ;;  %v1808_v41 = vunpack.c.h.s8.bf16 %v568_v44  ;;  %v1824_v44 = vunpack.c.h.s8.bf16 %v576_v45 }
 0x4fd   : > { %5095 = vmatprep.subr.bf16.mxu0 %v1769_v39  ;;  %5751 = vmatprep.subr.bf16.mxu1 %v1771_v53  ;;  %v1810_v39 = vunpack.c.h.s8.bf16 %v570_v55  ;;  %v1817_v53 = vunpack.c.l.s8.bf16 %v577_v37  ;;  %v1819_v42 = vunpack.c.l.s8.bf16 %v579_v40 }
 0x4ff   : > { %5087 = vmatmul.mubr.bf16.vlgmr.msra.gmra.mrb[4].mxu0 %v7965_v15  ;;  %5743 = vmatmul.mubr.bf16.vlgmr.msra.gmra.mrb[4].mxu1 %v7965_v15  ;;  %v1786_v15 = vunpack.c.l.s8.bf16 %v562_v8 }
 0x500   : > { %5096 = vmatpush1.bf16.msra.mxu0 %v1768_v52  ;;  %5752 = vmatpush1.bf16.msra.mxu1 %v1770_v51  ;;  %v578_v52 = vld [vmem:[%s7801_s18 + $0x6f0] sm:$0xff] }
 0x501   : > { %5097 = vmatprep.subr.bf16.mxu0 %v1777_v54  ;;  %5753 = vmatprep.subr.bf16.mxu1 %v1779_v56  ;;  %v8706_v56 = vsub.s32 %v6296_v35, %v7826_v38  ;;  %v1818_v8 = vunpack.c.l.s8.bf16 %v578_v52  ;;  %v1826_v55 = vunpack.c.h.s8.bf16 %v578_v52 }
 0x502   : > { %5127 = vmatprep.mubr.bf16.mxu0 %v7971_v22  ;;  %5783 = vmatprep.mubr.bf16.mxu1 %v7971_v22  ;;  %v1801_v22 = vunpack.c.l.s8.bf16 %v569_v12 }
 0x504   : > { %5098 = vmatpush1.bf16.msra.mxu0 %v1776_v58  ;;  %5754 = vmatpush1.bf16.msra.mxu1 %v1778_v63 }
 0x505   : > { %5099 = vmatprep.subr.bf16.mxu0 %v1785_v0  ;;  %5755 = vmatprep.subr.bf16.mxu1 %v1787_v1 }
 0x508   : > { %5100 = vmatpush1.bf16.msra.mxu0 %v1784_v9  ;;  %5756 = vmatpush1.bf16.msra.mxu1 %v1786_v15 }
 0x509   : > { %5101 = vmatprep.subr.bf16.mxu0 %v1793_v28  ;;  %5757 = vmatprep.subr.bf16.mxu1 %v1795_v10  ;;  %v1825_v28 = vunpack.c.h.s8.bf16 %v577_v37  ;;  %v1827_v10 = vunpack.c.h.s8.bf16 %v579_v40 }
 0x50c   : > { %5102 = vmatpush1.bf16.msra.mxu0 %v1792_v16  ;;  %5758 = vmatpush1.bf16.msra.mxu1 %v1794_v24  ;;  %v585_v16 = vld [vmem:[%s7801_s18 + $0x728] sm:$0xff]  ;;  %v587_v24 = vld [vmem:[%s7801_s18 + $0x738] sm:$0xff] }
 0x50d   : > { %5103 = vmatprep.subr.bf16.mxu0 %v1801_v22  ;;  %5759 = vmatprep.subr.bf16.mxu1 %v1803_v25  ;;  %v350_v22 = vld [vmem:[#allocation2] sm:$0xff]  ;;  %v1833_v30 = vunpack.c.l.s8.bf16 %v585_v16  ;;  %v1835_v49 = vunpack.c.l.s8.bf16 %v587_v24  ;;  %v1841_v37 = vunpack.c.h.s8.bf16 %v585_v16  ;;  %v1843_v40 = vunpack.c.h.s8.bf16 %v587_v24 }
 0x510   : > { %5104 = vmatpush1.bf16.msra.mxu0 %v1800_v3  ;;  %5760 = vmatpush1.bf16.msra.mxu1 %v1802_v31  ;;  %v584_v3 = vld [vmem:[%s7801_s18 + $0x720] sm:$0xff]  ;;  %v586_v31 = vld [vmem:[%s7801_s18 + $0x730] sm:$0xff] }
 0x511   : > { %5105 = vmatprep.subr.bf16.mxu0 %v1809_v26  ;;  %5761 = vmatprep.subr.bf16.mxu1 %v1811_v33  ;;  %v1832_v33 = vunpack.c.l.s8.bf16 %v584_v3  ;;  %v1834_v35 = vunpack.c.l.s8.bf16 %v586_v31 }
 0x512   : > { %v4309_v51 = vpop.f32.mrb[0].mxu0  ;;  %v4965_v54 = vpop.f32.mrb[0].mxu1 }
 0x513   : > { %v4311_v61 = vpop.f32.mrb[1].mxu0  ;;  %v4967_v57 = vpop.f32.mrb[1].mxu1 }
 0x514   : > { %v6292_v58 = vcombine.low %v4309_v51, %v4311_v61  ;;  %v6293_v63 = vcombine.low %v4965_v54, %v4967_v57  ;;  %v4313_v0 = vpop.f32.mrb[2].mxu0  ;;  %v4969_v1 = vpop.f32.mrb[2].mxu1  ;;  %5106 = vmatpush1.bf16.msra.mxu0 %v1808_v41  ;;  %5762 = vmatpush1.bf16.msra.mxu1 %v1810_v39  ;;  %v593_v41 = vld [vmem:[%s7801_s18 + $0x768] sm:$0xff]  ;;  %v595_v39 = vld [vmem:[%s7801_s18 + $0x778] sm:$0xff]  ;;  %v592_v51 = vld [vmem:[%s7801_s18 + $0x760] sm:$0xff] }
 0x515   : > { %v4314_v9 = vpop.f32.mrb[3].mxu0  ;;  %v4970_v15 = vpop.f32.mrb[3].mxu1  ;;  %5107 = vmatprep.subr.bf16.mxu0 %v1817_v53  ;;  %5763 = vmatprep.subr.bf16.mxu1 %v1819_v42  ;;  %v1840_v53 = vunpack.c.h.s8.bf16 %v584_v3  ;;  %v1842_v42 = vunpack.c.h.s8.bf16 %v586_v31  ;;  %v1849_v45 = vunpack.c.l.s8.bf16 %v593_v41  ;;  %v1851_v52 = vunpack.c.l.s8.bf16 %v595_v39  ;;  %v594_v54 = vld [vmem:[%s7801_s18 + $0x770] sm:$0xff]  ;;  %v601_v0 = vld [vmem:[%s7801_s18 + $0x7a8] sm:$0xff]  ;;  %v603_v1 = vld [vmem:[%s7801_s18 + $0x7b8] sm:$0xff] }
 0x516   : > { %v6300_v12 = vrot.slane %v6292_v58, %v8706_v56  ;;  %v6307_v13 = vrot.slane %v6293_v63, %v8706_v56  ;;  %v1848_v61 = vunpack.c.l.s8.bf16 %v592_v51  ;;  %v1850_v57 = vunpack.c.l.s8.bf16 %v594_v54  ;;  %v608_v3 = vld [vmem:[%s7801_s18 + $0x7e0] sm:$0xff]  ;;  %v610_v31 = vld [vmem:[%s7801_s18 + $0x7f0] sm:$0xff] }
 0x517   : > { %v1857_v58 = vunpack.c.h.s8.bf16 %v593_v41  ;;  %v1859_v63 = vunpack.c.h.s8.bf16 %v595_v39  ;;  %v1865_v9 = vunpack.c.l.s8.bf16 %v601_v0  ;;  %v1867_v15 = vunpack.c.l.s8.bf16 %v603_v1  ;;  %v619_v41 = vld [vmem:[%s7801_s18 + $0x838] sm:$0xff] }
 0x518   : > { %v6308_v25 = vcombine.low %v6300_v12, %v6307_v13  ;;  %5108 = vmatpush1.bf16.msra.mxu0 %v1816_v2  ;;  %5764 = vmatpush1.bf16.msra.mxu1 %v1818_v8  ;;  %v1856_v2 = vunpack.c.h.s8.bf16 %v592_v51  ;;  %v1858_v8 = vunpack.c.h.s8.bf16 %v594_v54  ;;  %v1873_v16 = vunpack.c.h.s8.bf16 %v601_v0  ;;  %v618_v51 = vld [vmem:[%s7801_s18 + $0x830] sm:$0xff]  ;;  %v627_v0 = vld [vmem:[%s7801_s18 + $0x878] sm:$0xff] }
 0x519   : > { %5109 = vmatprep.subr.bf16.mxu0 %v1825_v28  ;;  %5765 = vmatprep.subr.bf16.mxu1 %v1827_v10  ;;  %v600_v28 = vld [vmem:[%s7801_s18 + $0x7a0] sm:$0xff]  ;;  %v602_v10 = vld [vmem:[%s7801_s18 + $0x7b0] sm:$0xff]  ;;  %v1875_v24 = vunpack.c.h.s8.bf16 %v603_v1  ;;  %v1888_v39 = vunpack.c.h.s8.bf16 %v608_v3 }
 0x51a   : > { %v6328_v26 = vadd.f32 %v6308_v25, %v350_v22  ;;  %v1864_v12 = vunpack.c.l.s8.bf16 %v600_v28  ;;  %v1866_v13 = vunpack.c.l.s8.bf16 %v602_v10  ;;  %v609_v22 = vld [vmem:[%s7801_s18 + $0x7e8] sm:$0xff]  ;;  %v611_v25 = vld [vmem:[%s7801_s18 + $0x7f8] sm:$0xff] }
 0x51c   : > { %6330 = vst [vmem:[#allocation2] sm:$0xff] %v6328_v26  ;;  %5110 = vmatpush1.bf16.msra.mxu0 %v1824_v44  ;;  %5766 = vmatpush1.bf16.msra.mxu1 %v1826_v55  ;;  %v1872_v44 = vunpack.c.h.s8.bf16 %v600_v28  ;;  %v1874_v55 = vunpack.c.h.s8.bf16 %v602_v10  ;;  %v1880_v26 = vunpack.c.l.s8.bf16 %v608_v3  ;;  %v626_v28 = vld [vmem:[%s7801_s18 + $0x870] sm:$0xff] }
 0x51d   : > { %5111 = vmatprep.subr.bf16.mxu0 %v1833_v30  ;;  %5767 = vmatprep.subr.bf16.mxu1 %v1835_v49  ;;  %v1881_v30 = vunpack.c.l.s8.bf16 %v609_v22  ;;  %v1883_v49 = vunpack.c.l.s8.bf16 %v611_v25 }
 0x520   : > { %5112 = vmatpush1.bf16.msra.mxu0 %v1832_v33  ;;  %5768 = vmatpush1.bf16.msra.mxu1 %v1834_v35  ;;  %v1882_v33 = vunpack.c.l.s8.bf16 %v610_v31  ;;  %v1889_v35 = vunpack.c.h.s8.bf16 %v609_v22 }
 0x521   : > { %5113 = vmatprep.subr.bf16.mxu0 %v1841_v37  ;;  %5769 = vmatprep.subr.bf16.mxu1 %v1843_v40  ;;  %v1891_v37 = vunpack.c.h.s8.bf16 %v611_v25  ;;  %v617_v40 = vld [vmem:[%s7801_s18 + $0x828] sm:$0xff]  ;;  %v1922_v25 = vunpack.c.h.s8.bf16 %v626_v28 }
 0x524   : > { %5114 = vmatpush1.bf16.msra.mxu0 %v1840_v53  ;;  %5770 = vmatpush1.bf16.msra.mxu1 %v1842_v42  ;;  %v1890_v53 = vunpack.c.h.s8.bf16 %v610_v31  ;;  %v1897_v42 = vunpack.c.l.s8.bf16 %v617_v40 }
 0x525   : > { %5115 = vmatprep.subr.bf16.mxu0 %v1849_v45  ;;  %5771 = vmatprep.subr.bf16.mxu1 %v1851_v52  ;;  %v1899_v45 = vunpack.c.l.s8.bf16 %v619_v41  ;;  %v616_v52 = vld [vmem:[%s7801_s18 + $0x820] sm:$0xff] }
 0x526   : > { %v1896_v54 = vunpack.c.l.s8.bf16 %v616_v52  ;;  %v1904_v1 = vunpack.c.h.s8.bf16 %v616_v52 }
 0x528   : > { %5116 = vmatpush1.bf16.msra.mxu0 %v1848_v61  ;;  %5772 = vmatpush1.bf16.msra.mxu1 %v1850_v57  ;;  %v1898_v61 = vunpack.c.l.s8.bf16 %v618_v51  ;;  %v1905_v57 = vunpack.c.h.s8.bf16 %v617_v40 }
 0x529   : > { %5117 = vmatprep.subr.bf16.mxu0 %v1857_v58  ;;  %5773 = vmatprep.subr.bf16.mxu1 %v1859_v63  ;;  %v1907_v58 = vunpack.c.h.s8.bf16 %v619_v41  ;;  %v625_v63 = vld [vmem:[%s7801_s18 + $0x868] sm:$0xff] }
 0x52c   : > { %5118 = vmatpush1.bf16.msra.mxu0 %v1856_v2  ;;  %5774 = vmatpush1.bf16.msra.mxu1 %v1858_v8  ;;  %v1906_v2 = vunpack.c.h.s8.bf16 %v618_v51  ;;  %v1913_v8 = vunpack.c.l.s8.bf16 %v625_v63 }
 0x52d   : > { %5119 = vmatprep.subr.bf16.mxu0 %v1865_v9  ;;  %5775 = vmatprep.subr.bf16.mxu1 %v1867_v15  ;;  %v1915_v9 = vunpack.c.l.s8.bf16 %v627_v0  ;;  %v624_v15 = vld [vmem:[%s7801_s18 + $0x860] sm:$0xff] }
 0x52e   : > { %v1912_v10 = vunpack.c.l.s8.bf16 %v624_v15  ;;  %v1920_v22 = vunpack.c.h.s8.bf16 %v624_v15 }
 0x530   : > { %5120 = vmatpush1.bf16.msra.mxu0 %v1864_v12  ;;  %5776 = vmatpush1.bf16.msra.mxu1 %v1866_v13  ;;  %v1921_v12 = vunpack.c.h.s8.bf16 %v625_v63  ;;  %v1923_v13 = vunpack.c.h.s8.bf16 %v627_v0 }
 0x531   : > { %5121 = vmatprep.subr.bf16.mxu0 %v1873_v16  ;;  %5777 = vmatprep.subr.bf16.mxu1 %v1875_v24  ;;  %v633_v16 = vld [vmem:[%s7801_s18 + $0x8a8] sm:$0xff]  ;;  %v635_v24 = vld [vmem:[%s7801_s18 + $0x8b8] sm:$0xff] }
 0x532   : > { %v1937_v31 = vunpack.c.h.s8.bf16 %v633_v16 }
 0x534   : > { %5122 = vmatpush1.bf16.msra.mxu0 %v1872_v44  ;;  %5778 = vmatpush1.bf16.msra.mxu1 %v1874_v55  ;;  %v1931_v44 = vunpack.c.l.s8.bf16 %v635_v24  ;;  %v632_v55 = vld [vmem:[%s7801_s18 + $0x8a0] sm:$0xff] }
 0x535   : > { %5123 = vmatprep.subr.bf16.mxu0 %v1881_v30  ;;  %5779 = vmatprep.subr.bf16.mxu1 %v1883_v49  ;;  %v634_v30 = vld [vmem:[%s7801_s18 + $0x8b0] sm:$0xff]  ;;  %v1928_v49 = vunpack.c.l.s8.bf16 %v632_v55 }
 0x536   : > { %v1930_v3 = vunpack.c.l.s8.bf16 %v634_v30  ;;  %v1938_v40 = vunpack.c.h.s8.bf16 %v634_v30 }
 0x538   : > { %5124 = vmatpush1.bf16.msra.mxu0 %v1880_v26  ;;  %5780 = vmatpush1.bf16.msra.mxu1 %v1882_v33  ;;  %v1939_v26 = vunpack.c.h.s8.bf16 %v635_v24  ;;  %v641_v33 = vld [vmem:[%s7801_s18 + $0x8e8] sm:$0xff] }
 0x539   : > { %5125 = vmatprep.subr.bf16.mxu0 %v1889_v35  ;;  %5781 = vmatprep.subr.bf16.mxu1 %v1891_v37  ;;  %v643_v35 = vld [vmem:[%s7801_s18 + $0x8f8] sm:$0xff]  ;;  %v1936_v37 = vunpack.c.h.s8.bf16 %v632_v55  ;;  %v1945_v41 = vunpack.c.l.s8.bf16 %v641_v33  ;;  %v1953_v51 = vunpack.c.h.s8.bf16 %v641_v33 }
 0x53c   : > { %5126 = vmatpush1.bf16.msra.mxu0 %v1888_v39  ;;  %5782 = vmatpush1.bf16.msra.mxu1 %v1890_v53  ;;  %v1947_v39 = vunpack.c.l.s8.bf16 %v643_v35  ;;  %v640_v53 = vld [vmem:[%s7801_s18 + $0x8e0] sm:$0xff] }
 0x53d   : > { %5136 = vmatprep.subr.bf16.mxu0 %v1897_v42  ;;  %5792 = vmatprep.subr.bf16.mxu1 %v1899_v45  ;;  %v642_v42 = vld [vmem:[%s7801_s18 + $0x8f0] sm:$0xff]  ;;  %v1944_v45 = vunpack.c.l.s8.bf16 %v640_v53 }
 0x53e   : > { %v1946_v52 = vunpack.c.l.s8.bf16 %v642_v42  ;;  %v1954_v63 = vunpack.c.h.s8.bf16 %v642_v42 }
 0x53f   : > { %5128 = vmatmul.mubr.bf16.vlgmr.msra.gmra.mrb[4].mxu0 %v8018_v4  ;;  %5784 = vmatmul.mubr.bf16.vlgmr.msra.gmra.mrb[4].mxu1 %v8018_v4  ;;  %v1914_v4 = vunpack.c.l.s8.bf16 %v626_v28 }
 0x540   : > { %5137 = vmatpush1.bf16.msra.mxu0 %v1896_v54  ;;  %5793 = vmatpush1.bf16.msra.mxu1 %v1898_v61  ;;  %v1955_v54 = vunpack.c.h.s8.bf16 %v643_v35  ;;  %v649_v61 = vld [vmem:[%s7801_s18 + $0x928] sm:$0xff] }
 0x541   : > { %5138 = vmatprep.subr.bf16.mxu0 %v1905_v57  ;;  %5794 = vmatprep.subr.bf16.mxu1 %v1907_v58  ;;  %v651_v57 = vld [vmem:[%s7801_s18 + $0x938] sm:$0xff]  ;;  %v1952_v58 = vunpack.c.h.s8.bf16 %v640_v53  ;;  %v1961_v0 = vunpack.c.l.s8.bf16 %v649_v61  ;;  %v1969_v28 = vunpack.c.h.s8.bf16 %v649_v61 }
 0x542   : > { %5168 = vmatprep.mubr.bf16.mxu0 %v8023_v11  ;;  %5824 = vmatprep.mubr.bf16.mxu1 %v8023_v11  ;;  %v1929_v11 = vunpack.c.l.s8.bf16 %v633_v16 }
 0x544   : > { %5139 = vmatpush1.bf16.msra.mxu0 %v1904_v1  ;;  %5795 = vmatpush1.bf16.msra.mxu1 %v1906_v2  ;;  %v1963_v1 = vunpack.c.l.s8.bf16 %v651_v57  ;;  %v648_v2 = vld [vmem:[%s7801_s18 + $0x920] sm:$0xff] }
 0x545   : > { %5140 = vmatprep.subr.bf16.mxu0 %v1913_v8  ;;  %5796 = vmatprep.subr.bf16.mxu1 %v1915_v9  ;;  %v650_v8 = vld [vmem:[%s7801_s18 + $0x930] sm:$0xff]  ;;  %v1960_v9 = vunpack.c.l.s8.bf16 %v648_v2 }
 0x546   : > { %v1962_v15 = vunpack.c.l.s8.bf16 %v650_v8  ;;  %v1970_v16 = vunpack.c.h.s8.bf16 %v650_v8 }
 0x548   : > { %5141 = vmatpush1.bf16.msra.mxu0 %v1912_v10  ;;  %5797 = vmatpush1.bf16.msra.mxu1 %v1914_v4  ;;  %v1971_v10 = vunpack.c.h.s8.bf16 %v651_v57  ;;  %v657_v4 = vld [vmem:[%s7801_s18 + $0x968] sm:$0xff] }
 0x549   : > { %5142 = vmatprep.subr.bf16.mxu0 %v1921_v12  ;;  %5798 = vmatprep.subr.bf16.mxu1 %v1923_v13  ;;  %v659_v12 = vld [vmem:[%s7801_s18 + $0x978] sm:$0xff]  ;;  %v1968_v13 = vunpack.c.h.s8.bf16 %v648_v2  ;;  %v1977_v24 = vunpack.c.l.s8.bf16 %v657_v4  ;;  %v1985_v30 = vunpack.c.h.s8.bf16 %v657_v4 }
 0x54c   : > { %5143 = vmatpush1.bf16.msra.mxu0 %v1920_v22  ;;  %5799 = vmatpush1.bf16.msra.mxu1 %v1922_v25  ;;  %v1979_v22 = vunpack.c.l.s8.bf16 %v659_v12  ;;  %v656_v25 = vld [vmem:[%s7801_s18 + $0x960] sm:$0xff] }
 0x54d   : > { %5144 = vmatprep.subr.bf16.mxu0 %v1929_v11  ;;  %5800 = vmatprep.subr.bf16.mxu1 %v1931_v44  ;;  %v658_v11 = vld [vmem:[%s7801_s18 + $0x970] sm:$0xff]  ;;  %v1976_v44 = vunpack.c.l.s8.bf16 %v656_v25 }
 0x54e   : > { %v1978_v55 = vunpack.c.l.s8.bf16 %v658_v11  ;;  %v1986_v33 = vunpack.c.h.s8.bf16 %v658_v11 }
 0x550   : > { %5145 = vmatpush1.bf16.msra.mxu0 %v1928_v49  ;;  %5801 = vmatpush1.bf16.msra.mxu1 %v1930_v3  ;;  %v1987_v49 = vunpack.c.h.s8.bf16 %v659_v12  ;;  %v665_v3 = vld [vmem:[%s7801_s18 + $0x9a8] sm:$0xff] }
 0x551   : > { %5146 = vmatprep.subr.bf16.mxu0 %v1937_v31  ;;  %5802 = vmatprep.subr.bf16.mxu1 %v1939_v26  ;;  %v667_v31 = vld [vmem:[%s7801_s18 + $0x9b8] sm:$0xff]  ;;  %v1984_v26 = vunpack.c.h.s8.bf16 %v656_v25  ;;  %v1993_v35 = vunpack.c.l.s8.bf16 %v665_v3  ;;  %v2001_v42 = vunpack.c.h.s8.bf16 %v665_v3 }
 0x554   : > { %5147 = vmatpush1.bf16.msra.mxu0 %v1936_v37  ;;  %5803 = vmatpush1.bf16.msra.mxu1 %v1938_v40  ;;  %v1995_v37 = vunpack.c.l.s8.bf16 %v667_v31  ;;  %v664_v40 = vld [vmem:[%s7801_s18 + $0x9a0] sm:$0xff] }
 0x555   : > { %5148 = vmatprep.subr.bf16.mxu0 %v1945_v41  ;;  %5804 = vmatprep.subr.bf16.mxu1 %v1947_v39  ;;  %v666_v41 = vld [vmem:[%s7801_s18 + $0x9b0] sm:$0xff]  ;;  %v1992_v39 = vunpack.c.l.s8.bf16 %v664_v40 }
 0x556   : > { %v1994_v53 = vunpack.c.l.s8.bf16 %v666_v41  ;;  %v2002_v61 = vunpack.c.h.s8.bf16 %v666_v41 }
 0x558   : > { %5149 = vmatpush1.bf16.msra.mxu0 %v1944_v45  ;;  %5805 = vmatpush1.bf16.msra.mxu1 %v1946_v52  ;;  %v2003_v45 = vunpack.c.h.s8.bf16 %v667_v31  ;;  %v673_v52 = vld [vmem:[%s7801_s18 + $0x9e8] sm:$0xff] }
 0x559   : > { %5150 = vmatprep.subr.bf16.mxu0 %v1953_v51  ;;  %5806 = vmatprep.subr.bf16.mxu1 %v1955_v54  ;;  %v675_v51 = vld [vmem:[%s7801_s18 + $0x9f8] sm:$0xff]  ;;  %v2000_v54 = vunpack.c.h.s8.bf16 %v664_v40  ;;  %v2009_v57 = vunpack.c.l.s8.bf16 %v673_v52  ;;  %v2017_v8 = vunpack.c.h.s8.bf16 %v673_v52 }
 0x55c   : > { %5151 = vmatpush1.bf16.msra.mxu0 %v1952_v58  ;;  %5807 = vmatpush1.bf16.msra.mxu1 %v1954_v63  ;;  %v2011_v58 = vunpack.c.l.s8.bf16 %v675_v51  ;;  %v672_v63 = vld [vmem:[%s7801_s18 + $0x9e0] sm:$0xff] }
 0x55d   : > { %5152 = vmatprep.subr.bf16.mxu0 %v1961_v0  ;;  %5808 = vmatprep.subr.bf16.mxu1 %v1963_v1  ;;  %v674_v0 = vld [vmem:[%s7801_s18 + $0x9f0] sm:$0xff]  ;;  %v2008_v1 = vunpack.c.l.s8.bf16 %v672_v63 }
 0x55e   : > { %v2010_v2 = vunpack.c.l.s8.bf16 %v674_v0  ;;  %v2018_v4 = vunpack.c.h.s8.bf16 %v674_v0  ;;  %v705_v0 = vld [vmem:[%s7801_s18 + $0xae8] sm:$0xff] }
 0x560   : > { %5153 = vmatpush1.bf16.msra.mxu0 %v1960_v9  ;;  %5809 = vmatpush1.bf16.msra.mxu1 %v1962_v15  ;;  %v2019_v9 = vunpack.c.h.s8.bf16 %v675_v51  ;;  %v681_v15 = vld [vmem:[%s7801_s18 + $0xa28] sm:$0xff]  ;;  %v696_v51 = vld [vmem:[%s7801_s18 + $0xaa0] sm:$0xff] }
 0x561   : > { %5154 = vmatprep.subr.bf16.mxu0 %v1969_v28  ;;  %5810 = vmatprep.subr.bf16.mxu1 %v1971_v10  ;;  %v683_v28 = vld [vmem:[%s7801_s18 + $0xa38] sm:$0xff]  ;;  %v2016_v10 = vunpack.c.h.s8.bf16 %v672_v63  ;;  %v2025_v12 = vunpack.c.l.s8.bf16 %v681_v15  ;;  %v2033_v11 = vunpack.c.h.s8.bf16 %v681_v15 }
 0x564   : > { %5155 = vmatpush1.bf16.msra.mxu0 %v1968_v13  ;;  %5811 = vmatpush1.bf16.msra.mxu1 %v1970_v16  ;;  %v2027_v13 = vunpack.c.l.s8.bf16 %v683_v28  ;;  %v680_v16 = vld [vmem:[%s7801_s18 + $0xa20] sm:$0xff] }
 0x565   : > { %5156 = vmatprep.subr.bf16.mxu0 %v1977_v24  ;;  %5812 = vmatprep.subr.bf16.mxu1 %v1979_v22  ;;  %v682_v24 = vld [vmem:[%s7801_s18 + $0xa30] sm:$0xff]  ;;  %v2024_v22 = vunpack.c.l.s8.bf16 %v680_v16 }
 0x566   : > { %v2026_v25 = vunpack.c.l.s8.bf16 %v682_v24  ;;  %v2034_v3 = vunpack.c.h.s8.bf16 %v682_v24  ;;  %v713_v24 = vld [vmem:[%s7801_s18 + $0xb28] sm:$0xff] }
 0x568   : > { %5157 = vmatpush1.bf16.msra.mxu0 %v1976_v44  ;;  %5813 = vmatpush1.bf16.msra.mxu1 %v1978_v55  ;;  %v2035_v44 = vunpack.c.h.s8.bf16 %v683_v28  ;;  %v689_v55 = vld [vmem:[%s7801_s18 + $0xa68] sm:$0xff]  ;;  %v704_v28 = vld [vmem:[%s7801_s18 + $0xae0] sm:$0xff] }
 0x569   : > { %5158 = vmatprep.subr.bf16.mxu0 %v1985_v30  ;;  %5814 = vmatprep.subr.bf16.mxu1 %v1987_v49  ;;  %v691_v30 = vld [vmem:[%s7801_s18 + $0xa78] sm:$0xff]  ;;  %v2032_v49 = vunpack.c.h.s8.bf16 %v680_v16  ;;  %v2041_v31 = vunpack.c.l.s8.bf16 %v689_v55  ;;  %v2049_v40 = vunpack.c.h.s8.bf16 %v689_v55 }
 0x56a   : > { %v2051_v41 = vunpack.c.h.s8.bf16 %v691_v30 }
 0x56c   : > { %5159 = vmatpush1.bf16.msra.mxu0 %v1984_v26  ;;  %5815 = vmatpush1.bf16.msra.mxu1 %v1986_v33  ;;  %v2043_v26 = vunpack.c.l.s8.bf16 %v691_v30  ;;  %v688_v33 = vld [vmem:[%s7801_s18 + $0xa60] sm:$0xff] }
 0x56d   : > { %5160 = vmatprep.subr.bf16.mxu0 %v1993_v35  ;;  %5816 = vmatprep.subr.bf16.mxu1 %v1995_v37  ;;  %v690_v35 = vld [vmem:[%s7801_s18 + $0xa70] sm:$0xff]  ;;  %v2040_v37 = vunpack.c.l.s8.bf16 %v688_v33  ;;  %v712_v30 = vld [vmem:[%s7801_s18 + $0xb20] sm:$0xff] }
 0x570   : > { %5161 = vmatpush1.bf16.msra.mxu0 %v1992_v39  ;;  %5817 = vmatpush1.bf16.msra.mxu1 %v1994_v53  ;;  %v697_v39 = vld [vmem:[%s7801_s18 + $0xaa8] sm:$0xff]  ;;  %v699_v53 = vld [vmem:[%s7801_s18 + $0xab8] sm:$0xff] }
 0x571   : > { %5162 = vmatprep.subr.bf16.mxu0 %v2001_v42  ;;  %5818 = vmatprep.subr.bf16.mxu1 %v2003_v45  ;;  %v2048_v42 = vunpack.c.h.s8.bf16 %v688_v33  ;;  %v2050_v45 = vunpack.c.h.s8.bf16 %v690_v35  ;;  %v2059_v52 = vunpack.c.l.s8.bf16 %v699_v53  ;;  %v2067_v63 = vunpack.c.h.s8.bf16 %v699_v53  ;;  %v720_v53 = vld [vmem:[%s7801_s18 + $0xb60] sm:$0xff] }
 0x574   : > { %5163 = vmatpush1.bf16.msra.mxu0 %v2000_v54  ;;  %5819 = vmatpush1.bf16.msra.mxu1 %v2002_v61  ;;  %v698_v54 = vld [vmem:[%s7801_s18 + $0xab0] sm:$0xff]  ;;  %v2056_v61 = vunpack.c.l.s8.bf16 %v696_v51 }
 0x575   : > { %5164 = vmatprep.subr.bf16.mxu0 %v2009_v57  ;;  %5820 = vmatprep.subr.bf16.mxu1 %v2011_v58  ;;  %v2058_v57 = vunpack.c.l.s8.bf16 %v698_v54  ;;  %v2065_v58 = vunpack.c.h.s8.bf16 %v697_v39 }
 0x578   : > { %5165 = vmatpush1.bf16.msra.mxu0 %v2008_v1  ;;  %5821 = vmatpush1.bf16.msra.mxu1 %v2010_v2  ;;  %v707_v1 = vld [vmem:[%s7801_s18 + $0xaf8] sm:$0xff]  ;;  %v2064_v2 = vunpack.c.h.s8.bf16 %v696_v51 }
 0x579   : > { %5166 = vmatprep.subr.bf16.mxu0 %v2017_v8  ;;  %5822 = vmatprep.subr.bf16.mxu1 %v2019_v9  ;;  %v2066_v8 = vunpack.c.h.s8.bf16 %v698_v54  ;;  %v2073_v9 = vunpack.c.l.s8.bf16 %v705_v0  ;;  %v2075_v15 = vunpack.c.l.s8.bf16 %v707_v1  ;;  %v2083_v16 = vunpack.c.h.s8.bf16 %v707_v1  ;;  %v729_v54 = vld [vmem:[%s7801_s18 + $0xba8] sm:$0xff]  ;;  %v728_v1 = vld [vmem:[%s7801_s18 + $0xba0] sm:$0xff] }
 0x57c   : > { %5167 = vmatpush1.bf16.msra.mxu0 %v2016_v10  ;;  %5823 = vmatpush1.bf16.msra.mxu1 %v2018_v4  ;;  %v706_v10 = vld [vmem:[%s7801_s18 + $0xaf0] sm:$0xff]  ;;  %v2072_v4 = vunpack.c.l.s8.bf16 %v704_v28 }
 0x57d   : > { %5177 = vmatprep.subr.bf16.mxu0 %v2025_v12  ;;  %5833 = vmatprep.subr.bf16.mxu1 %v2027_v13  ;;  %v2074_v12 = vunpack.c.l.s8.bf16 %v706_v10  ;;  %v2081_v13 = vunpack.c.h.s8.bf16 %v705_v0 }
 0x57f   : > { %5169 = vmatmul.mubr.bf16.vlgmr.msra.gmra.mrb[4].mxu0 %v8061_v62  ;;  %5825 = vmatmul.mubr.bf16.vlgmr.msra.gmra.mrb[4].mxu1 %v8061_v62  ;;  %v2042_v62 = vunpack.c.l.s8.bf16 %v690_v35  ;;  %v721_v35 = vld [vmem:[%s7801_s18 + $0xb68] sm:$0xff] }
 0x580   : > { %5178 = vmatpush1.bf16.msra.mxu0 %v2024_v22  ;;  %5834 = vmatpush1.bf16.msra.mxu1 %v2026_v25  ;;  %v715_v22 = vld [vmem:[%s7801_s18 + $0xb38] sm:$0xff]  ;;  %v2080_v25 = vunpack.c.h.s8.bf16 %v704_v28 }
 0x581   : > { %5179 = vmatprep.subr.bf16.mxu0 %v2033_v11  ;;  %5835 = vmatprep.subr.bf16.mxu1 %v2035_v44  ;;  %v2082_v11 = vunpack.c.h.s8.bf16 %v706_v10  ;;  %v2089_v44 = vunpack.c.l.s8.bf16 %v713_v24  ;;  %v2091_v55 = vunpack.c.l.s8.bf16 %v715_v22  ;;  %v2099_v33 = vunpack.c.h.s8.bf16 %v715_v22  ;;  %v737_v10 = vld [vmem:[%s7801_s18 + $0xbe8] sm:$0xff]  ;;  %v736_v22 = vld [vmem:[%s7801_s18 + $0xbe0] sm:$0xff] }
 0x582   : > { %5209 = vmatprep.mubr.bf16.mxu0 %v8067_v6  ;;  %5865 = vmatprep.mubr.bf16.mxu1 %v8067_v6  ;;  %v2057_v6 = vunpack.c.l.s8.bf16 %v697_v39 }
 0x584   : > { %5180 = vmatpush1.bf16.msra.mxu0 %v2032_v49  ;;  %5836 = vmatpush1.bf16.msra.mxu1 %v2034_v3  ;;  %v714_v49 = vld [vmem:[%s7801_s18 + $0xb30] sm:$0xff]  ;;  %v2088_v3 = vunpack.c.l.s8.bf16 %v712_v30 }
 0x585   : > { %5181 = vmatprep.subr.bf16.mxu0 %v2041_v31  ;;  %5837 = vmatprep.subr.bf16.mxu1 %v2043_v26  ;;  %v2090_v31 = vunpack.c.l.s8.bf16 %v714_v49  ;;  %v2097_v26 = vunpack.c.h.s8.bf16 %v713_v24 }
 0x588   : > { %5182 = vmatpush1.bf16.msra.mxu0 %v2040_v37  ;;  %5838 = vmatpush1.bf16.msra.mxu1 %v2042_v62  ;;  %v723_v37 = vld [vmem:[%s7801_s18 + $0xb78] sm:$0xff]  ;;  %v2096_v62 = vunpack.c.h.s8.bf16 %v712_v30 }
 0x589   : > { %5183 = vmatprep.subr.bf16.mxu0 %v2049_v40  ;;  %5839 = vmatprep.subr.bf16.mxu1 %v2051_v41  ;;  %v2098_v40 = vunpack.c.h.s8.bf16 %v714_v49  ;;  %v2105_v41 = vunpack.c.l.s8.bf16 %v721_v35  ;;  %v2107_v39 = vunpack.c.l.s8.bf16 %v723_v37  ;;  %v2115_v51 = vunpack.c.h.s8.bf16 %v723_v37  ;;  %v745_v49 = vld [vmem:[%s7801_s18 + $0xc28] sm:$0xff]  ;;  %v744_v37 = vld [vmem:[%s7801_s18 + $0xc20] sm:$0xff] }
 0x58c   : > { %5184 = vmatpush1.bf16.msra.mxu0 %v2048_v42  ;;  %5840 = vmatpush1.bf16.msra.mxu1 %v2050_v45  ;;  %v722_v42 = vld [vmem:[%s7801_s18 + $0xb70] sm:$0xff]  ;;  %v2104_v45 = vunpack.c.l.s8.bf16 %v720_v53 }
 0x58d   : > { %5185 = vmatprep.subr.bf16.mxu0 %v2057_v6  ;;  %5841 = vmatprep.subr.bf16.mxu1 %v2059_v52  ;;  %v2106_v6 = vunpack.c.l.s8.bf16 %v722_v42  ;;  %v2113_v52 = vunpack.c.h.s8.bf16 %v721_v35 }
 0x590   : > { %5186 = vmatpush1.bf16.msra.mxu0 %v2056_v61  ;;  %5842 = vmatpush1.bf16.msra.mxu1 %v2058_v57  ;;  %v731_v61 = vld [vmem:[%s7801_s18 + $0xbb8] sm:$0xff]  ;;  %v2112_v57 = vunpack.c.h.s8.bf16 %v720_v53 }
 0x591   : > { %5187 = vmatprep.subr.bf16.mxu0 %v2065_v58  ;;  %5843 = vmatprep.subr.bf16.mxu1 %v2067_v63  ;;  %v2114_v58 = vunpack.c.h.s8.bf16 %v722_v42  ;;  %v2121_v63 = vunpack.c.l.s8.bf16 %v729_v54  ;;  %v2123_v0 = vunpack.c.l.s8.bf16 %v731_v61  ;;  %v2131_v28 = vunpack.c.h.s8.bf16 %v731_v61  ;;  %v753_v42 = vld [vmem:[%s7801_s18 + $0xc68] sm:$0xff]  ;;  %v752_v61 = vld [vmem:[%s7801_s18 + $0xc60] sm:$0xff] }
 0x594   : > { %5188 = vmatpush1.bf16.msra.mxu0 %v2064_v2  ;;  %5844 = vmatpush1.bf16.msra.mxu1 %v2066_v8  ;;  %v730_v2 = vld [vmem:[%s7801_s18 + $0xbb0] sm:$0xff]  ;;  %v2120_v8 = vunpack.c.l.s8.bf16 %v728_v1 }
 0x595   : > { %5189 = vmatprep.subr.bf16.mxu0 %v2073_v9  ;;  %5845 = vmatprep.subr.bf16.mxu1 %v2075_v15  ;;  %v2122_v9 = vunpack.c.l.s8.bf16 %v730_v2  ;;  %v2129_v15 = vunpack.c.h.s8.bf16 %v729_v54 }
 0x598   : > { %5190 = vmatpush1.bf16.msra.mxu0 %v2072_v4  ;;  %5846 = vmatpush1.bf16.msra.mxu1 %v2074_v12  ;;  %v739_v4 = vld [vmem:[%s7801_s18 + $0xbf8] sm:$0xff]  ;;  %v2128_v12 = vunpack.c.h.s8.bf16 %v728_v1  ;;  %v761_v1 = vld [vmem:[%s7801_s18 + $0xca8] sm:$0xff] }
 0x599   : > { %5191 = vmatprep.subr.bf16.mxu0 %v2081_v13  ;;  %5847 = vmatprep.subr.bf16.mxu1 %v2083_v16  ;;  %v2130_v13 = vunpack.c.h.s8.bf16 %v730_v2  ;;  %v2137_v16 = vunpack.c.l.s8.bf16 %v737_v10  ;;  %v2139_v24 = vunpack.c.l.s8.bf16 %v739_v4  ;;  %v2147_v30 = vunpack.c.h.s8.bf16 %v739_v4  ;;  %v763_v2 = vld [vmem:[%s7801_s18 + $0xcb8] sm:$0xff] }
 0x59c   : > { %5192 = vmatpush1.bf16.msra.mxu0 %v2080_v25  ;;  %5848 = vmatpush1.bf16.msra.mxu1 %v2082_v11  ;;  %v738_v25 = vld [vmem:[%s7801_s18 + $0xbf0] sm:$0xff]  ;;  %v2136_v11 = vunpack.c.l.s8.bf16 %v736_v22 }
 0x59d   : > { %5193 = vmatprep.subr.bf16.mxu0 %v2089_v44  ;;  %5849 = vmatprep.subr.bf16.mxu1 %v2091_v55  ;;  %v2138_v44 = vunpack.c.l.s8.bf16 %v738_v25  ;;  %v2145_v55 = vunpack.c.h.s8.bf16 %v737_v10  ;;  %v762_v10 = vld [vmem:[%s7801_s18 + $0xcb0] sm:$0xff] }
 0x5a0   : > { %5194 = vmatpush1.bf16.msra.mxu0 %v2088_v3  ;;  %5850 = vmatpush1.bf16.msra.mxu1 %v2090_v31  ;;  %v747_v3 = vld [vmem:[%s7801_s18 + $0xc38] sm:$0xff]  ;;  %v2144_v31 = vunpack.c.h.s8.bf16 %v736_v22 }
 0x5a1   : > { %5195 = vmatprep.subr.bf16.mxu0 %v2097_v26  ;;  %5851 = vmatprep.subr.bf16.mxu1 %v2099_v33  ;;  %v2146_v26 = vunpack.c.h.s8.bf16 %v738_v25  ;;  %v2153_v33 = vunpack.c.l.s8.bf16 %v745_v49  ;;  %v2155_v35 = vunpack.c.l.s8.bf16 %v747_v3  ;;  %v2163_v53 = vunpack.c.h.s8.bf16 %v747_v3  ;;  %v771_v22 = vld [vmem:[%s7801_s18 + $0xcf8] sm:$0xff] }
 0x5a4   : > { %5196 = vmatpush1.bf16.msra.mxu0 %v2096_v62  ;;  %5852 = vmatpush1.bf16.msra.mxu1 %v2098_v40  ;;  %v746_v62 = vld [vmem:[%s7801_s18 + $0xc30] sm:$0xff]  ;;  %v2152_v40 = vunpack.c.l.s8.bf16 %v744_v37 }
 0x5a5   : > { %5197 = vmatprep.subr.bf16.mxu0 %v2105_v41  ;;  %5853 = vmatprep.subr.bf16.mxu1 %v2107_v39  ;;  %v2154_v41 = vunpack.c.l.s8.bf16 %v746_v62  ;;  %v2161_v39 = vunpack.c.h.s8.bf16 %v745_v49  ;;  %v770_v49 = vld [vmem:[%s7801_s18 + $0xcf0] sm:$0xff] }
 0x5a8   : > { %5198 = vmatpush1.bf16.msra.mxu0 %v2104_v45  ;;  %5854 = vmatpush1.bf16.msra.mxu1 %v2106_v6  ;;  %v755_v45 = vld [vmem:[%s7801_s18 + $0xc78] sm:$0xff]  ;;  %v2160_v6 = vunpack.c.h.s8.bf16 %v744_v37 }
 0x5a9   : > { %5199 = vmatprep.subr.bf16.mxu0 %v2113_v52  ;;  %5855 = vmatprep.subr.bf16.mxu1 %v2115_v51  ;;  %v2162_v52 = vunpack.c.h.s8.bf16 %v746_v62  ;;  %v2169_v51 = vunpack.c.l.s8.bf16 %v753_v42  ;;  %v2171_v54 = vunpack.c.l.s8.bf16 %v755_v45  ;;  %v779_v37 = vld [vmem:[%s7801_s18 + $0xd38] sm:$0xff] }
 0x5ac   : > { %5200 = vmatpush1.bf16.msra.mxu0 %v2112_v57  ;;  %5856 = vmatpush1.bf16.msra.mxu1 %v2114_v58  ;;  %v754_v57 = vld [vmem:[%s7801_s18 + $0xc70] sm:$0xff]  ;;  %v2168_v58 = vunpack.c.l.s8.bf16 %v752_v61 }
 0x5ad   : > { %5201 = vmatprep.subr.bf16.mxu0 %v2121_v63  ;;  %5857 = vmatprep.subr.bf16.mxu1 %v2123_v0  ;;  %v2177_v63 = vunpack.c.h.s8.bf16 %v753_v42  ;;  %v2179_v0 = vunpack.c.h.s8.bf16 %v755_v45  ;;  %v778_v42 = vld [vmem:[%s7801_s18 + $0xd30] sm:$0xff] }
 0x5b0   : > { %5202 = vmatpush1.bf16.msra.mxu0 %v2120_v8  ;;  %5858 = vmatpush1.bf16.msra.mxu1 %v2122_v9  ;;  %v2176_v8 = vunpack.c.h.s8.bf16 %v752_v61  ;;  %v2178_v9 = vunpack.c.h.s8.bf16 %v754_v57  ;;  %v787_v61 = vld [vmem:[%s7801_s18 + $0xd78] sm:$0xff] }
 0x5b1   : > { %5203 = vmatprep.subr.bf16.mxu0 %v2129_v15  ;;  %5859 = vmatprep.subr.bf16.mxu1 %v2131_v28  ;;  %v2187_v15 = vunpack.c.l.s8.bf16 %v763_v2  ;;  %v760_v28 = vld [vmem:[%s7801_s18 + $0xca0] sm:$0xff] }
 0x5b2   : > { %v2184_v4 = vunpack.c.l.s8.bf16 %v760_v28  ;;  %v2192_v25 = vunpack.c.h.s8.bf16 %v760_v28  ;;  %v795_v28 = vld [vmem:[%s7801_s18 + $0xdb8] sm:$0xff] }
 0x5b4   : > { %5204 = vmatpush1.bf16.msra.mxu0 %v2128_v12  ;;  %5860 = vmatpush1.bf16.msra.mxu1 %v2130_v13  ;;  %v2186_v12 = vunpack.c.l.s8.bf16 %v762_v10  ;;  %v2193_v13 = vunpack.c.h.s8.bf16 %v761_v1 }
 0x5b5   : > { %5205 = vmatprep.subr.bf16.mxu0 %v2137_v16  ;;  %5861 = vmatprep.subr.bf16.mxu1 %v2139_v24  ;;  %v2195_v16 = vunpack.c.h.s8.bf16 %v763_v2  ;;  %v769_v24 = vld [vmem:[%s7801_s18 + $0xce8] sm:$0xff] }
 0x5b8   : > { %5206 = vmatpush1.bf16.msra.mxu0 %v2136_v11  ;;  %5862 = vmatpush1.bf16.msra.mxu1 %v2138_v44  ;;  %v2194_v11 = vunpack.c.h.s8.bf16 %v762_v10  ;;  %v2201_v44 = vunpack.c.l.s8.bf16 %v769_v24 }
 0x5b9   : > { %5207 = vmatprep.subr.bf16.mxu0 %v2145_v55  ;;  %5863 = vmatprep.subr.bf16.mxu1 %v2147_v30  ;;  %v2203_v55 = vunpack.c.l.s8.bf16 %v771_v22  ;;  %v768_v30 = vld [vmem:[%s7801_s18 + $0xce0] sm:$0xff] }
 0x5ba   : > { %v2200_v3 = vunpack.c.l.s8.bf16 %v768_v30  ;;  %v2208_v62 = vunpack.c.h.s8.bf16 %v768_v30  ;;  %v803_v30 = vld [vmem:[%s7801_s18 + $0xdf8] sm:$0xff] }
 0x5bc   : > { %5208 = vmatpush1.bf16.msra.mxu0 %v2144_v31  ;;  %5864 = vmatpush1.bf16.msra.mxu1 %v2146_v26  ;;  %v2202_v31 = vunpack.c.l.s8.bf16 %v770_v49  ;;  %v2209_v26 = vunpack.c.h.s8.bf16 %v769_v24  ;;  %v794_v24 = vld [vmem:[%s7801_s18 + $0xdb0] sm:$0xff] }
 0x5bd   : > { %5218 = vmatprep.subr.bf16.mxu0 %v2153_v33  ;;  %5874 = vmatprep.subr.bf16.mxu1 %v2155_v35  ;;  %v2211_v33 = vunpack.c.h.s8.bf16 %v771_v22  ;;  %v777_v35 = vld [vmem:[%s7801_s18 + $0xd28] sm:$0xff] }
 0x5bf   : > { %5210 = vmatmul.mubr.bf16.vlgmr.msra.gmra.mrb[4].mxu0 %v8112_v59  ;;  %5866 = vmatmul.mubr.bf16.vlgmr.msra.gmra.mrb[4].mxu1 %v8112_v59  ;;  %v2170_v59 = vunpack.c.l.s8.bf16 %v754_v57 }
 0x5c0   : > { %5219 = vmatpush1.bf16.msra.mxu0 %v2152_v40  ;;  %5875 = vmatpush1.bf16.msra.mxu1 %v2154_v41  ;;  %v2210_v40 = vunpack.c.h.s8.bf16 %v770_v49  ;;  %v2217_v41 = vunpack.c.l.s8.bf16 %v777_v35 }
 0x5c1   : > { %5220 = vmatprep.subr.bf16.mxu0 %v2161_v39  ;;  %5876 = vmatprep.subr.bf16.mxu1 %v2163_v53  ;;  %v2219_v39 = vunpack.c.l.s8.bf16 %v779_v37  ;;  %v776_v53 = vld [vmem:[%s7801_s18 + $0xd20] sm:$0xff] }
 0x5c2   : > { %5250 = vmatprep.mubr.bf16.mxu0 %v8117_v5  ;;  %5906 = vmatprep.mubr.bf16.mxu1 %v8117_v5  ;;  %v2185_v5 = vunpack.c.l.s8.bf16 %v761_v1  ;;  %v2216_v45 = vunpack.c.l.s8.bf16 %v776_v53  ;;  %v2224_v57 = vunpack.c.h.s8.bf16 %v776_v53  ;;  %v786_v1 = vld [vmem:[%s7801_s18 + $0xd70] sm:$0xff]  ;;  %v811_v53 = vld [vmem:[%s7801_s18 + $0xe38] sm:$0xff] }
 0x5c4   : > { %5221 = vmatpush1.bf16.msra.mxu0 %v2160_v6  ;;  %5877 = vmatpush1.bf16.msra.mxu1 %v2162_v52  ;;  %v2218_v6 = vunpack.c.l.s8.bf16 %v778_v42  ;;  %v2225_v52 = vunpack.c.h.s8.bf16 %v777_v35  ;;  %v802_v35 = vld [vmem:[%s7801_s18 + $0xdf0] sm:$0xff] }
 0x5c5   : > { %5222 = vmatprep.subr.bf16.mxu0 %v2169_v51  ;;  %5878 = vmatprep.subr.bf16.mxu1 %v2171_v54  ;;  %v2227_v51 = vunpack.c.h.s8.bf16 %v779_v37  ;;  %v785_v54 = vld [vmem:[%s7801_s18 + $0xd68] sm:$0xff] }
 0x5c8   : > { %5223 = vmatpush1.bf16.msra.mxu0 %v2168_v58  ;;  %5879 = vmatpush1.bf16.msra.mxu1 %v2170_v59  ;;  %v2226_v58 = vunpack.c.h.s8.bf16 %v778_v42  ;;  %v2233_v59 = vunpack.c.l.s8.bf16 %v785_v54 }
 0x5c9   : > { %5224 = vmatprep.subr.bf16.mxu0 %v2177_v63  ;;  %5880 = vmatprep.subr.bf16.mxu1 %v2179_v0  ;;  %v2235_v63 = vunpack.c.l.s8.bf16 %v787_v61  ;;  %v784_v0 = vld [vmem:[%s7801_s18 + $0xd60] sm:$0xff] }
 0x5ca   : > { %v2232_v2 = vunpack.c.l.s8.bf16 %v784_v0  ;;  %v2240_v10 = vunpack.c.h.s8.bf16 %v784_v0  ;;  %v819_v0 = vld [vmem:[%s7801_s18 + $0xe78] sm:$0xff] }
 0x5cc   : > { %5225 = vmatpush1.bf16.msra.mxu0 %v2176_v8  ;;  %5881 = vmatpush1.bf16.msra.mxu1 %v2178_v9  ;;  %v2234_v8 = vunpack.c.l.s8.bf16 %v786_v1  ;;  %v2241_v9 = vunpack.c.h.s8.bf16 %v785_v54  ;;  %v810_v54 = vld [vmem:[%s7801_s18 + $0xe30] sm:$0xff] }
 0x5cd   : > { %5226 = vmatprep.subr.bf16.mxu0 %v2185_v5  ;;  %5882 = vmatprep.subr.bf16.mxu1 %v2187_v15  ;;  %v2243_v5 = vunpack.c.h.s8.bf16 %v787_v61  ;;  %v793_v15 = vld [vmem:[%s7801_s18 + $0xda8] sm:$0xff] }
 0x5d0   : > { %5227 = vmatpush1.bf16.msra.mxu0 %v2184_v4  ;;  %5883 = vmatpush1.bf16.msra.mxu1 %v2186_v12  ;;  %v2242_v4 = vunpack.c.h.s8.bf16 %v786_v1  ;;  %v2249_v12 = vunpack.c.l.s8.bf16 %v793_v15 }
 0x5d1   : > { %5228 = vmatprep.subr.bf16.mxu0 %v2193_v13  ;;  %5884 = vmatprep.subr.bf16.mxu1 %v2195_v16  ;;  %v2251_v13 = vunpack.c.l.s8.bf16 %v795_v28  ;;  %v792_v16 = vld [vmem:[%s7801_s18 + $0xda0] sm:$0xff] }
 0x5d2   : > { %v2248_v22 = vunpack.c.l.s8.bf16 %v792_v16  ;;  %v2256_v49 = vunpack.c.h.s8.bf16 %v792_v16 }
 0x5d4   : > { %5229 = vmatpush1.bf16.msra.mxu0 %v2192_v25  ;;  %5885 = vmatpush1.bf16.msra.mxu1 %v2194_v11  ;;  %v2250_v25 = vunpack.c.l.s8.bf16 %v794_v24  ;;  %v2257_v11 = vunpack.c.h.s8.bf16 %v793_v15  ;;  %v818_v15 = vld [vmem:[%s7801_s18 + $0xe70] sm:$0xff] }
 0x5d5   : > { %5230 = vmatprep.subr.bf16.mxu0 %v2201_v44  ;;  %5886 = vmatprep.subr.bf16.mxu1 %v2203_v55  ;;  %v2259_v44 = vunpack.c.h.s8.bf16 %v795_v28  ;;  %v801_v55 = vld [vmem:[%s7801_s18 + $0xde8] sm:$0xff] }
 0x5d8   : > { %5231 = vmatpush1.bf16.msra.mxu0 %v2200_v3  ;;  %5887 = vmatpush1.bf16.msra.mxu1 %v2202_v31  ;;  %v2258_v3 = vunpack.c.h.s8.bf16 %v794_v24  ;;  %v2265_v31 = vunpack.c.l.s8.bf16 %v801_v55  ;;  %v2306_v24 = vunpack.c.h.s8.bf16 %v818_v15 }
 0x5d9   : > { %5232 = vmatprep.subr.bf16.mxu0 %v2209_v26  ;;  %5888 = vmatprep.subr.bf16.mxu1 %v2211_v33  ;;  %v2267_v26 = vunpack.c.l.s8.bf16 %v803_v30  ;;  %v800_v33 = vld [vmem:[%s7801_s18 + $0xde0] sm:$0xff] }
 0x5da   : > { %v2264_v37 = vunpack.c.l.s8.bf16 %v800_v33  ;;  %v2272_v42 = vunpack.c.h.s8.bf16 %v800_v33 }
 0x5dc   : > { %5233 = vmatpush1.bf16.msra.mxu0 %v2208_v62  ;;  %5889 = vmatpush1.bf16.msra.mxu1 %v2210_v40  ;;  %v2266_v62 = vunpack.c.l.s8.bf16 %v802_v35  ;;  %v2273_v40 = vunpack.c.h.s8.bf16 %v801_v55 }
 0x5dd   : > { %5234 = vmatprep.subr.bf16.mxu0 %v2217_v41  ;;  %5890 = vmatprep.subr.bf16.mxu1 %v2219_v39  ;;  %v2275_v41 = vunpack.c.h.s8.bf16 %v803_v30  ;;  %v809_v39 = vld [vmem:[%s7801_s18 + $0xe28] sm:$0xff] }
 0x5e0   : > { %5235 = vmatpush1.bf16.msra.mxu0 %v2216_v45  ;;  %5891 = vmatpush1.bf16.msra.mxu1 %v2218_v6  ;;  %v2274_v45 = vunpack.c.h.s8.bf16 %v802_v35  ;;  %v2281_v6 = vunpack.c.l.s8.bf16 %v809_v39 }
 0x5e1   : > { %5236 = vmatprep.subr.bf16.mxu0 %v2225_v52  ;;  %5892 = vmatprep.subr.bf16.mxu1 %v2227_v51  ;;  %v2283_v52 = vunpack.c.l.s8.bf16 %v811_v53  ;;  %v808_v51 = vld [vmem:[%s7801_s18 + $0xe20] sm:$0xff] }
 0x5e2   : > { %v2280_v61 = vunpack.c.l.s8.bf16 %v808_v51  ;;  %v2288_v1 = vunpack.c.h.s8.bf16 %v808_v51 }
 0x5e4   : > { %5237 = vmatpush1.bf16.msra.mxu0 %v2224_v57  ;;  %5893 = vmatpush1.bf16.msra.mxu1 %v2226_v58  ;;  %v2282_v57 = vunpack.c.l.s8.bf16 %v810_v54  ;;  %v2289_v58 = vunpack.c.h.s8.bf16 %v809_v39 }
 0x5e5   : > { %5238 = vmatprep.subr.bf16.mxu0 %v2233_v59  ;;  %5894 = vmatprep.subr.bf16.mxu1 %v2235_v63  ;;  %v2291_v59 = vunpack.c.h.s8.bf16 %v811_v53  ;;  %v817_v63 = vld [vmem:[%s7801_s18 + $0xe68] sm:$0xff] }
 0x5e8   : > { %5239 = vmatpush1.bf16.msra.mxu0 %v2232_v2  ;;  %5895 = vmatpush1.bf16.msra.mxu1 %v2234_v8  ;;  %v2290_v2 = vunpack.c.h.s8.bf16 %v810_v54  ;;  %v2297_v8 = vunpack.c.l.s8.bf16 %v817_v63 }
 0x5e9   : > { %5240 = vmatprep.subr.bf16.mxu0 %v2241_v9  ;;  %5896 = vmatprep.subr.bf16.mxu1 %v2243_v5  ;;  %v2299_v9 = vunpack.c.l.s8.bf16 %v819_v0  ;;  %v816_v5 = vld [vmem:[%s7801_s18 + $0xe60] sm:$0xff] }
 0x5ea   : > { %v2296_v28 = vunpack.c.l.s8.bf16 %v816_v5  ;;  %v2304_v16 = vunpack.c.h.s8.bf16 %v816_v5 }
 0x5ec   : > { %5241 = vmatpush1.bf16.msra.mxu0 %v2240_v10  ;;  %5897 = vmatpush1.bf16.msra.mxu1 %v2242_v4  ;;  %v2305_v10 = vunpack.c.h.s8.bf16 %v817_v63  ;;  %v2307_v4 = vunpack.c.h.s8.bf16 %v819_v0 }
 0x5ed   : > { %5242 = vmatprep.subr.bf16.mxu0 %v2249_v12  ;;  %5898 = vmatprep.subr.bf16.mxu1 %v2251_v13  ;;  %v825_v12 = vld [vmem:[%s7801_s18 + $0xea8] sm:$0xff]  ;;  %v827_v13 = vld [vmem:[%s7801_s18 + $0xeb8] sm:$0xff] }
 0x5ee   : > { %v2321_v30 = vunpack.c.h.s8.bf16 %v825_v12 }
 0x5f0   : > { %5243 = vmatpush1.bf16.msra.mxu0 %v2248_v22  ;;  %5899 = vmatpush1.bf16.msra.mxu1 %v2250_v25  ;;  %v2315_v22 = vunpack.c.l.s8.bf16 %v827_v13  ;;  %v824_v25 = vld [vmem:[%s7801_s18 + $0xea0] sm:$0xff] }
 0x5f1   : > { %5244 = vmatprep.subr.bf16.mxu0 %v2257_v11  ;;  %5900 = vmatprep.subr.bf16.mxu1 %v2259_v44  ;;  %v826_v11 = vld [vmem:[%s7801_s18 + $0xeb0] sm:$0xff]  ;;  %v2312_v44 = vunpack.c.l.s8.bf16 %v824_v25 }
 0x5f2   : > { %v2314_v55 = vunpack.c.l.s8.bf16 %v826_v11  ;;  %v2322_v33 = vunpack.c.h.s8.bf16 %v826_v11 }
 0x5f4   : > { %5245 = vmatpush1.bf16.msra.mxu0 %v2256_v49  ;;  %5901 = vmatpush1.bf16.msra.mxu1 %v2258_v3  ;;  %v2323_v49 = vunpack.c.h.s8.bf16 %v827_v13  ;;  %v833_v3 = vld [vmem:[%s7801_s18 + $0xee8] sm:$0xff] }
 0x5f5   : > { %5246 = vmatprep.subr.bf16.mxu0 %v2265_v31  ;;  %5902 = vmatprep.subr.bf16.mxu1 %v2267_v26  ;;  %v835_v31 = vld [vmem:[%s7801_s18 + $0xef8] sm:$0xff]  ;;  %v2320_v26 = vunpack.c.h.s8.bf16 %v824_v25  ;;  %v2329_v35 = vunpack.c.l.s8.bf16 %v833_v3  ;;  %v2337_v53 = vunpack.c.h.s8.bf16 %v833_v3 }
 0x5f8   : > { %5247 = vmatpush1.bf16.msra.mxu0 %v2264_v37  ;;  %5903 = vmatpush1.bf16.msra.mxu1 %v2266_v62  ;;  %v2331_v37 = vunpack.c.l.s8.bf16 %v835_v31  ;;  %v832_v62 = vld [vmem:[%s7801_s18 + $0xee0] sm:$0xff] }
 0x5f9   : > { %5248 = vmatprep.subr.bf16.mxu0 %v2273_v40  ;;  %5904 = vmatprep.subr.bf16.mxu1 %v2275_v41  ;;  %v834_v40 = vld [vmem:[%s7801_s18 + $0xef0] sm:$0xff]  ;;  %v2328_v41 = vunpack.c.l.s8.bf16 %v832_v62 }
 0x5fa   : > { %v2330_v39 = vunpack.c.l.s8.bf16 %v834_v40  ;;  %v2338_v51 = vunpack.c.h.s8.bf16 %v834_v40 }
 0x5fc   : > { %5249 = vmatpush1.bf16.msra.mxu0 %v2272_v42  ;;  %5905 = vmatpush1.bf16.msra.mxu1 %v2274_v45  ;;  %v2339_v42 = vunpack.c.h.s8.bf16 %v835_v31  ;;  %v841_v45 = vld [vmem:[%s7801_s18 + $0xf28] sm:$0xff] }
 0x5fd   : > { %5259 = vmatprep.subr.bf16.mxu0 %v2281_v6  ;;  %5915 = vmatprep.subr.bf16.mxu1 %v2283_v52  ;;  %v843_v6 = vld [vmem:[%s7801_s18 + $0xf38] sm:$0xff]  ;;  %v2336_v52 = vunpack.c.h.s8.bf16 %v832_v62  ;;  %v2345_v54 = vunpack.c.l.s8.bf16 %v841_v45  ;;  %v2353_v0 = vunpack.c.h.s8.bf16 %v841_v45 }
 0x5ff   : > { %5251 = vmatmul.mubr.bf16.vlgmr.msra.gmra.mrb[4].mxu0 %v8155_v50  ;;  %5907 = vmatmul.mubr.bf16.vlgmr.msra.gmra.mrb[4].mxu1 %v8155_v50  ;;  %v2298_v50 = vunpack.c.l.s8.bf16 %v818_v15 }
 0x600   : > { %5260 = vmatpush1.bf16.msra.mxu0 %v2280_v61  ;;  %5916 = vmatpush1.bf16.msra.mxu1 %v2282_v57  ;;  %v2347_v61 = vunpack.c.l.s8.bf16 %v843_v6  ;;  %v840_v57 = vld [vmem:[%s7801_s18 + $0xf20] sm:$0xff] }
 0x601   : > { %5261 = vmatprep.subr.bf16.mxu0 %v2289_v58  ;;  %5917 = vmatprep.subr.bf16.mxu1 %v2291_v59  ;;  %v842_v58 = vld [vmem:[%s7801_s18 + $0xf30] sm:$0xff]  ;;  %v2344_v59 = vunpack.c.l.s8.bf16 %v840_v57 }
 0x602   : > { %5291 = vmatprep.mubr.bf16.mxu0 %v8161_v7  ;;  %5947 = vmatprep.mubr.bf16.mxu1 %v8161_v7  ;;  %v2313_v7 = vunpack.c.l.s8.bf16 %v825_v12  ;;  %v2346_v63 = vunpack.c.l.s8.bf16 %v842_v58  ;;  %v2354_v5 = vunpack.c.h.s8.bf16 %v842_v58 }
 0x604   : > { %5262 = vmatpush1.bf16.msra.mxu0 %v2288_v1  ;;  %5918 = vmatpush1.bf16.msra.mxu1 %v2290_v2  ;;  %v2355_v1 = vunpack.c.h.s8.bf16 %v843_v6  ;;  %v849_v2 = vld [vmem:[%s7801_s18 + $0xf68] sm:$0xff] }
 0x605   : > { %5263 = vmatprep.subr.bf16.mxu0 %v2297_v8  ;;  %5919 = vmatprep.subr.bf16.mxu1 %v2299_v9  ;;  %v851_v8 = vld [vmem:[%s7801_s18 + $0xf78] sm:$0xff]  ;;  %v2352_v9 = vunpack.c.h.s8.bf16 %v840_v57  ;;  %v2361_v15 = vunpack.c.l.s8.bf16 %v849_v2  ;;  %v2369_v13 = vunpack.c.h.s8.bf16 %v849_v2 }
 0x608   : > { %5264 = vmatpush1.bf16.msra.mxu0 %v2296_v28  ;;  %5920 = vmatpush1.bf16.msra.mxu1 %v2298_v50  ;;  %v2363_v28 = vunpack.c.l.s8.bf16 %v851_v8  ;;  %v848_v50 = vld [vmem:[%s7801_s18 + $0xf60] sm:$0xff] }
 0x609   : > { %5265 = vmatprep.subr.bf16.mxu0 %v2305_v10  ;;  %5921 = vmatprep.subr.bf16.mxu1 %v2307_v4  ;;  %v850_v10 = vld [vmem:[%s7801_s18 + $0xf70] sm:$0xff]  ;;  %v2360_v4 = vunpack.c.l.s8.bf16 %v848_v50 }
 0x60a   : > { %v2362_v12 = vunpack.c.l.s8.bf16 %v850_v10  ;;  %v2370_v25 = vunpack.c.h.s8.bf16 %v850_v10 }
 0x60c   : > { %5266 = vmatpush1.bf16.msra.mxu0 %v2304_v16  ;;  %5922 = vmatpush1.bf16.msra.mxu1 %v2306_v24  ;;  %v2371_v16 = vunpack.c.h.s8.bf16 %v851_v8  ;;  %v857_v24 = vld [vmem:[%s7801_s18 + $0xfa8] sm:$0xff] }
 0x60d   : > { %5267 = vmatprep.subr.bf16.mxu0 %v2313_v7  ;;  %5923 = vmatprep.subr.bf16.mxu1 %v2315_v22  ;;  %v859_v7 = vld [vmem:[%s7801_s18 + $0xfb8] sm:$0xff]  ;;  %v2368_v22 = vunpack.c.h.s8.bf16 %v848_v50  ;;  %v2377_v11 = vunpack.c.l.s8.bf16 %v857_v24  ;;  %v2385_v31 = vunpack.c.h.s8.bf16 %v857_v24 }
 0x610   : > { %5268 = vmatpush1.bf16.msra.mxu0 %v2312_v44  ;;  %5924 = vmatpush1.bf16.msra.mxu1 %v2314_v55  ;;  %v2379_v44 = vunpack.c.l.s8.bf16 %v859_v7  ;;  %v856_v55 = vld [vmem:[%s7801_s18 + $0xfa0] sm:$0xff] }
 0x611   : > { %5269 = vmatprep.subr.bf16.mxu0 %v2321_v30  ;;  %5925 = vmatprep.subr.bf16.mxu1 %v2323_v49  ;;  %v858_v30 = vld [vmem:[%s7801_s18 + $0xfb0] sm:$0xff]  ;;  %v2376_v49 = vunpack.c.l.s8.bf16 %v856_v55 }
 0x612   : > { %v2378_v3 = vunpack.c.l.s8.bf16 %v858_v30  ;;  %v2386_v62 = vunpack.c.h.s8.bf16 %v858_v30  ;;  %v888_v30 = vld [vmem:[%s7801_s18 + $0x10a0] sm:$0xff] }
 0x614   : > { %5270 = vmatpush1.bf16.msra.mxu0 %v2320_v26  ;;  %5926 = vmatpush1.bf16.msra.mxu1 %v2322_v33  ;;  %v2387_v26 = vunpack.c.h.s8.bf16 %v859_v7  ;;  %v865_v33 = vld [vmem:[%s7801_s18 + $0xfe8] sm:$0xff] }
 0x615   : > { %5271 = vmatprep.subr.bf16.mxu0 %v2329_v35  ;;  %5927 = vmatprep.subr.bf16.mxu1 %v2331_v37  ;;  %v867_v35 = vld [vmem:[%s7801_s18 + $0xff8] sm:$0xff]  ;;  %v2384_v37 = vunpack.c.h.s8.bf16 %v856_v55  ;;  %v2393_v40 = vunpack.c.l.s8.bf16 %v865_v33  ;;  %v2401_v6 = vunpack.c.h.s8.bf16 %v865_v33 }
 0x618   : > { %5272 = vmatpush1.bf16.msra.mxu0 %v2328_v41  ;;  %5928 = vmatpush1.bf16.msra.mxu1 %v2330_v39  ;;  %v2395_v41 = vunpack.c.l.s8.bf16 %v867_v35  ;;  %v864_v39 = vld [vmem:[%s7801_s18 + $0xfe0] sm:$0xff] }
 0x619   : > { %5273 = vmatprep.subr.bf16.mxu0 %v2337_v53  ;;  %5929 = vmatprep.subr.bf16.mxu1 %v2339_v42  ;;  %v866_v53 = vld [vmem:[%s7801_s18 + $0xff0] sm:$0xff]  ;;  %v2392_v42 = vunpack.c.l.s8.bf16 %v864_v39 }
 0x61a   : > { %v2394_v45 = vunpack.c.l.s8.bf16 %v866_v53  ;;  %v2402_v57 = vunpack.c.h.s8.bf16 %v866_v53  ;;  %v896_v53 = vld [vmem:[%s7801_s18 + $0x10e0] sm:$0xff] }
 0x61c   : > { %5274 = vmatpush1.bf16.msra.mxu0 %v2336_v52  ;;  %5930 = vmatpush1.bf16.msra.mxu1 %v2338_v51  ;;  %v2403_v52 = vunpack.c.h.s8.bf16 %v867_v35  ;;  %v873_v51 = vld [vmem:[%s7801_s18 + $0x1028] sm:$0xff] }
 0x61d   : > { %5275 = vmatprep.subr.bf16.mxu0 %v2345_v54  ;;  %5931 = vmatprep.subr.bf16.mxu1 %v2347_v61  ;;  %v875_v54 = vld [vmem:[%s7801_s18 + $0x1038] sm:$0xff]  ;;  %v2400_v61 = vunpack.c.h.s8.bf16 %v864_v39  ;;  %v2409_v58 = vunpack.c.l.s8.bf16 %v873_v51  ;;  %v2417_v8 = vunpack.c.h.s8.bf16 %v873_v51  ;;  %v897_v35 = vld [vmem:[%s7801_s18 + $0x10e8] sm:$0xff] }
 0x620   : > { %5276 = vmatpush1.bf16.msra.mxu0 %v2344_v59  ;;  %5932 = vmatpush1.bf16.msra.mxu1 %v2346_v63  ;;  %v2411_v59 = vunpack.c.l.s8.bf16 %v875_v54  ;;  %v872_v63 = vld [vmem:[%s7801_s18 + $0x1020] sm:$0xff] }
 0x621   : > { %5277 = vmatprep.subr.bf16.mxu0 %v2353_v0  ;;  %5933 = vmatprep.subr.bf16.mxu1 %v2355_v1  ;;  %v874_v0 = vld [vmem:[%s7801_s18 + $0x1030] sm:$0xff]  ;;  %v2408_v1 = vunpack.c.l.s8.bf16 %v872_v63 }
 0x622   : > { %v2410_v2 = vunpack.c.l.s8.bf16 %v874_v0  ;;  %v2418_v50 = vunpack.c.h.s8.bf16 %v874_v0  ;;  %v904_v0 = vld [vmem:[%s7801_s18 + $0x1120] sm:$0xff] }
 0x624   : > { %5278 = vmatpush1.bf16.msra.mxu0 %v2352_v9  ;;  %5934 = vmatpush1.bf16.msra.mxu1 %v2354_v5  ;;  %v2419_v9 = vunpack.c.h.s8.bf16 %v875_v54  ;;  %v881_v5 = vld [vmem:[%s7801_s18 + $0x1068] sm:$0xff] }
 0x625   : > { %5279 = vmatprep.subr.bf16.mxu0 %v2361_v15  ;;  %5935 = vmatprep.subr.bf16.mxu1 %v2363_v28  ;;  %v883_v15 = vld [vmem:[%s7801_s18 + $0x1078] sm:$0xff]  ;;  %v2416_v28 = vunpack.c.h.s8.bf16 %v872_v63  ;;  %v2425_v10 = vunpack.c.l.s8.bf16 %v881_v5  ;;  %v2433_v24 = vunpack.c.h.s8.bf16 %v881_v5  ;;  %v905_v54 = vld [vmem:[%s7801_s18 + $0x1128] sm:$0xff] }
 0x626   : > { %v2435_v7 = vunpack.c.h.s8.bf16 %v883_v15 }
 0x628   : > { %5280 = vmatpush1.bf16.msra.mxu0 %v2360_v4  ;;  %5936 = vmatpush1.bf16.msra.mxu1 %v2362_v12  ;;  %v2427_v4 = vunpack.c.l.s8.bf16 %v883_v15  ;;  %v880_v12 = vld [vmem:[%s7801_s18 + $0x1060] sm:$0xff]  ;;  %v913_v15 = vld [vmem:[%s7801_s18 + $0x1168] sm:$0xff] }
 0x629   : > { %5281 = vmatprep.subr.bf16.mxu0 %v2369_v13  ;;  %5937 = vmatprep.subr.bf16.mxu1 %v2371_v16  ;;  %v882_v13 = vld [vmem:[%s7801_s18 + $0x1070] sm:$0xff]  ;;  %v2424_v16 = vunpack.c.l.s8.bf16 %v880_v12 }
 0x62c   : > { %5282 = vmatpush1.bf16.msra.mxu0 %v2368_v22  ;;  %5938 = vmatpush1.bf16.msra.mxu1 %v2370_v25  ;;  %v889_v22 = vld [vmem:[%s7801_s18 + $0x10a8] sm:$0xff]  ;;  %v891_v25 = vld [vmem:[%s7801_s18 + $0x10b8] sm:$0xff] }
 0x62d   : > { %5283 = vmatprep.subr.bf16.mxu0 %v2377_v11  ;;  %5939 = vmatprep.subr.bf16.mxu1 %v2379_v44  ;;  %v2432_v11 = vunpack.c.h.s8.bf16 %v880_v12  ;;  %v2434_v44 = vunpack.c.h.s8.bf16 %v882_v13  ;;  %v2443_v55 = vunpack.c.l.s8.bf16 %v891_v25  ;;  %v2451_v33 = vunpack.c.h.s8.bf16 %v891_v25  ;;  %v921_v25 = vld [vmem:[%s7801_s18 + $0x11a8] sm:$0xff] }
 0x630   : > { %5284 = vmatpush1.bf16.msra.mxu0 %v2376_v49  ;;  %5940 = vmatpush1.bf16.msra.mxu1 %v2378_v3  ;;  %v890_v49 = vld [vmem:[%s7801_s18 + $0x10b0] sm:$0xff]  ;;  %v2440_v3 = vunpack.c.l.s8.bf16 %v888_v30 }
 0x631   : > { %5285 = vmatprep.subr.bf16.mxu0 %v2385_v31  ;;  %5941 = vmatprep.subr.bf16.mxu1 %v2387_v26  ;;  %v2442_v31 = vunpack.c.l.s8.bf16 %v890_v49  ;;  %v2449_v26 = vunpack.c.h.s8.bf16 %v889_v22 }
 0x634   : > { %5286 = vmatpush1.bf16.msra.mxu0 %v2384_v37  ;;  %5942 = vmatpush1.bf16.msra.mxu1 %v2386_v62  ;;  %v899_v37 = vld [vmem:[%s7801_s18 + $0x10f8] sm:$0xff]  ;;  %v2448_v62 = vunpack.c.h.s8.bf16 %v888_v30 }
 0x635   : > { %5287 = vmatprep.subr.bf16.mxu0 %v2393_v40  ;;  %5943 = vmatprep.subr.bf16.mxu1 %v2395_v41  ;;  %v2450_v40 = vunpack.c.h.s8.bf16 %v890_v49  ;;  %v2457_v41 = vunpack.c.l.s8.bf16 %v897_v35  ;;  %v2459_v39 = vunpack.c.l.s8.bf16 %v899_v37  ;;  %v2467_v51 = vunpack.c.h.s8.bf16 %v899_v37  ;;  %v920_v49 = vld [vmem:[%s7801_s18 + $0x11a0] sm:$0xff]  ;;  %v929_v37 = vld [vmem:[%s7801_s18 + $0x11e8] sm:$0xff] }
 0x638   : > { %5288 = vmatpush1.bf16.msra.mxu0 %v2392_v42  ;;  %5944 = vmatpush1.bf16.msra.mxu1 %v2394_v45  ;;  %v898_v42 = vld [vmem:[%s7801_s18 + $0x10f0] sm:$0xff]  ;;  %v2456_v45 = vunpack.c.l.s8.bf16 %v896_v53 }
 0x639   : > { %5289 = vmatprep.subr.bf16.mxu0 %v2401_v6  ;;  %5945 = vmatprep.subr.bf16.mxu1 %v2403_v52  ;;  %v2458_v6 = vunpack.c.l.s8.bf16 %v898_v42  ;;  %v2465_v52 = vunpack.c.h.s8.bf16 %v897_v35 }
 0x63c   : > { %5290 = vmatpush1.bf16.msra.mxu0 %v2400_v61  ;;  %5946 = vmatpush1.bf16.msra.mxu1 %v2402_v57  ;;  %v907_v61 = vld [vmem:[%s7801_s18 + $0x1138] sm:$0xff]  ;;  %v2464_v57 = vunpack.c.h.s8.bf16 %v896_v53 }
 0x63d   : > { %5300 = vmatprep.subr.bf16.mxu0 %v2409_v58  ;;  %5956 = vmatprep.subr.bf16.mxu1 %v2411_v59  ;;  %v2466_v58 = vunpack.c.h.s8.bf16 %v898_v42  ;;  %v2473_v59 = vunpack.c.l.s8.bf16 %v905_v54  ;;  %v2475_v63 = vunpack.c.l.s8.bf16 %v907_v61  ;;  %v2483_v5 = vunpack.c.h.s8.bf16 %v907_v61  ;;  %v928_v42 = vld [vmem:[%s7801_s18 + $0x11e0] sm:$0xff]  ;;  %v937_v61 = vld [vmem:[%s7801_s18 + $0x1228] sm:$0xff] }
 0x63f   : > { %5292 = vmatmul.mubr.bf16.vlgmr.msra.gmra.mrb[4].mxu0 %v8208_v60  ;;  %5948 = vmatmul.mubr.bf16.vlgmr.msra.gmra.mrb[4].mxu1 %v8208_v60  ;;  %v2426_v60 = vunpack.c.l.s8.bf16 %v882_v13  ;;  %v912_v13 = vld [vmem:[%s7801_s18 + $0x1160] sm:$0xff] }
 0x640   : > { %5301 = vmatpush1.bf16.msra.mxu0 %v2408_v1  ;;  %5957 = vmatpush1.bf16.msra.mxu1 %v2410_v2  ;;  %v906_v1 = vld [vmem:[%s7801_s18 + $0x1130] sm:$0xff]  ;;  %v2472_v2 = vunpack.c.l.s8.bf16 %v904_v0 }
 0x641   : > { %5302 = vmatprep.subr.bf16.mxu0 %v2417_v8  ;;  %5958 = vmatprep.subr.bf16.mxu1 %v2419_v9  ;;  %v2474_v8 = vunpack.c.l.s8.bf16 %v906_v1  ;;  %v2481_v9 = vunpack.c.h.s8.bf16 %v905_v54 }
 0x642   : > { %5332 = vmatprep.mubr.bf16.mxu0 %v8213_v14  ;;  %5988 = vmatprep.mubr.bf16.mxu1 %v8213_v14  ;;  %v2441_v14 = vunpack.c.l.s8.bf16 %v889_v22 }
 0x644   : > { %5303 = vmatpush1.bf16.msra.mxu0 %v2416_v28  ;;  %5959 = vmatpush1.bf16.msra.mxu1 %v2418_v50  ;;  %v915_v28 = vld [vmem:[%s7801_s18 + $0x1178] sm:$0xff]  ;;  %v2480_v50 = vunpack.c.h.s8.bf16 %v904_v0 }
 0x645   : > { %5304 = vmatprep.subr.bf16.mxu0 %v2425_v10  ;;  %5960 = vmatprep.subr.bf16.mxu1 %v2427_v4  ;;  %v2482_v10 = vunpack.c.h.s8.bf16 %v906_v1  ;;  %v2489_v4 = vunpack.c.l.s8.bf16 %v913_v15  ;;  %v2491_v12 = vunpack.c.l.s8.bf16 %v915_v28  ;;  %v2499_v22 = vunpack.c.h.s8.bf16 %v915_v28  ;;  %v936_v1 = vld [vmem:[%s7801_s18 + $0x1220] sm:$0xff]  ;;  %v945_v28 = vld [vmem:[%s7801_s18 + $0x1268] sm:$0xff] }
 0x648   : > { %5305 = vmatpush1.bf16.msra.mxu0 %v2424_v16  ;;  %5961 = vmatpush1.bf16.msra.mxu1 %v2426_v60  ;;  %v914_v16 = vld [vmem:[%s7801_s18 + $0x1170] sm:$0xff]  ;;  %v2488_v60 = vunpack.c.l.s8.bf16 %v912_v13 }
 0x649   : > { %5306 = vmatprep.subr.bf16.mxu0 %v2433_v24  ;;  %5962 = vmatprep.subr.bf16.mxu1 %v2435_v7  ;;  %v2490_v24 = vunpack.c.l.s8.bf16 %v914_v16  ;;  %v2497_v7 = vunpack.c.h.s8.bf16 %v913_v15 }
 0x64c   : > { %5307 = vmatpush1.bf16.msra.mxu0 %v2432_v11  ;;  %5963 = vmatpush1.bf16.msra.mxu1 %v2434_v44  ;;  %v923_v11 = vld [vmem:[%s7801_s18 + $0x11b8] sm:$0xff]  ;;  %v2496_v44 = vunpack.c.h.s8.bf16 %v912_v13 }
 0x64d   : > { %5308 = vmatprep.subr.bf16.mxu0 %v2441_v14  ;;  %5964 = vmatprep.subr.bf16.mxu1 %v2443_v55  ;;  %v2498_v14 = vunpack.c.h.s8.bf16 %v914_v16  ;;  %v2505_v55 = vunpack.c.l.s8.bf16 %v921_v25  ;;  %v2507_v30 = vunpack.c.l.s8.bf16 %v923_v11  ;;  %v2515_v35 = vunpack.c.h.s8.bf16 %v923_v11  ;;  %v944_v16 = vld [vmem:[%s7801_s18 + $0x1260] sm:$0xff]  ;;  %v955_v11 = vld [vmem:[%s7801_s18 + $0x12b8] sm:$0xff] }
 0x650   : > { %5309 = vmatpush1.bf16.msra.mxu0 %v2440_v3  ;;  %5965 = vmatpush1.bf16.msra.mxu1 %v2442_v31  ;;  %v922_v3 = vld [vmem:[%s7801_s18 + $0x11b0] sm:$0xff]  ;;  %v2504_v31 = vunpack.c.l.s8.bf16 %v920_v49 }
 0x651   : > { %5310 = vmatprep.subr.bf16.mxu0 %v2449_v26  ;;  %5966 = vmatprep.subr.bf16.mxu1 %v2451_v33  ;;  %v2506_v26 = vunpack.c.l.s8.bf16 %v922_v3  ;;  %v2513_v33 = vunpack.c.h.s8.bf16 %v921_v25  ;;  %v953_v25 = vld [vmem:[%s7801_s18 + $0x12a8] sm:$0xff] }
 0x654   : > { %5311 = vmatpush1.bf16.msra.mxu0 %v2448_v62  ;;  %5967 = vmatpush1.bf16.msra.mxu1 %v2450_v40  ;;  %v931_v62 = vld [vmem:[%s7801_s18 + $0x11f8] sm:$0xff]  ;;  %v2512_v40 = vunpack.c.h.s8.bf16 %v920_v49  ;;  %v954_v49 = vld [vmem:[%s7801_s18 + $0x12b0] sm:$0xff] }
 0x655   : > { %5312 = vmatprep.subr.bf16.mxu0 %v2457_v41  ;;  %5968 = vmatprep.subr.bf16.mxu1 %v2459_v39  ;;  %v2514_v41 = vunpack.c.h.s8.bf16 %v922_v3  ;;  %v2521_v39 = vunpack.c.l.s8.bf16 %v929_v37  ;;  %v2523_v53 = vunpack.c.l.s8.bf16 %v931_v62  ;;  %v2531_v54 = vunpack.c.h.s8.bf16 %v931_v62 }
 0x658   : > { %5313 = vmatpush1.bf16.msra.mxu0 %v2456_v45  ;;  %5969 = vmatpush1.bf16.msra.mxu1 %v2458_v6  ;;  %v930_v45 = vld [vmem:[%s7801_s18 + $0x11f0] sm:$0xff]  ;;  %v2520_v6 = vunpack.c.l.s8.bf16 %v928_v42 }
 0x659   : > { %5314 = vmatprep.subr.bf16.mxu0 %v2465_v52  ;;  %5970 = vmatprep.subr.bf16.mxu1 %v2467_v51  ;;  %v2522_v52 = vunpack.c.l.s8.bf16 %v930_v45  ;;  %v2529_v51 = vunpack.c.h.s8.bf16 %v929_v37  ;;  %v963_v37 = vld [vmem:[%s7801_s18 + $0x12f8] sm:$0xff] }
 0x65c   : > { %5315 = vmatpush1.bf16.msra.mxu0 %v2464_v57  ;;  %5971 = vmatpush1.bf16.msra.mxu1 %v2466_v58  ;;  %v939_v57 = vld [vmem:[%s7801_s18 + $0x1238] sm:$0xff]  ;;  %v2528_v58 = vunpack.c.h.s8.bf16 %v928_v42  ;;  %v962_v42 = vld [vmem:[%s7801_s18 + $0x12f0] sm:$0xff] }
 0x65d   : > { %5316 = vmatprep.subr.bf16.mxu0 %v2473_v59  ;;  %5972 = vmatprep.subr.bf16.mxu1 %v2475_v63  ;;  %v2530_v59 = vunpack.c.h.s8.bf16 %v930_v45  ;;  %v2537_v63 = vunpack.c.l.s8.bf16 %v937_v61  ;;  %v2539_v0 = vunpack.c.l.s8.bf16 %v939_v57  ;;  %v2547_v15 = vunpack.c.h.s8.bf16 %v939_v57 }
 0x660   : > { %5317 = vmatpush1.bf16.msra.mxu0 %v2472_v2  ;;  %5973 = vmatpush1.bf16.msra.mxu1 %v2474_v8  ;;  %v938_v2 = vld [vmem:[%s7801_s18 + $0x1230] sm:$0xff]  ;;  %v2536_v8 = vunpack.c.l.s8.bf16 %v936_v1 }
 0x661   : > { %5318 = vmatprep.subr.bf16.mxu0 %v2481_v9  ;;  %5974 = vmatprep.subr.bf16.mxu1 %v2483_v5  ;;  %v2538_v9 = vunpack.c.l.s8.bf16 %v938_v2  ;;  %v2545_v5 = vunpack.c.h.s8.bf16 %v937_v61  ;;  %v971_v61 = vld [vmem:[%s7801_s18 + $0x1338] sm:$0xff] }
 0x664   : > { %5319 = vmatpush1.bf16.msra.mxu0 %v2480_v50  ;;  %5975 = vmatpush1.bf16.msra.mxu1 %v2482_v10  ;;  %v947_v50 = vld [vmem:[%s7801_s18 + $0x1278] sm:$0xff]  ;;  %v2544_v10 = vunpack.c.h.s8.bf16 %v936_v1  ;;  %v970_v1 = vld [vmem:[%s7801_s18 + $0x1330] sm:$0xff] }
 0x665   : > { %5320 = vmatprep.subr.bf16.mxu0 %v2489_v4  ;;  %5976 = vmatprep.subr.bf16.mxu1 %v2491_v12  ;;  %v2546_v4 = vunpack.c.h.s8.bf16 %v938_v2  ;;  %v2553_v12 = vunpack.c.l.s8.bf16 %v945_v28  ;;  %v2555_v13 = vunpack.c.l.s8.bf16 %v947_v50 }
 0x668   : > { %5321 = vmatpush1.bf16.msra.mxu0 %v2488_v60  ;;  %5977 = vmatpush1.bf16.msra.mxu1 %v2490_v24  ;;  %v946_v60 = vld [vmem:[%s7801_s18 + $0x1270] sm:$0xff]  ;;  %v2552_v24 = vunpack.c.l.s8.bf16 %v944_v16 }
 0x669   : > { %5322 = vmatprep.subr.bf16.mxu0 %v2497_v7  ;;  %5978 = vmatprep.subr.bf16.mxu1 %v2499_v22  ;;  %v2561_v7 = vunpack.c.h.s8.bf16 %v945_v28  ;;  %v2563_v22 = vunpack.c.h.s8.bf16 %v947_v50  ;;  %v979_v28 = vld [vmem:[%s7801_s18 + $0x1378] sm:$0xff] }
 0x66c   : > { %5323 = vmatpush1.bf16.msra.mxu0 %v2496_v44  ;;  %5979 = vmatpush1.bf16.msra.mxu1 %v2498_v14  ;;  %v2560_v44 = vunpack.c.h.s8.bf16 %v944_v16  ;;  %v2562_v14 = vunpack.c.h.s8.bf16 %v946_v60  ;;  %v978_v16 = vld [vmem:[%s7801_s18 + $0x1370] sm:$0xff] }
 0x66d   : > { %5324 = vmatprep.subr.bf16.mxu0 %v2505_v55  ;;  %5980 = vmatprep.subr.bf16.mxu1 %v2507_v30  ;;  %v2571_v55 = vunpack.c.l.s8.bf16 %v955_v11  ;;  %v952_v30 = vld [vmem:[%s7801_s18 + $0x12a0] sm:$0xff] }
 0x66e   : > { %v2568_v3 = vunpack.c.l.s8.bf16 %v952_v30  ;;  %v2576_v62 = vunpack.c.h.s8.bf16 %v952_v30  ;;  %v986_v30 = vld [vmem:[%s7801_s18 + $0x13b0] sm:$0xff] }
 0x670   : > { %5325 = vmatpush1.bf16.msra.mxu0 %v2504_v31  ;;  %5981 = vmatpush1.bf16.msra.mxu1 %v2506_v26  ;;  %v2570_v31 = vunpack.c.l.s8.bf16 %v954_v49  ;;  %v2577_v26 = vunpack.c.h.s8.bf16 %v953_v25 }
 0x671   : > { %5326 = vmatprep.subr.bf16.mxu0 %v2513_v33  ;;  %5982 = vmatprep.subr.bf16.mxu1 %v2515_v35  ;;  %v2579_v33 = vunpack.c.h.s8.bf16 %v955_v11  ;;  %v961_v35 = vld [vmem:[%s7801_s18 + $0x12e8] sm:$0xff] }
 0x674   : > { %5327 = vmatpush1.bf16.msra.mxu0 %v2512_v40  ;;  %5983 = vmatpush1.bf16.msra.mxu1 %v2514_v41  ;;  %v2578_v40 = vunpack.c.h.s8.bf16 %v954_v49  ;;  %v2585_v41 = vunpack.c.l.s8.bf16 %v961_v35 }
 0x675   : > { %5328 = vmatprep.subr.bf16.mxu0 %v2521_v39  ;;  %5984 = vmatprep.subr.bf16.mxu1 %v2523_v53  ;;  %v2587_v39 = vunpack.c.l.s8.bf16 %v963_v37  ;;  %v960_v53 = vld [vmem:[%s7801_s18 + $0x12e0] sm:$0xff] }
 0x676   : > { %v2584_v45 = vunpack.c.l.s8.bf16 %v960_v53  ;;  %v2592_v57 = vunpack.c.h.s8.bf16 %v960_v53  ;;  %v994_v53 = vld [vmem:[%s7801_s18 + $0x13f0] sm:$0xff] }
 0x678   : > { %5329 = vmatpush1.bf16.msra.mxu0 %v2520_v6  ;;  %5985 = vmatpush1.bf16.msra.mxu1 %v2522_v52  ;;  %v2586_v6 = vunpack.c.l.s8.bf16 %v962_v42  ;;  %v2593_v52 = vunpack.c.h.s8.bf16 %v961_v35  ;;  %v995_v35 = vld [vmem:[%s7801_s18 + $0x13f8] sm:$0xff] }
 0x679   : > { %5330 = vmatprep.subr.bf16.mxu0 %v2529_v51  ;;  %5986 = vmatprep.subr.bf16.mxu1 %v2531_v54  ;;  %v2595_v51 = vunpack.c.h.s8.bf16 %v963_v37  ;;  %v969_v54 = vld [vmem:[%s7801_s18 + $0x1328] sm:$0xff] }
 0x67c   : > { %5331 = vmatpush1.bf16.msra.mxu0 %v2528_v58  ;;  %5987 = vmatpush1.bf16.msra.mxu1 %v2530_v59  ;;  %v2594_v58 = vunpack.c.h.s8.bf16 %v962_v42  ;;  %v2601_v59 = vunpack.c.l.s8.bf16 %v969_v54 }
 0x67d   : > { %5341 = vmatprep.subr.bf16.mxu0 %v2537_v63  ;;  %5997 = vmatprep.subr.bf16.mxu1 %v2539_v0  ;;  %v2603_v63 = vunpack.c.l.s8.bf16 %v971_v61  ;;  %v968_v0 = vld [vmem:[%s7801_s18 + $0x1320] sm:$0xff] }
 0x67e   : > { %v2600_v2 = vunpack.c.l.s8.bf16 %v968_v0  ;;  %v2608_v50 = vunpack.c.h.s8.bf16 %v968_v0  ;;  %v1002_v0 = vld [vmem:[%s7801_s18 + $0x1430] sm:$0xff] }
 0x67f   : > { %5333 = vmatmul.mubr.bf16.vlgmr.msra.gmra.mrb[4].mxu0 %v8251_v20  ;;  %5989 = vmatmul.mubr.bf16.vlgmr.msra.gmra.mrb[4].mxu1 %v8251_v20  ;;  %v2554_v20 = vunpack.c.l.s8.bf16 %v946_v60 }
 0x680   : > { %5342 = vmatpush1.bf16.msra.mxu0 %v2536_v8  ;;  %5998 = vmatpush1.bf16.msra.mxu1 %v2538_v9  ;;  %v2602_v8 = vunpack.c.l.s8.bf16 %v970_v1  ;;  %v2609_v9 = vunpack.c.h.s8.bf16 %v969_v54  ;;  %v1003_v54 = vld [vmem:[%s7801_s18 + $0x1438] sm:$0xff] }
 0x681   : > { %5343 = vmatprep.subr.bf16.mxu0 %v2545_v5  ;;  %5999 = vmatprep.subr.bf16.mxu1 %v2547_v15  ;;  %v2611_v5 = vunpack.c.h.s8.bf16 %v971_v61  ;;  %v977_v15 = vld [vmem:[%s7801_s18 + $0x1368] sm:$0xff] }
 0x682   : > { %5373 = vmatprep.mubr.bf16.mxu0 %v8257_v27  ;;  %6029 = vmatprep.mubr.bf16.mxu1 %v8257_v27  ;;  %v2569_v27 = vunpack.c.l.s8.bf16 %v953_v25  ;;  %v987_v25 = vld [vmem:[%s7801_s18 + $0x13b8] sm:$0xff] }
 0x684   : > { %5344 = vmatpush1.bf16.msra.mxu0 %v2544_v10  ;;  %6000 = vmatpush1.bf16.msra.mxu1 %v2546_v4  ;;  %v2610_v10 = vunpack.c.h.s8.bf16 %v970_v1  ;;  %v2617_v4 = vunpack.c.l.s8.bf16 %v977_v15 }
 0x685   : > { %5345 = vmatprep.subr.bf16.mxu0 %v2553_v12  ;;  %6001 = vmatprep.subr.bf16.mxu1 %v2555_v13  ;;  %v2619_v12 = vunpack.c.l.s8.bf16 %v979_v28  ;;  %v976_v13 = vld [vmem:[%s7801_s18 + $0x1360] sm:$0xff] }
 0x686   : > { %v2616_v60 = vunpack.c.l.s8.bf16 %v976_v13  ;;  %v2624_v11 = vunpack.c.h.s8.bf16 %v976_v13  ;;  %v1010_v13 = vld [vmem:[%s7801_s18 + $0x1470] sm:$0xff] }
 0x688   : > { %5346 = vmatpush1.bf16.msra.mxu0 %v2552_v24  ;;  %6002 = vmatpush1.bf16.msra.mxu1 %v2554_v20  ;;  %v2618_v24 = vunpack.c.l.s8.bf16 %v978_v16  ;;  %v2625_v20 = vunpack.c.h.s8.bf16 %v977_v15  ;;  %v1011_v15 = vld [vmem:[%s7801_s18 + $0x1478] sm:$0xff] }
 0x689   : > { %5347 = vmatprep.subr.bf16.mxu0 %v2561_v7  ;;  %6003 = vmatprep.subr.bf16.mxu1 %v2563_v22  ;;  %v2627_v7 = vunpack.c.h.s8.bf16 %v979_v28  ;;  %v985_v22 = vld [vmem:[%s7801_s18 + $0x13a8] sm:$0xff] }
 0x68c   : > { %5348 = vmatpush1.bf16.msra.mxu0 %v2560_v44  ;;  %6004 = vmatpush1.bf16.msra.mxu1 %v2562_v14  ;;  %v2626_v44 = vunpack.c.h.s8.bf16 %v978_v16  ;;  %v2633_v14 = vunpack.c.l.s8.bf16 %v985_v22 }
 0x68d   : > { %5349 = vmatprep.subr.bf16.mxu0 %v2569_v27  ;;  %6005 = vmatprep.subr.bf16.mxu1 %v2571_v55  ;;  %v2635_v27 = vunpack.c.l.s8.bf16 %v987_v25  ;;  %v984_v55 = vld [vmem:[%s7801_s18 + $0x13a0] sm:$0xff] }
 0x68e   : > { %v2632_v49 = vunpack.c.l.s8.bf16 %v984_v55  ;;  %v2640_v37 = vunpack.c.h.s8.bf16 %v984_v55 }
 0x690   : > { %5350 = vmatpush1.bf16.msra.mxu0 %v2568_v3  ;;  %6006 = vmatpush1.bf16.msra.mxu1 %v2570_v31  ;;  %v2634_v3 = vunpack.c.l.s8.bf16 %v986_v30  ;;  %v2641_v31 = vunpack.c.h.s8.bf16 %v985_v22 }
 0x691   : > { %5351 = vmatprep.subr.bf16.mxu0 %v2577_v26  ;;  %6007 = vmatprep.subr.bf16.mxu1 %v2579_v33  ;;  %v2643_v26 = vunpack.c.h.s8.bf16 %v987_v25  ;;  %v993_v33 = vld [vmem:[%s7801_s18 + $0x13e8] sm:$0xff]  ;;  %v2690_v25 = vunpack.c.h.s8.bf16 %v1010_v13 }
 0x694   : > { %5352 = vmatpush1.bf16.msra.mxu0 %v2576_v62  ;;  %6008 = vmatpush1.bf16.msra.mxu1 %v2578_v40  ;;  %v2642_v62 = vunpack.c.h.s8.bf16 %v986_v30  ;;  %v2649_v40 = vunpack.c.l.s8.bf16 %v993_v33 }
 0x695   : > { %5353 = vmatprep.subr.bf16.mxu0 %v2585_v41  ;;  %6009 = vmatprep.subr.bf16.mxu1 %v2587_v39  ;;  %v2651_v41 = vunpack.c.l.s8.bf16 %v995_v35  ;;  %v992_v39 = vld [vmem:[%s7801_s18 + $0x13e0] sm:$0xff] }
 0x696   : > { %v2648_v42 = vunpack.c.l.s8.bf16 %v992_v39  ;;  %v2656_v61 = vunpack.c.h.s8.bf16 %v992_v39 }
 0x698   : > { %5354 = vmatpush1.bf16.msra.mxu0 %v2584_v45  ;;  %6010 = vmatpush1.bf16.msra.mxu1 %v2586_v6  ;;  %v2650_v45 = vunpack.c.l.s8.bf16 %v994_v53  ;;  %v2657_v6 = vunpack.c.h.s8.bf16 %v993_v33 }
 0x699   : > { %5355 = vmatprep.subr.bf16.mxu0 %v2593_v52  ;;  %6011 = vmatprep.subr.bf16.mxu1 %v2595_v51  ;;  %v2659_v52 = vunpack.c.h.s8.bf16 %v995_v35  ;;  %v1001_v51 = vld [vmem:[%s7801_s18 + $0x1428] sm:$0xff] }
 0x69c   : > { %5356 = vmatpush1.bf16.msra.mxu0 %v2592_v57  ;;  %6012 = vmatpush1.bf16.msra.mxu1 %v2594_v58  ;;  %v2658_v57 = vunpack.c.h.s8.bf16 %v994_v53  ;;  %v2665_v58 = vunpack.c.l.s8.bf16 %v1001_v51 }
 0x69d   : > { %5357 = vmatprep.subr.bf16.mxu0 %v2601_v59  ;;  %6013 = vmatprep.subr.bf16.mxu1 %v2603_v63  ;;  %v2667_v59 = vunpack.c.l.s8.bf16 %v1003_v54  ;;  %v1000_v63 = vld [vmem:[%s7801_s18 + $0x1420] sm:$0xff] }
 0x69e   : > { %v2664_v1 = vunpack.c.l.s8.bf16 %v1000_v63  ;;  %v2672_v28 = vunpack.c.h.s8.bf16 %v1000_v63 }
 0x6a0   : > { %5358 = vmatpush1.bf16.msra.mxu0 %v2600_v2  ;;  %6014 = vmatpush1.bf16.msra.mxu1 %v2602_v8  ;;  %v2666_v2 = vunpack.c.l.s8.bf16 %v1002_v0  ;;  %v2673_v8 = vunpack.c.h.s8.bf16 %v1001_v51 }
 0x6a1   : > { %5359 = vmatprep.subr.bf16.mxu0 %v2609_v9  ;;  %6015 = vmatprep.subr.bf16.mxu1 %v2611_v5  ;;  %v2675_v9 = vunpack.c.h.s8.bf16 %v1003_v54  ;;  %v1009_v5 = vld [vmem:[%s7801_s18 + $0x1468] sm:$0xff] }
 0x6a4   : > { %5360 = vmatpush1.bf16.msra.mxu0 %v2608_v50  ;;  %6016 = vmatpush1.bf16.msra.mxu1 %v2610_v10  ;;  %v2674_v50 = vunpack.c.h.s8.bf16 %v1002_v0  ;;  %v2681_v10 = vunpack.c.l.s8.bf16 %v1009_v5 }
 0x6a5   : > { %5361 = vmatprep.subr.bf16.mxu0 %v2617_v4  ;;  %6017 = vmatprep.subr.bf16.mxu1 %v2619_v12  ;;  %v2683_v4 = vunpack.c.l.s8.bf16 %v1011_v15  ;;  %v1008_v12 = vld [vmem:[%s7801_s18 + $0x1460] sm:$0xff] }
 0x6a6   : > { %v2680_v16 = vunpack.c.l.s8.bf16 %v1008_v12  ;;  %v2688_v22 = vunpack.c.h.s8.bf16 %v1008_v12 }
 0x6a8   : > { %5362 = vmatpush1.bf16.msra.mxu0 %v2616_v60  ;;  %6018 = vmatpush1.bf16.msra.mxu1 %v2618_v24  ;;  %v2689_v60 = vunpack.c.h.s8.bf16 %v1009_v5  ;;  %v2691_v24 = vunpack.c.h.s8.bf16 %v1011_v15 }
 0x6a9   : > { %5363 = vmatprep.subr.bf16.mxu0 %v2625_v20  ;;  %6019 = vmatprep.subr.bf16.mxu1 %v2627_v7  ;;  %v1017_v20 = vld [vmem:[%s7801_s18 + $0x14a8] sm:$0xff]  ;;  %v1019_v7 = vld [vmem:[%s7801_s18 + $0x14b8] sm:$0xff] }
 0x6aa   : > { %v2705_v30 = vunpack.c.h.s8.bf16 %v1017_v20 }
 0x6ac   : > { %5364 = vmatpush1.bf16.msra.mxu0 %v2624_v11  ;;  %6020 = vmatpush1.bf16.msra.mxu1 %v2626_v44  ;;  %v2699_v11 = vunpack.c.l.s8.bf16 %v1019_v7  ;;  %v1016_v44 = vld [vmem:[%s7801_s18 + $0x14a0] sm:$0xff] }
 0x6ad   : > { %5365 = vmatprep.subr.bf16.mxu0 %v2633_v14  ;;  %6021 = vmatprep.subr.bf16.mxu1 %v2635_v27  ;;  %v1018_v14 = vld [vmem:[%s7801_s18 + $0x14b0] sm:$0xff]  ;;  %v2696_v27 = vunpack.c.l.s8.bf16 %v1016_v44 }
 0x6ae   : > { %v2698_v55 = vunpack.c.l.s8.bf16 %v1018_v14  ;;  %v2706_v33 = vunpack.c.h.s8.bf16 %v1018_v14 }
 0x6b0   : > { %5366 = vmatpush1.bf16.msra.mxu0 %v2632_v49  ;;  %6022 = vmatpush1.bf16.msra.mxu1 %v2634_v3  ;;  %v2707_v49 = vunpack.c.h.s8.bf16 %v1019_v7  ;;  %v1025_v3 = vld [vmem:[%s7801_s18 + $0x14e8] sm:$0xff] }
 0x6b1   : > { %5367 = vmatprep.subr.bf16.mxu0 %v2641_v31  ;;  %6023 = vmatprep.subr.bf16.mxu1 %v2643_v26  ;;  %v1027_v31 = vld [vmem:[%s7801_s18 + $0x14f8] sm:$0xff]  ;;  %v2704_v26 = vunpack.c.h.s8.bf16 %v1016_v44  ;;  %v2713_v35 = vunpack.c.l.s8.bf16 %v1025_v3  ;;  %v2721_v53 = vunpack.c.h.s8.bf16 %v1025_v3 }
 0x6b4   : > { %5368 = vmatpush1.bf16.msra.mxu0 %v2640_v37  ;;  %6024 = vmatpush1.bf16.msra.mxu1 %v2642_v62  ;;  %v2715_v37 = vunpack.c.l.s8.bf16 %v1027_v31  ;;  %v1024_v62 = vld [vmem:[%s7801_s18 + $0x14e0] sm:$0xff] }
 0x6b5   : > { %5369 = vmatprep.subr.bf16.mxu0 %v2649_v40  ;;  %6025 = vmatprep.subr.bf16.mxu1 %v2651_v41  ;;  %v1026_v40 = vld [vmem:[%s7801_s18 + $0x14f0] sm:$0xff]  ;;  %v2712_v41 = vunpack.c.l.s8.bf16 %v1024_v62 }
 0x6b6   : > { %v2714_v39 = vunpack.c.l.s8.bf16 %v1026_v40  ;;  %v2722_v51 = vunpack.c.h.s8.bf16 %v1026_v40 }
 0x6b8   : > { %5370 = vmatpush1.bf16.msra.mxu0 %v2648_v42  ;;  %6026 = vmatpush1.bf16.msra.mxu1 %v2650_v45  ;;  %v2723_v42 = vunpack.c.h.s8.bf16 %v1027_v31  ;;  %v1033_v45 = vld [vmem:[%s7801_s18 + $0x1528] sm:$0xff] }
 0x6b9   : > { %5371 = vmatprep.subr.bf16.mxu0 %v2657_v6  ;;  %6027 = vmatprep.subr.bf16.mxu1 %v2659_v52  ;;  %v1035_v6 = vld [vmem:[%s7801_s18 + $0x1538] sm:$0xff]  ;;  %v2720_v52 = vunpack.c.h.s8.bf16 %v1024_v62  ;;  %v2729_v54 = vunpack.c.l.s8.bf16 %v1033_v45  ;;  %v2737_v0 = vunpack.c.h.s8.bf16 %v1033_v45 }
 0x6bc   : > { %5372 = vmatpush1.bf16.msra.mxu0 %v2656_v61  ;;  %6028 = vmatpush1.bf16.msra.mxu1 %v2658_v57  ;;  %v2731_v61 = vunpack.c.l.s8.bf16 %v1035_v6  ;;  %v1032_v57 = vld [vmem:[%s7801_s18 + $0x1520] sm:$0xff] }
 0x6bd   : > { %5382 = vmatprep.subr.bf16.mxu0 %v2665_v58  ;;  %6038 = vmatprep.subr.bf16.mxu1 %v2667_v59  ;;  %v1034_v58 = vld [vmem:[%s7801_s18 + $0x1530] sm:$0xff]  ;;  %v2728_v59 = vunpack.c.l.s8.bf16 %v1032_v57 }
 0x6be   : > { %v2730_v63 = vunpack.c.l.s8.bf16 %v1034_v58  ;;  %v2738_v5 = vunpack.c.h.s8.bf16 %v1034_v58 }
 0x6bf   : > { %5374 = vmatmul.mubr.bf16.vlgmr.msra.gmra.mrb[4].mxu0 %v8302_v36  ;;  %6030 = vmatmul.mubr.bf16.vlgmr.msra.gmra.mrb[4].mxu1 %v8302_v36  ;;  %v2682_v36 = vunpack.c.l.s8.bf16 %v1010_v13 }
 0x6c0   : > { %5383 = vmatpush1.bf16.msra.mxu0 %v2664_v1  ;;  %6039 = vmatpush1.bf16.msra.mxu1 %v2666_v2  ;;  %v2739_v1 = vunpack.c.h.s8.bf16 %v1035_v6  ;;  %v1041_v2 = vld [vmem:[%s7801_s18 + $0x1568] sm:$0xff] }
 0x6c1   : > { %5384 = vmatprep.subr.bf16.mxu0 %v2673_v8  ;;  %6040 = vmatprep.subr.bf16.mxu1 %v2675_v9  ;;  %v1043_v8 = vld [vmem:[%s7801_s18 + $0x1578] sm:$0xff]  ;;  %v2736_v9 = vunpack.c.h.s8.bf16 %v1032_v57  ;;  %v2745_v15 = vunpack.c.l.s8.bf16 %v1041_v2  ;;  %v2753_v13 = vunpack.c.h.s8.bf16 %v1041_v2 }
 0x6c2   : > { %5414 = vmatprep.mubr.bf16.mxu0 %v8307_v48  ;;  %6070 = vmatprep.mubr.bf16.mxu1 %v8307_v48  ;;  %v2697_v48 = vunpack.c.l.s8.bf16 %v1017_v20 }
 0x6c4   : > { %5385 = vmatpush1.bf16.msra.mxu0 %v2672_v28  ;;  %6041 = vmatpush1.bf16.msra.mxu1 %v2674_v50  ;;  %v2747_v28 = vunpack.c.l.s8.bf16 %v1043_v8  ;;  %v1040_v50 = vld [vmem:[%s7801_s18 + $0x1560] sm:$0xff] }
 0x6c5   : > { %5386 = vmatprep.subr.bf16.mxu0 %v2681_v10  ;;  %6042 = vmatprep.subr.bf16.mxu1 %v2683_v4  ;;  %v1042_v10 = vld [vmem:[%s7801_s18 + $0x1570] sm:$0xff]  ;;  %v2744_v4 = vunpack.c.l.s8.bf16 %v1040_v50 }
 0x6c6   : > { %v2746_v12 = vunpack.c.l.s8.bf16 %v1042_v10  ;;  %v2754_v20 = vunpack.c.h.s8.bf16 %v1042_v10 }
 0x6c8   : > { %5387 = vmatpush1.bf16.msra.mxu0 %v2680_v16  ;;  %6043 = vmatpush1.bf16.msra.mxu1 %v2682_v36  ;;  %v2755_v16 = vunpack.c.h.s8.bf16 %v1043_v8  ;;  %v1049_v36 = vld [vmem:[%s7801_s18 + $0x15a8] sm:$0xff] }
 0x6c9   : > { %5388 = vmatprep.subr.bf16.mxu0 %v2689_v60  ;;  %6044 = vmatprep.subr.bf16.mxu1 %v2691_v24  ;;  %v1051_v60 = vld [vmem:[%s7801_s18 + $0x15b8] sm:$0xff]  ;;  %v2752_v24 = vunpack.c.h.s8.bf16 %v1040_v50  ;;  %v2761_v7 = vunpack.c.l.s8.bf16 %v1049_v36  ;;  %v2769_v14 = vunpack.c.h.s8.bf16 %v1049_v36 }
 0x6cc   : > { %5389 = vmatpush1.bf16.msra.mxu0 %v2688_v22  ;;  %6045 = vmatpush1.bf16.msra.mxu1 %v2690_v25  ;;  %v2763_v22 = vunpack.c.l.s8.bf16 %v1051_v60  ;;  %v1048_v25 = vld [vmem:[%s7801_s18 + $0x15a0] sm:$0xff] }
 0x6cd   : > { %5390 = vmatprep.subr.bf16.mxu0 %v2697_v48  ;;  %6046 = vmatprep.subr.bf16.mxu1 %v2699_v11  ;;  %v1050_v48 = vld [vmem:[%s7801_s18 + $0x15b0] sm:$0xff]  ;;  %v2760_v11 = vunpack.c.l.s8.bf16 %v1048_v25 }
 0x6ce   : > { %v2762_v44 = vunpack.c.l.s8.bf16 %v1050_v48  ;;  %v2770_v3 = vunpack.c.h.s8.bf16 %v1050_v48  ;;  %v1089_v48 = vld [vmem:[%s7801_s18 + $0x16e8] sm:$0xff] }
 0x6d0   : > { %5391 = vmatpush1.bf16.msra.mxu0 %v2696_v27  ;;  %6047 = vmatpush1.bf16.msra.mxu1 %v2698_v55  ;;  %v2771_v27 = vunpack.c.h.s8.bf16 %v1051_v60  ;;  %v1057_v55 = vld [vmem:[%s7801_s18 + $0x15e8] sm:$0xff]  ;;  %v1080_v60 = vld [vmem:[%s7801_s18 + $0x16a0] sm:$0xff] }
 0x6d1   : > { %5392 = vmatprep.subr.bf16.mxu0 %v2705_v30  ;;  %6048 = vmatprep.subr.bf16.mxu1 %v2707_v49  ;;  %v1059_v30 = vld [vmem:[%s7801_s18 + $0x15f8] sm:$0xff]  ;;  %v2768_v49 = vunpack.c.h.s8.bf16 %v1048_v25  ;;  %v2777_v31 = vunpack.c.l.s8.bf16 %v1057_v55  ;;  %v2785_v40 = vunpack.c.h.s8.bf16 %v1057_v55 }
 0x6d4   : > { %5393 = vmatpush1.bf16.msra.mxu0 %v2704_v26  ;;  %6049 = vmatpush1.bf16.msra.mxu1 %v2706_v33  ;;  %v2779_v26 = vunpack.c.l.s8.bf16 %v1059_v30  ;;  %v1056_v33 = vld [vmem:[%s7801_s18 + $0x15e0] sm:$0xff] }
 0x6d5   : > { %5394 = vmatprep.subr.bf16.mxu0 %v2713_v35  ;;  %6050 = vmatprep.subr.bf16.mxu1 %v2715_v37  ;;  %v1058_v35 = vld [vmem:[%s7801_s18 + $0x15f0] sm:$0xff]  ;;  %v2776_v37 = vunpack.c.l.s8.bf16 %v1056_v33 }
 0x6d6   : > { %v2778_v62 = vunpack.c.l.s8.bf16 %v1058_v35  ;;  %v2786_v45 = vunpack.c.h.s8.bf16 %v1058_v35  ;;  %v1097_v35 = vld [vmem:[%s7801_s18 + $0x1728] sm:$0xff] }
 0x6d8   : > { %5395 = vmatpush1.bf16.msra.mxu0 %v2712_v41  ;;  %6051 = vmatpush1.bf16.msra.mxu1 %v2714_v39  ;;  %v2787_v41 = vunpack.c.h.s8.bf16 %v1059_v30  ;;  %v1065_v39 = vld [vmem:[%s7801_s18 + $0x1628] sm:$0xff]  ;;  %v1088_v30 = vld [vmem:[%s7801_s18 + $0x16e0] sm:$0xff] }
 0x6d9   : > { %5396 = vmatprep.subr.bf16.mxu0 %v2721_v53  ;;  %6052 = vmatprep.subr.bf16.mxu1 %v2723_v42  ;;  %v1067_v53 = vld [vmem:[%s7801_s18 + $0x1638] sm:$0xff]  ;;  %v2784_v42 = vunpack.c.h.s8.bf16 %v1056_v33  ;;  %v2793_v6 = vunpack.c.l.s8.bf16 %v1065_v39  ;;  %v2801_v58 = vunpack.c.h.s8.bf16 %v1065_v39 }
 0x6dc   : > { %5397 = vmatpush1.bf16.msra.mxu0 %v2720_v52  ;;  %6053 = vmatpush1.bf16.msra.mxu1 %v2722_v51  ;;  %v2795_v52 = vunpack.c.l.s8.bf16 %v1067_v53  ;;  %v1064_v51 = vld [vmem:[%s7801_s18 + $0x1620] sm:$0xff] }
 0x6dd   : > { %5398 = vmatprep.subr.bf16.mxu0 %v2729_v54  ;;  %6054 = vmatprep.subr.bf16.mxu1 %v2731_v61  ;;  %v1066_v54 = vld [vmem:[%s7801_s18 + $0x1630] sm:$0xff]  ;;  %v2792_v61 = vunpack.c.l.s8.bf16 %v1064_v51 }
 0x6de   : > { %v2794_v57 = vunpack.c.l.s8.bf16 %v1066_v54  ;;  %v2802_v2 = vunpack.c.h.s8.bf16 %v1066_v54  ;;  %v1105_v54 = vld [vmem:[%s7801_s18 + $0x1768] sm:$0xff] }
 0x6e0   : > { %5399 = vmatpush1.bf16.msra.mxu0 %v2728_v59  ;;  %6055 = vmatpush1.bf16.msra.mxu1 %v2730_v63  ;;  %v2803_v59 = vunpack.c.h.s8.bf16 %v1067_v53  ;;  %v1073_v63 = vld [vmem:[%s7801_s18 + $0x1668] sm:$0xff]  ;;  %v1096_v53 = vld [vmem:[%s7801_s18 + $0x1720] sm:$0xff] }
 0x6e1   : > { %5400 = vmatprep.subr.bf16.mxu0 %v2737_v0  ;;  %6056 = vmatprep.subr.bf16.mxu1 %v2739_v1  ;;  %v1075_v0 = vld [vmem:[%s7801_s18 + $0x1678] sm:$0xff]  ;;  %v2800_v1 = vunpack.c.h.s8.bf16 %v1064_v51  ;;  %v2809_v8 = vunpack.c.l.s8.bf16 %v1073_v63  ;;  %v2817_v50 = vunpack.c.h.s8.bf16 %v1073_v63 }
 0x6e2   : > { %v2819_v10 = vunpack.c.h.s8.bf16 %v1075_v0 }
 0x6e4   : > { %5401 = vmatpush1.bf16.msra.mxu0 %v2736_v9  ;;  %6057 = vmatpush1.bf16.msra.mxu1 %v2738_v5  ;;  %v2811_v9 = vunpack.c.l.s8.bf16 %v1075_v0  ;;  %v1072_v5 = vld [vmem:[%s7801_s18 + $0x1660] sm:$0xff] }
 0x6e5   : > { %5402 = vmatprep.subr.bf16.mxu0 %v2745_v15  ;;  %6058 = vmatprep.subr.bf16.mxu1 %v2747_v28  ;;  %v1074_v15 = vld [vmem:[%s7801_s18 + $0x1670] sm:$0xff]  ;;  %v2808_v28 = vunpack.c.l.s8.bf16 %v1072_v5  ;;  %v1104_v0 = vld [vmem:[%s7801_s18 + $0x1760] sm:$0xff] }
 0x6e8   : > { %5403 = vmatpush1.bf16.msra.mxu0 %v2744_v4  ;;  %6059 = vmatpush1.bf16.msra.mxu1 %v2746_v12  ;;  %v1081_v4 = vld [vmem:[%s7801_s18 + $0x16a8] sm:$0xff]  ;;  %v1083_v12 = vld [vmem:[%s7801_s18 + $0x16b8] sm:$0xff] }
 0x6e9   : > { %5404 = vmatprep.subr.bf16.mxu0 %v2753_v13  ;;  %6060 = vmatprep.subr.bf16.mxu1 %v2755_v16  ;;  %v2816_v13 = vunpack.c.h.s8.bf16 %v1072_v5  ;;  %v2818_v16 = vunpack.c.h.s8.bf16 %v1074_v15  ;;  %v2827_v36 = vunpack.c.l.s8.bf16 %v1083_v12  ;;  %v2835_v25 = vunpack.c.h.s8.bf16 %v1083_v12  ;;  %v1112_v12 = vld [vmem:[%s7801_s18 + $0x17a0] sm:$0xff] }
 0x6ec   : > { %5405 = vmatpush1.bf16.msra.mxu0 %v2752_v24  ;;  %6061 = vmatpush1.bf16.msra.mxu1 %v2754_v20  ;;  %v1082_v24 = vld [vmem:[%s7801_s18 + $0x16b0] sm:$0xff]  ;;  %v2824_v20 = vunpack.c.l.s8.bf16 %v1080_v60 }
 0x6ed   : > { %5406 = vmatprep.subr.bf16.mxu0 %v2761_v7  ;;  %6062 = vmatprep.subr.bf16.mxu1 %v2763_v22  ;;  %v2826_v7 = vunpack.c.l.s8.bf16 %v1082_v24  ;;  %v2833_v22 = vunpack.c.h.s8.bf16 %v1081_v4 }
 0x6f0   : > { %5407 = vmatpush1.bf16.msra.mxu0 %v2760_v11  ;;  %6063 = vmatpush1.bf16.msra.mxu1 %v2762_v44  ;;  %v1091_v11 = vld [vmem:[%s7801_s18 + $0x16f8] sm:$0xff]  ;;  %v2832_v44 = vunpack.c.h.s8.bf16 %v1080_v60 }
 0x6f1   : > { %5408 = vmatprep.subr.bf16.mxu0 %v2769_v14  ;;  %6064 = vmatprep.subr.bf16.mxu1 %v2771_v27  ;;  %v2834_v14 = vunpack.c.h.s8.bf16 %v1082_v24  ;;  %v2841_v27 = vunpack.c.l.s8.bf16 %v1089_v48  ;;  %v2843_v55 = vunpack.c.l.s8.bf16 %v1091_v11  ;;  %v2851_v33 = vunpack.c.h.s8.bf16 %v1091_v11  ;;  %v1121_v24 = vld [vmem:[%s7801_s18 + $0x17e8] sm:$0xff]  ;;  %v1120_v11 = vld [vmem:[%s7801_s18 + $0x17e0] sm:$0xff] }
 0x6f4   : > { %5409 = vmatpush1.bf16.msra.mxu0 %v2768_v49  ;;  %6065 = vmatpush1.bf16.msra.mxu1 %v2770_v3  ;;  %v1090_v49 = vld [vmem:[%s7801_s18 + $0x16f0] sm:$0xff]  ;;  %v2840_v3 = vunpack.c.l.s8.bf16 %v1088_v30 }
 0x6f5   : > { %5410 = vmatprep.subr.bf16.mxu0 %v2777_v31  ;;  %6066 = vmatprep.subr.bf16.mxu1 %v2779_v26  ;;  %v2842_v31 = vunpack.c.l.s8.bf16 %v1090_v49  ;;  %v2849_v26 = vunpack.c.h.s8.bf16 %v1089_v48 }
 0x6f8   : > { %5411 = vmatpush1.bf16.msra.mxu0 %v2776_v37  ;;  %6067 = vmatpush1.bf16.msra.mxu1 %v2778_v62  ;;  %v1099_v37 = vld [vmem:[%s7801_s18 + $0x1738] sm:$0xff]  ;;  %v2848_v62 = vunpack.c.h.s8.bf16 %v1088_v30 }
 0x6f9   : > { %5412 = vmatprep.subr.bf16.mxu0 %v2785_v40  ;;  %6068 = vmatprep.subr.bf16.mxu1 %v2787_v41  ;;  %v2850_v40 = vunpack.c.h.s8.bf16 %v1090_v49  ;;  %v2857_v41 = vunpack.c.l.s8.bf16 %v1097_v35  ;;  %v2859_v39 = vunpack.c.l.s8.bf16 %v1099_v37  ;;  %v2867_v51 = vunpack.c.h.s8.bf16 %v1099_v37  ;;  %v1129_v49 = vld [vmem:[%s7801_s18 + $0x1828] sm:$0xff]  ;;  %v1128_v37 = vld [vmem:[%s7801_s18 + $0x1820] sm:$0xff] }
 0x6fc   : > { %5413 = vmatpush1.bf16.msra.mxu0 %v2784_v42  ;;  %6069 = vmatpush1.bf16.msra.mxu1 %v2786_v45  ;;  %v1098_v42 = vld [vmem:[%s7801_s18 + $0x1730] sm:$0xff]  ;;  %v2856_v45 = vunpack.c.l.s8.bf16 %v1096_v53 }
 0x6fd   : > { %5423 = vmatprep.subr.bf16.mxu0 %v2793_v6  ;;  %6079 = vmatprep.subr.bf16.mxu1 %v2795_v52  ;;  %v2858_v6 = vunpack.c.l.s8.bf16 %v1098_v42  ;;  %v2865_v52 = vunpack.c.h.s8.bf16 %v1097_v35 }
 0x6ff   : > { %5415 = vmatmul.mubr.bf16.vlgmr.msra.gmra.mrb[4].mxu0 %v8345_v47  ;;  %6071 = vmatmul.mubr.bf16.vlgmr.msra.gmra.mrb[4].mxu1 %v8345_v47  ;;  %v2810_v47 = vunpack.c.l.s8.bf16 %v1074_v15  ;;  %v1113_v15 = vld [vmem:[%s7801_s18 + $0x17a8] sm:$0xff] }
 0x700   : > { %5424 = vmatpush1.bf16.msra.mxu0 %v2792_v61  ;;  %6080 = vmatpush1.bf16.msra.mxu1 %v2794_v57  ;;  %v1107_v61 = vld [vmem:[%s7801_s18 + $0x1778] sm:$0xff]  ;;  %v2864_v57 = vunpack.c.h.s8.bf16 %v1096_v53 }
 0x701   : > { %5425 = vmatprep.subr.bf16.mxu0 %v2801_v58  ;;  %6081 = vmatprep.subr.bf16.mxu1 %v2803_v59  ;;  %v2866_v58 = vunpack.c.h.s8.bf16 %v1098_v42  ;;  %v2873_v59 = vunpack.c.l.s8.bf16 %v1105_v54  ;;  %v2875_v63 = vunpack.c.l.s8.bf16 %v1107_v61  ;;  %v2883_v5 = vunpack.c.h.s8.bf16 %v1107_v61  ;;  %v1137_v42 = vld [vmem:[%s7801_s18 + $0x1868] sm:$0xff]  ;;  %v1136_v61 = vld [vmem:[%s7801_s18 + $0x1860] sm:$0xff] }
 0x702   : > { %5455 = vmatprep.mubr.bf16.mxu0 %v8351_v17  ;;  %6111 = vmatprep.mubr.bf16.mxu1 %v8351_v17  ;;  %v2825_v17 = vunpack.c.l.s8.bf16 %v1081_v4 }
 0x704   : > { %5426 = vmatpush1.bf16.msra.mxu0 %v2800_v1  ;;  %6082 = vmatpush1.bf16.msra.mxu1 %v2802_v2  ;;  %v1106_v1 = vld [vmem:[%s7801_s18 + $0x1770] sm:$0xff]  ;;  %v2872_v2 = vunpack.c.l.s8.bf16 %v1104_v0 }
 0x705   : > { %5427 = vmatprep.subr.bf16.mxu0 %v2809_v8  ;;  %6083 = vmatprep.subr.bf16.mxu1 %v2811_v9  ;;  %v2874_v8 = vunpack.c.l.s8.bf16 %v1106_v1  ;;  %v2881_v9 = vunpack.c.h.s8.bf16 %v1105_v54 }
 0x708   : > { %5428 = vmatpush1.bf16.msra.mxu0 %v2808_v28  ;;  %6084 = vmatpush1.bf16.msra.mxu1 %v2810_v47  ;;  %v1115_v28 = vld [vmem:[%s7801_s18 + $0x17b8] sm:$0xff]  ;;  %v2880_v47 = vunpack.c.h.s8.bf16 %v1104_v0  ;;  %v1145_v0 = vld [vmem:[%s7801_s18 + $0x18a8] sm:$0xff] }
 0x709   : > { %5429 = vmatprep.subr.bf16.mxu0 %v2817_v50  ;;  %6085 = vmatprep.subr.bf16.mxu1 %v2819_v10  ;;  %v2882_v50 = vunpack.c.h.s8.bf16 %v1106_v1  ;;  %v2889_v10 = vunpack.c.l.s8.bf16 %v1113_v15  ;;  %v2891_v4 = vunpack.c.l.s8.bf16 %v1115_v28  ;;  %v2899_v60 = vunpack.c.h.s8.bf16 %v1115_v28  ;;  %v1147_v1 = vld [vmem:[%s7801_s18 + $0x18b8] sm:$0xff] }
 0x70c   : > { %5430 = vmatpush1.bf16.msra.mxu0 %v2816_v13  ;;  %6086 = vmatpush1.bf16.msra.mxu1 %v2818_v16  ;;  %v1114_v13 = vld [vmem:[%s7801_s18 + $0x17b0] sm:$0xff]  ;;  %v2888_v16 = vunpack.c.l.s8.bf16 %v1112_v12 }
 0x70d   : > { %5431 = vmatprep.subr.bf16.mxu0 %v2825_v17  ;;  %6087 = vmatprep.subr.bf16.mxu1 %v2827_v36  ;;  %v2890_v17 = vunpack.c.l.s8.bf16 %v1114_v13  ;;  %v2897_v36 = vunpack.c.h.s8.bf16 %v1113_v15  ;;  %v1146_v15 = vld [vmem:[%s7801_s18 + $0x18b0] sm:$0xff] }
 0x710   : > { %5432 = vmatpush1.bf16.msra.mxu0 %v2824_v20  ;;  %6088 = vmatpush1.bf16.msra.mxu1 %v2826_v7  ;;  %v1123_v20 = vld [vmem:[%s7801_s18 + $0x17f8] sm:$0xff]  ;;  %v2896_v7 = vunpack.c.h.s8.bf16 %v1112_v12 }
 0x711   : > { %5433 = vmatprep.subr.bf16.mxu0 %v2833_v22  ;;  %6089 = vmatprep.subr.bf16.mxu1 %v2835_v25  ;;  %v2898_v22 = vunpack.c.h.s8.bf16 %v1114_v13  ;;  %v2905_v25 = vunpack.c.l.s8.bf16 %v1121_v24  ;;  %v2907_v48 = vunpack.c.l.s8.bf16 %v1123_v20  ;;  %v2915_v30 = vunpack.c.h.s8.bf16 %v1123_v20  ;;  %v1155_v12 = vld [vmem:[%s7801_s18 + $0x18f8] sm:$0xff] }
 0x714   : > { %5434 = vmatpush1.bf16.msra.mxu0 %v2832_v44  ;;  %6090 = vmatpush1.bf16.msra.mxu1 %v2834_v14  ;;  %v1122_v44 = vld [vmem:[%s7801_s18 + $0x17f0] sm:$0xff]  ;;  %v2904_v14 = vunpack.c.l.s8.bf16 %v1120_v11 }
 0x715   : > { %5435 = vmatprep.subr.bf16.mxu0 %v2841_v27  ;;  %6091 = vmatprep.subr.bf16.mxu1 %v2843_v55  ;;  %v2906_v27 = vunpack.c.l.s8.bf16 %v1122_v44  ;;  %v2913_v55 = vunpack.c.h.s8.bf16 %v1121_v24  ;;  %v1154_v24 = vld [vmem:[%s7801_s18 + $0x18f0] sm:$0xff] }
 0x718   : > { %5436 = vmatpush1.bf16.msra.mxu0 %v2840_v3  ;;  %6092 = vmatpush1.bf16.msra.mxu1 %v2842_v31  ;;  %v1131_v3 = vld [vmem:[%s7801_s18 + $0x1838] sm:$0xff]  ;;  %v2912_v31 = vunpack.c.h.s8.bf16 %v1120_v11 }
 0x719   : > { %5437 = vmatprep.subr.bf16.mxu0 %v2849_v26  ;;  %6093 = vmatprep.subr.bf16.mxu1 %v2851_v33  ;;  %v2914_v26 = vunpack.c.h.s8.bf16 %v1122_v44  ;;  %v2921_v33 = vunpack.c.l.s8.bf16 %v1129_v49  ;;  %v2923_v35 = vunpack.c.l.s8.bf16 %v1131_v3  ;;  %v2931_v53 = vunpack.c.h.s8.bf16 %v1131_v3  ;;  %v1163_v11 = vld [vmem:[%s7801_s18 + $0x1938] sm:$0xff] }
 0x71c   : > { %5438 = vmatpush1.bf16.msra.mxu0 %v2848_v62  ;;  %6094 = vmatpush1.bf16.msra.mxu1 %v2850_v40  ;;  %v1130_v62 = vld [vmem:[%s7801_s18 + $0x1830] sm:$0xff]  ;;  %v2920_v40 = vunpack.c.l.s8.bf16 %v1128_v37 }
 0x71d   : > { %5439 = vmatprep.subr.bf16.mxu0 %v2857_v41  ;;  %6095 = vmatprep.subr.bf16.mxu1 %v2859_v39  ;;  %v2922_v41 = vunpack.c.l.s8.bf16 %v1130_v62  ;;  %v2929_v39 = vunpack.c.h.s8.bf16 %v1129_v49  ;;  %v1162_v49 = vld [vmem:[%s7801_s18 + $0x1930] sm:$0xff] }
 0x720   : > { %5440 = vmatpush1.bf16.msra.mxu0 %v2856_v45  ;;  %6096 = vmatpush1.bf16.msra.mxu1 %v2858_v6  ;;  %v1139_v45 = vld [vmem:[%s7801_s18 + $0x1878] sm:$0xff]  ;;  %v2928_v6 = vunpack.c.h.s8.bf16 %v1128_v37 }
 0x721   : > { %5441 = vmatprep.subr.bf16.mxu0 %v2865_v52  ;;  %6097 = vmatprep.subr.bf16.mxu1 %v2867_v51  ;;  %v2930_v52 = vunpack.c.h.s8.bf16 %v1130_v62  ;;  %v2937_v51 = vunpack.c.l.s8.bf16 %v1137_v42  ;;  %v2939_v54 = vunpack.c.l.s8.bf16 %v1139_v45  ;;  %v1171_v37 = vld [vmem:[%s7801_s18 + $0x1978] sm:$0xff] }
 0x724   : > { %5442 = vmatpush1.bf16.msra.mxu0 %v2864_v57  ;;  %6098 = vmatpush1.bf16.msra.mxu1 %v2866_v58  ;;  %v1138_v57 = vld [vmem:[%s7801_s18 + $0x1870] sm:$0xff]  ;;  %v2936_v58 = vunpack.c.l.s8.bf16 %v1136_v61 }
 0x725   : > { %5443 = vmatprep.subr.bf16.mxu0 %v2873_v59  ;;  %6099 = vmatprep.subr.bf16.mxu1 %v2875_v63  ;;  %v2945_v59 = vunpack.c.h.s8.bf16 %v1137_v42  ;;  %v2947_v63 = vunpack.c.h.s8.bf16 %v1139_v45  ;;  %v1170_v42 = vld [vmem:[%s7801_s18 + $0x1970] sm:$0xff] }
 0x728   : > { %5444 = vmatpush1.bf16.msra.mxu0 %v2872_v2  ;;  %6100 = vmatpush1.bf16.msra.mxu1 %v2874_v8  ;;  %v2944_v2 = vunpack.c.h.s8.bf16 %v1136_v61  ;;  %v2946_v8 = vunpack.c.h.s8.bf16 %v1138_v57  ;;  %v1179_v61 = vld [vmem:[%s7801_s18 + $0x19b8] sm:$0xff] }
 0x729   : > { %5445 = vmatprep.subr.bf16.mxu0 %v2881_v9  ;;  %6101 = vmatprep.subr.bf16.mxu1 %v2883_v5  ;;  %v2955_v9 = vunpack.c.l.s8.bf16 %v1147_v1  ;;  %v1144_v5 = vld [vmem:[%s7801_s18 + $0x18a0] sm:$0xff] }
 0x72a   : > { %v2952_v28 = vunpack.c.l.s8.bf16 %v1144_v5  ;;  %v2960_v13 = vunpack.c.h.s8.bf16 %v1144_v5  ;;  %v1187_v5 = vld [vmem:[%s7801_s18 + $0x19f8] sm:$0xff] }
 0x72c   : > { %5446 = vmatpush1.bf16.msra.mxu0 %v2880_v47  ;;  %6102 = vmatpush1.bf16.msra.mxu1 %v2882_v50  ;;  %v2954_v47 = vunpack.c.l.s8.bf16 %v1146_v15  ;;  %v2961_v50 = vunpack.c.h.s8.bf16 %v1145_v0 }
 0x72d   : > { %5447 = vmatprep.subr.bf16.mxu0 %v2889_v10  ;;  %6103 = vmatprep.subr.bf16.mxu1 %v2891_v4  ;;  %v2963_v10 = vunpack.c.h.s8.bf16 %v1147_v1  ;;  %v1153_v4 = vld [vmem:[%s7801_s18 + $0x18e8] sm:$0xff] }
 0x730   : > { %5448 = vmatpush1.bf16.msra.mxu0 %v2888_v16  ;;  %6104 = vmatpush1.bf16.msra.mxu1 %v2890_v17  ;;  %v2962_v16 = vunpack.c.h.s8.bf16 %v1146_v15  ;;  %v2969_v17 = vunpack.c.l.s8.bf16 %v1153_v4 }
 0x731   : > { %5449 = vmatprep.subr.bf16.mxu0 %v2897_v36  ;;  %6105 = vmatprep.subr.bf16.mxu1 %v2899_v60  ;;  %v2971_v36 = vunpack.c.l.s8.bf16 %v1155_v12  ;;  %v1152_v60 = vld [vmem:[%s7801_s18 + $0x18e0] sm:$0xff] }
 0x732   : > { %v2968_v20 = vunpack.c.l.s8.bf16 %v1152_v60  ;;  %v2976_v44 = vunpack.c.h.s8.bf16 %v1152_v60  ;;  %v1195_v60 = vld [vmem:[%s7801_s18 + $0x1a38] sm:$0xff] }
 0x734   : > { %5450 = vmatpush1.bf16.msra.mxu0 %v2896_v7  ;;  %6106 = vmatpush1.bf16.msra.mxu1 %v2898_v22  ;;  %v2970_v7 = vunpack.c.l.s8.bf16 %v1154_v24  ;;  %v2977_v22 = vunpack.c.h.s8.bf16 %v1153_v4  ;;  %v1186_v4 = vld [vmem:[%s7801_s18 + $0x19f0] sm:$0xff] }
 0x735   : > { %5451 = vmatprep.subr.bf16.mxu0 %v2905_v25  ;;  %6107 = vmatprep.subr.bf16.mxu1 %v2907_v48  ;;  %v2979_v25 = vunpack.c.h.s8.bf16 %v1155_v12  ;;  %v1161_v48 = vld [vmem:[%s7801_s18 + $0x1928] sm:$0xff] }
 0x738   : > { %5452 = vmatpush1.bf16.msra.mxu0 %v2904_v14  ;;  %6108 = vmatpush1.bf16.msra.mxu1 %v2906_v27  ;;  %v2978_v14 = vunpack.c.h.s8.bf16 %v1154_v24  ;;  %v2985_v27 = vunpack.c.l.s8.bf16 %v1161_v48 }
 0x739   : > { %5453 = vmatprep.subr.bf16.mxu0 %v2913_v55  ;;  %6109 = vmatprep.subr.bf16.mxu1 %v2915_v30  ;;  %v2987_v55 = vunpack.c.l.s8.bf16 %v1163_v11  ;;  %v1160_v30 = vld [vmem:[%s7801_s18 + $0x1920] sm:$0xff] }
 0x73a   : > { %v2984_v3 = vunpack.c.l.s8.bf16 %v1160_v30  ;;  %v2992_v62 = vunpack.c.h.s8.bf16 %v1160_v30  ;;  %v1203_v30 = vld [vmem:[%s7801_s18 + $0x1a78] sm:$0xff] }
 0x73c   : > { %5454 = vmatpush1.bf16.msra.mxu0 %v2912_v31  ;;  %6110 = vmatpush1.bf16.msra.mxu1 %v2914_v26  ;;  %v2986_v31 = vunpack.c.l.s8.bf16 %v1162_v49  ;;  %v2993_v26 = vunpack.c.h.s8.bf16 %v1161_v48  ;;  %v1194_v48 = vld [vmem:[%s7801_s18 + $0x1a30] sm:$0xff] }
 0x73d   : > { %5464 = vmatprep.subr.bf16.mxu0 %v2921_v33  ;;  %6120 = vmatprep.subr.bf16.mxu1 %v2923_v35  ;;  %v2995_v33 = vunpack.c.h.s8.bf16 %v1163_v11  ;;  %v1169_v35 = vld [vmem:[%s7801_s18 + $0x1968] sm:$0xff] }
 0x73f   : > { %5456 = vmatmul.mubr.bf16.vlgmr.msra.gmra.mrb[4].mxu0 %v8398_v34  ;;  %6112 = vmatmul.mubr.bf16.vlgmr.msra.gmra.mrb[4].mxu1 %v8398_v34  ;;  %v2938_v34 = vunpack.c.l.s8.bf16 %v1138_v57 }
 0x740   : > { %5465 = vmatpush1.bf16.msra.mxu0 %v2920_v40  ;;  %6121 = vmatpush1.bf16.msra.mxu1 %v2922_v41  ;;  %v2994_v40 = vunpack.c.h.s8.bf16 %v1162_v49  ;;  %v3001_v41 = vunpack.c.l.s8.bf16 %v1169_v35 }
 0x741   : > { %5466 = vmatprep.subr.bf16.mxu0 %v2929_v39  ;;  %6122 = vmatprep.subr.bf16.mxu1 %v2931_v53  ;;  %v3003_v39 = vunpack.c.l.s8.bf16 %v1171_v37  ;;  %v1168_v53 = vld [vmem:[%s7801_s18 + $0x1960] sm:$0xff] }
 0x742   : > { %5496 = vmatprep.mubr.bf16.mxu0 %v8403_v46  ;;  %6152 = vmatprep.mubr.bf16.mxu1 %v8403_v46  ;;  %v2953_v46 = vunpack.c.l.s8.bf16 %v1145_v0  ;;  %v3000_v45 = vunpack.c.l.s8.bf16 %v1168_v53  ;;  %v3008_v57 = vunpack.c.h.s8.bf16 %v1168_v53  ;;  %v1178_v0 = vld [vmem:[%s7801_s18 + $0x19b0] sm:$0xff] }
 0x744   : > { %5467 = vmatpush1.bf16.msra.mxu0 %v2928_v6  ;;  %6123 = vmatpush1.bf16.msra.mxu1 %v2930_v52  ;;  %v3002_v6 = vunpack.c.l.s8.bf16 %v1170_v42  ;;  %v3009_v52 = vunpack.c.h.s8.bf16 %v1169_v35  ;;  %v1202_v35 = vld [vmem:[%s7801_s18 + $0x1a70] sm:$0xff] }
 0x745   : > { %5468 = vmatprep.subr.bf16.mxu0 %v2937_v51  ;;  %6124 = vmatprep.subr.bf16.mxu1 %v2939_v54  ;;  %v3011_v51 = vunpack.c.h.s8.bf16 %v1171_v37  ;;  %v1177_v54 = vld [vmem:[%s7801_s18 + $0x19a8] sm:$0xff] }
 0x748   : > { %5469 = vmatpush1.bf16.msra.mxu0 %v2936_v58  ;;  %6125 = vmatpush1.bf16.msra.mxu1 %v2938_v34  ;;  %v3010_v58 = vunpack.c.h.s8.bf16 %v1170_v42  ;;  %v3017_v34 = vunpack.c.l.s8.bf16 %v1177_v54  ;;  %v3074_v42 = vunpack.c.h.s8.bf16 %v1202_v35 }
 0x749   : > { %5470 = vmatprep.subr.bf16.mxu0 %v2945_v59  ;;  %6126 = vmatprep.subr.bf16.mxu1 %v2947_v63  ;;  %v3019_v59 = vunpack.c.l.s8.bf16 %v1179_v61  ;;  %v1176_v63 = vld [vmem:[%s7801_s18 + $0x19a0] sm:$0xff] }
 0x74a   : > { %v3016_v1 = vunpack.c.l.s8.bf16 %v1176_v63  ;;  %v3024_v15 = vunpack.c.h.s8.bf16 %v1176_v63 }
 0x74c   : > { %5471 = vmatpush1.bf16.msra.mxu0 %v2944_v2  ;;  %6127 = vmatpush1.bf16.msra.mxu1 %v2946_v8  ;;  %v3018_v2 = vunpack.c.l.s8.bf16 %v1178_v0  ;;  %v3025_v8 = vunpack.c.h.s8.bf16 %v1177_v54 }
 0x74d   : > { %5472 = vmatprep.subr.bf16.mxu0 %v2953_v46  ;;  %6128 = vmatprep.subr.bf16.mxu1 %v2955_v9  ;;  %v3027_v46 = vunpack.c.h.s8.bf16 %v1179_v61  ;;  %v1185_v9 = vld [vmem:[%s7801_s18 + $0x19e8] sm:$0xff] }
 0x750   : > { %5473 = vmatpush1.bf16.msra.mxu0 %v2952_v28  ;;  %6129 = vmatpush1.bf16.msra.mxu1 %v2954_v47  ;;  %v3026_v28 = vunpack.c.h.s8.bf16 %v1178_v0  ;;  %v3033_v47 = vunpack.c.l.s8.bf16 %v1185_v9 }
 0x751   : > { %5474 = vmatprep.subr.bf16.mxu0 %v2961_v50  ;;  %6130 = vmatprep.subr.bf16.mxu1 %v2963_v10  ;;  %v3035_v50 = vunpack.c.l.s8.bf16 %v1187_v5  ;;  %v1184_v10 = vld [vmem:[%s7801_s18 + $0x19e0] sm:$0xff] }
 0x752   : > { %v3032_v12 = vunpack.c.l.s8.bf16 %v1184_v10  ;;  %v3040_v24 = vunpack.c.h.s8.bf16 %v1184_v10 }
 0x754   : > { %5475 = vmatpush1.bf16.msra.mxu0 %v2960_v13  ;;  %6131 = vmatpush1.bf16.msra.mxu1 %v2962_v16  ;;  %v3034_v13 = vunpack.c.l.s8.bf16 %v1186_v4  ;;  %v3041_v16 = vunpack.c.h.s8.bf16 %v1185_v9 }
 0x755   : > { %5476 = vmatprep.subr.bf16.mxu0 %v2969_v17  ;;  %6132 = vmatprep.subr.bf16.mxu1 %v2971_v36  ;;  %v3043_v17 = vunpack.c.h.s8.bf16 %v1187_v5  ;;  %v1193_v36 = vld [vmem:[%s7801_s18 + $0x1a28] sm:$0xff] }
 0x758   : > { %5477 = vmatpush1.bf16.msra.mxu0 %v2968_v20  ;;  %6133 = vmatpush1.bf16.msra.mxu1 %v2970_v7  ;;  %v3042_v20 = vunpack.c.h.s8.bf16 %v1186_v4  ;;  %v3049_v7 = vunpack.c.l.s8.bf16 %v1193_v36 }
 0x759   : > { %5478 = vmatprep.subr.bf16.mxu0 %v2977_v22  ;;  %6134 = vmatprep.subr.bf16.mxu1 %v2979_v25  ;;  %v3051_v22 = vunpack.c.l.s8.bf16 %v1195_v60  ;;  %v1192_v25 = vld [vmem:[%s7801_s18 + $0x1a20] sm:$0xff] }
 0x75a   : > { %v3048_v11 = vunpack.c.l.s8.bf16 %v1192_v25  ;;  %v3056_v49 = vunpack.c.h.s8.bf16 %v1192_v25 }
 0x75c   : > { %5479 = vmatpush1.bf16.msra.mxu0 %v2976_v44  ;;  %6135 = vmatpush1.bf16.msra.mxu1 %v2978_v14  ;;  %v3050_v44 = vunpack.c.l.s8.bf16 %v1194_v48  ;;  %v3057_v14 = vunpack.c.h.s8.bf16 %v1193_v36 }
 0x75d   : > { %5480 = vmatprep.subr.bf16.mxu0 %v2985_v27  ;;  %6136 = vmatprep.subr.bf16.mxu1 %v2987_v55  ;;  %v3059_v27 = vunpack.c.h.s8.bf16 %v1195_v60  ;;  %v1201_v55 = vld [vmem:[%s7801_s18 + $0x1a68] sm:$0xff] }
 0x760   : > { %5481 = vmatpush1.bf16.msra.mxu0 %v2984_v3  ;;  %6137 = vmatpush1.bf16.msra.mxu1 %v2986_v31  ;;  %v3058_v3 = vunpack.c.h.s8.bf16 %v1194_v48  ;;  %v3065_v31 = vunpack.c.l.s8.bf16 %v1201_v55 }
 0x761   : > { %5482 = vmatprep.subr.bf16.mxu0 %v2993_v26  ;;  %6138 = vmatprep.subr.bf16.mxu1 %v2995_v33  ;;  %v3067_v26 = vunpack.c.l.s8.bf16 %v1203_v30  ;;  %v1200_v33 = vld [vmem:[%s7801_s18 + $0x1a60] sm:$0xff] }
 0x762   : > { %v3064_v37 = vunpack.c.l.s8.bf16 %v1200_v33  ;;  %v3072_v53 = vunpack.c.h.s8.bf16 %v1200_v33 }
 0x764   : > { %5483 = vmatpush1.bf16.msra.mxu0 %v2992_v62  ;;  %6139 = vmatpush1.bf16.msra.mxu1 %v2994_v40  ;;  %v3073_v62 = vunpack.c.h.s8.bf16 %v1201_v55  ;;  %v3075_v40 = vunpack.c.h.s8.bf16 %v1203_v30 }
 0x765   : > { %5484 = vmatprep.subr.bf16.mxu0 %v3001_v41  ;;  %6140 = vmatprep.subr.bf16.mxu1 %v3003_v39  ;;  %v1209_v41 = vld [vmem:[%s7801_s18 + $0x1aa8] sm:$0xff]  ;;  %v1211_v39 = vld [vmem:[%s7801_s18 + $0x1ab8] sm:$0xff] }
 0x766   : > { %v3089_v61 = vunpack.c.h.s8.bf16 %v1209_v41 }
 0x768   : > { %5485 = vmatpush1.bf16.msra.mxu0 %v3000_v45  ;;  %6141 = vmatpush1.bf16.msra.mxu1 %v3002_v6  ;;  %v3083_v45 = vunpack.c.l.s8.bf16 %v1211_v39  ;;  %v1208_v6 = vld [vmem:[%s7801_s18 + $0x1aa0] sm:$0xff] }
 0x769   : > { %5486 = vmatprep.subr.bf16.mxu0 %v3009_v52  ;;  %6142 = vmatprep.subr.bf16.mxu1 %v3011_v51  ;;  %v1210_v52 = vld [vmem:[%s7801_s18 + $0x1ab0] sm:$0xff]  ;;  %v3080_v51 = vunpack.c.l.s8.bf16 %v1208_v6 }
 0x76a   : > { %v3082_v54 = vunpack.c.l.s8.bf16 %v1210_v52  ;;  %v3090_v63 = vunpack.c.h.s8.bf16 %v1210_v52 }
 0x76c   : > { %5487 = vmatpush1.bf16.msra.mxu0 %v3008_v57  ;;  %6143 = vmatpush1.bf16.msra.mxu1 %v3010_v58  ;;  %v3091_v57 = vunpack.c.h.s8.bf16 %v1211_v39  ;;  %v1217_v58 = vld [vmem:[%s7801_s18 + $0x1ae8] sm:$0xff] }
 0x76d   : > { %5488 = vmatprep.subr.bf16.mxu0 %v3017_v34  ;;  %6144 = vmatprep.subr.bf16.mxu1 %v3019_v59  ;;  %v1219_v34 = vld [vmem:[%s7801_s18 + $0x1af8] sm:$0xff]  ;;  %v3088_v59 = vunpack.c.h.s8.bf16 %v1208_v6  ;;  %v3097_v0 = vunpack.c.l.s8.bf16 %v1217_v58  ;;  %v3105_v5 = vunpack.c.h.s8.bf16 %v1217_v58 }
 0x770   : > { %5489 = vmatpush1.bf16.msra.mxu0 %v3016_v1  ;;  %6145 = vmatpush1.bf16.msra.mxu1 %v3018_v2  ;;  %v3099_v1 = vunpack.c.l.s8.bf16 %v1219_v34  ;;  %v1216_v2 = vld [vmem:[%s7801_s18 + $0x1ae0] sm:$0xff] }
 0x771   : > { %5490 = vmatprep.subr.bf16.mxu0 %v3025_v8  ;;  %6146 = vmatprep.subr.bf16.mxu1 %v3027_v46  ;;  %v1218_v8 = vld [vmem:[%s7801_s18 + $0x1af0] sm:$0xff]  ;;  %v3096_v46 = vunpack.c.l.s8.bf16 %v1216_v2 }
 0x772   : > { %v3098_v9 = vunpack.c.l.s8.bf16 %v1218_v8  ;;  %v3106_v10 = vunpack.c.h.s8.bf16 %v1218_v8 }
 0x774   : > { %5491 = vmatpush1.bf16.msra.mxu0 %v3024_v15  ;;  %6147 = vmatpush1.bf16.msra.mxu1 %v3026_v28  ;;  %v3107_v15 = vunpack.c.h.s8.bf16 %v1219_v34  ;;  %v1225_v28 = vld [vmem:[%s7801_s18 + $0x1b28] sm:$0xff] }
 0x775   : > { %5492 = vmatprep.subr.bf16.mxu0 %v3033_v47  ;;  %6148 = vmatprep.subr.bf16.mxu1 %v3035_v50  ;;  %v1227_v47 = vld [vmem:[%s7801_s18 + $0x1b38] sm:$0xff]  ;;  %v3104_v50 = vunpack.c.h.s8.bf16 %v1216_v2  ;;  %v3113_v4 = vunpack.c.l.s8.bf16 %v1225_v28  ;;  %v3121_v60 = vunpack.c.h.s8.bf16 %v1225_v28 }
 0x778   : > { %5493 = vmatpush1.bf16.msra.mxu0 %v3032_v12  ;;  %6149 = vmatpush1.bf16.msra.mxu1 %v3034_v13  ;;  %v3115_v12 = vunpack.c.l.s8.bf16 %v1227_v47  ;;  %v1224_v13 = vld [vmem:[%s7801_s18 + $0x1b20] sm:$0xff] }
 0x779   : > { %5494 = vmatprep.subr.bf16.mxu0 %v3041_v16  ;;  %6150 = vmatprep.subr.bf16.mxu1 %v3043_v17  ;;  %v1226_v16 = vld [vmem:[%s7801_s18 + $0x1b30] sm:$0xff]  ;;  %v3112_v17 = vunpack.c.l.s8.bf16 %v1224_v13 }
 0x77a   : > { %v3114_v36 = vunpack.c.l.s8.bf16 %v1226_v16  ;;  %v3122_v25 = vunpack.c.h.s8.bf16 %v1226_v16 }
 0x77c   : > { %5495 = vmatpush1.bf16.msra.mxu0 %v3040_v24  ;;  %6151 = vmatpush1.bf16.msra.mxu1 %v3042_v20  ;;  %v3123_v24 = vunpack.c.h.s8.bf16 %v1227_v47  ;;  %v1233_v20 = vld [vmem:[%s7801_s18 + $0x1b68] sm:$0xff] }
 0x77d   : > { %5505 = vmatprep.subr.bf16.mxu0 %v3049_v7  ;;  %6161 = vmatprep.subr.bf16.mxu1 %v3051_v22  ;;  %v1235_v7 = vld [vmem:[%s7801_s18 + $0x1b78] sm:$0xff]  ;;  %v3120_v22 = vunpack.c.h.s8.bf16 %v1224_v13  ;;  %v3129_v48 = vunpack.c.l.s8.bf16 %v1233_v20  ;;  %v3137_v30 = vunpack.c.h.s8.bf16 %v1233_v20 }
 0x77f   : > { %5497 = vmatmul.mubr.bf16.vlgmr.msra.gmra.mrb[4].mxu0 %v8441_v23  ;;  %6153 = vmatmul.mubr.bf16.vlgmr.msra.gmra.mrb[4].mxu1 %v8441_v23  ;;  %v3066_v23 = vunpack.c.l.s8.bf16 %v1202_v35 }
 0x780   : > { %5506 = vmatpush1.bf16.msra.mxu0 %v3048_v11  ;;  %6162 = vmatpush1.bf16.msra.mxu1 %v3050_v44  ;;  %v3131_v11 = vunpack.c.l.s8.bf16 %v1235_v7  ;;  %v1232_v44 = vld [vmem:[%s7801_s18 + $0x1b60] sm:$0xff] }
 0x781   : > { %5507 = vmatprep.subr.bf16.mxu0 %v3057_v14  ;;  %6163 = vmatprep.subr.bf16.mxu1 %v3059_v27  ;;  %v1234_v14 = vld [vmem:[%s7801_s18 + $0x1b70] sm:$0xff]  ;;  %v3128_v27 = vunpack.c.l.s8.bf16 %v1232_v44 }
 0x782   : > { %5537 = vmatprep.mubr.bf16.mxu0 %v8447_v32  ;;  %6193 = vmatprep.mubr.bf16.mxu1 %v8447_v32  ;;  %v3081_v32 = vunpack.c.l.s8.bf16 %v1209_v41  ;;  %v3130_v55 = vunpack.c.l.s8.bf16 %v1234_v14  ;;  %v3138_v33 = vunpack.c.h.s8.bf16 %v1234_v14  ;;  %v1272_v14 = vld [vmem:[%s7801_s18 + $0x1ca0] sm:$0xff] }
 0x784   : > { %5508 = vmatpush1.bf16.msra.mxu0 %v3056_v49  ;;  %6164 = vmatpush1.bf16.msra.mxu1 %v3058_v3  ;;  %v3139_v49 = vunpack.c.h.s8.bf16 %v1235_v7  ;;  %v1241_v3 = vld [vmem:[%s7801_s18 + $0x1ba8] sm:$0xff] }
 0x785   : > { %5509 = vmatprep.subr.bf16.mxu0 %v3065_v31  ;;  %6165 = vmatprep.subr.bf16.mxu1 %v3067_v26  ;;  %v1243_v31 = vld [vmem:[%s7801_s18 + $0x1bb8] sm:$0xff]  ;;  %v3136_v26 = vunpack.c.h.s8.bf16 %v1232_v44  ;;  %v3145_v35 = vunpack.c.l.s8.bf16 %v1241_v3  ;;  %v3153_v39 = vunpack.c.h.s8.bf16 %v1241_v3 }
 0x788   : > { %5510 = vmatpush1.bf16.msra.mxu0 %v3064_v37  ;;  %6166 = vmatpush1.bf16.msra.mxu1 %v3066_v23  ;;  %v3147_v37 = vunpack.c.l.s8.bf16 %v1243_v31  ;;  %v1240_v23 = vld [vmem:[%s7801_s18 + $0x1ba0] sm:$0xff] }
 0x789   : > { %5511 = vmatprep.subr.bf16.mxu0 %v3073_v62  ;;  %6167 = vmatprep.subr.bf16.mxu1 %v3075_v40  ;;  %v1242_v62 = vld [vmem:[%s7801_s18 + $0x1bb0] sm:$0xff]  ;;  %v3144_v40 = vunpack.c.l.s8.bf16 %v1240_v23 }
 0x78a   : > { %v3146_v41 = vunpack.c.l.s8.bf16 %v1242_v62  ;;  %v3154_v6 = vunpack.c.h.s8.bf16 %v1242_v62  ;;  %v1280_v62 = vld [vmem:[%s7801_s18 + $0x1ce0] sm:$0xff] }
 0x78c   : > { %5512 = vmatpush1.bf16.msra.mxu0 %v3072_v53  ;;  %6168 = vmatpush1.bf16.msra.mxu1 %v3074_v42  ;;  %v3155_v53 = vunpack.c.h.s8.bf16 %v1243_v31  ;;  %v1249_v42 = vld [vmem:[%s7801_s18 + $0x1be8] sm:$0xff] }
 0x78d   : > { %5513 = vmatprep.subr.bf16.mxu0 %v3081_v32  ;;  %6169 = vmatprep.subr.bf16.mxu1 %v3083_v45  ;;  %v1251_v32 = vld [vmem:[%s7801_s18 + $0x1bf8] sm:$0xff]  ;;  %v3152_v45 = vunpack.c.h.s8.bf16 %v1240_v23  ;;  %v3161_v52 = vunpack.c.l.s8.bf16 %v1249_v42  ;;  %v3169_v34 = vunpack.c.h.s8.bf16 %v1249_v42  ;;  %v1281_v31 = vld [vmem:[%s7801_s18 + $0x1ce8] sm:$0xff] }
 0x790   : > { %5514 = vmatpush1.bf16.msra.mxu0 %v3080_v51  ;;  %6170 = vmatpush1.bf16.msra.mxu1 %v3082_v54  ;;  %v3163_v51 = vunpack.c.l.s8.bf16 %v1251_v32  ;;  %v1248_v54 = vld [vmem:[%s7801_s18 + $0x1be0] sm:$0xff] }
 0x791   : > { %5515 = vmatprep.subr.bf16.mxu0 %v3089_v61  ;;  %6171 = vmatprep.subr.bf16.mxu1 %v3091_v57  ;;  %v1250_v61 = vld [vmem:[%s7801_s18 + $0x1bf0] sm:$0xff]  ;;  %v3160_v57 = vunpack.c.l.s8.bf16 %v1248_v54 }
 0x792   : > { %v3162_v58 = vunpack.c.l.s8.bf16 %v1250_v61  ;;  %v3170_v2 = vunpack.c.h.s8.bf16 %v1250_v61  ;;  %v1288_v61 = vld [vmem:[%s7801_s18 + $0x1d20] sm:$0xff] }
 0x794   : > { %5516 = vmatpush1.bf16.msra.mxu0 %v3088_v59  ;;  %6172 = vmatpush1.bf16.msra.mxu1 %v3090_v63  ;;  %v3171_v59 = vunpack.c.h.s8.bf16 %v1251_v32  ;;  %v1257_v63 = vld [vmem:[%s7801_s18 + $0x1c28] sm:$0xff] }
 0x795   : > { %5517 = vmatprep.subr.bf16.mxu0 %v3097_v0  ;;  %6173 = vmatprep.subr.bf16.mxu1 %v3099_v1  ;;  %v1259_v0 = vld [vmem:[%s7801_s18 + $0x1c38] sm:$0xff]  ;;  %v3168_v1 = vunpack.c.h.s8.bf16 %v1248_v54  ;;  %v3177_v8 = vunpack.c.l.s8.bf16 %v1257_v63  ;;  %v3185_v47 = vunpack.c.h.s8.bf16 %v1257_v63  ;;  %v1289_v32 = vld [vmem:[%s7801_s18 + $0x1d28] sm:$0xff] }
 0x798   : > { %5518 = vmatpush1.bf16.msra.mxu0 %v3096_v46  ;;  %6174 = vmatpush1.bf16.msra.mxu1 %v3098_v9  ;;  %v3179_v46 = vunpack.c.l.s8.bf16 %v1259_v0  ;;  %v1256_v9 = vld [vmem:[%s7801_s18 + $0x1c20] sm:$0xff] }
 0x799   : > { %5519 = vmatprep.subr.bf16.mxu0 %v3105_v5  ;;  %6175 = vmatprep.subr.bf16.mxu1 %v3107_v15  ;;  %v1258_v5 = vld [vmem:[%s7801_s18 + $0x1c30] sm:$0xff]  ;;  %v3176_v15 = vunpack.c.l.s8.bf16 %v1256_v9 }
 0x79a   : > { %v3178_v28 = vunpack.c.l.s8.bf16 %v1258_v5  ;;  %v3186_v13 = vunpack.c.h.s8.bf16 %v1258_v5  ;;  %v1296_v5 = vld [vmem:[%s7801_s18 + $0x1d60] sm:$0xff] }
 0x79c   : > { %5520 = vmatpush1.bf16.msra.mxu0 %v3104_v50  ;;  %6176 = vmatpush1.bf16.msra.mxu1 %v3106_v10  ;;  %v3187_v50 = vunpack.c.h.s8.bf16 %v1259_v0  ;;  %v1265_v10 = vld [vmem:[%s7801_s18 + $0x1c68] sm:$0xff] }
 0x79d   : > { %5521 = vmatprep.subr.bf16.mxu0 %v3113_v4  ;;  %6177 = vmatprep.subr.bf16.mxu1 %v3115_v12  ;;  %v1267_v4 = vld [vmem:[%s7801_s18 + $0x1c78] sm:$0xff]  ;;  %v3184_v12 = vunpack.c.h.s8.bf16 %v1256_v9  ;;  %v3193_v16 = vunpack.c.l.s8.bf16 %v1265_v10  ;;  %v3201_v20 = vunpack.c.h.s8.bf16 %v1265_v10  ;;  %v1297_v0 = vld [vmem:[%s7801_s18 + $0x1d68] sm:$0xff] }
 0x79e   : > { %v3203_v7 = vunpack.c.h.s8.bf16 %v1267_v4 }
 0x7a0   : > { %5522 = vmatpush1.bf16.msra.mxu0 %v3112_v17  ;;  %6178 = vmatpush1.bf16.msra.mxu1 %v3114_v36  ;;  %v3195_v17 = vunpack.c.l.s8.bf16 %v1267_v4  ;;  %v1264_v36 = vld [vmem:[%s7801_s18 + $0x1c60] sm:$0xff]  ;;  %v1305_v4 = vld [vmem:[%s7801_s18 + $0x1da8] sm:$0xff] }
 0x7a1   : > { %5523 = vmatprep.subr.bf16.mxu0 %v3121_v60  ;;  %6179 = vmatprep.subr.bf16.mxu1 %v3123_v24  ;;  %v1266_v60 = vld [vmem:[%s7801_s18 + $0x1c70] sm:$0xff]  ;;  %v3192_v24 = vunpack.c.l.s8.bf16 %v1264_v36 }
 0x7a4   : > { %5524 = vmatpush1.bf16.msra.mxu0 %v3120_v22  ;;  %6180 = vmatpush1.bf16.msra.mxu1 %v3122_v25  ;;  %v1273_v22 = vld [vmem:[%s7801_s18 + $0x1ca8] sm:$0xff]  ;;  %v1275_v25 = vld [vmem:[%s7801_s18 + $0x1cb8] sm:$0xff] }
 0x7a5   : > { %5525 = vmatprep.subr.bf16.mxu0 %v3129_v48  ;;  %6181 = vmatprep.subr.bf16.mxu1 %v3131_v11  ;;  %v3200_v48 = vunpack.c.h.s8.bf16 %v1264_v36  ;;  %v3202_v11 = vunpack.c.h.s8.bf16 %v1266_v60  ;;  %v3211_v44 = vunpack.c.l.s8.bf16 %v1275_v25  ;;  %v3219_v3 = vunpack.c.h.s8.bf16 %v1275_v25  ;;  %v1313_v25 = vld [vmem:[%s7801_s18 + $0x1de8] sm:$0xff] }
 0x7a8   : > { %5526 = vmatpush1.bf16.msra.mxu0 %v3128_v27  ;;  %6182 = vmatpush1.bf16.msra.mxu1 %v3130_v55  ;;  %v1274_v27 = vld [vmem:[%s7801_s18 + $0x1cb0] sm:$0xff]  ;;  %v3208_v55 = vunpack.c.l.s8.bf16 %v1272_v14 }
 0x7a9   : > { %5527 = vmatprep.subr.bf16.mxu0 %v3137_v30  ;;  %6183 = vmatprep.subr.bf16.mxu1 %v3139_v49  ;;  %v3210_v30 = vunpack.c.l.s8.bf16 %v1274_v27  ;;  %v3217_v49 = vunpack.c.h.s8.bf16 %v1273_v22 }
 0x7ac   : > { %5528 = vmatpush1.bf16.msra.mxu0 %v3136_v26  ;;  %6184 = vmatpush1.bf16.msra.mxu1 %v3138_v33  ;;  %v1283_v26 = vld [vmem:[%s7801_s18 + $0x1cf8] sm:$0xff]  ;;  %v3216_v33 = vunpack.c.h.s8.bf16 %v1272_v14 }
 0x7ad   : > { %5529 = vmatprep.subr.bf16.mxu0 %v3145_v35  ;;  %6185 = vmatprep.subr.bf16.mxu1 %v3147_v37  ;;  %v3218_v35 = vunpack.c.h.s8.bf16 %v1274_v27  ;;  %v3225_v37 = vunpack.c.l.s8.bf16 %v1281_v31  ;;  %v3227_v23 = vunpack.c.l.s8.bf16 %v1283_v26  ;;  %v3235_v42 = vunpack.c.h.s8.bf16 %v1283_v26  ;;  %v1312_v27 = vld [vmem:[%s7801_s18 + $0x1de0] sm:$0xff]  ;;  %v1321_v26 = vld [vmem:[%s7801_s18 + $0x1e28] sm:$0xff] }
 0x7b0   : > { %5530 = vmatpush1.bf16.msra.mxu0 %v3144_v40  ;;  %6186 = vmatpush1.bf16.msra.mxu1 %v3146_v41  ;;  %v1282_v40 = vld [vmem:[%s7801_s18 + $0x1cf0] sm:$0xff]  ;;  %v3224_v41 = vunpack.c.l.s8.bf16 %v1280_v62 }
 0x7b1   : > { %5531 = vmatprep.subr.bf16.mxu0 %v3153_v39  ;;  %6187 = vmatprep.subr.bf16.mxu1 %v3155_v53  ;;  %v3226_v39 = vunpack.c.l.s8.bf16 %v1282_v40  ;;  %v3233_v53 = vunpack.c.h.s8.bf16 %v1281_v31 }
 0x7b4   : > { %5532 = vmatpush1.bf16.msra.mxu0 %v3152_v45  ;;  %6188 = vmatpush1.bf16.msra.mxu1 %v3154_v6  ;;  %v1291_v45 = vld [vmem:[%s7801_s18 + $0x1d38] sm:$0xff]  ;;  %v3232_v6 = vunpack.c.h.s8.bf16 %v1280_v62 }
 0x7b5   : > { %5533 = vmatprep.subr.bf16.mxu0 %v3161_v52  ;;  %6189 = vmatprep.subr.bf16.mxu1 %v3163_v51  ;;  %v3234_v52 = vunpack.c.h.s8.bf16 %v1282_v40  ;;  %v3241_v51 = vunpack.c.l.s8.bf16 %v1289_v32  ;;  %v3243_v54 = vunpack.c.l.s8.bf16 %v1291_v45  ;;  %v3251_v63 = vunpack.c.h.s8.bf16 %v1291_v45  ;;  %v1320_v40 = vld [vmem:[%s7801_s18 + $0x1e20] sm:$0xff]  ;;  %v1329_v45 = vld [vmem:[%s7801_s18 + $0x1e68] sm:$0xff] }
 0x7b8   : > { %5534 = vmatpush1.bf16.msra.mxu0 %v3160_v57  ;;  %6190 = vmatpush1.bf16.msra.mxu1 %v3162_v58  ;;  %v1290_v57 = vld [vmem:[%s7801_s18 + $0x1d30] sm:$0xff]  ;;  %v3240_v58 = vunpack.c.l.s8.bf16 %v1288_v61 }
 0x7b9   : > { %5535 = vmatprep.subr.bf16.mxu0 %v3169_v34  ;;  %6191 = vmatprep.subr.bf16.mxu1 %v3171_v59  ;;  %v3242_v34 = vunpack.c.l.s8.bf16 %v1290_v57  ;;  %v3249_v59 = vunpack.c.h.s8.bf16 %v1289_v32 }
 0x7bc   : > { %5536 = vmatpush1.bf16.msra.mxu0 %v3168_v1  ;;  %6192 = vmatpush1.bf16.msra.mxu1 %v3170_v2  ;;  %v1299_v1 = vld [vmem:[%s7801_s18 + $0x1d78] sm:$0xff]  ;;  %v3248_v2 = vunpack.c.h.s8.bf16 %v1288_v61 }
 0x7bd   : > { %5546 = vmatprep.subr.bf16.mxu0 %v3177_v8  ;;  %6202 = vmatprep.subr.bf16.mxu1 %v3179_v46  ;;  %v3250_v8 = vunpack.c.h.s8.bf16 %v1290_v57  ;;  %v3257_v46 = vunpack.c.l.s8.bf16 %v1297_v0  ;;  %v3259_v9 = vunpack.c.l.s8.bf16 %v1299_v1  ;;  %v3267_v10 = vunpack.c.h.s8.bf16 %v1299_v1  ;;  %v1328_v57 = vld [vmem:[%s7801_s18 + $0x1e60] sm:$0xff]  ;;  %v1339_v1 = vld [vmem:[%s7801_s18 + $0x1eb8] sm:$0xff] }
 0x7bf   : > { %5538 = vmatmul.mubr.bf16.vlgmr.msra.gmra.mrb[4].mxu0 %v8492_v18  ;;  %6194 = vmatmul.mubr.bf16.vlgmr.msra.gmra.mrb[4].mxu1 %v8492_v18  ;;  %v3194_v18 = vunpack.c.l.s8.bf16 %v1266_v60  ;;  %v1304_v60 = vld [vmem:[%s7801_s18 + $0x1da0] sm:$0xff] }
 0x7c0   : > { %5547 = vmatpush1.bf16.msra.mxu0 %v3176_v15  ;;  %6203 = vmatpush1.bf16.msra.mxu1 %v3178_v28  ;;  %v1298_v15 = vld [vmem:[%s7801_s18 + $0x1d70] sm:$0xff]  ;;  %v3256_v28 = vunpack.c.l.s8.bf16 %v1296_v5 }
 0x7c1   : > { %5548 = vmatprep.subr.bf16.mxu0 %v3185_v47  ;;  %6204 = vmatprep.subr.bf16.mxu1 %v3187_v50  ;;  %v3258_v47 = vunpack.c.l.s8.bf16 %v1298_v15  ;;  %v3265_v50 = vunpack.c.h.s8.bf16 %v1297_v0  ;;  %v1337_v0 = vld [vmem:[%s7801_s18 + $0x1ea8] sm:$0xff] }
 0x7c2   : > { %5578 = vmatprep.mubr.bf16.mxu0 %v8497_v29  ;;  %6234 = vmatprep.mubr.bf16.mxu1 %v8497_v29  ;;  %v3209_v29 = vunpack.c.l.s8.bf16 %v1273_v22 }
 0x7c4   : > { %5549 = vmatpush1.bf16.msra.mxu0 %v3184_v12  ;;  %6205 = vmatpush1.bf16.msra.mxu1 %v3186_v13  ;;  %v1307_v12 = vld [vmem:[%s7801_s18 + $0x1db8] sm:$0xff]  ;;  %v3264_v13 = vunpack.c.h.s8.bf16 %v1296_v5  ;;  %v1338_v5 = vld [vmem:[%s7801_s18 + $0x1eb0] sm:$0xff] }
 0x7c5   : > { %5550 = vmatprep.subr.bf16.mxu0 %v3193_v16  ;;  %6206 = vmatprep.subr.bf16.mxu1 %v3195_v17  ;;  %v3266_v16 = vunpack.c.h.s8.bf16 %v1298_v15  ;;  %v3273_v17 = vunpack.c.l.s8.bf16 %v1305_v4  ;;  %v3275_v36 = vunpack.c.l.s8.bf16 %v1307_v12  ;;  %v3283_v22 = vunpack.c.h.s8.bf16 %v1307_v12 }
 0x7c8   : > { %5551 = vmatpush1.bf16.msra.mxu0 %v3192_v24  ;;  %6207 = vmatpush1.bf16.msra.mxu1 %v3194_v18  ;;  %v1306_v24 = vld [vmem:[%s7801_s18 + $0x1db0] sm:$0xff]  ;;  %v3272_v18 = vunpack.c.l.s8.bf16 %v1304_v60 }
 0x7c9   : > { %5552 = vmatprep.subr.bf16.mxu0 %v3201_v20  ;;  %6208 = vmatprep.subr.bf16.mxu1 %v3203_v7  ;;  %v3274_v20 = vunpack.c.l.s8.bf16 %v1306_v24  ;;  %v3281_v7 = vunpack.c.h.s8.bf16 %v1305_v4  ;;  %v1347_v4 = vld [vmem:[%s7801_s18 + $0x1ef8] sm:$0xff] }
 0x7cc   : > { %5553 = vmatpush1.bf16.msra.mxu0 %v3200_v48  ;;  %6209 = vmatpush1.bf16.msra.mxu1 %v3202_v11  ;;  %v1315_v48 = vld [vmem:[%s7801_s18 + $0x1df8] sm:$0xff]  ;;  %v3280_v11 = vunpack.c.h.s8.bf16 %v1304_v60  ;;  %v1346_v60 = vld [vmem:[%s7801_s18 + $0x1ef0] sm:$0xff] }
 0x7cd   : > { %5554 = vmatprep.subr.bf16.mxu0 %v3209_v29  ;;  %6210 = vmatprep.subr.bf16.mxu1 %v3211_v44  ;;  %v3282_v29 = vunpack.c.h.s8.bf16 %v1306_v24  ;;  %v3289_v44 = vunpack.c.l.s8.bf16 %v1313_v25  ;;  %v3291_v14 = vunpack.c.l.s8.bf16 %v1315_v48  ;;  %v3299_v31 = vunpack.c.h.s8.bf16 %v1315_v48 }
 0x7d0   : > { %5555 = vmatpush1.bf16.msra.mxu0 %v3208_v55  ;;  %6211 = vmatpush1.bf16.msra.mxu1 %v3210_v30  ;;  %v1314_v55 = vld [vmem:[%s7801_s18 + $0x1df0] sm:$0xff]  ;;  %v3288_v30 = vunpack.c.l.s8.bf16 %v1312_v27 }
 0x7d1   : > { %5556 = vmatprep.subr.bf16.mxu0 %v3217_v49  ;;  %6212 = vmatprep.subr.bf16.mxu1 %v3219_v3  ;;  %v3290_v49 = vunpack.c.l.s8.bf16 %v1314_v55  ;;  %v3297_v3 = vunpack.c.h.s8.bf16 %v1313_v25  ;;  %v1355_v25 = vld [vmem:[%s7801_s18 + $0x1f38] sm:$0xff] }
 0x7d4   : > { %5557 = vmatpush1.bf16.msra.mxu0 %v3216_v33  ;;  %6213 = vmatpush1.bf16.msra.mxu1 %v3218_v35  ;;  %v1323_v33 = vld [vmem:[%s7801_s18 + $0x1e38] sm:$0xff]  ;;  %v3296_v35 = vunpack.c.h.s8.bf16 %v1312_v27  ;;  %v1354_v27 = vld [vmem:[%s7801_s18 + $0x1f30] sm:$0xff] }
 0x7d5   : > { %5558 = vmatprep.subr.bf16.mxu0 %v3225_v37  ;;  %6214 = vmatprep.subr.bf16.mxu1 %v3227_v23  ;;  %v3298_v37 = vunpack.c.h.s8.bf16 %v1314_v55  ;;  %v3305_v23 = vunpack.c.l.s8.bf16 %v1321_v26  ;;  %v3307_v62 = vunpack.c.l.s8.bf16 %v1323_v33  ;;  %v3315_v32 = vunpack.c.h.s8.bf16 %v1323_v33 }
 0x7d8   : > { %5559 = vmatpush1.bf16.msra.mxu0 %v3224_v41  ;;  %6215 = vmatpush1.bf16.msra.mxu1 %v3226_v39  ;;  %v1322_v41 = vld [vmem:[%s7801_s18 + $0x1e30] sm:$0xff]  ;;  %v3304_v39 = vunpack.c.l.s8.bf16 %v1320_v40 }
 0x7d9   : > { %5560 = vmatprep.subr.bf16.mxu0 %v3233_v53  ;;  %6216 = vmatprep.subr.bf16.mxu1 %v3235_v42  ;;  %v3306_v53 = vunpack.c.l.s8.bf16 %v1322_v41  ;;  %v3313_v42 = vunpack.c.h.s8.bf16 %v1321_v26  ;;  %v1363_v26 = vld [vmem:[%s7801_s18 + $0x1f78] sm:$0xff] }
 0x7dc   : > { %5561 = vmatpush1.bf16.msra.mxu0 %v3232_v6  ;;  %6217 = vmatpush1.bf16.msra.mxu1 %v3234_v52  ;;  %v1331_v6 = vld [vmem:[%s7801_s18 + $0x1e78] sm:$0xff]  ;;  %v3312_v52 = vunpack.c.h.s8.bf16 %v1320_v40  ;;  %v1362_v40 = vld [vmem:[%s7801_s18 + $0x1f70] sm:$0xff] }
 0x7dd   : > { %5562 = vmatprep.subr.bf16.mxu0 %v3241_v51  ;;  %6218 = vmatprep.subr.bf16.mxu1 %v3243_v54  ;;  %v3314_v51 = vunpack.c.h.s8.bf16 %v1322_v41  ;;  %v3321_v54 = vunpack.c.l.s8.bf16 %v1329_v45  ;;  %v3323_v61 = vunpack.c.l.s8.bf16 %v1331_v6 }
 0x7e0   : > { %5563 = vmatpush1.bf16.msra.mxu0 %v3240_v58  ;;  %6219 = vmatpush1.bf16.msra.mxu1 %v3242_v34  ;;  %v1330_v58 = vld [vmem:[%s7801_s18 + $0x1e70] sm:$0xff]  ;;  %v3320_v34 = vunpack.c.l.s8.bf16 %v1328_v57 }
 0x7e1   : > { %5564 = vmatprep.subr.bf16.mxu0 %v3249_v59  ;;  %6220 = vmatprep.subr.bf16.mxu1 %v3251_v63  ;;  %v3329_v59 = vunpack.c.h.s8.bf16 %v1329_v45  ;;  %v3331_v63 = vunpack.c.h.s8.bf16 %v1331_v6  ;;  %v1371_v45 = vld [vmem:[%s7801_s18 + $0x1fb8] sm:$0xff] }
 0x7e4   : > { %5565 = vmatpush1.bf16.msra.mxu0 %v3248_v2  ;;  %6221 = vmatpush1.bf16.msra.mxu1 %v3250_v8  ;;  %v3328_v2 = vunpack.c.h.s8.bf16 %v1328_v57  ;;  %v3330_v8 = vunpack.c.h.s8.bf16 %v1330_v58  ;;  %v1370_v57 = vld [vmem:[%s7801_s18 + $0x1fb0] sm:$0xff] }
 0x7e5   : > { %5566 = vmatprep.subr.bf16.mxu0 %v3257_v46  ;;  %6222 = vmatprep.subr.bf16.mxu1 %v3259_v9  ;;  %v3339_v46 = vunpack.c.l.s8.bf16 %v1339_v1  ;;  %v1336_v9 = vld [vmem:[%s7801_s18 + $0x1ea0] sm:$0xff] }
 0x7e6   : > { %v3336_v15 = vunpack.c.l.s8.bf16 %v1336_v9  ;;  %v3344_v12 = vunpack.c.h.s8.bf16 %v1336_v9  ;;  %v1378_v9 = vld [vmem:[%s7801_s18 + $0x1ff0] sm:$0xff] }
 0x7e8   : > { %5567 = vmatpush1.bf16.msra.mxu0 %v3256_v28  ;;  %6223 = vmatpush1.bf16.msra.mxu1 %v3258_v47  ;;  %v3338_v28 = vunpack.c.l.s8.bf16 %v1338_v5  ;;  %v3345_v47 = vunpack.c.h.s8.bf16 %v1337_v0 }
 0x7e9   : > { %5568 = vmatprep.subr.bf16.mxu0 %v3265_v50  ;;  %6224 = vmatprep.subr.bf16.mxu1 %v3267_v10  ;;  %v3347_v50 = vunpack.c.h.s8.bf16 %v1339_v1  ;;  %v1345_v10 = vld [vmem:[%s7801_s18 + $0x1ee8] sm:$0xff] }
 0x7ec   : > { %5569 = vmatpush1.bf16.msra.mxu0 %v3264_v13  ;;  %6225 = vmatpush1.bf16.msra.mxu1 %v3266_v16  ;;  %v3346_v13 = vunpack.c.h.s8.bf16 %v1338_v5  ;;  %v3353_v16 = vunpack.c.l.s8.bf16 %v1345_v10 }
 0x7ed   : > { %5570 = vmatprep.subr.bf16.mxu0 %v3273_v17  ;;  %6226 = vmatprep.subr.bf16.mxu1 %v3275_v36  ;;  %v3355_v17 = vunpack.c.l.s8.bf16 %v1347_v4  ;;  %v1344_v36 = vld [vmem:[%s7801_s18 + $0x1ee0] sm:$0xff] }
 0x7ee   : > { %v3352_v24 = vunpack.c.l.s8.bf16 %v1344_v36  ;;  %v3360_v48 = vunpack.c.h.s8.bf16 %v1344_v36 }
 0x7f0   : > { %5571 = vmatpush1.bf16.msra.mxu0 %v3272_v18  ;;  %6227 = vmatpush1.bf16.msra.mxu1 %v3274_v20  ;;  %v3354_v18 = vunpack.c.l.s8.bf16 %v1346_v60  ;;  %v3361_v20 = vunpack.c.h.s8.bf16 %v1345_v10  ;;  %v3426_v10 = vunpack.c.h.s8.bf16 %v1378_v9 }
 0x7f1   : > { %5572 = vmatprep.subr.bf16.mxu0 %v3281_v7  ;;  %6228 = vmatprep.subr.bf16.mxu1 %v3283_v22  ;;  %v3363_v7 = vunpack.c.h.s8.bf16 %v1347_v4  ;;  %v1353_v22 = vld [vmem:[%s7801_s18 + $0x1f28] sm:$0xff] }
 0x7f4   : > { %5573 = vmatpush1.bf16.msra.mxu0 %v3280_v11  ;;  %6229 = vmatpush1.bf16.msra.mxu1 %v3282_v29  ;;  %v3362_v11 = vunpack.c.h.s8.bf16 %v1346_v60  ;;  %v3369_v29 = vunpack.c.l.s8.bf16 %v1353_v22 }
 0x7f5   : > { %5574 = vmatprep.subr.bf16.mxu0 %v3289_v44  ;;  %6230 = vmatprep.subr.bf16.mxu1 %v3291_v14  ;;  %v3371_v44 = vunpack.c.l.s8.bf16 %v1355_v25  ;;  %v1352_v14 = vld [vmem:[%s7801_s18 + $0x1f20] sm:$0xff] }
 0x7f6   : > { %v3368_v55 = vunpack.c.l.s8.bf16 %v1352_v14  ;;  %v3376_v33 = vunpack.c.h.s8.bf16 %v1352_v14 }
 0x7f8   : > { %5575 = vmatpush1.bf16.msra.mxu0 %v3288_v30  ;;  %6231 = vmatpush1.bf16.msra.mxu1 %v3290_v49  ;;  %v3370_v30 = vunpack.c.l.s8.bf16 %v1354_v27  ;;  %v3377_v49 = vunpack.c.h.s8.bf16 %v1353_v22 }
 0x7f9   : > { %5576 = vmatprep.subr.bf16.mxu0 %v3297_v3  ;;  %6232 = vmatprep.subr.bf16.mxu1 %v3299_v31  ;;  %v3379_v3 = vunpack.c.h.s8.bf16 %v1355_v25  ;;  %v1361_v31 = vld [vmem:[%s7801_s18 + $0x1f68] sm:$0xff]  ;;  %v351_v25 = vld [vmem:[#allocation2 + $0x8] sm:$0xff] }
 0x7fc   : > { %5577 = vmatpush1.bf16.msra.mxu0 %v3296_v35  ;;  %6233 = vmatpush1.bf16.msra.mxu1 %v3298_v37  ;;  %v3378_v35 = vunpack.c.h.s8.bf16 %v1354_v27  ;;  %v3385_v37 = vunpack.c.l.s8.bf16 %v1361_v31  ;;  %v6465_v27 = vld [vmem:[%s9607_s4 + $0x188] sm:$0xff] (!%p7008_p7) }
 0x7fd   : > { %5587 = vmatprep.subr.bf16.mxu0 %v3305_v23  ;;  %6243 = vmatprep.subr.bf16.mxu1 %v3307_v62  ;;  %v3387_v23 = vunpack.c.l.s8.bf16 %v1363_v26  ;;  %v1360_v62 = vld [vmem:[%s7801_s18 + $0x1f60] sm:$0xff] }
 0x7fe   : > { %v3384_v41 = vunpack.c.l.s8.bf16 %v1360_v62  ;;  %v3392_v6 = vunpack.c.h.s8.bf16 %v1360_v62  ;;  %v6467_v62 = vld [vmem:[%s9607_s4 + $0x198] sm:$0xff] (!%p7008_p7) }
 0x7ff   : > { %5579 = vmatmul.mubr.bf16.vlgmr.msra.gmra.mrb[4].mxu0 %v8535_v19  ;;  %6235 = vmatmul.mubr.bf16.vlgmr.msra.gmra.mrb[4].mxu1 %v8535_v19  ;;  %v3322_v19 = vunpack.c.l.s8.bf16 %v1330_v58 }
 0x800   : > { %5588 = vmatpush1.bf16.msra.mxu0 %v3304_v39  ;;  %6244 = vmatpush1.bf16.msra.mxu1 %v3306_v53  ;;  %v3386_v39 = vunpack.c.l.s8.bf16 %v1362_v40  ;;  %v3393_v53 = vunpack.c.h.s8.bf16 %v1361_v31  ;;  %v6448_v31 = vld [vmem:[%s9607_s4 + $0x100] sm:$0xff] (!%p7008_p7) }
 0x801   : > { %5589 = vmatprep.subr.bf16.mxu0 %v3313_v42  ;;  %6245 = vmatprep.subr.bf16.mxu1 %v3315_v32  ;;  %v3395_v42 = vunpack.c.h.s8.bf16 %v1363_v26  ;;  %v1369_v32 = vld [vmem:[%s7801_s18 + $0x1fa8] sm:$0xff]  ;;  %v6449_v26 = vld [vmem:[%s9607_s4 + $0x108] sm:$0xff] (!%p7008_p7) }
 0x802   : > { %5619 = vmatprep.mubr.bf16.mxu0 %v8541_v43  ;;  %6275 = vmatprep.mubr.bf16.mxu1 %v8541_v43  ;;  %v3337_v43 = vunpack.c.l.s8.bf16 %v1337_v0  ;;  %v1379_v0 = vld [vmem:[%s7801_s18 + $0x1ff8] sm:$0xff] }
 0x804   : > { %5590 = vmatpush1.bf16.msra.mxu0 %v3312_v52  ;;  %6246 = vmatpush1.bf16.msra.mxu1 %v3314_v51  ;;  %v3394_v52 = vunpack.c.h.s8.bf16 %v1362_v40  ;;  %v3401_v51 = vunpack.c.l.s8.bf16 %v1369_v32 }
 0x805   : > { %5591 = vmatprep.subr.bf16.mxu0 %v3321_v54  ;;  %6247 = vmatprep.subr.bf16.mxu1 %v3323_v61  ;;  %v3403_v54 = vunpack.c.l.s8.bf16 %v1371_v45  ;;  %v1368_v61 = vld [vmem:[%s7801_s18 + $0x1fa0] sm:$0xff] }
 0x806   : > { %v3400_v58 = vunpack.c.l.s8.bf16 %v1368_v61  ;;  %v3408_v1 = vunpack.c.h.s8.bf16 %v1368_v61  ;;  %v6468_v61 = vld [vmem:[%s9607_s4 + $0x1a0] sm:$0xff] (!%p7008_p7) }
 0x808   : > { %5592 = vmatpush1.bf16.msra.mxu0 %v3320_v34  ;;  %6248 = vmatpush1.bf16.msra.mxu1 %v3322_v19  ;;  %v3402_v34 = vunpack.c.l.s8.bf16 %v1370_v57  ;;  %v3409_v19 = vunpack.c.h.s8.bf16 %v1369_v32 }
 0x809   : > { %5593 = vmatprep.subr.bf16.mxu0 %v3329_v59  ;;  %6249 = vmatprep.subr.bf16.mxu1 %v3331_v63  ;;  %v3411_v59 = vunpack.c.h.s8.bf16 %v1371_v45  ;;  %v1377_v63 = vld [vmem:[%s7801_s18 + $0x1fe8] sm:$0xff] }
 0x80a   : > { %v6451_v45 = vld [vmem:[%s9607_s4 + $0x118] sm:$0xff] (!%p7008_p7) }
 0x80c   : > { %5594 = vmatpush1.bf16.msra.mxu0 %v3328_v2  ;;  %6250 = vmatpush1.bf16.msra.mxu1 %v3330_v8  ;;  %v3410_v2 = vunpack.c.h.s8.bf16 %v1370_v57  ;;  %v3417_v8 = vunpack.c.l.s8.bf16 %v1377_v63  ;;  %v6469_v57 = vld [vmem:[%s9607_s4 + $0x1a8] sm:$0xff] (!%p7008_p7) }
 0x80d   : > { %5595 = vmatprep.subr.bf16.mxu0 %v3337_v43  ;;  %6251 = vmatprep.subr.bf16.mxu1 %v3339_v46  ;;  %v3419_v43 = vunpack.c.l.s8.bf16 %v1379_v0  ;;  %v1376_v46 = vld [vmem:[%s7801_s18 + $0x1fe0] sm:$0xff] }
 0x80e   : > { %v3416_v5 = vunpack.c.l.s8.bf16 %v1376_v46 }
 0x810   : > { %5596 = vmatpush1.bf16.msra.mxu0 %v3336_v15  ;;  %6252 = vmatpush1.bf16.msra.mxu1 %v3338_v28  ;;  %v3418_v15 = vunpack.c.l.s8.bf16 %v1378_v9  ;;  %v3425_v28 = vunpack.c.h.s8.bf16 %v1377_v63  ;;  %v6453_v63 = vld [vmem:[%s9607_s4 + $0x128] sm:$0xff] (!%p7008_p7)  ;;  %v6471_v9 = vld [vmem:[%s9607_s4 + $0x1b8] sm:$0xff] (!%p7008_p7) }
 0x811   : > { %5597 = vmatprep.subr.bf16.mxu0 %v3345_v47  ;;  %6253 = vmatprep.subr.bf16.mxu1 %v3347_v50  ;;  %v3427_v47 = vunpack.c.h.s8.bf16 %v1379_v0  ;;  %v3424_v50 = vunpack.c.h.s8.bf16 %v1376_v46 }
 0x814   : > { %5598 = vmatpush1.bf16.msra.mxu0 %v3344_v12  ;;  %6254 = vmatpush1.bf16.msra.mxu1 %v3346_v13 }
 0x815   : > { %5599 = vmatprep.subr.bf16.mxu0 %v3353_v16  ;;  %6255 = vmatprep.subr.bf16.mxu1 %v3355_v17 }
 0x818   : > { %5600 = vmatpush1.bf16.msra.mxu0 %v3352_v24  ;;  %6256 = vmatpush1.bf16.msra.mxu1 %v3354_v18 }
 0x819   : > { %5601 = vmatprep.subr.bf16.mxu0 %v3361_v20  ;;  %6257 = vmatprep.subr.bf16.mxu1 %v3363_v7 }
 0x81c   : > { %5602 = vmatpush1.bf16.msra.mxu0 %v3360_v48  ;;  %6258 = vmatpush1.bf16.msra.mxu1 %v3362_v11 }
 0x81d   : > { %5603 = vmatprep.subr.bf16.mxu0 %v3369_v29  ;;  %6259 = vmatprep.subr.bf16.mxu1 %v3371_v44  ;;  %v6433_v29 = vld [vmem:[%s9607_s4 + $0x88] sm:$0xff] (!%p7008_p7)  ;;  %v6464_v44 = vld [vmem:[%s9607_s4 + $0x180] sm:$0xff] (!%p7008_p7) }
 0x820   : > { %5604 = vmatpush1.bf16.msra.mxu0 %v3368_v55  ;;  %6260 = vmatpush1.bf16.msra.mxu1 %v3370_v30  ;;  %v6416_v55 = vld [vmem:[%s9607_s4] sm:$0xff] (!%p7008_p7)  ;;  %v6417_v30 = vld [vmem:[%s9607_s4 + $0x8] sm:$0xff] (!%p7008_p7) }
 0x821   : > { %5605 = vmatprep.subr.bf16.mxu0 %v3377_v49  ;;  %6261 = vmatprep.subr.bf16.mxu1 %v3379_v3  ;;  %v7186_v49 = vpack.c.bf16 (!%p7008_p7), %v6465_v27, %v6464_v44  ;;  %v7156_v3 = vpack.c.bf16 (!%p7008_p7), %v6417_v30, %v6416_v55  ;;  %v6427_v27 = vld [vmem:[%s9607_s4 + $0x58] sm:$0xff] (!%p7008_p7)  ;;  %v6458_v55 = vld [vmem:[%s9607_s4 + $0x150] sm:$0xff] (!%p7008_p7) }
 0x824   : > { %5606 = vmatpush1.bf16.msra.mxu0 %v3376_v33  ;;  %6262 = vmatpush1.bf16.msra.mxu1 %v3378_v35  ;;  %v6434_v33 = vld [vmem:[%s9607_s4 + $0x90] sm:$0xff] (!%p7008_p7)  ;;  %v7188_v35 = vpack.c.bf16 (!%p7008_p7), %v6449_v26, %v6448_v31  ;;  %v6445_v31 = vld [vmem:[%s9607_s4 + $0xe8] sm:$0xff] (!%p7008_p7)  ;;  %v6342_v26 = vsub.s32 (!%p7008_p7), 0, %v7826_v38 }
 0x825   : > { %5607 = vmatprep.subr.bf16.mxu0 %v3385_v37  ;;  %6263 = vmatprep.subr.bf16.mxu1 %v3387_v23  ;;  %v6435_v37 = vld [vmem:[%s9607_s4 + $0x98] sm:$0xff] (!%p7008_p7)  ;;  %v6466_v23 = vld [vmem:[%s9607_s4 + $0x190] sm:$0xff] (!%p7008_p7) }
 0x826   : > { %v7158_v40 = vpack.c.bf16 (!%p7008_p7), %v6435_v37, %v6434_v33  ;;  %v6346_v33 = vsub.s32 (!%p7008_p7), 1, %v7826_v38  ;;  %v6476_v37 = vld [vmem:[%s9607_s4 + $0x1e0] sm:$0xff] (!%p7008_p7) }
 0x828   : > { %5608 = vmatpush1.bf16.msra.mxu0 %v3384_v41  ;;  %6264 = vmatpush1.bf16.msra.mxu1 %v3386_v39  ;;  %v7190_v41 = vpack.c.bf16 (!%p7008_p7), %v6467_v62, %v6466_v23  ;;  %v6418_v39 = vld [vmem:[%s9607_s4 + $0x10] sm:$0xff] (!%p7008_p7)  ;;  %v6477_v23 = vld [vmem:[%s9607_s4 + $0x1e8] sm:$0xff] (!%p7008_p7)  ;;  %v6354_v62 = vsub.s32 (!%p7008_p7), 3, %v7826_v38 }
 0x829   : > { %5609 = vmatprep.subr.bf16.mxu0 %v3393_v53  ;;  %6265 = vmatprep.subr.bf16.mxu1 %v3395_v42  ;;  %v6419_v53 = vld [vmem:[%s9607_s4 + $0x18] sm:$0xff] (!%p7008_p7)  ;;  %v6450_v42 = vld [vmem:[%s9607_s4 + $0x110] sm:$0xff] (!%p7008_p7) }
 0x82a   : > { %v7160_v32 = vpack.c.bf16 (!%p7008_p7), %v6419_v53, %v6418_v39 }
 0x82c   : > { %5610 = vmatpush1.bf16.msra.mxu0 %v3392_v6  ;;  %6266 = vmatpush1.bf16.msra.mxu1 %v3394_v52  ;;  %v6436_v6 = vld [vmem:[%s9607_s4 + $0xa0] sm:$0xff] (!%p7008_p7)  ;;  %v6437_v52 = vld [vmem:[%s9607_s4 + $0xa8] sm:$0xff] (!%p7008_p7) }
 0x82d   : > { %5611 = vmatprep.subr.bf16.mxu0 %v3401_v51  ;;  %6267 = vmatprep.subr.bf16.mxu1 %v3403_v54  ;;  %v7192_v51 = vpack.c.bf16 (!%p7008_p7), %v6451_v45, %v6450_v42  ;;  %v7162_v54 = vpack.c.bf16 (!%p7008_p7), %v6437_v52, %v6436_v6  ;;  %v6429_v42 = vld [vmem:[%s9607_s4 + $0x68] sm:$0xff] (!%p7008_p7)  ;;  %v6338_v45 = vld [vmem:[%s9605_s2] sm:$0xff] (!%p7008_p7)  ;;  %v7210_v6 = vpack.c.bf16 (!%p7008_p7), %v6477_v23, %v6476_v37  ;;  %v6499_v37 = vld [vmem:[%s9607_s4 + $0x298] sm:$0xff] (!%p7008_p7) }
 0x82e   : > { %v6461_v52 = vld [vmem:[%s9607_s4 + $0x168] sm:$0xff] (!%p7008_p7)  ;;  %v6512_v23 = vld [vmem:[%s9607_s4 + $0x300] sm:$0xff] (!%p7008_p7) }
 0x830   : > { %5612 = vmatpush1.bf16.msra.mxu0 %v3400_v58  ;;  %6268 = vmatpush1.bf16.msra.mxu1 %v3402_v34  ;;  %v6420_v58 = vld [vmem:[%s9607_s4 + $0x20] sm:$0xff] (!%p7008_p7)  ;;  %v7194_v34 = vpack.c.bf16 (!%p7008_p7), %v6469_v57, %v6468_v61  ;;  %v6343_v61 = vrot.slane (!%p7008_p7), %v6338_v45, %v6342_v26  ;;  %v6347_v57 = vrot.slane (!%p7008_p7), %v6338_v45, %v6346_v33 }
 0x831   : > { %5613 = vmatprep.subr.bf16.mxu0 %v3409_v19  ;;  %6269 = vmatprep.subr.bf16.mxu1 %v3411_v59  ;;  %v6421_v19 = vld [vmem:[%s9607_s4 + $0x28] sm:$0xff] (!%p7008_p7)  ;;  %v6452_v59 = vld [vmem:[%s9607_s4 + $0x120] sm:$0xff] (!%p7008_p7) }
 0x832   : > { %v7164_v0 = vpack.c.bf16 (!%p7008_p7), %v6421_v19, %v6420_v58  ;;  %v6479_v19 = vld [vmem:[%s9607_s4 + $0x1f8] sm:$0xff] (!%p7008_p7) }
 0x834   : > { %5614 = vmatpush1.bf16.msra.mxu0 %v3408_v1  ;;  %6270 = vmatpush1.bf16.msra.mxu1 %v3410_v2  ;;  %v6438_v1 = vld [vmem:[%s9607_s4 + $0xb0] sm:$0xff] (!%p7008_p7)  ;;  %v6439_v2 = vld [vmem:[%s9607_s4 + $0xb8] sm:$0xff] (!%p7008_p7) }
 0x835   : > { %5615 = vmatprep.subr.bf16.mxu0 %v3417_v8  ;;  %6271 = vmatprep.subr.bf16.mxu1 %v3419_v43  ;;  %v6470_v8 = vld [vmem:[%s9607_s4 + $0x1b0] sm:$0xff] (!%p7008_p7)  ;;  %v7196_v43 = vpack.c.bf16 (!%p7008_p7), %v6453_v63, %v6452_v59  ;;  %v7166_v46 = vpack.c.bf16 (!%p7008_p7), %v6439_v2, %v6438_v1  ;;  %v6355_v59 = vrot.slane (!%p7008_p7), %v6338_v45, %v6354_v62  ;;  %v6358_v63 = vsub.s32 (!%p7008_p7), 4, %v7826_v38  ;;  %v6513_v62 = vld [vmem:[%s9607_s4 + $0x308] sm:$0xff] (!%p7008_p7) }
 0x836   : > { %v6430_v2 = vld [vmem:[%s9607_s4 + $0x70] sm:$0xff] (!%p7008_p7) }
 0x838   : > { %5616 = vmatpush1.bf16.msra.mxu0 %v3416_v5  ;;  %6272 = vmatpush1.bf16.msra.mxu1 %v3418_v15  ;;  %v6422_v5 = vld [vmem:[%s9607_s4 + $0x30] sm:$0xff] (!%p7008_p7)  ;;  %v6423_v15 = vld [vmem:[%s9607_s4 + $0x38] sm:$0xff] (!%p7008_p7) }
 0x839   : > { %5617 = vmatprep.subr.bf16.mxu0 %v3425_v28  ;;  %6273 = vmatprep.subr.bf16.mxu1 %v3427_v47  ;;  %v7198_v28 = vpack.c.bf16 (!%p7008_p7), %v6471_v9, %v6470_v8  ;;  %v6454_v47 = vld [vmem:[%s9607_s4 + $0x130] sm:$0xff] (!%p7008_p7)  ;;  %v6431_v8 = vld [vmem:[%s9607_s4 + $0x78] sm:$0xff] (!%p7008_p7)  ;;  %v6370_v9 = vsub.s32 (!%p7008_p7), 7, %v7826_v38 }
 0x83c   : > { %5618 = vmatpush1.bf16.msra.mxu0 %v3424_v50  ;;  %6274 = vmatpush1.bf16.msra.mxu1 %v3426_v10  ;;  %v6455_v50 = vld [vmem:[%s9607_s4 + $0x138] sm:$0xff] (!%p7008_p7)  ;;  %v6440_v10 = vld [vmem:[%s9607_s4 + $0xc0] sm:$0xff] (!%p7008_p7) }
 0x83d   : > { %7187 = vmatprep.subr.bf16.mxu1 (!%p7008_p7), %v7186_v49  ;;  %v6459_v49 = vld [vmem:[%s9607_s4 + $0x158] sm:$0xff] (!%p7008_p7) }
 0x83e   : > { %v7208_v39 = vpack.c.bf16 (!%p7008_p7), %v6459_v49, %v6458_v55  ;;  %v6481_v49 = vld [vmem:[%s9607_s4 + $0x208] sm:$0xff] (!%p7008_p7) }
 0x83f   : > { %5620 = vmatmul.mubr.bf16.vlgmr.msra.gmra.mrb[4].mxu0 %v8579_v21  ;;  %6276 = vmatmul.mubr.bf16.vlgmr.msra.gmra.mrb[4].mxu1 %v8579_v21  ;;  %v6432_v21 = vld [vmem:[%s9607_s4 + $0x80] sm:$0xff] (!%p7008_p7) }
 0x840   : > { %v7154_v14 = vpack.c.bf16 (!%p7008_p7), %v6433_v29, %v6432_v21  ;;  %7189 = vmatpush3.bf16.msra.mxu1 (!%p7008_p7), %v7188_v35  ;;  %v6350_v35 = vsub.s32 (!%p7008_p7), 2, %v7826_v38 }
 0x841   : > { %7191 = vmatprep.subr.bf16.mxu1 (!%p7008_p7), %v7190_v41  ;;  %v6428_v41 = vld [vmem:[%s9607_s4 + $0x60] sm:$0xff] (!%p7008_p7) }
 0x842   : > { %7155 = vmatprep.subr.bf16.mxu0 (!%p7008_p7), %v7154_v14  ;;  %v6426_v14 = vld [vmem:[%s9607_s4 + $0x50] sm:$0xff] (!%p7008_p7)  ;;  %v6351_v58 = vrot.slane (!%p7008_p7), %v6338_v45, %v6350_v35  ;;  %v7180_v1 = vpack.c.bf16 (!%p7008_p7), %v6429_v42, %v6428_v41  ;;  %v6531_v42 = vld [vmem:[%s9607_s4 + $0x398] sm:$0xff] (!%p7008_p7) }
 0x843   : > { %7157 = vmatpush3.bf16.msra.mxu0 (!%p7008_p7), %v7156_v3  ;;  %v6444_v3 = vld [vmem:[%s9607_s4 + $0xe0] sm:$0xff] (!%p7008_p7)  ;;  %v6498_v35 = vld [vmem:[%s9607_s4 + $0x290] sm:$0xff] (!%p7008_p7) }
 0x844   : > { %7159 = vmatprep.subr.bf16.mxu0 (!%p7008_p7), %v7158_v40  ;;  %7193 = vmatpush3.bf16.msra.mxu1 (!%p7008_p7), %v7192_v51  ;;  %v7176_v40 = vpack.c.bf16 (!%p7008_p7), %v6427_v27, %v6426_v14  ;;  %v7178_v53 = vpack.c.bf16 (!%p7008_p7), %v6445_v31, %v6444_v3  ;;  %v6446_v51 = vld [vmem:[%s9607_s4 + $0xf0] sm:$0xff] (!%p7008_p7) }
 0x845   : > { %7195 = vmatprep.subr.bf16.mxu1 (!%p7008_p7), %v7194_v34  ;;  %v6478_v34 = vld [vmem:[%s9607_s4 + $0x1f0] sm:$0xff] (!%p7008_p7) }
 0x847   : > { %7161 = vmatpush3.bf16.msra.mxu0 (!%p7008_p7), %v7160_v32  ;;  %v6460_v32 = vld [vmem:[%s9607_s4 + $0x160] sm:$0xff] (!%p7008_p7) }
 0x848   : > { %7163 = vmatprep.subr.bf16.mxu0 (!%p7008_p7), %v7162_v54  ;;  %7197 = vmatpush3.bf16.msra.mxu1 (!%p7008_p7), %v7196_v43  ;;  %v6447_v54 = vld [vmem:[%s9607_s4 + $0xf8] sm:$0xff] (!%p7008_p7)  ;;  %v6372_v43 = vcombine.low (!%p7008_p7), %v6343_v61, %v6347_v57  ;;  %v6500_v61 = vld [vmem:[%s9607_s4 + $0x2a0] sm:$0xff] (!%p7008_p7)  ;;  %v6501_v57 = vld [vmem:[%s9607_s4 + $0x2a8] sm:$0xff] (!%p7008_p7) }
 0x849   : > { %7199 = vmatprep.subr.bf16.mxu1 (!%p7008_p7), %v7198_v28  ;;  %v6462_v28 = vld [vmem:[%s9607_s4 + $0x170] sm:$0xff] (!%p7008_p7) }
 0x84b   : > { %7165 = vmatpush3.bf16.msra.mxu0 (!%p7008_p7), %v7164_v0  ;;  %v6362_v0 = vsub.s32 (!%p7008_p7), 5, %v7826_v38 }
 0x84c   : > { %7167 = vmatprep.subr.bf16.mxu0 (!%p7008_p7), %v7166_v46  ;;  %v6366_v46 = vsub.s32 (!%p7008_p7), 6, %v7826_v38  ;;  %v6496_v38 = vld [vmem:[%s9607_s4 + $0x280] sm:$0xff] (!%p7008_p7) }
 0x912   : > { %v5621_v4 = vpop.f32.mrb[4].mxu0  ;;  %v6277_v12 = vpop.f32.mrb[4].mxu1 }
 0x913   : > { %v5623_v13 = vpop.f32.mrb[5].mxu0  ;;  %v6279_v16 = vpop.f32.mrb[5].mxu1 }
 0x914   : > { %v6309_v17 = vcombine.low %v5621_v4, %v5623_v13  ;;  %v6310_v36 = vcombine.low %v6277_v12, %v6279_v16  ;;  %v5625_v60 = vpop.f32.mrb[6].mxu0  ;;  %v6281_v24 = vpop.f32.mrb[6].mxu1  ;;  %v6441_v4 = vld [vmem:[%s9607_s4 + $0xc8] sm:$0xff] (!%p7008_p7)  ;;  %v6472_v12 = vld [vmem:[%s9607_s4 + $0x1c0] sm:$0xff] (!%p7008_p7)  ;;  %v7168_v16 = vpack.c.bf16 (!%p7008_p7), %v6423_v15, %v6422_v5  ;;  %v7212_v5 = vpack.c.bf16 (!%p7008_p7), %v6461_v52, %v6460_v32 }
 0x915   : > { %v5626_v18 = vpop.f32.mrb[7].mxu0  ;;  %v6282_v20 = vpop.f32.mrb[7].mxu1  ;;  %v6473_v13 = vld [vmem:[%s9607_s4 + $0x1c8] sm:$0xff] (!%p7008_p7)  ;;  %v6424_v60 = vld [vmem:[%s9607_s4 + $0x40] sm:$0xff] (!%p7008_p7)  ;;  %v7182_v15 = vpack.c.bf16 (!%p7008_p7), %v6447_v54, %v6446_v51  ;;  %v7222_v32 = vpack.c.bf16 (!%p7008_p7), %v6499_v37, %v6498_v35  ;;  %v7252_v54 = vpack.c.bf16 (!%p7008_p7), %v6513_v62, %v6512_v23  ;;  %v6538_v62 = vld [vmem:[%s9607_s4 + $0x3d0] sm:$0xff] (!%p7008_p7) }
 0x916   : > { %v6317_v7 = vrot.slane %v6309_v17, %v8706_v56  ;;  %v6324_v22 = vrot.slane %v6310_v36, %v8706_v56  ;;  %6335 = sbr.rel (%p7008_p7) target bundleno = 2597 (0xa25), region = 52  ;;  %v7200_v17 = vpack.c.bf16 (!%p7008_p7), %v6455_v50, %v6454_v47  ;;  %v7170_v36 = vpack.c.bf16 (!%p7008_p7), %v6441_v4, %v6440_v10  ;;  %v6425_v24 = vld [vmem:[%s9607_s4 + $0x48] sm:$0xff] (!%p7008_p7)  ;;  %v6456_v18 = vld [vmem:[%s9607_s4 + $0x140] sm:$0xff] (!%p7008_p7)  ;;  %7169 = vmatpush3.bf16.msra.mxu0 (!%p7008_p7), %v7168_v16  ;;  %v6463_v10 = vld [vmem:[%s9607_s4 + $0x178] sm:$0xff] (!%p7008_p7) }
 0x917   : > { %v7202_v20 = vpack.c.bf16 (!%p7008_p7), %v6473_v13, %v6472_v12  ;;  %v7172_v21 = vpack.c.bf16 (!%p7008_p7), %v6425_v24, %v6424_v60  ;;  %v6373_v47 = vcombine.low (!%p7008_p7), %v6351_v58, %v6355_v59  ;;  %v7214_v50 = vpack.c.bf16 (!%p7008_p7), %v6479_v19, %v6478_v34  ;;  %v6497_v12 = vld [vmem:[%s9607_s4 + $0x288] sm:$0xff] (!%p7008_p7)  ;;  %v6336_v60 = vld [vmem:[#allocation2] sm:$0xff] (!%p7008_p7)  ;;  %v6514_v34 = vld [vmem:[%s9607_s4 + $0x310] sm:$0xff] (!%p7008_p7) }
 0x918   : > { %v6325_v48 = vcombine.low %v6317_v7, %v6324_v22  ;;  %v6457_v7 = vld [vmem:[%s9607_s4 + $0x148] sm:$0xff] (!%p7008_p7)  ;;  %v6442_v22 = vld [vmem:[%s9607_s4 + $0xd0] sm:$0xff] (!%p7008_p7)  ;;  %7201 = vmatpush3.bf16.msra.mxu1 (!%p7008_p7), %v7200_v17  ;;  %7171 = vmatprep.subr.bf16.mxu0 (!%p7008_p7), %v7170_v36  ;;  %v6380_v4 = vrot.slane (!%p7008_p7), %v6372_v43, %v8706_v56  ;;  %v7184_v13 = vpack.c.bf16 (!%p7008_p7), %v6431_v8, %v6430_v2  ;;  %v6528_v17 = vld [vmem:[%s9607_s4 + $0x380] sm:$0xff] (!%p7008_p7) }
 0x919   : > { %v7204_v29 = vpack.c.bf16 (!%p7008_p7), %v6457_v7, %v6456_v18  ;;  %7203 = vmatprep.subr.bf16.mxu1 (!%p7008_p7), %v7202_v20  ;;  %v6387_v16 = vrot.slane (!%p7008_p7), %v6373_v47, %v8706_v56  ;;  %v6529_v36 = vld [vmem:[%s9607_s4 + $0x388] sm:$0xff] (!%p7008_p7)  ;;  %v6359_v24 = vrot.slane (!%p7008_p7), %v6338_v45, %v6358_v63  ;;  %v6363_v18 = vrot.slane (!%p7008_p7), %v6338_v45, %v6362_v0  ;;  %v6515_v19 = vld [vmem:[%s9607_s4 + $0x318] sm:$0xff] (!%p7008_p7)  ;;  %v6532_v63 = vld [vmem:[%s9607_s4 + $0x3a0] sm:$0xff] (!%p7008_p7) }
 0x91a   : > { %v6329_v11 = vadd.f32 %v6325_v48, %v351_v25  ;;  %v6443_v25 = vld [vmem:[%s9607_s4 + $0xd8] sm:$0xff] (!%p7008_p7)  ;;  %v6474_v48 = vld [vmem:[%s9607_s4 + $0x1d0] sm:$0xff] (!%p7008_p7)  ;;  %7173 = vmatpush3.bf16.msra.mxu0 (!%p7008_p7), %v7172_v21  ;;  %v6367_v20 = vrot.slane (!%p7008_p7), %v6338_v45, %v6366_v46  ;;  %v6371_v7 = vrot.slane (!%p7008_p7), %v6338_v45, %v6370_v9  ;;  %v7250_v21 = vpack.c.bf16 (!%p7008_p7), %v6529_v36, %v6528_v17  ;;  %v6533_v0 = vld [vmem:[%s9607_s4 + $0x3a8] sm:$0xff] (!%p7008_p7) }
 0x91b   : > { %v7174_v44 = vpack.c.bf16 (!%p7008_p7), %v6443_v25, %v6442_v22  ;;  %v7216_v22 = vpack.c.bf16 (!%p7008_p7), %v6463_v10, %v6462_v28  ;;  %v6388_v25 = vcombine.low (!%p7008_p7), %v6380_v4, %v6387_v16  ;;  %v6482_v45 = vld [vmem:[%s9607_s4 + $0x210] sm:$0xff] (!%p7008_p7)  ;;  %v7226_v2 = vpack.c.bf16 (!%p7008_p7), %v6501_v57, %v6500_v61  ;;  %v6484_v8 = vld [vmem:[%s9607_s4 + $0x220] sm:$0xff] (!%p7008_p7)  ;;  %v6485_v43 = vld [vmem:[%s9607_s4 + $0x228] sm:$0xff] (!%p7008_p7) }
 0x91c   : > { %6331 = vst [vmem:[#allocation2 + $0x8] sm:$0xff] %v6329_v11  ;;  %v6475_v11 = vld [vmem:[%s9607_s4 + $0x1d8] sm:$0xff] (!%p7008_p7)  ;;  %7205 = vmatpush3.bf16.msra.mxu1 (!%p7008_p7), %v7204_v29  ;;  %v6390_v14 = vcombine.low (!%p7008_p7), %v6367_v20, %v6371_v7  ;;  %v6411_v9 = vld [vmem:[%s9606_s3 + $0x8] sm:$0xff] (!%p7008_p7)  ;;  %v7258_v47 = vpack.c.bf16 (!%p7008_p7), %v6533_v0, %v6532_v63  ;;  %v6486_v17 = vld [vmem:[%s9607_s4 + $0x230] sm:$0xff] (!%p7008_p7) }
 0x91d   : > { %v7206_v30 = vpack.c.bf16 %v6475_v11, %v6474_v48  ;;  %7175 = vmatprep.subr.bf16.mxu0 %v7174_v44  ;;  %v7218_v48 = vpack.c.bf16 %v6497_v12, %v6496_v38  ;;  %v6410_v11 = vld [vmem:[%s9606_s3] sm:$0xff]  ;;  %v6408_v29 = vmul.f32 %v6388_v25, %v6336_v60  ;;  %v6389_v44 = vcombine.low %v6359_v24, %v6363_v18  ;;  %v6503_v28 = vld [vmem:[%s9607_s4 + $0x2b8] sm:$0xff]  ;;  %v6517_v10 = vld [vmem:[%s9607_s4 + $0x328] sm:$0xff] }
 0x91e   : > { %7177 = vmatpush3.bf16.msra.mxu0 %v7176_v40  ;;  %v6404_v31 = vrot.slane %v6390_v14, %v8706_v56  ;;  %v7228_v38 = vpack.c.bf16 %v6485_v43, %v6484_v8  ;;  %v6534_v12 = vld [vmem:[%s9607_s4 + $0x3b0] sm:$0xff]  ;;  %v6487_v36 = vld [vmem:[%s9607_s4 + $0x238] sm:$0xff]  ;;  %v6504_v18 = vld [vmem:[%s9607_s4 + $0x2c0] sm:$0xff] }
 0x91f   : > { %7207 = vmatprep.subr.bf16.mxu1 %v7206_v30  ;;  %7179 = vmatprep.subr.bf16.mxu0 %v7178_v53  ;;  %v6412_v27 = vadd.f32 %v6410_v11, %v6408_v29  ;;  %v6480_v30 = vld [vmem:[%s9607_s4 + $0x200] sm:$0xff]  ;;  %v6397_v3 = vrot.slane %v6389_v44, %v8706_v56  ;;  %v6530_v53 = vld [vmem:[%s9607_s4 + $0x390] sm:$0xff]  ;;  %v6505_v20 = vld [vmem:[%s9607_s4 + $0x2c8] sm:$0xff] }
 0x920   : > { %7209 = vmatpush3.bf16.msra.mxu1 %v7208_v39  ;;  %v7220_v39 = vpack.c.bf16 %v6481_v49, %v6480_v30  ;;  %v7254_v58 = vpack.c.bf16 %v6531_v42, %v6530_v53  ;;  %v6519_v25 = vld [vmem:[%s9607_s4 + $0x338] sm:$0xff]  ;;  %v6536_v29 = vld [vmem:[%s9607_s4 + $0x3c0] sm:$0xff]  ;;  %v6537_v44 = vld [vmem:[%s9607_s4 + $0x3c8] sm:$0xff]  ;;  %v7234_v14 = vpack.c.bf16 %v6505_v20, %v6504_v18 }
 0x921   : > { %7211 = vmatprep.subr.bf16.mxu1 %v7210_v6  ;;  %v6414_v55 = vmax.f32 %v6412_v27, 0.0  ;;  %v6483_v6 = vld [vmem:[%s9607_s4 + $0x218] sm:$0xff]  ;;  %v6405_v52 = vcombine.low %v6397_v3, %v6404_v31  ;;  %v6488_v27 = vld [vmem:[%s9607_s4 + $0x240] sm:$0xff]  ;;  %v6506_v31 = vld [vmem:[%s9607_s4 + $0x2d0] sm:$0xff] }
 0x922   : > { %7181 = vmatpush3.bf16.msra.mxu0 %v7180_v1  ;;  %v7224_v59 = vpack.c.bf16 %v6483_v6, %v6482_v45  ;;  %v6520_v35 = vld [vmem:[%s9607_s4 + $0x340] sm:$0xff]  ;;  %v6491_v53 = vld [vmem:[%s9607_s4 + $0x258] sm:$0xff]  ;;  %v6509_v45 = vld [vmem:[%s9607_s4 + $0x2e8] sm:$0xff] }
 0x923   : > { %7183 = vmatprep.subr.bf16.mxu0 %v7182_v15  ;;  %v6553_v26 = vrot.slane %v6414_v55, %v8706_v56  ;;  %v6546_v33 = vcombine.high %v6414_v55, %v6414_v55  ;;  %v6337_v1 = vld [vmem:[#allocation2 + $0x8] sm:$0xff]  ;;  %v6502_v15 = vld [vmem:[%s9607_s4 + $0x2b0] sm:$0xff]  ;;  %v6540_v61 = vld [vmem:[%s9607_s4 + $0x3e0] sm:$0xff] }
 0x924   : > { %7213 = vmatpush3.bf16.msra.mxu1 %v7212_v5  ;;  %v6409_v46 = vmul.f32 %v6405_v52, %v6337_v1  ;;  %v7256_v5 = vpack.c.bf16 %v6515_v19, %v6514_v34  ;;  %v7230_v16 = vpack.c.bf16 %v6503_v28, %v6502_v15  ;;  %v6489_v55 = vld [vmem:[%s9607_s4 + $0x248] sm:$0xff]  ;;  %v6522_v52 = vld [vmem:[%s9607_s4 + $0x350] sm:$0xff]  ;;  %v6492_v34 = vld [vmem:[%s9607_s4 + $0x260] sm:$0xff] }
 0x925   : > { %7215 = vmatprep.subr.bf16.mxu1 %v7214_v50  ;;  %v6561_v40 = vcombine.high %v6553_v26, %v6553_v26  ;;  %v6560_v41 = vrot.slane %v6546_v33, %v8706_v56  ;;  %v6516_v50 = vld [vmem:[%s9607_s4 + $0x320] sm:$0xff]  ;;  %v7266_v33 = vpack.c.bf16 %v6537_v44, %v6536_v29  ;;  %v7236_v23 = vpack.c.bf16 %v6489_v55, %v6488_v27  ;;  %v6541_v57 = vld [vmem:[%s9607_s4 + $0x3e8] sm:$0xff]  ;;  %v6510_v63 = vld [vmem:[%s9607_s4 + $0x2f0] sm:$0xff] }
 0x926   : > { %7185 = vmatpush3.bf16.msra.mxu0 %v7184_v13  ;;  %v6413_v4 = vadd.f32 %v6411_v9, %v6409_v46  ;;  %v6535_v13 = vld [vmem:[%s9607_s4 + $0x3b8] sm:$0xff]  ;;  %v7260_v24 = vpack.c.bf16 %v6517_v10, %v6516_v50  ;;  %v6493_v19 = vld [vmem:[%s9607_s4 + $0x268] sm:$0xff]  ;;  %v7274_v1 = vpack.c.bf16 %v6541_v57, %v6540_v61  ;;  %v6542_v46 = vld [vmem:[%s9607_s4 + $0x3f0] sm:$0xff] }
 0x927   : > { %7219 = vmatprep.subr.bf16.mxu0 %v7218_v48  ;;  %6652 = vmatprep.mubr.f32.mxu0 %v6561_v40  ;;  %v6562_v51 = vcombine.high %v6560_v41, %v6560_v41  ;;  %v7262_v7 = vpack.c.bf16 %v6535_v13, %v6534_v12  ;;  %v6539_v40 = vld [vmem:[%s9607_s4 + $0x3d8] sm:$0xff]  ;;  %v6525_v8 = vld [vmem:[%s9607_s4 + $0x368] sm:$0xff]  ;;  %v7244_v43 = vpack.c.bf16 %v6493_v19, %v6492_v34  ;;  %v6494_v15 = vld [vmem:[%s9607_s4 + $0x270] sm:$0xff] }
 0x928   : > { %7217 = vmatpush3.bf16.msra.mxu1 %v7216_v22  ;;  %v6415_v60 = vmax.f32 %v6413_v4, 0.0  ;;  %v6518_v22 = vld [vmem:[%s9607_s4 + $0x330] sm:$0xff]  ;;  %v7270_v6 = vpack.c.bf16 %v6539_v40, %v6538_v62  ;;  %v6511_v0 = vld [vmem:[%s9607_s4 + $0x2f8] sm:$0xff] }
 0x929   : > { %7251 = vmatprep.subr.bf16.mxu1 %v7250_v21  ;;  %6653 = vmatmul.mubr.f32.vlgmr.msra.gmra.mrb[0].mxu0 %v6553_v26  ;;  %v7232_v21 = vpack.c.bf16 %v6487_v36, %v6486_v17  ;;  %v7264_v3 = vpack.c.bf16 %v6519_v25, %v6518_v22  ;;  %v6507_v26 = vld [vmem:[%s9607_s4 + $0x2d8] sm:$0xff]  ;;  %v6526_v10 = vld [vmem:[%s9607_s4 + $0x370] sm:$0xff] }
 0x92a   : > { %6722 = vmatprep.mubr.f32.mxu1 %v6562_v51  ;;  %7221 = vmatpush3.bf16.msra.mxu0 %v7220_v39  ;;  %v9481_v48 = vrot.slane %v6415_v60, %v8706_v56  ;;  %v6563_v11 = vcombine.high %v6415_v60, %v6415_v60  ;;  %v6490_v39 = vld [vmem:[%s9607_s4 + $0x250] sm:$0xff]  ;;  %v6523_v51 = vld [vmem:[%s9607_s4 + $0x358] sm:$0xff] }
 0x92b   : > { %6723 = vmatmul.mubr.f32.vlgmr.msra.gmra.mrb[0].mxu1 %v6560_v41  ;;  %7223 = vmatprep.subr.bf16.mxu0 %v7222_v32  ;;  %v7238_v41 = vpack.c.bf16 %v6507_v26, %v6506_v31  ;;  %v6508_v32 = vld [vmem:[%s9607_s4 + $0x2e0] sm:$0xff]  ;;  %v6543_v9 = vld [vmem:[%s9607_s4 + $0x3f8] sm:$0xff] }
 0x92c   : > { %7253 = vmatpush3.bf16.msra.mxu1 %v7252_v54  ;;  %v6578_v30 = vcombine.high %v9481_v48, %v9481_v48  ;;  %v9498_v49 = vrot.slane %v6563_v11, %v8706_v56  ;;  %v6521_v56 = vld [vmem:[%s9607_s4 + $0x348] sm:$0xff]  ;;  %v7240_v54 = vpack.c.bf16 %v6491_v53, %v6490_v39  ;;  %v6495_v28 = vld [vmem:[%s9607_s4 + $0x278] sm:$0xff]  ;;  %v7278_v50 = vpack.c.bf16 %v6543_v9, %v6542_v46 }
 0x92d   : > { %7255 = vmatprep.subr.bf16.mxu1 %v7254_v58  ;;  %v7268_v42 = vpack.c.bf16 %v6521_v56, %v6520_v35  ;;  %v7242_v58 = vpack.c.bf16 %v6509_v45, %v6508_v32  ;;  %v6527_v4 = vld [vmem:[%s9607_s4 + $0x378] sm:$0xff] }
 0x92e   : > { %7225 = vmatpush3.bf16.msra.mxu0 %v7224_v59  ;;  %6792 = vmatprep.mubr.f32.mxu0 %v6578_v30  ;;  %v6579_v37 = vcombine.high %v9498_v49, %v9498_v49  ;;  %v7272_v59 = vpack.c.bf16 %v6523_v51, %v6522_v52  ;;  %v7280_v12 = vpack.c.bf16 %v6527_v4, %v6526_v10 }
 0x92f   : > { %7227 = vmatprep.subr.bf16.mxu0 %v7226_v2  ;;  %v6524_v2 = vld [vmem:[%s9607_s4 + $0x360] sm:$0xff] }
 0x930   : > { %7257 = vmatpush3.bf16.msra.mxu1 %v7256_v5  ;;  %6862 = vmatprep.mubr.f32.mxu1 %v6579_v37  ;;  %v7246_v5 = vpack.c.bf16 %v6511_v0, %v6510_v63 }
 0x931   : > { %7259 = vmatprep.subr.bf16.mxu1 %v7258_v47  ;;  %v7276_v47 = vpack.c.bf16 %v6525_v8, %v6524_v2 }
 0x932   : > { %7229 = vmatpush3.bf16.msra.mxu0 %v7228_v38  ;;  %v7248_v38 = vpack.c.bf16 %v6495_v28, %v6494_v15 }
 0x933   : > { %7231 = vmatprep.subr.bf16.mxu0 %v7230_v16 }
 0x934   : > { %7261 = vmatpush3.bf16.msra.mxu1 %v7260_v24 }
 0x935   : > { %7263 = vmatprep.subr.bf16.mxu1 %v7262_v7 }
 0x936   : > { %7233 = vmatpush3.bf16.msra.mxu0 %v7232_v21 }
 0x937   : > { %7235 = vmatprep.subr.bf16.mxu0 %v7234_v14 }
 0x938   : > { %7265 = vmatpush3.bf16.msra.mxu1 %v7264_v3 }
 0x939   : > { %7267 = vmatprep.subr.bf16.mxu1 %v7266_v33 }
 0x93a   : > { %7237 = vmatpush3.bf16.msra.mxu0 %v7236_v23 }
 0x93b   : > { %7239 = vmatprep.subr.bf16.mxu0 %v7238_v41 }
 0x93c   : > { %7269 = vmatpush3.bf16.msra.mxu1 %v7268_v42 }
 0x93d   : > { %7271 = vmatprep.subr.bf16.mxu1 %v7270_v6 }
 0x93e   : > { %7241 = vmatpush3.bf16.msra.mxu0 %v7240_v54 }
 0x93f   : > { %7243 = vmatprep.subr.bf16.mxu0 %v7242_v58 }
 0x940   : > { %7273 = vmatpush3.bf16.msra.mxu1 %v7272_v59 }
 0x941   : > { %7275 = vmatprep.subr.bf16.mxu1 %v7274_v1 }
 0x942   : > { %7245 = vmatpush3.bf16.msra.mxu0 %v7244_v43 }
 0x943   : > { %7247 = vmatprep.subr.bf16.mxu0 %v7246_v5 }
 0x944   : > { %7277 = vmatpush3.bf16.msra.mxu1 %v7276_v47 }
 0x945   : > { %7279 = vmatprep.subr.bf16.mxu1 %v7278_v50 }
 0x946   : > { %7249 = vmatpush3.bf16.msra.mxu0 %v7248_v38 }
 0x948   : > { %7281 = vmatpush3.bf16.msra.mxu1 %v7280_v12 }
 0x949   : > { %6793 = vmatmul.mubr.f32.vlgmr.msra.gmra.mrb[2].mxu0 %v9481_v48 }
 0x94b   : > { %6863 = vmatmul.mubr.f32.vlgmr.msra.gmra.mrb[2].mxu1 %v9498_v49 }
 0x9fc   : > { %v7046_v13 = vpop.f32.mrb[0].mxu0 }
 0x9fd   : > { %v7047_v16 = vpop.f32.mrb[1].mxu0 }
 0x9fe   : > { %v7081_v17 = vpop.f32.mrb[0].mxu1  ;;  %v7048_v36 = vadd.f32 %v7047_v16, %v7046_v13 }
 0x9ff   : > { %v7082_v60 = vpop.f32.mrb[1].mxu1 }
 0xa00   : > { %v7083_v24 = vadd.f32 %v7082_v60, %v7081_v17 }
 0xa02   : > { %v6725_v18 = vadd.f32 %v7083_v24, %v7048_v36 }
 0xa1c   : > { %v7116_v20 = vpop.f32.mrb[2].mxu0 }
 0xa1d   : > { %v7117_v7 = vpop.f32.mrb[3].mxu0 }
 0xa1e   : > { %v7118_v22 = vadd.f32 %v7117_v7, %v7116_v20  ;;  %v7151_v25 = vpop.f32.mrb[2].mxu1 }
 0xa1f   : > { %v7152_v11 = vpop.f32.mrb[3].mxu1 }
 0xa20   : > { %v6795_v21 = vadd.f32 %v7118_v22, %v6725_v18  ;;  %v7153_v29 = vadd.f32 %v7152_v11, %v7151_v25 }
 0xa22   : > { %v6865_v44 = vadd.f32 %v7153_v29, %v6795_v21 }
 0xa24   : > { %6869 = vst.msk [vmem:[%s9608_s5] sm:$0x3] %vm6868_vm0, %v6865_v44 }
 0xa25 PF: > { %s18_s23 = sadd.s32 1, %s7666_s23   ;;  %s9612_s18 = smov %s7650_s19 }
 0xa26   : > { %p15_p5 = scmp.ge.s32.totalorder %s18_s23, 10   ;;  %s9613_s19 = smov %s7654_s20 }
 0xa27   : > { %s9614_s20 = smov %s7753_s30  ;;  %s9615_s21 = smov %s7662_s22 }
 0xa28   : > { %s9616_s22 = smov %s9618_s25  ;;  %17 = sbr.rel (!%p15_p5) target bundleno = 4 (0x4), region = 100 }
 0xa2f   :  { %6889 = vsyncpa [#allocation4], 1 }
 0xa30   :  { %6891 = vsyncpa [#allocation4 + $0x1], 1 }

</bundles_post_ra>
